<compile_context>
chip_gen: v7x
topology: tpu7x:2x2x1
jax: 0.10.0
libtpu: 0.0.40
codegen_flags: <defaults>
</compile_context>

<pallas_src>
import functools

import jax
import jax.numpy as jnp
from jax.experimental import pallas as pl
from jax.experimental.pallas import tpu as pltpu

nc = 3
ngf = 64
nz = 100
BN_EPS = 1e-5

_VMEM_LIMIT_BYTES = 48 * 1024 * 1024   # comfortably under v7x's 64 MiB VMEM


def _round_up(x, m):
    return (x + m - 1) // m * m


def _pad3d(x, rows, cols):
    """Zero-pad the last two dims of a (P, R, C) array; no copy if aligned."""
    _, r, c = x.shape
    if r == rows and c == cols:
        return x
    return jnp.pad(x, ((0, 0), (0, rows - r), (0, cols - c)))


def _divisor_tile(dim, pref, base):
    """Largest multiple of `base` that divides `dim`, at most max(pref, base)."""
    assert dim % base == 0
    t = max(base, (min(pref, dim) // base) * base)
    while dim % t:
        t -= base
    return t


# ----------------------------------------------------------------------------
# Pallas kernels
# ----------------------------------------------------------------------------
def _bmm_act_kernel(a_ref, b_ref, o_ref, *, act):
    """Full-K bf16 GEMM tile (one phase) with fused activation on writeback."""
    y = jnp.dot(a_ref[0], b_ref[0], preferred_element_type=jnp.float32)
    if act == "tanh":
        y = jnp.tanh(y)
    elif act == "relu":
        y = jnp.maximum(y, 0.0)
    o_ref[0, :, :] = y.astype(o_ref.dtype)


def _bmm_stats_kernel(a_ref, b_ref, o_ref, sum_ref, sq_ref):
    """Full-K bf16 GEMM tile + in-kernel accumulated per-column sum / sum-sq.

    Grid is (nj, P, mi): the stats blocks are indexed by j only, so they stay
    resident in VMEM across all (phase, row-tile) iterations and are written
    back once per column tile.
    """
    y = jnp.dot(a_ref[0], b_ref[0], preferred_element_type=jnp.float32)
    o_ref[0, :, :] = y.astype(o_ref.dtype)

    @pl.when((pl.program_id(1) == 0) & (pl.program_id(2) == 0))
    def _():
        sum_ref[...] = jnp.zeros_like(sum_ref)
        sq_ref[...] = jnp.zeros_like(sq_ref)

    s = jnp.sum(y, axis=0, keepdims=True)
    q = jnp.sum(y * y, axis=0, keepdims=True)
    sum_ref[...] += jnp.broadcast_to(s, sum_ref.shape)
    sq_ref[...] += jnp.broadcast_to(q, sq_ref.shape)


def pallas_batched_matmul(a, b, *, act="none", compute_stats=False,
                          out_dtype=jnp.float32, tm_pref=256, tn_pref=256):
    """Batched (P, M, K) @ (P, K, N) on the MXU, bf16 inputs / f32 accumulation.

    Returns the zero-padded (P, Mp, Np) product in `out_dtype`.  With
    compute_stats=True also returns f32 per-column sum and sum-of-squares
    (length Np) accumulated in-kernel over all P slices and M rows (padding
    rows are zero so the statistics over real rows are exact).
    """
    P, M, K = a.shape
    P2, K2, N = b.shape
    assert P == P2 and K == K2
    tm = min(tm_pref, _round_up(M, 16))
    tn = min(tn_pref, _round_up(N, 128))
    Mp, Kp, Np = _round_up(M, tm), _round_up(K, 128), _round_up(N, tn)
    a_p = _pad3d(a.astype(jnp.bfloat16), Mp, Kp)
    b_p = _pad3d(b.astype(jnp.bfloat16), Kp, Np)
    mi, nj = Mp // tm, Np // tn

    if compute_stats:
        # j outermost so the stats accumulator block is resident across (p, i).
        grid = (nj, P, mi)
        in_specs = [pl.BlockSpec((1, tm, Kp), lambda j, p, i: (p, i, 0)),
                    pl.BlockSpec((1, Kp, tn), lambda j, p, i: (p, 0, j))]
        out_shape = (jax.ShapeDtypeStruct((P, Mp, Np), out_dtype),
                     jax.ShapeDtypeStruct((8, Np), jnp.float32),
                     jax.ShapeDtypeStruct((8, Np), jnp.float32))
        out_specs = (pl.BlockSpec((1, tm, tn), lambda j, p, i: (p, i, j)),
                     pl.BlockSpec((8, tn), lambda j, p, i: (0, j)),
                     pl.BlockSpec((8, tn), lambda j, p, i: (0, j)))
        kernel = _bmm_stats_kernel
        dims = ("parallel", "arbitrary", "arbitrary")
    else:
        grid = (P, mi, nj)
        in_specs = [pl.BlockSpec((1, tm, Kp), lambda p, i, j: (p, i, 0)),
                    pl.BlockSpec((1, Kp, tn), lambda p, i, j: (p, 0, j))]
        out_shape = jax.ShapeDtypeStruct((P, Mp, Np), out_dtype)
        out_specs = pl.BlockSpec((1, tm, tn), lambda p, i, j: (p, i, j))
        kernel = functools.partial(_bmm_act_kernel, act=act)
        dims = ("parallel", "parallel", "parallel")

    res = pl.pallas_call(
        kernel,
        out_shape=out_shape,
        grid_spec=pltpu.PrefetchScalarGridSpec(
            num_scalar_prefetch=0,
            grid=grid,
            in_specs=in_specs,
            out_specs=out_specs),
        compiler_params=pltpu.CompilerParams(
            dimension_semantics=dims,
            vmem_limit_bytes=_VMEM_LIMIT_BYTES),
    )(a_p, b_p)

    if compute_stats:
        y, s, q = res
        return y, s[0], q[0]
    return res


def _affine_act_kernel(y_ref, s_ref, b_ref, o_ref, *, act):
    out = y_ref[0].astype(jnp.float32) * s_ref[...] + b_ref[...]
    if act == "relu":
        out = jnp.maximum(out, 0.0)
    elif act == "tanh":
        out = jnp.tanh(out)
    o_ref[0, :, :] = out.astype(o_ref.dtype)


def pallas_affine_act(y, scale, bias, *, act, out_dtype=jnp.bfloat16,
                      tm_pref=512, tc_pref=512):
    """Fused per-column affine + activation on a tile-aligned (P, M, C) tensor."""
    P, M, C = y.shape
    assert M % 16 == 0 and C % 128 == 0, (M, C)
    tm = _divisor_tile(M, tm_pref, 16)
    tc = _divisor_tile(C, tc_pref, 128)
    return pl.pallas_call(
        functools.partial(_affine_act_kernel, act=act),
        out_shape=jax.ShapeDtypeStruct((P, M, C), out_dtype),
        grid_spec=pltpu.PrefetchScalarGridSpec(
            num_scalar_prefetch=0,
            grid=(P, M // tm, C // tc),
            in_specs=[pl.BlockSpec((1, tm, tc), lambda p, i, j: (p, i, j)),
                      pl.BlockSpec((1, tc), lambda p, i, j: (0, j)),
                      pl.BlockSpec((1, tc), lambda p, i, j: (0, j))],
            out_specs=pl.BlockSpec((1, tm, tc), lambda p, i, j: (p, i, j))),
        compiler_params=pltpu.CompilerParams(
            dimension_semantics=("parallel", "parallel", "parallel"),
            vmem_limit_bytes=_VMEM_LIMIT_BYTES),
    )(y, scale.reshape(1, C).astype(jnp.float32),
      bias.reshape(1, C).astype(jnp.float32))


def _bn_scale_bias(col_sum, col_sq, count, gamma, beta):
    """Training-mode BatchNorm (biased variance) folded into per-channel affine."""
    mean = col_sum / count
    var = jnp.maximum(col_sq / count - mean * mean, 0.0)
    scale = gamma / jnp.sqrt(var + BN_EPS)
    bias = beta - mean * scale
    return scale, bias


# ----------------------------------------------------------------------------
# ConvTranspose2d lowering (data-movement glue in JAX, compute in Pallas)
# ----------------------------------------------------------------------------
_PHASES = ((0, 0), (0, 1), (1, 0), (1, 1))


def _phase_im2col(xpad, ph, pw, H, W):
    """2x2-tap im2col for output phase (ph, pw) of a stride-2 transposed conv.

    xpad: NHWC input zero-padded by 1 on each spatial side.
    Returns (N*H*W, 4*C) with column layout (dh, dw, c).
    """
    N, _, _, C = xpad.shape
    taps = []
    for dh in range(2):
        for dw in range(2):
            taps.append(xpad[:, ph + dh:ph + dh + H, pw + dw:pw + dw + W, :])
    patches = jnp.stack(taps, axis=3)              # (N, H, W, 4, C)
    return patches.reshape(N * H * W, 4 * C)


def _phase_weight(Wt, ph, pw):
    """Weight slice for phase (ph, pw): rows laid out (dh, dw, ci), cols co.

    For output pixel (2q+ph, 2r+pw) the contributing kernel taps are
    kh = 3 - ph - 2*dh, kw = 3 - pw - 2*dw, read from input row q + ph + dh - 1
    (dh, dw in {0, 1}); this matches _phase_im2col's padded-input taps.
    """
    kh = jnp.array([3 - ph, 1 - ph])
    kw = jnp.array([3 - pw, 1 - pw])
    Wp = Wt[:, :, kh, :][:, :, :, kw]              # (Cin, Cout, 2, 2)
    return Wp.transpose(2, 3, 0, 1).reshape(4 * Wt.shape[0], Wt.shape[1])


def _deconv_block(x_nhwc, Wt, gamma, beta, *, act, use_bn):
    """ConvTranspose2d(k=4, s=2, p=1) [+ BatchNorm2d] + activation, NHWC in/out."""
    N, H, W, _ = x_nhwc.shape
    Cout = Wt.shape[1]
    M = N * H * W
    xpad = jnp.pad(x_nhwc, ((0, 0), (1, 1), (1, 1), (0, 0)))

    # All 4 sub-pixel phases as one batched GEMM: A (4, M, 4Cin), B (4, 4Cin, Cout).
    A = jnp.stack([_phase_im2col(xpad, ph, pw, H, W) for ph, pw in _PHASES])
    Bm = jnp.stack([_phase_weight(Wt, ph, pw) for ph, pw in _PHASES])

    if use_bn:
        y, col_sum, col_sq = pallas_batched_matmul(
            A, Bm, compute_stats=True, out_dtype=jnp.bfloat16)
        Np = y.shape[2]
        scale, bias = _bn_scale_bias(col_sum[:Cout], col_sq[:Cout],
                                     4 * M, gamma, beta)
        scale_p = jnp.ones((Np,), jnp.float32).at[:Cout].set(scale)
        bias_p = jnp.zeros((Np,), jnp.float32).at[:Cout].set(bias)
        y = pallas_affine_act(y, scale_p, bias_p, act=act, out_dtype=jnp.bfloat16)
    else:
        # no BN: fuse the activation straight into the GEMM writeback
        y = pallas_batched_matmul(A, Bm, act=act, out_dtype=jnp.float32)

    # sub-pixel interleave: out[:, 2q+ph, 2r+pw, :] = y_{ph,pw}[:, q, r, :]
    imgs = y[:, :M, :Cout].reshape(2, 2, N, H, W, Cout)
    return imgs.transpose(2, 3, 0, 4, 1, 5).reshape(N, 2 * H, 2 * W, Cout)


def _first_block(z2d, Wt, gamma, beta):
    """ConvTranspose2d(nz, ngf*8, 4, 1, 0) on a 1x1 input + BN + ReLU."""
    N = z2d.shape[0]
    Cin, Cout, k, _ = Wt.shape
    # Columns laid out (kh, kw, co) so the GEMM output is already NHWC-ordered.
    Bm = Wt.transpose(0, 2, 3, 1).reshape(Cin, k * k * Cout)
    y, col_sum, col_sq = pallas_batched_matmul(
        z2d[None], Bm[None], compute_stats=True, out_dtype=jnp.bfloat16)
    ch_sum = col_sum[:k * k * Cout].reshape(k * k, Cout).sum(axis=0)
    ch_sq = col_sq[:k * k * Cout].reshape(k * k, Cout).sum(axis=0)
    scale, bias = _bn_scale_bias(ch_sum, ch_sq, N * k * k, gamma, beta)
    h = y[0, :N, :k * k * Cout].reshape(1, N * k * k, Cout)
    h = pallas_affine_act(h, scale, bias, act="relu", out_dtype=jnp.bfloat16)
    return h.reshape(N, k, k, Cout)


def generator_forward(z, params):
    """z: (N, nz, 1, 1) NCHW -> (N, nc, 64, 64) NCHW (matches the PyTorch module)."""
    z2d = z.reshape(z.shape[0], z.shape[1]).astype(jnp.float32)
    h = _first_block(z2d, params["w1"], params["g1"], params["b1"])        # (N, 4, 4, 512)
    h = _deconv_block(h, params["w2"], params["g2"], params["b2"],
                      act="relu", use_bn=True)                             # (N, 8, 8, 256)
    h = _deconv_block(h, params["w3"], params["g3"], params["b3"],
                      act="relu", use_bn=True)                             # (N, 16, 16, 128)
    h = _deconv_block(h, params["w4"], params["g4"], params["b4"],
                      act="relu", use_bn=True)                             # (N, 32, 32, 64)
    h = _deconv_block(h, params["w5"], None, None,
                      act="tanh", use_bn=False)                            # (N, 64, 64, 3)
    return h.transpose(0, 3, 1, 2).astype(jnp.float32)                     # NCHW


def init_params(key):
    ks = jax.random.split(key, 16)

    def w(k, shape):
        return 0.02 * jax.random.normal(k, shape, jnp.float32)

    return {
        "w1": w(ks[0], (nz, ngf * 8, 4, 4)),
        "w2": w(ks[1], (ngf * 8, ngf * 4, 4, 4)),
        "w3": w(ks[2], (ngf * 4, ngf * 2, 4, 4)),
        "w4": w(ks[3], (ngf * 2, ngf, 4, 4)),
        "w5": w(ks[4], (ngf, nc, 4, 4)),
        "g1": 1.0 + 0.02 * jax.random.normal(ks[5], (ngf * 8,), jnp.float32),
        "b1": 0.01 * jax.random.normal(ks[6], (ngf * 8,), jnp.float32),
        "g2": 1.0 + 0.02 * jax.random.normal(ks[7], (ngf * 4,), jnp.float32),
        "b2": 0.01 * jax.random.normal(ks[8], (ngf * 4,), jnp.float32),
        "g3": 1.0 + 0.02 * jax.random.normal(ks[9], (ngf * 2,), jnp.float32),
        "b3": 0.01 * jax.random.normal(ks[10], (ngf * 2,), jnp.float32),
        "g4": 1.0 + 0.02 * jax.random.normal(ks[11], (ngf,), jnp.float32),
        "b4": 0.01 * jax.random.normal(ks[12], (ngf,), jnp.float32),
    }


if __name__ == "__main__":
    key = jax.random.PRNGKey(0)
    k_params, k_z = jax.random.split(key)
    params = init_params(k_params)

    batch = 2
    z = jax.random.normal(k_z, (batch, nz, 1, 1), jnp.float32)

    fwd = jax.jit(generator_forward)
    out = fwd(z, params)
    out = jax.block_until_ready(out)

    assert out.shape == (batch, nc, 64, 64), out.shape
    assert bool(jnp.all(jnp.isfinite(out)))
    assert bool(jnp.all(jnp.abs(out) <= 1.0 + 1e-6))  # Tanh range
    print("KERNEL_OK")
</pallas_src>

<mosaic_0001>
module attributes {stable_mosaic.version = 11 : i64} {
  func.func @_bmm_stats_kernel(%arg0: i32, %arg1: i32, %arg2: i32, %arg3: memref<1x16x128xbf16, #tpu.memory_space<vmem>>, %arg4: memref<1x128x256xbf16, #tpu.memory_space<vmem>>, %arg5: memref<1x16x256xbf16, #tpu.memory_space<vmem>>, %arg6: memref<8x256xf32, #tpu.memory_space<vmem>>, %arg7: memref<8x256xf32, #tpu.memory_space<vmem>>) attributes {dimension_semantics = [#tpu.dimension_semantics<parallel>, #tpu.dimension_semantics<arbitrary>, #tpu.dimension_semantics<arbitrary>], iteration_bounds = array<i64: 32, 1, 1>, scalar_prefetch = 0 : i64, scratch_operands = 0 : i64, tpu.core_type = #tpu.core_type<tc>, window_params = [{transform_indices = @transform_0, window_bounds = array<i64: 1, 16, 128>}, {transform_indices = @transform_1, window_bounds = array<i64: 1, 128, 256>}, {transform_indices = @transform_2, window_bounds = array<i64: 1, 16, 256>}, {transform_indices = @transform_3, window_bounds = array<i64: 8, 256>}, {transform_indices = @transform_4, window_bounds = array<i64: 8, 256>}]} {
    %c0 = arith.constant 0 : index
    %c0_0 = arith.constant 0 : index
    %c0_1 = arith.constant 0 : index
    %0 = vector.load %arg3[%c0, %c0_0, %c0_1] : memref<1x16x128xbf16, #tpu.memory_space<vmem>>, vector<1x16x128xbf16>
    %1 = vector.shape_cast %0 : vector<1x16x128xbf16> to vector<16x128xbf16>
    %c0_2 = arith.constant 0 : index
    %c0_3 = arith.constant 0 : index
    %c0_4 = arith.constant 0 : index
    %2 = vector.load %arg4[%c0_2, %c0_3, %c0_4] : memref<1x128x256xbf16, #tpu.memory_space<vmem>>, vector<1x128x256xbf16>
    %3 = vector.shape_cast %2 : vector<1x128x256xbf16> to vector<128x256xbf16>
    %cst = arith.constant dense<0.000000e+00> : vector<16x256xf32>
    %4 = tpu.matmul %1, %3, %cst {dimension_numbers = #tpu.dot_dimension_numbers<[1], [0], [0], [1], [0, 0, 1, 1], [], []>} : vector<16x128xbf16>, vector<128x256xbf16>, vector<16x256xf32> -> vector<16x256xf32>
    %5 = arith.truncf %4 : vector<16x256xf32> to vector<16x256xbf16>
    %c0_5 = arith.constant 0 : index
    %c0_6 = arith.constant 0 : index
    %c0_7 = arith.constant 0 : index
    %6 = vector.load %arg5[%c0_5, %c0_6, %c0_7] : memref<1x16x256xbf16, #tpu.memory_space<vmem>>, vector<1x16x256xbf16>
    %7 = vector.shape_cast %6 : vector<1x16x256xbf16> to vector<16x256xbf16>
    %8 = vector.shape_cast %5 : vector<16x256xbf16> to vector<1x16x256xbf16>
    tpu.vector_store %arg5[%c0_5, %c0_6, %c0_7], %8 {strides = array<i32>} : memref<1x16x256xbf16, #tpu.memory_space<vmem>>, vector<1x16x256xbf16>,
    %c0_i32 = arith.constant 0 : i32
    %9 = arith.cmpi eq, %arg1, %c0_i32 : i32
    %c0_i32_8 = arith.constant 0 : i32
    %10 = arith.cmpi eq, %arg2, %c0_i32_8 : i32
    %11 = arith.andi %9, %10 : i1
    %12 = arith.extui %11 : i1 to i32
    %c0_i32_9 = arith.constant 0 : i32
    %13 = arith.cmpi ne, %12, %c0_i32_9 : i32
    scf.if %13 {
      %cst_20 = arith.constant 0.000000e+00 : f32
      %29 = vector.broadcast %cst_20 : f32 to vector<8x256xf32>
      %c0_21 = arith.constant 0 : index
      %c0_22 = arith.constant 0 : index
      %30 = vector.load %arg6[%c0_21, %c0_22] : memref<8x256xf32, #tpu.memory_space<vmem>>, vector<8x256xf32>
      tpu.vector_store %arg6[%c0_21, %c0_22], %29 {strides = array<i32>} : memref<8x256xf32, #tpu.memory_space<vmem>>, vector<8x256xf32>,
      %cst_23 = arith.constant 0.000000e+00 : f32
      %31 = vector.broadcast %cst_23 : f32 to vector<8x256xf32>
      %c0_24 = arith.constant 0 : index
      %c0_25 = arith.constant 0 : index
      %32 = vector.load %arg7[%c0_24, %c0_25] : memref<8x256xf32, #tpu.memory_space<vmem>>, vector<8x256xf32>
      tpu.vector_store %arg7[%c0_24, %c0_25], %31 {strides = array<i32>} : memref<8x256xf32, #tpu.memory_space<vmem>>, vector<8x256xf32>,
    } else {
    }
    %cst_10 = arith.constant dense<0.000000e+00> : vector<256xf32>
    %14 = vector.multi_reduction <add>, %4, %cst_10 [0] : vector<16x256xf32> to vector<256xf32>
    %15 = vector.shape_cast %14 : vector<256xf32> to vector<1x256xf32>
    %16 = arith.mulf %4, %4 : vector<16x256xf32>
    %cst_11 = arith.constant dense<0.000000e+00> : vector<256xf32>
    %17 = vector.multi_reduction <add>, %16, %cst_11 [0] : vector<16x256xf32> to vector<256xf32>
    %18 = vector.shape_cast %17 : vector<256xf32> to vector<1x256xf32>
    %c0_12 = arith.constant 0 : index
    %c0_13 = arith.constant 0 : index
    %19 = vector.load %arg6[%c0_12, %c0_13] : memref<8x256xf32, #tpu.memory_space<vmem>>, vector<8x256xf32>
    %20 = vector.shape_cast %15 : vector<1x256xf32> to vector<1x256xf32>
    %21 = vector.broadcast %20 : vector<1x256xf32> to vector<8x256xf32>
    %22 = arith.addf %19, %21 : vector<8x256xf32>
    %c0_14 = arith.constant 0 : index
    %c0_15 = arith.constant 0 : index
    %23 = vector.load %arg6[%c0_14, %c0_15] : memref<8x256xf32, #tpu.memory_space<vmem>>, vector<8x256xf32>
    tpu.vector_store %arg6[%c0_14, %c0_15], %22 {strides = array<i32>} : memref<8x256xf32, #tpu.memory_space<vmem>>, vector<8x256xf32>,
    %c0_16 = arith.constant 0 : index
    %c0_17 = arith.constant 0 : index
    %24 = vector.load %arg7[%c0_16, %c0_17] : memref<8x256xf32, #tpu.memory_space<vmem>>, vector<8x256xf32>
    %25 = vector.shape_cast %18 : vector<1x256xf32> to vector<1x256xf32>
    %26 = vector.broadcast %25 : vector<1x256xf32> to vector<8x256xf32>
    %27 = arith.addf %24, %26 : vector<8x256xf32>
    %c0_18 = arith.constant 0 : index
    %c0_19 = arith.constant 0 : index
    %28 = vector.load %arg7[%c0_18, %c0_19] : memref<8x256xf32, #tpu.memory_space<vmem>>, vector<8x256xf32>
    tpu.vector_store %arg7[%c0_18, %c0_19], %27 {strides = array<i32>} : memref<8x256xf32, #tpu.memory_space<vmem>>, vector<8x256xf32>,
    return
  }
  func.func @transform_0(%arg0: i32, %arg1: i32, %arg2: i32) -> (i32, i32, i32) {
    %c0_i32 = arith.constant 0 : i32
    %c0_i32_0 = arith.constant 0 : i32
    return %arg1, %arg2, %c0_i32 : i32, i32, i32
  }
  func.func @transform_1(%arg0: i32, %arg1: i32, %arg2: i32) -> (i32, i32, i32) {
    %c0_i32 = arith.constant 0 : i32
    %c0_i32_0 = arith.constant 0 : i32
    return %arg1, %c0_i32, %arg0 : i32, i32, i32
  }
  func.func @transform_2(%arg0: i32, %arg1: i32, %arg2: i32) -> (i32, i32, i32) {
    %c0_i32 = arith.constant 0 : i32
    return %arg1, %arg2, %arg0 : i32, i32, i32
  }
  func.func @transform_3(%arg0: i32, %arg1: i32, %arg2: i32) -> (i32, i32) {
    %c0_i32 = arith.constant 0 : i32
    %c0_i32_0 = arith.constant 0 : i32
    return %c0_i32, %arg0 : i32, i32
  }
  func.func @transform_4(%arg0: i32, %arg1: i32, %arg2: i32) -> (i32, i32) {
    %c0_i32 = arith.constant 0 : i32
    %c0_i32_0 = arith.constant 0 : i32
    return %c0_i32, %arg0 : i32, i32
  }
}

module attributes {stable_mosaic.version = 11 : i64} {
  func.func @_affine_act_kernel(%arg0: i32, %arg1: i32, %arg2: i32, %arg3: memref<1x32x512xbf16, #tpu.memory_space<vmem>>, %arg4: memref<1x512xf32, #tpu.memory_space<vmem>>, %arg5: memref<1x512xf32, #tpu.memory_space<vmem>>, %arg6: memref<1x32x512xbf16, #tpu.memory_space<vmem>>) attributes {dimension_semantics = [#tpu.dimension_semantics<parallel>, #tpu.dimension_semantics<parallel>, #tpu.dimension_semantics<parallel>], iteration_bounds = array<i64: 1, 1, 1>, scalar_prefetch = 0 : i64, scratch_operands = 0 : i64, tpu.core_type = #tpu.core_type<tc>, window_params = [{transform_indices = @transform_0, window_bounds = array<i64: 1, 32, 512>}, {transform_indices = @transform_1, window_bounds = array<i64: 1, 512>}, {transform_indices = @transform_2, window_bounds = array<i64: 1, 512>}, {transform_indices = @transform_3, window_bounds = array<i64: 1, 32, 512>}]} {
    %c0 = arith.constant 0 : index
    %c0_0 = arith.constant 0 : index
    %c0_1 = arith.constant 0 : index
    %0 = vector.load %arg3[%c0, %c0_0, %c0_1] : memref<1x32x512xbf16, #tpu.memory_space<vmem>>, vector<1x32x512xbf16>
    %1 = vector.shape_cast %0 : vector<1x32x512xbf16> to vector<32x512xbf16>
    %2 = arith.extf %1 : vector<32x512xbf16> to vector<32x512xf32>
    %c0_2 = arith.constant 0 : index
    %c0_3 = arith.constant 0 : index
    %3 = vector.load %arg4[%c0_2, %c0_3] : memref<1x512xf32, #tpu.memory_space<vmem>>, vector<1x512xf32>
    %4 = vector.broadcast %3 : vector<1x512xf32> to vector<32x512xf32>
    %5 = arith.mulf %2, %4 : vector<32x512xf32>
    %c0_4 = arith.constant 0 : index
    %c0_5 = arith.constant 0 : index
    %6 = vector.load %arg5[%c0_4, %c0_5] : memref<1x512xf32, #tpu.memory_space<vmem>>, vector<1x512xf32>
    %7 = vector.broadcast %6 : vector<1x512xf32> to vector<32x512xf32>
    %8 = arith.addf %5, %7 : vector<32x512xf32>
    %cst = arith.constant 0.000000e+00 : f32
    %9 = vector.broadcast %cst : f32 to vector<32x512xf32>
    %10 = arith.maximumf %8, %9 : vector<32x512xf32>
    %11 = arith.truncf %10 : vector<32x512xf32> to vector<32x512xbf16>
    %c0_6 = arith.constant 0 : index
    %c0_7 = arith.constant 0 : index
    %c0_8 = arith.constant 0 : index
    %12 = vector.load %arg6[%c0_6, %c0_7, %c0_8] : memref<1x32x512xbf16, #tpu.memory_space<vmem>>, vector<1x32x512xbf16>
    %13 = vector.shape_cast %12 : vector<1x32x512xbf16> to vector<32x512xbf16>
    %14 = vector.shape_cast %11 : vector<32x512xbf16> to vector<1x32x512xbf16>
    tpu.vector_store %arg6[%c0_6, %c0_7, %c0_8], %14 {strides = array<i32>} : memref<1x32x512xbf16, #tpu.memory_space<vmem>>, vector<1x32x512xbf16>,
    return
  }
  func.func @transform_0(%arg0: i32, %arg1: i32, %arg2: i32) -> (i32, i32, i32) {
    %c0_i32 = arith.constant 0 : i32
    return %arg0, %arg1, %arg2 : i32, i32, i32
  }
  func.func @transform_1(%arg0: i32, %arg1: i32, %arg2: i32) -> (i32, i32) {
    %c0_i32 = arith.constant 0 : i32
    %c0_i32_0 = arith.constant 0 : i32
    return %c0_i32, %arg2 : i32, i32
  }
  func.func @transform_2(%arg0: i32, %arg1: i32, %arg2: i32) -> (i32, i32) {
    %c0_i32 = arith.constant 0 : i32
    %c0_i32_0 = arith.constant 0 : i32
    return %c0_i32, %arg2 : i32, i32
  }
  func.func @transform_3(%arg0: i32, %arg1: i32, %arg2: i32) -> (i32, i32, i32) {
    %c0_i32 = arith.constant 0 : i32
    return %arg0, %arg1, %arg2 : i32, i32, i32
  }
}

module attributes {stable_mosaic.version = 11 : i64} {
  func.func @_bmm_stats_kernel(%arg0: i32, %arg1: i32, %arg2: i32, %arg3: memref<1x32x2048xbf16, #tpu.memory_space<vmem>>, %arg4: memref<1x2048x256xbf16, #tpu.memory_space<vmem>>, %arg5: memref<1x32x256xbf16, #tpu.memory_space<vmem>>, %arg6: memref<8x256xf32, #tpu.memory_space<vmem>>, %arg7: memref<8x256xf32, #tpu.memory_space<vmem>>) attributes {dimension_semantics = [#tpu.dimension_semantics<parallel>, #tpu.dimension_semantics<arbitrary>, #tpu.dimension_semantics<arbitrary>], iteration_bounds = array<i64: 1, 4, 1>, scalar_prefetch = 0 : i64, scratch_operands = 0 : i64, tpu.core_type = #tpu.core_type<tc>, window_params = [{transform_indices = @transform_0, window_bounds = array<i64: 1, 32, 2048>}, {transform_indices = @transform_1, window_bounds = array<i64: 1, 2048, 256>}, {transform_indices = @transform_2, window_bounds = array<i64: 1, 32, 256>}, {transform_indices = @transform_3, window_bounds = array<i64: 8, 256>}, {transform_indices = @transform_4, window_bounds = array<i64: 8, 256>}]} {
    %c0 = arith.constant 0 : index
    %c0_0 = arith.constant 0 : index
    %c0_1 = arith.constant 0 : index
    %0 = vector.load %arg3[%c0, %c0_0, %c0_1] : memref<1x32x2048xbf16, #tpu.memory_space<vmem>>, vector<1x32x2048xbf16>
    %1 = vector.shape_cast %0 : vector<1x32x2048xbf16> to vector<32x2048xbf16>
    %c0_2 = arith.constant 0 : index
    %c0_3 = arith.constant 0 : index
    %c0_4 = arith.constant 0 : index
    %2 = vector.load %arg4[%c0_2, %c0_3, %c0_4] : memref<1x2048x256xbf16, #tpu.memory_space<vmem>>, vector<1x2048x256xbf16>
    %3 = vector.shape_cast %2 : vector<1x2048x256xbf16> to vector<2048x256xbf16>
    %cst = arith.constant dense<0.000000e+00> : vector<32x256xf32>
    %4 = tpu.matmul %1, %3, %cst {dimension_numbers = #tpu.dot_dimension_numbers<[1], [0], [0], [1], [0, 0, 1, 1], [], []>} : vector<32x2048xbf16>, vector<2048x256xbf16>, vector<32x256xf32> -> vector<32x256xf32>
    %5 = arith.truncf %4 : vector<32x256xf32> to vector<32x256xbf16>
    %c0_5 = arith.constant 0 : index
    %c0_6 = arith.constant 0 : index
    %c0_7 = arith.constant 0 : index
    %6 = vector.load %arg5[%c0_5, %c0_6, %c0_7] : memref<1x32x256xbf16, #tpu.memory_space<vmem>>, vector<1x32x256xbf16>
    %7 = vector.shape_cast %6 : vector<1x32x256xbf16> to vector<32x256xbf16>
    %8 = vector.shape_cast %5 : vector<32x256xbf16> to vector<1x32x256xbf16>
    tpu.vector_store %arg5[%c0_5, %c0_6, %c0_7], %8 {strides = array<i32>} : memref<1x32x256xbf16, #tpu.memory_space<vmem>>, vector<1x32x256xbf16>,
    %c0_i32 = arith.constant 0 : i32
    %9 = arith.cmpi eq, %arg1, %c0_i32 : i32
    %c0_i32_8 = arith.constant 0 : i32
    %10 = arith.cmpi eq, %arg2, %c0_i32_8 : i32
    %11 = arith.andi %9, %10 : i1
    %12 = arith.extui %11 : i1 to i32
    %c0_i32_9 = arith.constant 0 : i32
    %13 = arith.cmpi ne, %12, %c0_i32_9 : i32
    scf.if %13 {
      %cst_20 = arith.constant 0.000000e+00 : f32
      %29 = vector.broadcast %cst_20 : f32 to vector<8x256xf32>
      %c0_21 = arith.constant 0 : index
      %c0_22 = arith.constant 0 : index
      %30 = vector.load %arg6[%c0_21, %c0_22] : memref<8x256xf32, #tpu.memory_space<vmem>>, vector<8x256xf32>
      tpu.vector_store %arg6[%c0_21, %c0_22], %29 {strides = array<i32>} : memref<8x256xf32, #tpu.memory_space<vmem>>, vector<8x256xf32>,
      %cst_23 = arith.constant 0.000000e+00 : f32
      %31 = vector.broadcast %cst_23 : f32 to vector<8x256xf32>
      %c0_24 = arith.constant 0 : index
      %c0_25 = arith.constant 0 : index
      %32 = vector.load %arg7[%c0_24, %c0_25] : memref<8x256xf32, #tpu.memory_space<vmem>>, vector<8x256xf32>
      tpu.vector_store %arg7[%c0_24, %c0_25], %31 {strides = array<i32>} : memref<8x256xf32, #tpu.memory_space<vmem>>, vector<8x256xf32>,
    } else {
    }
    %cst_10 = arith.constant dense<0.000000e+00> : vector<256xf32>
    %14 = vector.multi_reduction <add>, %4, %cst_10 [0] : vector<32x256xf32> to vector<256xf32>
    %15 = vector.shape_cast %14 : vector<256xf32> to vector<1x256xf32>
    %16 = arith.mulf %4, %4 : vector<32x256xf32>
    %cst_11 = arith.constant dense<0.000000e+00> : vector<256xf32>
    %17 = vector.multi_reduction <add>, %16, %cst_11 [0] : vector<32x256xf32> to vector<256xf32>
    %18 = vector.shape_cast %17 : vector<256xf32> to vector<1x256xf32>
    %c0_12 = arith.constant 0 : index
    %c0_13 = arith.constant 0 : index
    %19 = vector.load %arg6[%c0_12, %c0_13] : memref<8x256xf32, #tpu.memory_space<vmem>>, vector<8x256xf32>
    %20 = vector.shape_cast %15 : vector<1x256xf32> to vector<1x256xf32>
    %21 = vector.broadcast %20 : vector<1x256xf32> to vector<8x256xf32>
    %22 = arith.addf %19, %21 : vector<8x256xf32>
    %c0_14 = arith.constant 0 : index
    %c0_15 = arith.constant 0 : index
    %23 = vector.load %arg6[%c0_14, %c0_15] : memref<8x256xf32, #tpu.memory_space<vmem>>, vector<8x256xf32>
    tpu.vector_store %arg6[%c0_14, %c0_15], %22 {strides = array<i32>} : memref<8x256xf32, #tpu.memory_space<vmem>>, vector<8x256xf32>,
    %c0_16 = arith.constant 0 : index
    %c0_17 = arith.constant 0 : index
    %24 = vector.load %arg7[%c0_16, %c0_17] : memref<8x256xf32, #tpu.memory_space<vmem>>, vector<8x256xf32>
    %25 = vector.shape_cast %18 : vector<1x256xf32> to vector<1x256xf32>
    %26 = vector.broadcast %25 : vector<1x256xf32> to vector<8x256xf32>
    %27 = arith.addf %24, %26 : vector<8x256xf32>
    %c0_18 = arith.constant 0 : index
    %c0_19 = arith.constant 0 : index
    %28 = vector.load %arg7[%c0_18, %c0_19] : memref<8x256xf32, #tpu.memory_space<vmem>>, vector<8x256xf32>
    tpu.vector_store %arg7[%c0_18, %c0_19], %27 {strides = array<i32>} : memref<8x256xf32, #tpu.memory_space<vmem>>, vector<8x256xf32>,
    return
  }
  func.func @transform_0(%arg0: i32, %arg1: i32, %arg2: i32) -> (i32, i32, i32) {
    %c0_i32 = arith.constant 0 : i32
    %c0_i32_0 = arith.constant 0 : i32
    return %arg1, %arg2, %c0_i32 : i32, i32, i32
  }
  func.func @transform_1(%arg0: i32, %arg1: i32, %arg2: i32) -> (i32, i32, i32) {
    %c0_i32 = arith.constant 0 : i32
    %c0_i32_0 = arith.constant 0 : i32
    return %arg1, %c0_i32, %arg0 : i32, i32, i32
  }
  func.func @transform_2(%arg0: i32, %arg1: i32, %arg2: i32) -> (i32, i32, i32) {
    %c0_i32 = arith.constant 0 : i32
    return %arg1, %arg2, %arg0 : i32, i32, i32
  }
  func.func @transform_3(%arg0: i32, %arg1: i32, %arg2: i32) -> (i32, i32) {
    %c0_i32 = arith.constant 0 : i32
    %c0_i32_0 = arith.constant 0 : i32
    return %c0_i32, %arg0 : i32, i32
  }
  func.func @transform_4(%arg0: i32, %arg1: i32, %arg2: i32) -> (i32, i32) {
    %c0_i32 = arith.constant 0 : i32
    %c0_i32_0 = arith.constant 0 : i32
    return %c0_i32, %arg0 : i32, i32
  }
}

module attributes {stable_mosaic.version = 11 : i64} {
  func.func @_affine_act_kernel(%arg0: i32, %arg1: i32, %arg2: i32, %arg3: memref<1x32x256xbf16, #tpu.memory_space<vmem>>, %arg4: memref<1x256xf32, #tpu.memory_space<vmem>>, %arg5: memref<1x256xf32, #tpu.memory_space<vmem>>, %arg6: memref<1x32x256xbf16, #tpu.memory_space<vmem>>) attributes {dimension_semantics = [#tpu.dimension_semantics<parallel>, #tpu.dimension_semantics<parallel>, #tpu.dimension_semantics<parallel>], iteration_bounds = array<i64: 4, 1, 1>, scalar_prefetch = 0 : i64, scratch_operands = 0 : i64, tpu.core_type = #tpu.core_type<tc>, window_params = [{transform_indices = @transform_0, window_bounds = array<i64: 1, 32, 256>}, {transform_indices = @transform_1, window_bounds = array<i64: 1, 256>}, {transform_indices = @transform_2, window_bounds = array<i64: 1, 256>}, {transform_indices = @transform_3, window_bounds = array<i64: 1, 32, 256>}]} {
    %c0 = arith.constant 0 : index
    %c0_0 = arith.constant 0 : index
    %c0_1 = arith.constant 0 : index
    %0 = vector.load %arg3[%c0, %c0_0, %c0_1] : memref<1x32x256xbf16, #tpu.memory_space<vmem>>, vector<1x32x256xbf16>
    %1 = vector.shape_cast %0 : vector<1x32x256xbf16> to vector<32x256xbf16>
    %2 = arith.extf %1 : vector<32x256xbf16> to vector<32x256xf32>
    %c0_2 = arith.constant 0 : index
    %c0_3 = arith.constant 0 : index
    %3 = vector.load %arg4[%c0_2, %c0_3] : memref<1x256xf32, #tpu.memory_space<vmem>>, vector<1x256xf32>
    %4 = vector.broadcast %3 : vector<1x256xf32> to vector<32x256xf32>
    %5 = arith.mulf %2, %4 : vector<32x256xf32>
    %c0_4 = arith.constant 0 : index
    %c0_5 = arith.constant 0 : index
    %6 = vector.load %arg5[%c0_4, %c0_5] : memref<1x256xf32, #tpu.memory_space<vmem>>, vector<1x256xf32>
    %7 = vector.broadcast %6 : vector<1x256xf32> to vector<32x256xf32>
    %8 = arith.addf %5, %7 : vector<32x256xf32>
    %cst = arith.constant 0.000000e+00 : f32
    %9 = vector.broadcast %cst : f32 to vector<32x256xf32>
    %10 = arith.maximumf %8, %9 : vector<32x256xf32>
    %11 = arith.truncf %10 : vector<32x256xf32> to vector<32x256xbf16>
    %c0_6 = arith.constant 0 : index
    %c0_7 = arith.constant 0 : index
    %c0_8 = arith.constant 0 : index
    %12 = vector.load %arg6[%c0_6, %c0_7, %c0_8] : memref<1x32x256xbf16, #tpu.memory_space<vmem>>, vector<1x32x256xbf16>
    %13 = vector.shape_cast %12 : vector<1x32x256xbf16> to vector<32x256xbf16>
    %14 = vector.shape_cast %11 : vector<32x256xbf16> to vector<1x32x256xbf16>
    tpu.vector_store %arg6[%c0_6, %c0_7, %c0_8], %14 {strides = array<i32>} : memref<1x32x256xbf16, #tpu.memory_space<vmem>>, vector<1x32x256xbf16>,
    return
  }
  func.func @transform_0(%arg0: i32, %arg1: i32, %arg2: i32) -> (i32, i32, i32) {
    %c0_i32 = arith.constant 0 : i32
    return %arg0, %arg1, %arg2 : i32, i32, i32
  }
  func.func @transform_1(%arg0: i32, %arg1: i32, %arg2: i32) -> (i32, i32) {
    %c0_i32 = arith.constant 0 : i32
    %c0_i32_0 = arith.constant 0 : i32
    return %c0_i32, %arg2 : i32, i32
  }
  func.func @transform_2(%arg0: i32, %arg1: i32, %arg2: i32) -> (i32, i32) {
    %c0_i32 = arith.constant 0 : i32
    %c0_i32_0 = arith.constant 0 : i32
    return %c0_i32, %arg2 : i32, i32
  }
  func.func @transform_3(%arg0: i32, %arg1: i32, %arg2: i32) -> (i32, i32, i32) {
    %c0_i32 = arith.constant 0 : i32
    return %arg0, %arg1, %arg2 : i32, i32, i32
  }
}

module attributes {stable_mosaic.version = 11 : i64} {
  func.func @_bmm_stats_kernel(%arg0: i32, %arg1: i32, %arg2: i32, %arg3: memref<1x128x1024xbf16, #tpu.memory_space<vmem>>, %arg4: memref<1x1024x128xbf16, #tpu.memory_space<vmem>>, %arg5: memref<1x128x128xbf16, #tpu.memory_space<vmem>>, %arg6: memref<8x128xf32, #tpu.memory_space<vmem>>, %arg7: memref<8x128xf32, #tpu.memory_space<vmem>>) attributes {dimension_semantics = [#tpu.dimension_semantics<parallel>, #tpu.dimension_semantics<arbitrary>, #tpu.dimension_semantics<arbitrary>], iteration_bounds = array<i64: 1, 4, 1>, scalar_prefetch = 0 : i64, scratch_operands = 0 : i64, tpu.core_type = #tpu.core_type<tc>, window_params = [{transform_indices = @transform_0, window_bounds = array<i64: 1, 128, 1024>}, {transform_indices = @transform_1, window_bounds = array<i64: 1, 1024, 128>}, {transform_indices = @transform_2, window_bounds = array<i64: 1, 128, 128>}, {transform_indices = @transform_3, window_bounds = array<i64: 8, 128>}, {transform_indices = @transform_4, window_bounds = array<i64: 8, 128>}]} {
    %c0 = arith.constant 0 : index
    %c0_0 = arith.constant 0 : index
    %c0_1 = arith.constant 0 : index
    %0 = vector.load %arg3[%c0, %c0_0, %c0_1] : memref<1x128x1024xbf16, #tpu.memory_space<vmem>>, vector<1x128x1024xbf16>
    %1 = vector.shape_cast %0 : vector<1x128x1024xbf16> to vector<128x1024xbf16>
    %c0_2 = arith.constant 0 : index
    %c0_3 = arith.constant 0 : index
    %c0_4 = arith.constant 0 : index
    %2 = vector.load %arg4[%c0_2, %c0_3, %c0_4] : memref<1x1024x128xbf16, #tpu.memory_space<vmem>>, vector<1x1024x128xbf16>
    %3 = vector.shape_cast %2 : vector<1x1024x128xbf16> to vector<1024x128xbf16>
    %cst = arith.constant dense<0.000000e+00> : vector<128x128xf32>
    %4 = tpu.matmul %1, %3, %cst {dimension_numbers = #tpu.dot_dimension_numbers<[1], [0], [0], [1], [0, 0, 1, 1], [], []>} : vector<128x1024xbf16>, vector<1024x128xbf16>, vector<128x128xf32> -> vector<128x128xf32>
    %5 = arith.truncf %4 : vector<128x128xf32> to vector<128x128xbf16>
    %c0_5 = arith.constant 0 : index
    %c0_6 = arith.constant 0 : index
    %c0_7 = arith.constant 0 : index
    %6 = vector.load %arg5[%c0_5, %c0_6, %c0_7] : memref<1x128x128xbf16, #tpu.memory_space<vmem>>, vector<1x128x128xbf16>
    %7 = vector.shape_cast %6 : vector<1x128x128xbf16> to vector<128x128xbf16>
    %8 = vector.shape_cast %5 : vector<128x128xbf16> to vector<1x128x128xbf16>
    tpu.vector_store %arg5[%c0_5, %c0_6, %c0_7], %8 {strides = array<i32>} : memref<1x128x128xbf16, #tpu.memory_space<vmem>>, vector<1x128x128xbf16>,
    %c0_i32 = arith.constant 0 : i32
    %9 = arith.cmpi eq, %arg1, %c0_i32 : i32
    %c0_i32_8 = arith.constant 0 : i32
    %10 = arith.cmpi eq, %arg2, %c0_i32_8 : i32
    %11 = arith.andi %9, %10 : i1
    %12 = arith.extui %11 : i1 to i32
    %c0_i32_9 = arith.constant 0 : i32
    %13 = arith.cmpi ne, %12, %c0_i32_9 : i32
    scf.if %13 {
      %cst_20 = arith.constant 0.000000e+00 : f32
      %29 = vector.broadcast %cst_20 : f32 to vector<8x128xf32>
      %c0_21 = arith.constant 0 : index
      %c0_22 = arith.constant 0 : index
      %30 = vector.load %arg6[%c0_21, %c0_22] : memref<8x128xf32, #tpu.memory_space<vmem>>, vector<8x128xf32>
      tpu.vector_store %arg6[%c0_21, %c0_22], %29 {strides = array<i32>} : memref<8x128xf32, #tpu.memory_space<vmem>>, vector<8x128xf32>,
      %cst_23 = arith.constant 0.000000e+00 : f32
      %31 = vector.broadcast %cst_23 : f32 to vector<8x128xf32>
      %c0_24 = arith.constant 0 : index
      %c0_25 = arith.constant 0 : index
      %32 = vector.load %arg7[%c0_24, %c0_25] : memref<8x128xf32, #tpu.memory_space<vmem>>, vector<8x128xf32>
      tpu.vector_store %arg7[%c0_24, %c0_25], %31 {strides = array<i32>} : memref<8x128xf32, #tpu.memory_space<vmem>>, vector<8x128xf32>,
    } else {
    }
    %cst_10 = arith.constant dense<0.000000e+00> : vector<128xf32>
    %14 = vector.multi_reduction <add>, %4, %cst_10 [0] : vector<128x128xf32> to vector<128xf32>
    %15 = vector.shape_cast %14 : vector<128xf32> to vector<1x128xf32>
    %16 = arith.mulf %4, %4 : vector<128x128xf32>
    %cst_11 = arith.constant dense<0.000000e+00> : vector<128xf32>
    %17 = vector.multi_reduction <add>, %16, %cst_11 [0] : vector<128x128xf32> to vector<128xf32>
    %18 = vector.shape_cast %17 : vector<128xf32> to vector<1x128xf32>
    %c0_12 = arith.constant 0 : index
    %c0_13 = arith.constant 0 : index
    %19 = vector.load %arg6[%c0_12, %c0_13] : memref<8x128xf32, #tpu.memory_space<vmem>>, vector<8x128xf32>
    %20 = vector.shape_cast %15 : vector<1x128xf32> to vector<1x128xf32>
    %21 = vector.broadcast %20 : vector<1x128xf32> to vector<8x128xf32>
    %22 = arith.addf %19, %21 : vector<8x128xf32>
    %c0_14 = arith.constant 0 : index
    %c0_15 = arith.constant 0 : index
    %23 = vector.load %arg6[%c0_14, %c0_15] : memref<8x128xf32, #tpu.memory_space<vmem>>, vector<8x128xf32>
    tpu.vector_store %arg6[%c0_14, %c0_15], %22 {strides = array<i32>} : memref<8x128xf32, #tpu.memory_space<vmem>>, vector<8x128xf32>,
    %c0_16 = arith.constant 0 : index
    %c0_17 = arith.constant 0 : index
    %24 = vector.load %arg7[%c0_16, %c0_17] : memref<8x128xf32, #tpu.memory_space<vmem>>, vector<8x128xf32>
    %25 = vector.shape_cast %18 : vector<1x128xf32> to vector<1x128xf32>
    %26 = vector.broadcast %25 : vector<1x128xf32> to vector<8x128xf32>
    %27 = arith.addf %24, %26 : vector<8x128xf32>
    %c0_18 = arith.constant 0 : index
    %c0_19 = arith.constant 0 : index
    %28 = vector.load %arg7[%c0_18, %c0_19] : memref<8x128xf32, #tpu.memory_space<vmem>>, vector<8x128xf32>
    tpu.vector_store %arg7[%c0_18, %c0_19], %27 {strides = array<i32>} : memref<8x128xf32, #tpu.memory_space<vmem>>, vector<8x128xf32>,
    return
  }
  func.func @transform_0(%arg0: i32, %arg1: i32, %arg2: i32) -> (i32, i32, i32) {
    %c0_i32 = arith.constant 0 : i32
    %c0_i32_0 = arith.constant 0 : i32
    return %arg1, %arg2, %c0_i32 : i32, i32, i32
  }
  func.func @transform_1(%arg0: i32, %arg1: i32, %arg2: i32) -> (i32, i32, i32) {
    %c0_i32 = arith.constant 0 : i32
    %c0_i32_0 = arith.constant 0 : i32
    return %arg1, %c0_i32, %arg0 : i32, i32, i32
  }
  func.func @transform_2(%arg0: i32, %arg1: i32, %arg2: i32) -> (i32, i32, i32) {
    %c0_i32 = arith.constant 0 : i32
    return %arg1, %arg2, %arg0 : i32, i32, i32
  }
  func.func @transform_3(%arg0: i32, %arg1: i32, %arg2: i32) -> (i32, i32) {
    %c0_i32 = arith.constant 0 : i32
    %c0_i32_0 = arith.constant 0 : i32
    return %c0_i32, %arg0 : i32, i32
  }
  func.func @transform_4(%arg0: i32, %arg1: i32, %arg2: i32) -> (i32, i32) {
    %c0_i32 = arith.constant 0 : i32
    %c0_i32_0 = arith.constant 0 : i32
    return %c0_i32, %arg0 : i32, i32
  }
}

module attributes {stable_mosaic.version = 11 : i64} {
  func.func @_affine_act_kernel(%arg0: i32, %arg1: i32, %arg2: i32, %arg3: memref<1x128x128xbf16, #tpu.memory_space<vmem>>, %arg4: memref<1x128xf32, #tpu.memory_space<vmem>>, %arg5: memref<1x128xf32, #tpu.memory_space<vmem>>, %arg6: memref<1x128x128xbf16, #tpu.memory_space<vmem>>) attributes {dimension_semantics = [#tpu.dimension_semantics<parallel>, #tpu.dimension_semantics<parallel>, #tpu.dimension_semantics<parallel>], iteration_bounds = array<i64: 4, 1, 1>, scalar_prefetch = 0 : i64, scratch_operands = 0 : i64, tpu.core_type = #tpu.core_type<tc>, window_params = [{transform_indices = @transform_0, window_bounds = array<i64: 1, 128, 128>}, {transform_indices = @transform_1, window_bounds = array<i64: 1, 128>}, {transform_indices = @transform_2, window_bounds = array<i64: 1, 128>}, {transform_indices = @transform_3, window_bounds = array<i64: 1, 128, 128>}]} {
    %c0 = arith.constant 0 : index
    %c0_0 = arith.constant 0 : index
    %c0_1 = arith.constant 0 : index
    %0 = vector.load %arg3[%c0, %c0_0, %c0_1] : memref<1x128x128xbf16, #tpu.memory_space<vmem>>, vector<1x128x128xbf16>
    %1 = vector.shape_cast %0 : vector<1x128x128xbf16> to vector<128x128xbf16>
    %2 = arith.extf %1 : vector<128x128xbf16> to vector<128x128xf32>
    %c0_2 = arith.constant 0 : index
    %c0_3 = arith.constant 0 : index
    %3 = vector.load %arg4[%c0_2, %c0_3] : memref<1x128xf32, #tpu.memory_space<vmem>>, vector<1x128xf32>
    %4 = vector.broadcast %3 : vector<1x128xf32> to vector<128x128xf32>
    %5 = arith.mulf %2, %4 : vector<128x128xf32>
    %c0_4 = arith.constant 0 : index
    %c0_5 = arith.constant 0 : index
    %6 = vector.load %arg5[%c0_4, %c0_5] : memref<1x128xf32, #tpu.memory_space<vmem>>, vector<1x128xf32>
    %7 = vector.broadcast %6 : vector<1x128xf32> to vector<128x128xf32>
    %8 = arith.addf %5, %7 : vector<128x128xf32>
    %cst = arith.constant 0.000000e+00 : f32
    %9 = vector.broadcast %cst : f32 to vector<128x128xf32>
    %10 = arith.maximumf %8, %9 : vector<128x128xf32>
    %11 = arith.truncf %10 : vector<128x128xf32> to vector<128x128xbf16>
    %c0_6 = arith.constant 0 : index
    %c0_7 = arith.constant 0 : index
    %c0_8 = arith.constant 0 : index
    %12 = vector.load %arg6[%c0_6, %c0_7, %c0_8] : memref<1x128x128xbf16, #tpu.memory_space<vmem>>, vector<1x128x128xbf16>
    %13 = vector.shape_cast %12 : vector<1x128x128xbf16> to vector<128x128xbf16>
    %14 = vector.shape_cast %11 : vector<128x128xbf16> to vector<1x128x128xbf16>
    tpu.vector_store %arg6[%c0_6, %c0_7, %c0_8], %14 {strides = array<i32>} : memref<1x128x128xbf16, #tpu.memory_space<vmem>>, vector<1x128x128xbf16>,
    return
  }
  func.func @transform_0(%arg0: i32, %arg1: i32, %arg2: i32) -> (i32, i32, i32) {
    %c0_i32 = arith.constant 0 : i32
    return %arg0, %arg1, %arg2 : i32, i32, i32
  }
  func.func @transform_1(%arg0: i32, %arg1: i32, %arg2: i32) -> (i32, i32) {
    %c0_i32 = arith.constant 0 : i32
    %c0_i32_0 = arith.constant 0 : i32
    return %c0_i32, %arg2 : i32, i32
  }
  func.func @transform_2(%arg0: i32, %arg1: i32, %arg2: i32) -> (i32, i32) {
    %c0_i32 = arith.constant 0 : i32
    %c0_i32_0 = arith.constant 0 : i32
    return %c0_i32, %arg2 : i32, i32
  }
  func.func @transform_3(%arg0: i32, %arg1: i32, %arg2: i32) -> (i32, i32, i32) {
    %c0_i32 = arith.constant 0 : i32
    return %arg0, %arg1, %arg2 : i32, i32, i32
  }
}

module attributes {stable_mosaic.version = 11 : i64} {
  func.func @_bmm_stats_kernel(%arg0: i32, %arg1: i32, %arg2: i32, %arg3: memref<1x256x512xbf16, #tpu.memory_space<vmem>>, %arg4: memref<1x512x128xbf16, #tpu.memory_space<vmem>>, %arg5: memref<1x256x128xbf16, #tpu.memory_space<vmem>>, %arg6: memref<8x128xf32, #tpu.memory_space<vmem>>, %arg7: memref<8x128xf32, #tpu.memory_space<vmem>>) attributes {dimension_semantics = [#tpu.dimension_semantics<parallel>, #tpu.dimension_semantics<arbitrary>, #tpu.dimension_semantics<arbitrary>], iteration_bounds = array<i64: 1, 4, 2>, scalar_prefetch = 0 : i64, scratch_operands = 0 : i64, tpu.core_type = #tpu.core_type<tc>, window_params = [{transform_indices = @transform_0, window_bounds = array<i64: 1, 256, 512>}, {transform_indices = @transform_1, window_bounds = array<i64: 1, 512, 128>}, {transform_indices = @transform_2, window_bounds = array<i64: 1, 256, 128>}, {transform_indices = @transform_3, window_bounds = array<i64: 8, 128>}, {transform_indices = @transform_4, window_bounds = array<i64: 8, 128>}]} {
    %c0 = arith.constant 0 : index
    %c0_0 = arith.constant 0 : index
    %c0_1 = arith.constant 0 : index
    %0 = vector.load %arg3[%c0, %c0_0, %c0_1] : memref<1x256x512xbf16, #tpu.memory_space<vmem>>, vector<1x256x512xbf16>
    %1 = vector.shape_cast %0 : vector<1x256x512xbf16> to vector<256x512xbf16>
    %c0_2 = arith.constant 0 : index
    %c0_3 = arith.constant 0 : index
    %c0_4 = arith.constant 0 : index
    %2 = vector.load %arg4[%c0_2, %c0_3, %c0_4] : memref<1x512x128xbf16, #tpu.memory_space<vmem>>, vector<1x512x128xbf16>
    %3 = vector.shape_cast %2 : vector<1x512x128xbf16> to vector<512x128xbf16>
    %cst = arith.constant dense<0.000000e+00> : vector<256x128xf32>
    %4 = tpu.matmul %1, %3, %cst {dimension_numbers = #tpu.dot_dimension_numbers<[1], [0], [0], [1], [0, 0, 1, 1], [], []>} : vector<256x512xbf16>, vector<512x128xbf16>, vector<256x128xf32> -> vector<256x128xf32>
    %5 = arith.truncf %4 : vector<256x128xf32> to vector<256x128xbf16>
    %c0_5 = arith.constant 0 : index
    %c0_6 = arith.constant 0 : index
    %c0_7 = arith.constant 0 : index
    %6 = vector.load %arg5[%c0_5, %c0_6, %c0_7] : memref<1x256x128xbf16, #tpu.memory_space<vmem>>, vector<1x256x128xbf16>
    %7 = vector.shape_cast %6 : vector<1x256x128xbf16> to vector<256x128xbf16>
    %8 = vector.shape_cast %5 : vector<256x128xbf16> to vector<1x256x128xbf16>
    tpu.vector_store %arg5[%c0_5, %c0_6, %c0_7], %8 {strides = array<i32>} : memref<1x256x128xbf16, #tpu.memory_space<vmem>>, vector<1x256x128xbf16>,
    %c0_i32 = arith.constant 0 : i32
    %9 = arith.cmpi eq, %arg1, %c0_i32 : i32
    %c0_i32_8 = arith.constant 0 : i32
    %10 = arith.cmpi eq, %arg2, %c0_i32_8 : i32
    %11 = arith.andi %9, %10 : i1
    %12 = arith.extui %11 : i1 to i32
    %c0_i32_9 = arith.constant 0 : i32
    %13 = arith.cmpi ne, %12, %c0_i32_9 : i32
    scf.if %13 {
      %cst_20 = arith.constant 0.000000e+00 : f32
      %29 = vector.broadcast %cst_20 : f32 to vector<8x128xf32>
      %c0_21 = arith.constant 0 : index
      %c0_22 = arith.constant 0 : index
      %30 = vector.load %arg6[%c0_21, %c0_22] : memref<8x128xf32, #tpu.memory_space<vmem>>, vector<8x128xf32>
      tpu.vector_store %arg6[%c0_21, %c0_22], %29 {strides = array<i32>} : memref<8x128xf32, #tpu.memory_space<vmem>>, vector<8x128xf32>,
      %cst_23 = arith.constant 0.000000e+00 : f32
      %31 = vector.broadcast %cst_23 : f32 to vector<8x128xf32>
      %c0_24 = arith.constant 0 : index
      %c0_25 = arith.constant 0 : index
      %32 = vector.load %arg7[%c0_24, %c0_25] : memref<8x128xf32, #tpu.memory_space<vmem>>, vector<8x128xf32>
      tpu.vector_store %arg7[%c0_24, %c0_25], %31 {strides = array<i32>} : memref<8x128xf32, #tpu.memory_space<vmem>>, vector<8x128xf32>,
    } else {
    }
    %cst_10 = arith.constant dense<0.000000e+00> : vector<128xf32>
    %14 = vector.multi_reduction <add>, %4, %cst_10 [0] : vector<256x128xf32> to vector<128xf32>
    %15 = vector.shape_cast %14 : vector<128xf32> to vector<1x128xf32>
    %16 = arith.mulf %4, %4 : vector<256x128xf32>
    %cst_11 = arith.constant dense<0.000000e+00> : vector<128xf32>
    %17 = vector.multi_reduction <add>, %16, %cst_11 [0] : vector<256x128xf32> to vector<128xf32>
    %18 = vector.shape_cast %17 : vector<128xf32> to vector<1x128xf32>
    %c0_12 = arith.constant 0 : index
    %c0_13 = arith.constant 0 : index
    %19 = vector.load %arg6[%c0_12, %c0_13] : memref<8x128xf32, #tpu.memory_space<vmem>>, vector<8x128xf32>
    %20 = vector.shape_cast %15 : vector<1x128xf32> to vector<1x128xf32>
    %21 = vector.broadcast %20 : vector<1x128xf32> to vector<8x128xf32>
    %22 = arith.addf %19, %21 : vector<8x128xf32>
    %c0_14 = arith.constant 0 : index
    %c0_15 = arith.constant 0 : index
    %23 = vector.load %arg6[%c0_14, %c0_15] : memref<8x128xf32, #tpu.memory_space<vmem>>, vector<8x128xf32>
    tpu.vector_store %arg6[%c0_14, %c0_15], %22 {strides = array<i32>} : memref<8x128xf32, #tpu.memory_space<vmem>>, vector<8x128xf32>,
    %c0_16 = arith.constant 0 : index
    %c0_17 = arith.constant 0 : index
    %24 = vector.load %arg7[%c0_16, %c0_17] : memref<8x128xf32, #tpu.memory_space<vmem>>, vector<8x128xf32>
    %25 = vector.shape_cast %18 : vector<1x128xf32> to vector<1x128xf32>
    %26 = vector.broadcast %25 : vector<1x128xf32> to vector<8x128xf32>
    %27 = arith.addf %24, %26 : vector<8x128xf32>
    %c0_18 = arith.constant 0 : index
    %c0_19 = arith.constant 0 : index
    %28 = vector.load %arg7[%c0_18, %c0_19] : memref<8x128xf32, #tpu.memory_space<vmem>>, vector<8x128xf32>
    tpu.vector_store %arg7[%c0_18, %c0_19], %27 {strides = array<i32>} : memref<8x128xf32, #tpu.memory_space<vmem>>, vector<8x128xf32>,
    return
  }
  func.func @transform_0(%arg0: i32, %arg1: i32, %arg2: i32) -> (i32, i32, i32) {
    %c0_i32 = arith.constant 0 : i32
    %c0_i32_0 = arith.constant 0 : i32
    return %arg1, %arg2, %c0_i32 : i32, i32, i32
  }
  func.func @transform_1(%arg0: i32, %arg1: i32, %arg2: i32) -> (i32, i32, i32) {
    %c0_i32 = arith.constant 0 : i32
    %c0_i32_0 = arith.constant 0 : i32
    return %arg1, %c0_i32, %arg0 : i32, i32, i32
  }
  func.func @transform_2(%arg0: i32, %arg1: i32, %arg2: i32) -> (i32, i32, i32) {
    %c0_i32 = arith.constant 0 : i32
    return %arg1, %arg2, %arg0 : i32, i32, i32
  }
  func.func @transform_3(%arg0: i32, %arg1: i32, %arg2: i32) -> (i32, i32) {
    %c0_i32 = arith.constant 0 : i32
    %c0_i32_0 = arith.constant 0 : i32
    return %c0_i32, %arg0 : i32, i32
  }
  func.func @transform_4(%arg0: i32, %arg1: i32, %arg2: i32) -> (i32, i32) {
    %c0_i32 = arith.constant 0 : i32
    %c0_i32_0 = arith.constant 0 : i32
    return %c0_i32, %arg0 : i32, i32
  }
}

module attributes {stable_mosaic.version = 11 : i64} {
  func.func @_affine_act_kernel(%arg0: i32, %arg1: i32, %arg2: i32, %arg3: memref<1x512x128xbf16, #tpu.memory_space<vmem>>, %arg4: memref<1x128xf32, #tpu.memory_space<vmem>>, %arg5: memref<1x128xf32, #tpu.memory_space<vmem>>, %arg6: memref<1x512x128xbf16, #tpu.memory_space<vmem>>) attributes {dimension_semantics = [#tpu.dimension_semantics<parallel>, #tpu.dimension_semantics<parallel>, #tpu.dimension_semantics<parallel>], iteration_bounds = array<i64: 4, 1, 1>, scalar_prefetch = 0 : i64, scratch_operands = 0 : i64, tpu.core_type = #tpu.core_type<tc>, window_params = [{transform_indices = @transform_0, window_bounds = array<i64: 1, 512, 128>}, {transform_indices = @transform_1, window_bounds = array<i64: 1, 128>}, {transform_indices = @transform_2, window_bounds = array<i64: 1, 128>}, {transform_indices = @transform_3, window_bounds = array<i64: 1, 512, 128>}]} {
    %c0 = arith.constant 0 : index
    %c0_0 = arith.constant 0 : index
    %c0_1 = arith.constant 0 : index
    %0 = vector.load %arg3[%c0, %c0_0, %c0_1] : memref<1x512x128xbf16, #tpu.memory_space<vmem>>, vector<1x512x128xbf16>
    %1 = vector.shape_cast %0 : vector<1x512x128xbf16> to vector<512x128xbf16>
    %2 = arith.extf %1 : vector<512x128xbf16> to vector<512x128xf32>
    %c0_2 = arith.constant 0 : index
    %c0_3 = arith.constant 0 : index
    %3 = vector.load %arg4[%c0_2, %c0_3] : memref<1x128xf32, #tpu.memory_space<vmem>>, vector<1x128xf32>
    %4 = vector.broadcast %3 : vector<1x128xf32> to vector<512x128xf32>
    %5 = arith.mulf %2, %4 : vector<512x128xf32>
    %c0_4 = arith.constant 0 : index
    %c0_5 = arith.constant 0 : index
    %6 = vector.load %arg5[%c0_4, %c0_5] : memref<1x128xf32, #tpu.memory_space<vmem>>, vector<1x128xf32>
    %7 = vector.broadcast %6 : vector<1x128xf32> to vector<512x128xf32>
    %8 = arith.addf %5, %7 : vector<512x128xf32>
    %cst = arith.constant 0.000000e+00 : f32
    %9 = vector.broadcast %cst : f32 to vector<512x128xf32>
    %10 = arith.maximumf %8, %9 : vector<512x128xf32>
    %11 = arith.truncf %10 : vector<512x128xf32> to vector<512x128xbf16>
    %c0_6 = arith.constant 0 : index
    %c0_7 = arith.constant 0 : index
    %c0_8 = arith.constant 0 : index
    %12 = vector.load %arg6[%c0_6, %c0_7, %c0_8] : memref<1x512x128xbf16, #tpu.memory_space<vmem>>, vector<1x512x128xbf16>
    %13 = vector.shape_cast %12 : vector<1x512x128xbf16> to vector<512x128xbf16>
    %14 = vector.shape_cast %11 : vector<512x128xbf16> to vector<1x512x128xbf16>
    tpu.vector_store %arg6[%c0_6, %c0_7, %c0_8], %14 {strides = array<i32>} : memref<1x512x128xbf16, #tpu.memory_space<vmem>>, vector<1x512x128xbf16>,
    return
  }
  func.func @transform_0(%arg0: i32, %arg1: i32, %arg2: i32) -> (i32, i32, i32) {
    %c0_i32 = arith.constant 0 : i32
    return %arg0, %arg1, %arg2 : i32, i32, i32
  }
  func.func @transform_1(%arg0: i32, %arg1: i32, %arg2: i32) -> (i32, i32) {
    %c0_i32 = arith.constant 0 : i32
    %c0_i32_0 = arith.constant 0 : i32
    return %c0_i32, %arg2 : i32, i32
  }
  func.func @transform_2(%arg0: i32, %arg1: i32, %arg2: i32) -> (i32, i32) {
    %c0_i32 = arith.constant 0 : i32
    %c0_i32_0 = arith.constant 0 : i32
    return %c0_i32, %arg2 : i32, i32
  }
  func.func @transform_3(%arg0: i32, %arg1: i32, %arg2: i32) -> (i32, i32, i32) {
    %c0_i32 = arith.constant 0 : i32
    return %arg0, %arg1, %arg2 : i32, i32, i32
  }
}

module attributes {stable_mosaic.version = 11 : i64} {
  func.func @_bmm_act_kernel(%arg0: i32, %arg1: i32, %arg2: i32, %arg3: memref<1x256x256xbf16, #tpu.memory_space<vmem>>, %arg4: memref<1x256x128xbf16, #tpu.memory_space<vmem>>, %arg5: memref<1x256x128xf32, #tpu.memory_space<vmem>>) attributes {dimension_semantics = [#tpu.dimension_semantics<parallel>, #tpu.dimension_semantics<parallel>, #tpu.dimension_semantics<parallel>], iteration_bounds = array<i64: 4, 8, 1>, scalar_prefetch = 0 : i64, scratch_operands = 0 : i64, tpu.core_type = #tpu.core_type<tc>, window_params = [{transform_indices = @transform_0, window_bounds = array<i64: 1, 256, 256>}, {transform_indices = @transform_1, window_bounds = array<i64: 1, 256, 128>}, {transform_indices = @transform_2, window_bounds = array<i64: 1, 256, 128>}]} {
    %c0 = arith.constant 0 : index
    %c0_0 = arith.constant 0 : index
    %c0_1 = arith.constant 0 : index
    %0 = vector.load %arg3[%c0, %c0_0, %c0_1] : memref<1x256x256xbf16, #tpu.memory_space<vmem>>, vector<1x256x256xbf16>
    %1 = vector.shape_cast %0 : vector<1x256x256xbf16> to vector<256x256xbf16>
    %c0_2 = arith.constant 0 : index
    %c0_3 = arith.constant 0 : index
    %c0_4 = arith.constant 0 : index
    %2 = vector.load %arg4[%c0_2, %c0_3, %c0_4] : memref<1x256x128xbf16, #tpu.memory_space<vmem>>, vector<1x256x128xbf16>
    %3 = vector.shape_cast %2 : vector<1x256x128xbf16> to vector<256x128xbf16>
    %cst = arith.constant dense<0.000000e+00> : vector<256x128xf32>
    %4 = tpu.matmul %1, %3, %cst {dimension_numbers = #tpu.dot_dimension_numbers<[1], [0], [0], [1], [0, 0, 1, 1], [], []>} : vector<256x256xbf16>, vector<256x128xbf16>, vector<256x128xf32> -> vector<256x128xf32>
    %5 = math.tanh %4 : vector<256x128xf32>
    %c0_5 = arith.constant 0 : index
    %c0_6 = arith.constant 0 : index
    %c0_7 = arith.constant 0 : index
    %6 = vector.load %arg5[%c0_5, %c0_6, %c0_7] : memref<1x256x128xf32, #tpu.memory_space<vmem>>, vector<1x256x128xf32>
    %7 = vector.shape_cast %6 : vector<1x256x128xf32> to vector<256x128xf32>
    %8 = vector.shape_cast %5 : vector<256x128xf32> to vector<1x256x128xf32>
    tpu.vector_store %arg5[%c0_5, %c0_6, %c0_7], %8 {strides = array<i32>} : memref<1x256x128xf32, #tpu.memory_space<vmem>>, vector<1x256x128xf32>,
    return
  }
  func.func @transform_0(%arg0: i32, %arg1: i32, %arg2: i32) -> (i32, i32, i32) {
    %c0_i32 = arith.constant 0 : i32
    %c0_i32_0 = arith.constant 0 : i32
    return %arg0, %arg1, %c0_i32 : i32, i32, i32
  }
  func.func @transform_1(%arg0: i32, %arg1: i32, %arg2: i32) -> (i32, i32, i32) {
    %c0_i32 = arith.constant 0 : i32
    %c0_i32_0 = arith.constant 0 : i32
    return %arg0, %c0_i32, %arg2 : i32, i32, i32
  }
  func.func @transform_2(%arg0: i32, %arg1: i32, %arg2: i32) -> (i32, i32, i32) {
    %c0_i32 = arith.constant 0 : i32
    return %arg0, %arg1, %arg2 : i32, i32, i32
  }
}

</mosaic_0001>

<bundles_post_ra>
// kernel: generator_forward.9
= control target key start
LH: loop header
LB: loop body
LE: loop exit
PB: predicated region body
PF: predicated region fallthrough
CT: control target
= control target key end

     0   :  { %s988_s15 = smov 0   ;;  %s990_s16 = smov 0   ;;  %s1098_s0 = inlined_call_operand.vmem [shape: bf16[1,16,128], index: 0, kind: input, shape index: {}]   ;;  %s1099_s1 = inlined_call_operand.vmem [shape: bf16[1,128,8192], index: 1, kind: input, shape index: {}]   ;;  %s1100_s2 = inlined_call_operand.vmem [shape: bf16[1,16,8192], index: 2, kind: output, shape index: {0}]   ;;  %s1101_s3 = inlined_call_operand.vmem [shape: f32[8,8192], index: 3, kind: output, shape index: {1}]   ;;  %s1102_s4 = inlined_call_operand.vmem [shape: f32[8,8192], index: 4, kind: output, shape index: {2}]  }
   0x1   :  { %s992_s17 = smov 0   ;;  %s994_s18 = smov 0  }
   0x2   :  { %s996_s19 = smov 0  }
   0x3 LB: > { %s34_s20 = sadd.s32 1, %s956_s18  ;;  %s812_s21 = sadd.s32 4294967295, %s960_s19   ;;  %s960_s19 = sphi %s996_s19, %s15_s19   ;;  %s956_s18 = sphi %s994_s18, %s1107_s18   ;;  %s952_s17 = sphi %s992_s17, %s1106_s17   ;;  %s948_s16 = sphi %s990_s16, %s1105_s16   ;;  %s944_s15 = sphi %s988_s15, %s1104_s15  }
   0x4   : > { %p36_p0 = scmp.ge.s32.totalorder %s34_s20, 32  ;;  %p78_p1 = scmp.ne.s32.totalorder %s948_s16, %s944_s15 }
   0x5   : > { %p79_p2 = scmp.eq.s32.totalorder %s960_s19, 0  ;;  %p112_p4 = scmp.eq.s32.totalorder %s812_s21, 31 }
   0x6   : > { %s1109_s20 = smov (%p36_p0, %s34_s20), 0  ;;  %s71_s23 = sadd.s32 1, %s948_s16 }
   0x7   : > { %p80_p3 = por %p79_p2, %p78_p1  ;;  %s67_s22 = ssub.s32 %s956_s18, %s1109_s20 }
   0x8   : > { %p69_p5 = scmp.eq.s32.totalorder %s67_s22, 0  ;;  %p1023_p6 = por %p112_p4, %p78_p1 }
   0x9   : > { %p816_p7 = scmp.ge.s32.totalorder %s960_s19, 32 }
   0xa   : > { %s1028_s25 = scalar_select %p69_p5, %s948_s16, %s71_s23  }
   0xb   : > { %199 = sbr.rel (%p816_p7) target bundleno = 38 (0x26), region = 20 }
  0x12   : > { %202 = sbr.rel (!%p80_p3) target bundleno = 38 (0x26), region = 24  ;;  %s204_s26 = sand.u32 (%p80_p3), 1, %s948_s16  }
  0x13   : > { %s851_s27 = sshll.u32 (%p80_p3), %s956_s18, 3  ;;  %s817_s28 = sshll.u32 (%p80_p3), %s204_s26, 7 }
  0x14   : > { %s1036_s5 = scalar_lea.vmem (%p80_p3), %s1099_s1, %s851_s27  ;;  %s206_s6 = scalar_lea.vmem (%p80_p3), [#allocation2], %s817_s28 }
  0x15   : > { %v269_v0 = vld [vmem:[%s1036_s5] sm:$0xff] (%p80_p3) }
  0x16   : > { %v271_v1 = vld [vmem:[%s1036_s5 + $0x100] sm:$0xff] (%p80_p3)  ;;  %270 = vst [vmem:[%s206_s6] sm:$0xff] (%p80_p3), %v269_v0 }
  0x17   : > { %v273_v2 = vld [vmem:[%s1036_s5 + $0x200] sm:$0xff] (%p80_p3)  ;;  %272 = vst [vmem:[%s206_s6 + $0x8] sm:$0xff] (%p80_p3), %v271_v1 }
  0x18   : > { %274 = vst [vmem:[%s206_s6 + $0x10] sm:$0xff] (%p80_p3), %v273_v2  ;;  %v275_v3 = vld [vmem:[%s1036_s5 + $0x300] sm:$0xff] (%p80_p3) }
  0x19   : > { %v277_v4 = vld [vmem:[%s1036_s5 + $0x400] sm:$0xff]  ;;  %276 = vst [vmem:[%s206_s6 + $0x18] sm:$0xff] %v275_v3 }
  0x1a   : > { %v279_v5 = vld [vmem:[%s1036_s5 + $0x500] sm:$0xff]  ;;  %278 = vst [vmem:[%s206_s6 + $0x20] sm:$0xff] %v277_v4 }
  0x1b   : > { %280 = vst [vmem:[%s206_s6 + $0x28] sm:$0xff] %v279_v5  ;;  %v281_v6 = vld [vmem:[%s1036_s5 + $0x600] sm:$0xff] }
  0x1c   : > { %v283_v7 = vld [vmem:[%s1036_s5 + $0x700] sm:$0xff]  ;;  %282 = vst [vmem:[%s206_s6 + $0x30] sm:$0xff] %v281_v6 }
  0x1d   : > { %v285_v8 = vld [vmem:[%s1036_s5 + $0x800] sm:$0xff]  ;;  %284 = vst [vmem:[%s206_s6 + $0x38] sm:$0xff] %v283_v7 }
  0x1e   : > { %286 = vst [vmem:[%s206_s6 + $0x40] sm:$0xff] %v285_v8  ;;  %v287_v9 = vld [vmem:[%s1036_s5 + $0x900] sm:$0xff] }
  0x1f   : > { %v289_v10 = vld [vmem:[%s1036_s5 + $0xa00] sm:$0xff]  ;;  %288 = vst [vmem:[%s206_s6 + $0x48] sm:$0xff] %v287_v9 }
  0x20   : > { %v291_v11 = vld [vmem:[%s1036_s5 + $0xb00] sm:$0xff]  ;;  %290 = vst [vmem:[%s206_s6 + $0x50] sm:$0xff] %v289_v10 }
  0x21   : > { %292 = vst [vmem:[%s206_s6 + $0x58] sm:$0xff] %v291_v11  ;;  %v293_v12 = vld [vmem:[%s1036_s5 + $0xc00] sm:$0xff] }
  0x22   : > { %v295_v13 = vld [vmem:[%s1036_s5 + $0xd00] sm:$0xff]  ;;  %294 = vst [vmem:[%s206_s6 + $0x60] sm:$0xff] %v293_v12 }
  0x23   : > { %v297_v14 = vld [vmem:[%s1036_s5 + $0xe00] sm:$0xff]  ;;  %296 = vst [vmem:[%s206_s6 + $0x68] sm:$0xff] %v295_v13 }
  0x24   : > { %298 = vst [vmem:[%s206_s6 + $0x70] sm:$0xff] %v297_v14  ;;  %v299_v15 = vld [vmem:[%s1036_s5 + $0xf00] sm:$0xff] }
  0x25   : > { %300 = vst [vmem:[%s206_s6 + $0x78] sm:$0xff] %v299_v15 }
  0x26 PF: > { %p820_p8 = scmp.ge.s32.totalorder %s960_s19, 1  ;;  %p305_p9 = scmp.lt.s32.totalorder %s960_s19, 33 }
  0x28   : > { %p306_p10 = pnand %p820_p8, %p305_p9 }
  0x29   : > { %s312_s7 = sand.u32 (!%p306_p10), 1, %s944_s15   ;;  %v962_v16 = vmov (!%p306_p10), 0   ;;  %v921_v33 = vld [vmem:[%s1098_s0] sm:$0xff] (!%p306_p10)   ;;  %s823_s13 = sshll.u32 (!%p306_p10), %s952_s17, 1 }
  0x2a   : > { %309 = sbr.rel (%p306_p10) target bundleno = 309 (0x135), region = 62  ;;  %s821_s8 = sshll.u32 (!%p306_p10), %s312_s7, 7  ;;  %517 = vmatprep.mubr.bf16.mxu0 (!%p306_p10), %v962_v16 }
  0x2b   : > { %s314_s9 = scalar_lea.vmem (!%p306_p10), [#allocation2], %s821_s8  ;;  %s822_s12 = sshll.u32 (!%p306_p10), %s312_s7, 4 }
  0x2c   : > { %v897_v17 = vld [vmem:[%s314_s9 + $0x4] ss:$8 sps:$4 sm:$0xff] (!%p306_p10)   ;;  %v899_v18 = vld [vmem:[%s314_s9] ss:$8 sps:$4 sm:$0xff] (!%p306_p10)   ;;  %v900_v19 = vld [vmem:[%s314_s9 + $0x14] ss:$8 sps:$4 sm:$0xff] (!%p306_p10)  }
  0x2d   : > { %485 = vmatprep.subr.bf16.mxu0 (!%p306_p10), %v897_v17  ;;  %v902_v20 = vld [vmem:[%s314_s9 + $0x10] ss:$8 sps:$4 sm:$0xff] (!%p306_p10)   ;;  %v903_v21 = vld [vmem:[%s314_s9 + $0x24] ss:$8 sps:$4 sm:$0xff] (!%p306_p10)   ;;  %v905_v22 = vld [vmem:[%s314_s9 + $0x20] ss:$8 sps:$4 sm:$0xff] (!%p306_p10)  }
  0x2e   : > { %486 = vmatpush1.bf16.msra.mxu0 (!%p306_p10), %v899_v18  ;;  %v906_v23 = vld [vmem:[%s314_s9 + $0x34] ss:$8 sps:$4 sm:$0xff] (!%p306_p10)   ;;  %v908_v24 = vld [vmem:[%s314_s9 + $0x30] ss:$8 sps:$4 sm:$0xff] (!%p306_p10)   ;;  %v909_v25 = vld [vmem:[%s314_s9 + $0x44] ss:$8 sps:$4 sm:$0xff] (!%p306_p10)  }
  0x2f   : > { %487 = vmatprep.subr.bf16.mxu0 (!%p306_p10), %v900_v19  ;;  %v911_v26 = vld [vmem:[%s314_s9 + $0x40] ss:$8 sps:$4 sm:$0xff] (!%p306_p10)   ;;  %v912_v27 = vld [vmem:[%s314_s9 + $0x54] ss:$8 sps:$4 sm:$0xff] (!%p306_p10)   ;;  %v914_v28 = vld [vmem:[%s314_s9 + $0x50] ss:$8 sps:$4 sm:$0xff] (!%p306_p10)  }
  0x30   : > { %v915_v29 = vld [vmem:[%s314_s9 + $0x64] ss:$8 sps:$4 sm:$0xff] (!%p306_p10)   ;;  %v917_v30 = vld [vmem:[%s314_s9 + $0x60] ss:$8 sps:$4 sm:$0xff] (!%p306_p10)   ;;  %v918_v31 = vld [vmem:[%s314_s9 + $0x74] ss:$8 sps:$4 sm:$0xff] (!%p306_p10)  }
  0x31   : > { %v920_v32 = vld [vmem:[%s314_s9 + $0x70] ss:$8 sps:$4 sm:$0xff]   ;;  %s1065_s14 = scalar_lea.vmem [#allocation3], %s822_s12  ;;  %p369_p11 = scmp.lt.s32.totalorder %s823_s13, 63 }
  0x32   : > { %488 = vmatpush1.bf16.msra.mxu0 %v902_v20  ;;  %s854_s29 = sshll.u32 (%p1023_p6), %s952_s17, 3 }
  0x33   : > { %489 = vmatprep.subr.bf16.mxu0 %v903_v21  ;;  %s1111_s13 = smov (!%p369_p11, %s823_s13), 63  ;;  %s620_s6 = scalar_lea.vmem (%p1023_p6), %s1100_s2, %s854_s29 }
  0x34   : > { %s824_s15 = sshll.u32 %s1111_s13, 3 }
  0x35   : > { %s372_s23 = scalar_lea.vmem %s1101_s3, %s824_s15  ;;  %s378_s28 = scalar_lea.vmem %s1102_s4, %s824_s15 }
  0x36   : > { %490 = vmatpush1.bf16.msra.mxu0 %v905_v22 }
  0x37   : > { %491 = vmatprep.subr.bf16.mxu0 %v906_v23 }
  0x3a   : > { %492 = vmatpush1.bf16.msra.mxu0 %v908_v24 }
  0x3b   : > { %493 = vmatprep.subr.bf16.mxu0 %v909_v25 }
  0x3e   : > { %494 = vmatpush1.bf16.msra.mxu0 %v911_v26 }
  0x3f   : > { %495 = vmatprep.subr.bf16.mxu0 %v912_v27 }
  0x42   : > { %496 = vmatpush1.bf16.msra.mxu0 %v914_v28 }
  0x43   : > { %497 = vmatprep.subr.bf16.mxu0 %v915_v29 }
  0x46   : > { %498 = vmatpush1.bf16.msra.mxu0 %v917_v30 }
  0x47   : > { %499 = vmatprep.subr.bf16.mxu0 %v918_v31 }
  0x4a   : > { %500 = vmatpush1.bf16.msra.mxu0 %v920_v32 }
  0x4d   : > { %518 = vmatmul.mubr.bf16.vlgmr.msra.gmra.mrb[0].mxu0 %v921_v33 }
 0x120   : > { %v519_v34 = vpop.f32.mrb[0].mxu0 }
 0x121   : > { %v521_v35 = vpop.f32.mrb[1].mxu0  ;;  %v566_v38 = vmul.f32 %v519_v34, %v519_v34 }
 0x122   : > { %v852_v36 = vpack.c.bf16 %v521_v35, %v519_v34  ;;  %v523_v37 = vpop.f32.mrb[2].mxu0  ;;  %v567_v42 = vmul.f32 %v521_v35, %v521_v35 }
 0x123   : > { %v552_v39 = vadd.f32 %v523_v37, %v519_v34  ;;  %v568_v40 = vmul.f32 %v523_v37, %v523_v37  ;;  %v525_v41 = vpop.f32.mrb[3].mxu0 }
 0x124   : > { %v853_v43 = vpack.c.bf16 %v525_v41, %v523_v37  ;;  %540 = vst [vmem:[%s1065_s14] sm:$0xff] %v852_v36  ;;  %v559_v44 = vadd.f32 %v525_v41, %v521_v35  ;;  %v569_v45 = vmul.f32 %v525_v41, %v525_v41 }
 0x125   : > { %v553_v46 = vrot.slane %v552_v39, 4  ;;  %v570_v47 = vadd.f32 %v568_v40, %v566_v38 }
 0x126   : > { %541 = vst [vmem:[%s1065_s14 + $0x8] sm:$0xff] %v853_v43  ;;  %v560_v48 = vrot.slane %v559_v44, 4  ;;  %v577_v49 = vadd.f32 %v569_v45, %v567_v42 }
 0x127   : > { %v554_v50 = vadd.f32 %v553_v46, %v552_v39  ;;  %v571_v51 = vrot.slane %v570_v47, 4 }
 0x128   : > { %v561_v52 = vadd.f32 %v560_v48, %v559_v44  ;;  %v578_v53 = vrot.slane %v577_v49, 4 }
 0x129   : > { %v555_v54 = vrot.slane %v554_v50, 2  ;;  %v572_v55 = vadd.f32 %v571_v51, %v570_v47 }
 0x12a   : > { %v562_v56 = vrot.slane %v561_v52, 2  ;;  %v579_v57 = vadd.f32 %v578_v53, %v577_v49 }
 0x12b   : > { %v556_v58 = vadd.f32 %v555_v54, %v554_v50  ;;  %v573_v59 = vrot.slane %v572_v55, 2  ;;  %v650_v8 = vld [vmem:[%s1065_s14] sm:$0xff] (%p1023_p6) }
 0x12c   : > { %v563_v60 = vadd.f32 %v562_v56, %v561_v52  ;;  %v580_v61 = vrot.slane %v579_v57, 2  ;;  %651 = vst [vmem:[%s620_s6] sm:$0xff] (%p1023_p6), %v650_v8 }
 0x12d   : > { %v557_v62 = vrot.slane %v556_v58, 1  ;;  %v574_v63 = vadd.f32 %v573_v59, %v572_v55  ;;  %v652_v9 = vld [vmem:[%s1065_s14 + $0x8] sm:$0xff] (%p1023_p6) }
 0x12e   : > { %v564_v0 = vrot.slane %v563_v60, 1  ;;  %v581_v1 = vadd.f32 %v580_v61, %v579_v57  ;;  %612 = sbr.rel (!%p1023_p6) target bundleno = 309 (0x135), region = 74  ;;  %653 = vst [vmem:[%s620_s6 + $0x100] sm:$0xff] (%p1023_p6), %v652_v9 }
 0x12f   : > { %v558_v2 = vadd.f32 %v557_v62, %v556_v58  ;;  %v575_v3 = vrot.slane %v574_v63, 1 }
 0x130   : > { %v565_v4 = vadd.f32 %v564_v0, %v563_v60  ;;  %v582_v5 = vrot.slane %v581_v1, 1 }
 0x131   : > { %v576_v6 = vadd.f32 %v575_v3, %v574_v63  ;;  %588 = vst [vmem:[%s372_s23] sm:$0xff] %v558_v2 }
 0x132   : > { %v583_v7 = vadd.f32 %v582_v5, %v581_v1  ;;  %589 = vst [vmem:[%s372_s23 + $0x8] sm:$0xff] %v565_v4 }
 0x133   : > { %594 = vst [vmem:[%s378_s28] sm:$0xff] %v576_v6 }
 0x134   : > { %595 = vst [vmem:[%s378_s28 + $0x8] sm:$0xff] %v583_v7 }
 0x135 PF: > { %s15_s19 = sadd.s32 1, %s960_s19   ;;  %s1104_s15 = smov %s948_s16 }
 0x136   : > { %p12_p12 = scmp.ge.s32.totalorder %s15_s19, 34   ;;  %s1105_s16 = smov %s1028_s25 }
 0x137   : > { %s1106_s17 = smov %s956_s18  ;;  %s1107_s18 = smov %s1109_s20 }
 0x138   :  { %14 = sbr.rel (!%p12_p12) target bundleno = 3 (0x3), region = 170 }

// kernel: squeeze.9
= control target key start
LH: loop header
LB: loop body
LE: loop exit
PB: predicated region body
PF: predicated region fallthrough
CT: control target
= control target key end

     0   :  { %s152_s0 = inlined_call_operand.vmem [shape: f32[8192], index: 0, kind: input, shape index: {}]   ;;  %s153_s1 = inlined_call_operand.vmem [shape: f32[16,512], index: 1, kind: output, shape index: {}]  }
   0x1   :  { %v2_v0 = vld [vmem:[%s152_s0] sm:$0xff]   ;;  %v49_v1 = vld [vmem:[%s152_s0 + $0x8] sm:$0xff]   ;;  %v52_v2 = vld [vmem:[%s152_s0 + $0x10] sm:$0xff]  }
   0x2   :  { %3 = vst [vmem:[%s153_s1] ss:$8 sm:$0xf] %v2_v0   ;;  %48 = vst [vmem:[%s153_s1 - $0x1f] ss:$8 sm:$0xf0] %v2_v0   ;;  %v55_v3 = vld [vmem:[%s152_s0 + $0x18] sm:$0xff]  }
   0x3   :  { %50 = vst [vmem:[%s153_s1 + $0x2] ss:$8 sm:$0xf] %v49_v1   ;;  %51 = vst [vmem:[%s153_s1 - $0x1d] ss:$8 sm:$0xf0] %v49_v1  }
   0x4   :  { %53 = vst [vmem:[%s153_s1 + $0x4] ss:$8 sm:$0xf] %v52_v2   ;;  %54 = vst [vmem:[%s153_s1 - $0x1b] ss:$8 sm:$0xf0] %v52_v2  }
   0x5   :  { %v58_v4 = vld [vmem:[%s152_s0 + $0x20] sm:$0xff]   ;;  %v61_v5 = vld [vmem:[%s152_s0 + $0x28] sm:$0xff]   ;;  %56 = vst [vmem:[%s153_s1 + $0x6] ss:$8 sm:$0xf] %v55_v3   ;;  %v64_v6 = vld [vmem:[%s152_s0 + $0x30] sm:$0xff]  }
   0x6   :  { %57 = vst [vmem:[%s153_s1 - $0x19] ss:$8 sm:$0xf0] %v55_v3   ;;  %59 = vst [vmem:[%s153_s1 + $0x20] ss:$8 sm:$0xf] %v58_v4  }
   0x7   :  { %60 = vst [vmem:[%s153_s1 + $0x1] ss:$8 sm:$0xf0] %v58_v4   ;;  %62 = vst [vmem:[%s153_s1 + $0x22] ss:$8 sm:$0xf] %v61_v5  }
   0x8   :  { %63 = vst [vmem:[%s153_s1 + $0x3] ss:$8 sm:$0xf0] %v61_v5   ;;  %v67_v7 = vld [vmem:[%s152_s0 + $0x38] sm:$0xff]  }
   0x9   :  { %65 = vst [vmem:[%s153_s1 + $0x24] ss:$8 sm:$0xf] %v64_v6   ;;  %66 = vst [vmem:[%s153_s1 + $0x5] ss:$8 sm:$0xf0] %v64_v6  }
   0xa   :  { %68 = vst [vmem:[%s153_s1 + $0x26] ss:$8 sm:$0xf] %v67_v7   ;;  %69 = vst [vmem:[%s153_s1 + $0x7] ss:$8 sm:$0xf0] %v67_v7  }

// kernel: squeeze.11
= control target key start
LH: loop header
LB: loop body
LE: loop exit
PB: predicated region body
PF: predicated region fallthrough
CT: control target
= control target key end

     0   :  { %s1946_s0 = inlined_call_operand.vmem [shape: bf16[1,2,8192], index: 0, kind: input, shape index: {}]   ;;  %s1947_s1 = inlined_call_operand.vmem [shape: bf16[1,32,512], index: 1, kind: output, shape index: {}]  }
   0x1   :  { %v1595_v0 = vld [vmem:[%s1946_s0 + $0x3f] sm:$0x1]  ;;  %v1596_v1 = vld [vmem:[%s1946_s0 + $0x3e] sm:$0x1]  ;;  %v1597_v2 = vld [vmem:[%s1946_s0 + $0x3d] sm:$0x1] }
   0x2   :  { %v17_v3 = vunpack.c.l.bf16 %v1595_v0  ;;  %v33_v4 = vunpack.c.l.bf16 %v1596_v1  ;;  %v49_v5 = vunpack.c.l.bf16 %v1597_v2  ;;  %v1598_v6 = vld [vmem:[%s1946_s0 + $0x3c] sm:$0x1]  ;;  %v1599_v7 = vld [vmem:[%s1946_s0 + $0x3b] sm:$0x1]  ;;  %v1600_v8 = vld [vmem:[%s1946_s0 + $0x3a] sm:$0x1] }
   0x3   :  { %v65_v9 = vunpack.c.l.bf16 %v1598_v6  ;;  %v81_v10 = vunpack.c.l.bf16 %v1599_v7  ;;  %v97_v11 = vunpack.c.l.bf16 %v1600_v8  ;;  %v1601_v12 = vld [vmem:[%s1946_s0 + $0x39] sm:$0x1]  ;;  %v1602_v13 = vld [vmem:[%s1946_s0 + $0x38] sm:$0x1]  ;;  %v1603_v14 = vld [vmem:[%s1946_s0 + $0x37] sm:$0x1] }
   0x4   :  { %20 = vst [vmem:[#allocation1 + $0x1f8] sm:$0x3] %v17_v3  ;;  %36 = vst [vmem:[#allocation1 + $0x1f0] sm:$0x3] %v33_v4  ;;  %v113_v15 = vunpack.c.l.bf16 %v1601_v12  ;;  %v129_v16 = vunpack.c.l.bf16 %v1602_v13  ;;  %v145_v17 = vunpack.c.l.bf16 %v1603_v14  ;;  %v1604_v18 = vld [vmem:[%s1946_s0 + $0x36] sm:$0x1] }
   0x5   :  { %52 = vst [vmem:[#allocation1 + $0x1e8] sm:$0x3] %v49_v5  ;;  %v1605_v19 = vld [vmem:[%s1946_s0 + $0x35] sm:$0x1]  ;;  %v1606_v20 = vld [vmem:[%s1946_s0 + $0x34] sm:$0x1]  ;;  %v161_v21 = vunpack.c.l.bf16 %v1604_v18 }
   0x6   :  { %68 = vst [vmem:[#allocation1 + $0x1e0] sm:$0x3] %v65_v9  ;;  %84 = vst [vmem:[#allocation1 + $0x1d8] sm:$0x3] %v81_v10  ;;  %v177_v22 = vunpack.c.l.bf16 %v1605_v19  ;;  %v193_v23 = vunpack.c.l.bf16 %v1606_v20  ;;  %v1607_v24 = vld [vmem:[%s1946_s0 + $0x33] sm:$0x1] }
   0x7   :  { %100 = vst [vmem:[#allocation1 + $0x1d0] sm:$0x3] %v97_v11  ;;  %v1608_v25 = vld [vmem:[%s1946_s0 + $0x32] sm:$0x1]  ;;  %v1609_v26 = vld [vmem:[%s1946_s0 + $0x31] sm:$0x1]  ;;  %v209_v27 = vunpack.c.l.bf16 %v1607_v24 }
   0x8   :  { %116 = vst [vmem:[#allocation1 + $0x1c8] sm:$0x3] %v113_v15  ;;  %132 = vst [vmem:[#allocation1 + $0x1c0] sm:$0x3] %v129_v16  ;;  %v225_v28 = vunpack.c.l.bf16 %v1608_v25  ;;  %v241_v29 = vunpack.c.l.bf16 %v1609_v26  ;;  %v1610_v30 = vld [vmem:[%s1946_s0 + $0x30] sm:$0x1] }
   0x9   :  { %148 = vst [vmem:[#allocation1 + $0x1b8] sm:$0x3] %v145_v17  ;;  %v1611_v31 = vld [vmem:[%s1946_s0 + $0x2f] sm:$0x1]  ;;  %v1612_v32 = vld [vmem:[%s1946_s0 + $0x2e] sm:$0x1]  ;;  %v257_v33 = vunpack.c.l.bf16 %v1610_v30 }
   0xa   :  { %164 = vst [vmem:[#allocation1 + $0x1b0] sm:$0x3] %v161_v21  ;;  %180 = vst [vmem:[#allocation1 + $0x1a8] sm:$0x3] %v177_v22  ;;  %v273_v34 = vunpack.c.l.bf16 %v1611_v31  ;;  %v289_v35 = vunpack.c.l.bf16 %v1612_v32  ;;  %v1613_v36 = vld [vmem:[%s1946_s0 + $0x2d] sm:$0x1] }
   0xb   :  { %196 = vst [vmem:[#allocation1 + $0x1a0] sm:$0x3] %v193_v23  ;;  %v1614_v37 = vld [vmem:[%s1946_s0 + $0x2c] sm:$0x1]  ;;  %v1615_v38 = vld [vmem:[%s1946_s0 + $0x2b] sm:$0x1]  ;;  %v305_v39 = vunpack.c.l.bf16 %v1613_v36 }
   0xc   :  { %212 = vst [vmem:[#allocation1 + $0x198] sm:$0x3] %v209_v27  ;;  %228 = vst [vmem:[#allocation1 + $0x190] sm:$0x3] %v225_v28  ;;  %v321_v40 = vunpack.c.l.bf16 %v1614_v37  ;;  %v337_v41 = vunpack.c.l.bf16 %v1615_v38  ;;  %v1616_v42 = vld [vmem:[%s1946_s0 + $0x2a] sm:$0x1] }
   0xd   :  { %244 = vst [vmem:[#allocation1 + $0x188] sm:$0x3] %v241_v29  ;;  %v1617_v43 = vld [vmem:[%s1946_s0 + $0x29] sm:$0x1]  ;;  %v1618_v44 = vld [vmem:[%s1946_s0 + $0x28] sm:$0x1]  ;;  %v353_v45 = vunpack.c.l.bf16 %v1616_v42 }
   0xe   :  { %260 = vst [vmem:[#allocation1 + $0x180] sm:$0x3] %v257_v33  ;;  %276 = vst [vmem:[#allocation1 + $0x178] sm:$0x3] %v273_v34  ;;  %v369_v46 = vunpack.c.l.bf16 %v1617_v43  ;;  %v385_v47 = vunpack.c.l.bf16 %v1618_v44  ;;  %v1619_v48 = vld [vmem:[%s1946_s0 + $0x27] sm:$0x1] }
   0xf   :  { %292 = vst [vmem:[#allocation1 + $0x170] sm:$0x3] %v289_v35  ;;  %v1620_v49 = vld [vmem:[%s1946_s0 + $0x26] sm:$0x1]  ;;  %v1621_v50 = vld [vmem:[%s1946_s0 + $0x25] sm:$0x1]  ;;  %v401_v51 = vunpack.c.l.bf16 %v1619_v48 }
  0x10   :  { %308 = vst [vmem:[#allocation1 + $0x168] sm:$0x3] %v305_v39  ;;  %324 = vst [vmem:[#allocation1 + $0x160] sm:$0x3] %v321_v40  ;;  %v417_v52 = vunpack.c.l.bf16 %v1620_v49  ;;  %v433_v53 = vunpack.c.l.bf16 %v1621_v50  ;;  %v1622_v54 = vld [vmem:[%s1946_s0 + $0x24] sm:$0x1] }
  0x11   :  { %340 = vst [vmem:[#allocation1 + $0x158] sm:$0x3] %v337_v41  ;;  %v1623_v55 = vld [vmem:[%s1946_s0 + $0x23] sm:$0x1]  ;;  %v1624_v56 = vld [vmem:[%s1946_s0 + $0x22] sm:$0x1]  ;;  %v449_v57 = vunpack.c.l.bf16 %v1622_v54 }
  0x12   :  { %356 = vst [vmem:[#allocation1 + $0x150] sm:$0x3] %v353_v45  ;;  %372 = vst [vmem:[#allocation1 + $0x148] sm:$0x3] %v369_v46  ;;  %v465_v58 = vunpack.c.l.bf16 %v1623_v55  ;;  %v481_v59 = vunpack.c.l.bf16 %v1624_v56  ;;  %v1625_v60 = vld [vmem:[%s1946_s0 + $0x21] sm:$0x1] }
  0x13   :  { %388 = vst [vmem:[#allocation1 + $0x140] sm:$0x3] %v385_v47  ;;  %v1626_v61 = vld [vmem:[%s1946_s0 + $0x20] sm:$0x1]  ;;  %v1627_v62 = vld [vmem:[%s1946_s0 + $0x1f] sm:$0x1]  ;;  %v497_v63 = vunpack.c.l.bf16 %v1625_v60 }
  0x14   :  { %404 = vst [vmem:[#allocation1 + $0x138] sm:$0x3] %v401_v51  ;;  %420 = vst [vmem:[#allocation1 + $0x130] sm:$0x3] %v417_v52  ;;  %v513_v0 = vunpack.c.l.bf16 %v1626_v61  ;;  %v529_v1 = vunpack.c.l.bf16 %v1627_v62  ;;  %v1628_v2 = vld [vmem:[%s1946_s0 + $0x1e] sm:$0x1] }
  0x15   :  { %436 = vst [vmem:[#allocation1 + $0x128] sm:$0x3] %v433_v53  ;;  %v1629_v3 = vld [vmem:[%s1946_s0 + $0x1d] sm:$0x1]  ;;  %v1630_v4 = vld [vmem:[%s1946_s0 + $0x1c] sm:$0x1]  ;;  %v545_v5 = vunpack.c.l.bf16 %v1628_v2 }
  0x16   :  { %452 = vst [vmem:[#allocation1 + $0x120] sm:$0x3] %v449_v57  ;;  %468 = vst [vmem:[#allocation1 + $0x118] sm:$0x3] %v465_v58  ;;  %v561_v6 = vunpack.c.l.bf16 %v1629_v3  ;;  %v577_v7 = vunpack.c.l.bf16 %v1630_v4  ;;  %v1631_v8 = vld [vmem:[%s1946_s0 + $0x1b] sm:$0x1] }
  0x17   :  { %484 = vst [vmem:[#allocation1 + $0x110] sm:$0x3] %v481_v59  ;;  %v1632_v9 = vld [vmem:[%s1946_s0 + $0x1a] sm:$0x1]  ;;  %v1633_v10 = vld [vmem:[%s1946_s0 + $0x19] sm:$0x1]  ;;  %v593_v11 = vunpack.c.l.bf16 %v1631_v8 }
  0x18   :  { %500 = vst [vmem:[#allocation1 + $0x108] sm:$0x3] %v497_v63  ;;  %516 = vst [vmem:[#allocation1 + $0x100] sm:$0x3] %v513_v0  ;;  %v609_v12 = vunpack.c.l.bf16 %v1632_v9  ;;  %v625_v13 = vunpack.c.l.bf16 %v1633_v10  ;;  %v1634_v14 = vld [vmem:[%s1946_s0 + $0x18] sm:$0x1] }
  0x19   :  { %532 = vst [vmem:[#allocation1 + $0xf8] sm:$0x3] %v529_v1  ;;  %v1635_v15 = vld [vmem:[%s1946_s0 + $0x17] sm:$0x1]  ;;  %v1636_v16 = vld [vmem:[%s1946_s0 + $0x16] sm:$0x1]  ;;  %v641_v17 = vunpack.c.l.bf16 %v1634_v14 }
  0x1a   :  { %548 = vst [vmem:[#allocation1 + $0xf0] sm:$0x3] %v545_v5  ;;  %564 = vst [vmem:[#allocation1 + $0xe8] sm:$0x3] %v561_v6  ;;  %v657_v18 = vunpack.c.l.bf16 %v1635_v15  ;;  %v673_v19 = vunpack.c.l.bf16 %v1636_v16  ;;  %v1637_v20 = vld [vmem:[%s1946_s0 + $0x15] sm:$0x1] }
  0x1b   :  { %580 = vst [vmem:[#allocation1 + $0xe0] sm:$0x3] %v577_v7  ;;  %v1638_v21 = vld [vmem:[%s1946_s0 + $0x14] sm:$0x1]  ;;  %v1639_v22 = vld [vmem:[%s1946_s0 + $0x13] sm:$0x1]  ;;  %v689_v23 = vunpack.c.l.bf16 %v1637_v20 }
  0x1c   :  { %596 = vst [vmem:[#allocation1 + $0xd8] sm:$0x3] %v593_v11  ;;  %612 = vst [vmem:[#allocation1 + $0xd0] sm:$0x3] %v609_v12  ;;  %v705_v24 = vunpack.c.l.bf16 %v1638_v21  ;;  %v721_v25 = vunpack.c.l.bf16 %v1639_v22  ;;  %v1640_v26 = vld [vmem:[%s1946_s0 + $0x12] sm:$0x1] }
  0x1d   :  { %628 = vst [vmem:[#allocation1 + $0xc8] sm:$0x3] %v625_v13  ;;  %v1641_v27 = vld [vmem:[%s1946_s0 + $0x11] sm:$0x1]  ;;  %v1642_v28 = vld [vmem:[%s1946_s0 + $0x10] sm:$0x1]  ;;  %v737_v29 = vunpack.c.l.bf16 %v1640_v26 }
  0x1e   :  { %644 = vst [vmem:[#allocation1 + $0xc0] sm:$0x3] %v641_v17  ;;  %660 = vst [vmem:[#allocation1 + $0xb8] sm:$0x3] %v657_v18  ;;  %v753_v30 = vunpack.c.l.bf16 %v1641_v27  ;;  %v769_v31 = vunpack.c.l.bf16 %v1642_v28  ;;  %v1643_v32 = vld [vmem:[%s1946_s0 + $0xf] sm:$0x1] }
  0x1f   :  { %676 = vst [vmem:[#allocation1 + $0xb0] sm:$0x3] %v673_v19  ;;  %v1644_v33 = vld [vmem:[%s1946_s0 + $0xe] sm:$0x1]  ;;  %v1645_v34 = vld [vmem:[%s1946_s0 + $0xd] sm:$0x1]  ;;  %v785_v35 = vunpack.c.l.bf16 %v1643_v32 }
  0x20   :  { %692 = vst [vmem:[#allocation1 + $0xa8] sm:$0x3] %v689_v23  ;;  %708 = vst [vmem:[#allocation1 + $0xa0] sm:$0x3] %v705_v24  ;;  %v801_v36 = vunpack.c.l.bf16 %v1644_v33  ;;  %v817_v37 = vunpack.c.l.bf16 %v1645_v34  ;;  %v1646_v38 = vld [vmem:[%s1946_s0 + $0xc] sm:$0x1] }
  0x21   :  { %724 = vst [vmem:[#allocation1 + $0x98] sm:$0x3] %v721_v25  ;;  %v1647_v39 = vld [vmem:[%s1946_s0 + $0xb] sm:$0x1]  ;;  %v1648_v40 = vld [vmem:[%s1946_s0 + $0xa] sm:$0x1]  ;;  %v833_v41 = vunpack.c.l.bf16 %v1646_v38 }
  0x22   :  { %740 = vst [vmem:[#allocation1 + $0x90] sm:$0x3] %v737_v29  ;;  %756 = vst [vmem:[#allocation1 + $0x88] sm:$0x3] %v753_v30  ;;  %v849_v42 = vunpack.c.l.bf16 %v1647_v39  ;;  %v865_v43 = vunpack.c.l.bf16 %v1648_v40  ;;  %v1649_v44 = vld [vmem:[%s1946_s0 + $0x9] sm:$0x1] }
  0x23   :  { %772 = vst [vmem:[#allocation1 + $0x80] sm:$0x3] %v769_v31  ;;  %v1650_v45 = vld [vmem:[%s1946_s0 + $0x8] sm:$0x1]  ;;  %v1651_v46 = vld [vmem:[%s1946_s0 + $0x7] sm:$0x1]  ;;  %v881_v47 = vunpack.c.l.bf16 %v1649_v44 }
  0x24   :  { %788 = vst [vmem:[#allocation1 + $0x78] sm:$0x3] %v785_v35  ;;  %804 = vst [vmem:[#allocation1 + $0x70] sm:$0x3] %v801_v36  ;;  %v897_v48 = vunpack.c.l.bf16 %v1650_v45  ;;  %v913_v49 = vunpack.c.l.bf16 %v1651_v46  ;;  %v1652_v50 = vld [vmem:[%s1946_s0 + $0x6] sm:$0x1] }
  0x25   :  { %820 = vst [vmem:[#allocation1 + $0x68] sm:$0x3] %v817_v37  ;;  %v1653_v51 = vld [vmem:[%s1946_s0 + $0x5] sm:$0x1]  ;;  %v1654_v52 = vld [vmem:[%s1946_s0 + $0x4] sm:$0x1]  ;;  %v929_v53 = vunpack.c.l.bf16 %v1652_v50 }
  0x26   :  { %836 = vst [vmem:[#allocation1 + $0x60] sm:$0x3] %v833_v41  ;;  %852 = vst [vmem:[#allocation1 + $0x58] sm:$0x3] %v849_v42  ;;  %v945_v54 = vunpack.c.l.bf16 %v1653_v51  ;;  %v961_v55 = vunpack.c.l.bf16 %v1654_v52  ;;  %v1655_v56 = vld [vmem:[%s1946_s0 + $0x3] sm:$0x1] }
  0x27   :  { %868 = vst [vmem:[#allocation1 + $0x50] sm:$0x3] %v865_v43  ;;  %v1656_v57 = vld [vmem:[%s1946_s0 + $0x2] sm:$0x1]  ;;  %v1657_v58 = vld [vmem:[%s1946_s0 + $0x1] sm:$0x1]  ;;  %v977_v59 = vunpack.c.l.bf16 %v1655_v56 }
  0x28   :  { %884 = vst [vmem:[#allocation1 + $0x48] sm:$0x3] %v881_v47  ;;  %900 = vst [vmem:[#allocation1 + $0x40] sm:$0x3] %v897_v48  ;;  %v993_v60 = vunpack.c.l.bf16 %v1656_v57  ;;  %v1008_v61 = vunpack.c.l.bf16 %v1657_v58  ;;  %v1021_v62 = vld [vmem:[%s1946_s0] sm:$0x1] }
  0x29   :  { %916 = vst [vmem:[#allocation1 + $0x38] sm:$0x3] %v913_v49  ;;  %v1192_v63 = vld [vmem:[#allocation1 + $0xe0] sm:$0x3]   ;;  %v1198_v0 = vld [vmem:[#allocation1 + $0xe8] sm:$0x3]   ;;  %v1022_v1 = vunpack.c.l.bf16 %v1021_v62 }
  0x2a   :  { %932 = vst [vmem:[#allocation1 + $0x30] sm:$0x3] %v929_v53  ;;  %948 = vst [vmem:[#allocation1 + $0x28] sm:$0x3] %v945_v54  ;;  %v1174_v2 = vld [vmem:[#allocation1 + $0xc8] sm:$0x3]  }
  0x2b   :  { %964 = vst [vmem:[#allocation1 + $0x20] sm:$0x3] %v961_v55  ;;  %v1180_v3 = vld [vmem:[#allocation1 + $0xd0] sm:$0x3]   ;;  %v1186_v4 = vld [vmem:[#allocation1 + $0xd8] sm:$0x3]  }
  0x2c   :  { %1194 = vst [vmem:[#allocation0 + $0x7] sm:$0x1] %v1192_v63   ;;  %1196 = vst [vmem:[#allocation0 + $0x46] sm:$0x2] %v1192_v63   ;;  %v1156_v5 = vld [vmem:[#allocation1 + $0xb0] sm:$0x3]  }
  0x2d   :  { %1200 = vst [vmem:[#allocation0 + $0xf] sm:$0x1] %v1198_v0   ;;  %1202 = vst [vmem:[#allocation0 + $0x4e] sm:$0x2] %v1198_v0   ;;  %v1162_v6 = vld [vmem:[#allocation1 + $0xb8] sm:$0x3]  }
  0x2e   :  { %980 = vst [vmem:[#allocation1 + $0x18] sm:$0x3] %v977_v59  ;;  %996 = vst [vmem:[#allocation1 + $0x10] sm:$0x3] %v993_v60  ;;  %v1168_v7 = vld [vmem:[#allocation1 + $0xc0] sm:$0x3]  }
  0x2f   :  { %1011 = vst [vmem:[#allocation1 + $0x8] sm:$0x3] %v1008_v61  ;;  %1176 = vst [vmem:[#allocation0 + $0xe] sm:$0x1] %v1174_v2   ;;  %v1138_v8 = vld [vmem:[#allocation1 + $0x98] sm:$0x3]  }
  0x30   :  { %1178 = vst [vmem:[#allocation0 + $0x4d] sm:$0x2] %v1174_v2   ;;  %1182 = vst [vmem:[#allocation0 + $0x16] sm:$0x1] %v1180_v3   ;;  %v1144_v9 = vld [vmem:[#allocation1 + $0xa0] sm:$0x3]  }
  0x31   :  { %1184 = vst [vmem:[#allocation0 + $0x55] sm:$0x2] %v1180_v3   ;;  %1188 = vst [vmem:[#allocation0 + $0x1e] sm:$0x1] %v1186_v4   ;;  %v1150_v10 = vld [vmem:[#allocation1 + $0xa8] sm:$0x3]  }
  0x32   :  { %1190 = vst [vmem:[#allocation0 + $0x5d] sm:$0x2] %v1186_v4   ;;  %1024 = vst [vmem:[#allocation1] sm:$0x3] %v1022_v1  ;;  %v1120_v11 = vld [vmem:[#allocation1 + $0x80] sm:$0x3]  }
  0x33   :  { %1158 = vst [vmem:[#allocation0 + $0x15] sm:$0x1] %v1156_v5   ;;  %1160 = vst [vmem:[#allocation0 + $0x54] sm:$0x2] %v1156_v5   ;;  %v1126_v12 = vld [vmem:[#allocation1 + $0x88] sm:$0x3]  }
  0x34   :  { %1164 = vst [vmem:[#allocation0 + $0x1d] sm:$0x1] %v1162_v6   ;;  %1166 = vst [vmem:[#allocation0 + $0x5c] sm:$0x2] %v1162_v6   ;;  %v1132_v13 = vld [vmem:[#allocation1 + $0x90] sm:$0x3]  }
  0x35   :  { %1170 = vst [vmem:[#allocation0 + $0x6] sm:$0x1] %v1168_v7   ;;  %1172 = vst [vmem:[#allocation0 + $0x45] sm:$0x2] %v1168_v7   ;;  %v1102_v14 = vld [vmem:[#allocation1 + $0x68] sm:$0x3]  }
  0x36   :  { %1140 = vst [vmem:[#allocation0 + $0x1c] sm:$0x1] %v1138_v8   ;;  %1142 = vst [vmem:[#allocation0 + $0x5b] sm:$0x2] %v1138_v8   ;;  %v1108_v15 = vld [vmem:[#allocation1 + $0x70] sm:$0x3]  }
  0x37   :  { %1146 = vst [vmem:[#allocation0 + $0x5] sm:$0x1] %v1144_v9   ;;  %1148 = vst [vmem:[#allocation0 + $0x44] sm:$0x2] %v1144_v9   ;;  %v1114_v16 = vld [vmem:[#allocation1 + $0x78] sm:$0x3]  }
  0x38   :  { %1152 = vst [vmem:[#allocation0 + $0xd] sm:$0x1] %v1150_v10   ;;  %1154 = vst [vmem:[#allocation0 + $0x4c] sm:$0x2] %v1150_v10   ;;  %v1084_v17 = vld [vmem:[#allocation1 + $0x50] sm:$0x3]  }
  0x39   :  { %1122 = vst [vmem:[#allocation0 + $0x4] sm:$0x1] %v1120_v11   ;;  %1124 = vst [vmem:[#allocation0 + $0x43] sm:$0x2] %v1120_v11   ;;  %v1090_v18 = vld [vmem:[#allocation1 + $0x58] sm:$0x3]  }
  0x3a   :  { %1128 = vst [vmem:[#allocation0 + $0xc] sm:$0x1] %v1126_v12   ;;  %1130 = vst [vmem:[#allocation0 + $0x4b] sm:$0x2] %v1126_v12   ;;  %v1096_v19 = vld [vmem:[#allocation1 + $0x60] sm:$0x3]  }
  0x3b   :  { %1134 = vst [vmem:[#allocation0 + $0x14] sm:$0x1] %v1132_v13   ;;  %1136 = vst [vmem:[#allocation0 + $0x53] sm:$0x2] %v1132_v13   ;;  %v1066_v20 = vld [vmem:[#allocation1 + $0x38] sm:$0x3]  }
  0x3c   :  { %1104 = vst [vmem:[#allocation0 + $0xb] sm:$0x1] %v1102_v14   ;;  %1106 = vst [vmem:[#allocation0 + $0x4a] sm:$0x2] %v1102_v14   ;;  %v1072_v21 = vld [vmem:[#allocation1 + $0x40] sm:$0x3]  }
  0x3d   :  { %1110 = vst [vmem:[#allocation0 + $0x13] sm:$0x1] %v1108_v15   ;;  %1112 = vst [vmem:[#allocation0 + $0x52] sm:$0x2] %v1108_v15   ;;  %v1078_v22 = vld [vmem:[#allocation1 + $0x48] sm:$0x3]  }
  0x3e   :  { %1116 = vst [vmem:[#allocation0 + $0x1b] sm:$0x1] %v1114_v16   ;;  %1118 = vst [vmem:[#allocation0 + $0x5a] sm:$0x2] %v1114_v16   ;;  %v1048_v23 = vld [vmem:[#allocation1 + $0x20] sm:$0x3]  }
  0x3f   :  { %1086 = vst [vmem:[#allocation0 + $0x12] sm:$0x1] %v1084_v17   ;;  %1088 = vst [vmem:[#allocation0 + $0x51] sm:$0x2] %v1084_v17   ;;  %v1054_v24 = vld [vmem:[#allocation1 + $0x28] sm:$0x3]  }
  0x40   :  { %1092 = vst [vmem:[#allocation0 + $0x1a] sm:$0x1] %v1090_v18   ;;  %1094 = vst [vmem:[#allocation0 + $0x59] sm:$0x2] %v1090_v18   ;;  %v1060_v25 = vld [vmem:[#allocation1 + $0x30] sm:$0x3]  }
  0x41   :  { %1098 = vst [vmem:[#allocation0 + $0x3] sm:$0x1] %v1096_v19   ;;  %1100 = vst [vmem:[#allocation0 + $0x42] sm:$0x2] %v1096_v19   ;;  %v1030_v26 = vld [vmem:[#allocation1 + $0x8] sm:$0x3]  }
  0x42   :  { %1068 = vst [vmem:[#allocation0 + $0x19] sm:$0x1] %v1066_v20   ;;  %1070 = vst [vmem:[#allocation0 + $0x58] sm:$0x2] %v1066_v20   ;;  %v1036_v27 = vld [vmem:[#allocation1 + $0x10] sm:$0x3]  }
  0x43   :  { %1074 = vst [vmem:[#allocation0 + $0x2] sm:$0x1] %v1072_v21   ;;  %1076 = vst [vmem:[#allocation0 + $0x41] sm:$0x2] %v1072_v21   ;;  %v1042_v28 = vld [vmem:[#allocation1 + $0x18] sm:$0x3]  }
  0x44   :  { %1080 = vst [vmem:[#allocation0 + $0xa] sm:$0x1] %v1078_v22   ;;  %1082 = vst [vmem:[#allocation0 + $0x49] sm:$0x2] %v1078_v22   ;;  %v1025_v29 = vld [vmem:[#allocation1] sm:$0x3]  }
  0x45   :  { %1050 = vst [vmem:[#allocation0 + $0x1] sm:$0x1] %v1048_v23   ;;  %1052 = vst [vmem:[#allocation0 + $0x40] sm:$0x2] %v1048_v23   ;;  %v1204_v30 = vld [vmem:[#allocation1 + $0xf0] sm:$0x3]  }
  0x46   :  { %1056 = vst [vmem:[#allocation0 + $0x9] sm:$0x1] %v1054_v24   ;;  %1058 = vst [vmem:[#allocation0 + $0x48] sm:$0x2] %v1054_v24   ;;  %v1210_v31 = vld [vmem:[#allocation1 + $0xf8] sm:$0x3]  }
  0x47   :  { %1062 = vst [vmem:[#allocation0 + $0x11] sm:$0x1] %v1060_v25   ;;  %1064 = vst [vmem:[#allocation0 + $0x50] sm:$0x2] %v1060_v25   ;;  %v1216_v32 = vld [vmem:[#allocation1 + $0x100] sm:$0x3]  }
  0x48   :  { %1032 = vst [vmem:[#allocation0 + $0x8] sm:$0x1] %v1030_v26   ;;  %1034 = vst [vmem:[#allocation0 + $0x47] sm:$0x2] %v1030_v26   ;;  %v1222_v33 = vld [vmem:[#allocation1 + $0x108] sm:$0x3]  }
  0x49   :  { %1038 = vst [vmem:[#allocation0 + $0x10] sm:$0x1] %v1036_v27   ;;  %1040 = vst [vmem:[#allocation0 + $0x4f] sm:$0x2] %v1036_v27   ;;  %v1228_v34 = vld [vmem:[#allocation1 + $0x110] sm:$0x3]  }
  0x4a   :  { %1044 = vst [vmem:[#allocation0 + $0x18] sm:$0x1] %v1042_v28   ;;  %1046 = vst [vmem:[#allocation0 + $0x57] sm:$0x2] %v1042_v28   ;;  %v1234_v35 = vld [vmem:[#allocation1 + $0x118] sm:$0x3]  }
  0x4b   :  { %1026 = vst [vmem:[#allocation0] sm:$0x1] %v1025_v29   ;;  %1028 = vst [vmem:[#allocation0 + $0x3f] sm:$0x2] %v1025_v29   ;;  %v1240_v36 = vld [vmem:[#allocation1 + $0x120] sm:$0x3]  }
  0x4c   :  { %1206 = vst [vmem:[#allocation0 + $0x17] sm:$0x1] %v1204_v30   ;;  %1208 = vst [vmem:[#allocation0 + $0x56] sm:$0x2] %v1204_v30   ;;  %v1246_v37 = vld [vmem:[#allocation1 + $0x128] sm:$0x3]  }
  0x4d   :  { %1212 = vst [vmem:[#allocation0 + $0x1f] sm:$0x1] %v1210_v31   ;;  %1214 = vst [vmem:[#allocation0 + $0x5e] sm:$0x2] %v1210_v31   ;;  %v1252_v38 = vld [vmem:[#allocation1 + $0x130] sm:$0x3]  }
  0x4e   :  { %1218 = vst [vmem:[#allocation0 + $0x20] sm:$0x1] %v1216_v32   ;;  %1220 = vst [vmem:[#allocation0 + $0x5f] sm:$0x2] %v1216_v32   ;;  %v1258_v39 = vld [vmem:[#allocation1 + $0x138] sm:$0x3]  }
  0x4f   :  { %1224 = vst [vmem:[#allocation0 + $0x28] sm:$0x1] %v1222_v33   ;;  %1226 = vst [vmem:[#allocation0 + $0x67] sm:$0x2] %v1222_v33   ;;  %v1264_v40 = vld [vmem:[#allocation1 + $0x140] sm:$0x3]  }
  0x50   :  { %1230 = vst [vmem:[#allocation0 + $0x30] sm:$0x1] %v1228_v34   ;;  %1232 = vst [vmem:[#allocation0 + $0x6f] sm:$0x2] %v1228_v34   ;;  %v1270_v41 = vld [vmem:[#allocation1 + $0x148] sm:$0x3]  }
  0x51   :  { %1236 = vst [vmem:[#allocation0 + $0x38] sm:$0x1] %v1234_v35   ;;  %1238 = vst [vmem:[#allocation0 + $0x77] sm:$0x2] %v1234_v35   ;;  %v1276_v42 = vld [vmem:[#allocation1 + $0x150] sm:$0x3]  }
  0x52   :  { %1242 = vst [vmem:[#allocation0 + $0x21] sm:$0x1] %v1240_v36   ;;  %1244 = vst [vmem:[#allocation0 + $0x60] sm:$0x2] %v1240_v36   ;;  %v1282_v43 = vld [vmem:[#allocation1 + $0x158] sm:$0x3]  }
  0x53   :  { %1248 = vst [vmem:[#allocation0 + $0x29] sm:$0x1] %v1246_v37   ;;  %1250 = vst [vmem:[#allocation0 + $0x68] sm:$0x2] %v1246_v37   ;;  %v1288_v44 = vld [vmem:[#allocation1 + $0x160] sm:$0x3]  }
  0x54   :  { %1254 = vst [vmem:[#allocation0 + $0x31] sm:$0x1] %v1252_v38   ;;  %1256 = vst [vmem:[#allocation0 + $0x70] sm:$0x2] %v1252_v38   ;;  %v1294_v45 = vld [vmem:[#allocation1 + $0x168] sm:$0x3]  }
  0x55   :  { %1260 = vst [vmem:[#allocation0 + $0x39] sm:$0x1] %v1258_v39   ;;  %1262 = vst [vmem:[#allocation0 + $0x78] sm:$0x2] %v1258_v39   ;;  %v1300_v46 = vld [vmem:[#allocation1 + $0x170] sm:$0x3]  }
  0x56   :  { %1266 = vst [vmem:[#allocation0 + $0x22] sm:$0x1] %v1264_v40   ;;  %1268 = vst [vmem:[#allocation0 + $0x61] sm:$0x2] %v1264_v40   ;;  %v1306_v47 = vld [vmem:[#allocation1 + $0x178] sm:$0x3]  }
  0x57   :  { %1272 = vst [vmem:[#allocation0 + $0x2a] sm:$0x1] %v1270_v41   ;;  %1274 = vst [vmem:[#allocation0 + $0x69] sm:$0x2] %v1270_v41   ;;  %v1312_v48 = vld [vmem:[#allocation1 + $0x180] sm:$0x3]  }
  0x58   :  { %1278 = vst [vmem:[#allocation0 + $0x32] sm:$0x1] %v1276_v42   ;;  %1280 = vst [vmem:[#allocation0 + $0x71] sm:$0x2] %v1276_v42   ;;  %v1318_v49 = vld [vmem:[#allocation1 + $0x188] sm:$0x3]  }
  0x59   :  { %1284 = vst [vmem:[#allocation0 + $0x3a] sm:$0x1] %v1282_v43   ;;  %1286 = vst [vmem:[#allocation0 + $0x79] sm:$0x2] %v1282_v43   ;;  %v1324_v50 = vld [vmem:[#allocation1 + $0x190] sm:$0x3]  }
  0x5a   :  { %1290 = vst [vmem:[#allocation0 + $0x23] sm:$0x1] %v1288_v44   ;;  %1292 = vst [vmem:[#allocation0 + $0x62] sm:$0x2] %v1288_v44   ;;  %v1330_v51 = vld [vmem:[#allocation1 + $0x198] sm:$0x3]  }
  0x5b   :  { %1296 = vst [vmem:[#allocation0 + $0x2b] sm:$0x1] %v1294_v45   ;;  %1298 = vst [vmem:[#allocation0 + $0x6a] sm:$0x2] %v1294_v45   ;;  %v1336_v52 = vld [vmem:[#allocation1 + $0x1a0] sm:$0x3]  }
  0x5c   :  { %1302 = vst [vmem:[#allocation0 + $0x33] sm:$0x1] %v1300_v46   ;;  %1304 = vst [vmem:[#allocation0 + $0x72] sm:$0x2] %v1300_v46   ;;  %v1342_v53 = vld [vmem:[#allocation1 + $0x1a8] sm:$0x3]  }
  0x5d   :  { %1308 = vst [vmem:[#allocation0 + $0x3b] sm:$0x1] %v1306_v47   ;;  %1310 = vst [vmem:[#allocation0 + $0x7a] sm:$0x2] %v1306_v47   ;;  %v1348_v54 = vld [vmem:[#allocation1 + $0x1b0] sm:$0x3]  }
  0x5e   :  { %1314 = vst [vmem:[#allocation0 + $0x24] sm:$0x1] %v1312_v48   ;;  %1316 = vst [vmem:[#allocation0 + $0x63] sm:$0x2] %v1312_v48   ;;  %v1354_v55 = vld [vmem:[#allocation1 + $0x1b8] sm:$0x3]  }
  0x5f   :  { %1320 = vst [vmem:[#allocation0 + $0x2c] sm:$0x1] %v1318_v49   ;;  %1322 = vst [vmem:[#allocation0 + $0x6b] sm:$0x2] %v1318_v49   ;;  %v1360_v56 = vld [vmem:[#allocation1 + $0x1c0] sm:$0x3]  }
  0x60   :  { %1326 = vst [vmem:[#allocation0 + $0x34] sm:$0x1] %v1324_v50   ;;  %1328 = vst [vmem:[#allocation0 + $0x73] sm:$0x2] %v1324_v50   ;;  %v1366_v57 = vld [vmem:[#allocation1 + $0x1c8] sm:$0x3]  }
  0x61   :  { %1332 = vst [vmem:[#allocation0 + $0x3c] sm:$0x1] %v1330_v51   ;;  %1334 = vst [vmem:[#allocation0 + $0x7b] sm:$0x2] %v1330_v51   ;;  %v1372_v58 = vld [vmem:[#allocation1 + $0x1d0] sm:$0x3]  }
  0x62   :  { %1338 = vst [vmem:[#allocation0 + $0x25] sm:$0x1] %v1336_v52   ;;  %1340 = vst [vmem:[#allocation0 + $0x64] sm:$0x2] %v1336_v52   ;;  %v1378_v59 = vld [vmem:[#allocation1 + $0x1d8] sm:$0x3]  }
  0x63   :  { %1344 = vst [vmem:[#allocation0 + $0x2d] sm:$0x1] %v1342_v53   ;;  %1346 = vst [vmem:[#allocation0 + $0x6c] sm:$0x2] %v1342_v53   ;;  %v1384_v60 = vld [vmem:[#allocation1 + $0x1e0] sm:$0x3]  }
  0x64   :  { %1350 = vst [vmem:[#allocation0 + $0x35] sm:$0x1] %v1348_v54   ;;  %1352 = vst [vmem:[#allocation0 + $0x74] sm:$0x2] %v1348_v54   ;;  %v1390_v61 = vld [vmem:[#allocation1 + $0x1e8] sm:$0x3]  }
  0x65   :  { %1356 = vst [vmem:[#allocation0 + $0x3d] sm:$0x1] %v1354_v55   ;;  %1358 = vst [vmem:[#allocation0 + $0x7c] sm:$0x2] %v1354_v55   ;;  %v1396_v62 = vld [vmem:[#allocation1 + $0x1f0] sm:$0x3]  }
  0x66   :  { %1362 = vst [vmem:[#allocation0 + $0x26] sm:$0x1] %v1360_v56   ;;  %1364 = vst [vmem:[#allocation0 + $0x65] sm:$0x2] %v1360_v56   ;;  %v1402_v63 = vld [vmem:[#allocation1 + $0x1f8] sm:$0x3]  }
  0x67   :  { %1368 = vst [vmem:[#allocation0 + $0x2e] sm:$0x1] %v1366_v57   ;;  %1370 = vst [vmem:[#allocation0 + $0x6d] sm:$0x2] %v1366_v57   ;;  %v1411_v0 = vld [vmem:[#allocation0] sm:$0xff]  ;;  %v1416_v1 = vld [vmem:[#allocation0 + $0x8] sm:$0xff] }
  0x68   :  { %1374 = vst [vmem:[#allocation0 + $0x36] sm:$0x1] %v1372_v58   ;;  %1376 = vst [vmem:[#allocation0 + $0x75] sm:$0x2] %v1372_v58   ;;  %v1422_v2 = vld [vmem:[#allocation0 + $0x10] sm:$0xff]  ;;  %v1429_v3 = vld [vmem:[#allocation0 + $0x18] sm:$0xff]  ;;  %v1676_v4 = vpack.c.bf16 %v1416_v1, %v1411_v0 }
  0x69   :  { %1380 = vst [vmem:[#allocation0 + $0x3e] sm:$0x1] %v1378_v59   ;;  %1382 = vst [vmem:[#allocation0 + $0x7d] sm:$0x2] %v1378_v59   ;;  %v1681_v5 = vpack.c.bf16 %v1429_v3, %v1422_v2  ;;  %v1464_v6 = vld [vmem:[#allocation0 + $0x40] sm:$0xff]  ;;  %v1471_v7 = vld [vmem:[#allocation0 + $0x48] sm:$0xff] }
  0x6a   :  { %1386 = vst [vmem:[#allocation0 + $0x27] sm:$0x1] %v1384_v60   ;;  %1388 = vst [vmem:[#allocation0 + $0x66] sm:$0x2] %v1384_v60   ;;  %v1478_v8 = vld [vmem:[#allocation0 + $0x50] sm:$0xff]  ;;  %v1696_v9 = vpack.c.bf16 %v1471_v7, %v1464_v6  ;;  %v1485_v10 = vld [vmem:[#allocation0 + $0x58] sm:$0xff] }
  0x6b   :  { %1392 = vst [vmem:[#allocation0 + $0x2f] sm:$0x1] %v1390_v61   ;;  %1394 = vst [vmem:[#allocation0 + $0x6e] sm:$0x2] %v1390_v61   ;;  %v1701_v11 = vpack.c.bf16 %v1485_v10, %v1478_v8 }
  0x6c   :  { %1398 = vst [vmem:[#allocation0 + $0x37] sm:$0x1] %v1396_v62   ;;  %1400 = vst [vmem:[#allocation0 + $0x76] sm:$0x2] %v1396_v62  }
  0x6d   :  { %1404 = vst [vmem:[#allocation0 + $0x3f] sm:$0x1] %v1402_v63   ;;  %1406 = vst [vmem:[#allocation0 + $0x7e] sm:$0x2] %v1402_v63  }
  0x6e   :  { %1677 = vst [vmem:[%s1947_s1] sm:$0xff] %v1676_v4   ;;  %1713 = vst [vmem:[%s1947_s1 + $0x8] sm:$0xff] %v1681_v5  }
  0x6f   :  { %1716 = vst [vmem:[%s1947_s1 + $0x20] sm:$0xff] %v1696_v9   ;;  %1717 = vst [vmem:[%s1947_s1 + $0x28] sm:$0xff] %v1701_v11  }
  0x71   :  { %v1436_v12 = vld [vmem:[#allocation0 + $0x20] sm:$0xff] }
  0x72   :  { %v1443_v13 = vld [vmem:[#allocation0 + $0x28] sm:$0xff]  ;;  %v1492_v14 = vld [vmem:[#allocation0 + $0x60] sm:$0xff] }
  0x73   :  { %v1686_v15 = vpack.c.bf16 %v1443_v13, %v1436_v12  ;;  %v1450_v16 = vld [vmem:[#allocation0 + $0x30] sm:$0xff]  ;;  %v1499_v18 = vld [vmem:[#allocation0 + $0x68] sm:$0xff] }
  0x74   :  { %v1457_v17 = vld [vmem:[#allocation0 + $0x38] sm:$0xff]  ;;  %v1706_v20 = vpack.c.bf16 %v1499_v18, %v1492_v14  ;;  %v1506_v21 = vld [vmem:[#allocation0 + $0x70] sm:$0xff] }
  0x75   :  { %v1691_v19 = vpack.c.bf16 %v1457_v17, %v1450_v16  ;;  %v1513_v22 = vld [vmem:[#allocation0 + $0x78] sm:$0xff]  ;;  %1714 = vst [vmem:[%s1947_s1 + $0x10] sm:$0xff] %v1686_v15  }
  0x76   :  { %v1711_v23 = vpack.c.bf16 %v1513_v22, %v1506_v21  ;;  %1718 = vst [vmem:[%s1947_s1 + $0x30] sm:$0xff] %v1706_v20  }
  0x77   :  { %1715 = vst [vmem:[%s1947_s1 + $0x18] sm:$0xff] %v1691_v19  }
  0x78   :  { %1719 = vst [vmem:[%s1947_s1 + $0x38] sm:$0xff] %v1711_v23  }

// kernel: generator_forward.10
= control target key start
LH: loop header
LB: loop body
LE: loop exit
PB: predicated region body
PF: predicated region fallthrough
CT: control target
= control target key end

     0   :  { %v40_v0 = vlaneseq  ;;  %s304_s0 = inlined_call_operand.vmem [shape: bf16[1,32,512], index: 0, kind: input, shape index: {}]   ;;  %s305_s1 = inlined_call_operand.vmem [shape: f32[1,512], index: 1, kind: input, shape index: {}]   ;;  %s306_s2 = inlined_call_operand.vmem [shape: f32[1,512], index: 2, kind: input, shape index: {}]   ;;  %s307_s3 = inlined_call_operand.vmem [shape: bf16[1,32,512], index: 3, kind: output, shape index: {}]  }
   0x1   :  { %v14_v1 = vld [vmem:[%s304_s0] sm:$0xff]  ;;  %v15_v5 = vld [vmem:[%s304_s0 + $0x8] sm:$0xff]  ;;  %v16_v6 = vld [vmem:[%s304_s0 + $0x10] sm:$0xff] }
   0x2   :  { %v22_v2 = vunpack.c.l.bf16 %v14_v1  ;;  %v23_v3 = vunpack.c.h.bf16 %v14_v1  ;;  %v41_v4 = vshrl.u32 %v40_v0, 7  ;;  %v17_v7 = vld [vmem:[%s304_s0 + $0x18] sm:$0xff]  ;;  %v38_v8 = vld [vmem:[%s305_s1] sm:$0xf]  ;;  %v24_v10 = vunpack.c.l.bf16 %v15_v5  ;;  %v19_v51 = vld [vmem:[%s304_s0 + $0x28] sm:$0xff] }
   0x3   :  { %v76_v9 = vld [vmem:[%s306_s2] sm:$0xf]  ;;  %v25_v11 = vunpack.c.h.bf16 %v15_v5  ;;  %v26_v12 = vunpack.c.l.bf16 %v16_v6  ;;  %v27_v13 = vunpack.c.h.bf16 %v16_v6  ;;  %v28_v19 = vunpack.c.l.bf16 %v17_v7  ;;  %v20_v56 = vld [vmem:[%s304_s0 + $0x30] sm:$0xff]  ;;  %v21_v61 = vld [vmem:[%s304_s0 + $0x38] sm:$0xff] }
   0x4   :  { %v18_v14 = vld [vmem:[%s304_s0 + $0x20] sm:$0xff]  ;;  %v42_v15 = vsub.s32 0, %v41_v4  ;;  %v46_v16 = vsub.s32 1, %v41_v4  ;;  %v50_v17 = vsub.s32 2, %v41_v4  ;;  %v54_v18 = vsub.s32 3, %v41_v4 }
   0x5   :  { %v29_v20 = vunpack.c.h.bf16 %v17_v7  ;;  %v30_v21 = vunpack.c.l.bf16 %v18_v14  ;;  %v31_v22 = vunpack.c.h.bf16 %v18_v14  ;;  %v32_v0 = vunpack.c.l.bf16 %v19_v51 }
   0x6   :  { %v43_v23 = vrot.slane %v38_v8, %v42_v15  ;;  %v47_v24 = vrot.slane %v38_v8, %v46_v16  ;;  %v247_v25 = vrot.slane %v76_v9, %v42_v15  ;;  %v249_v26 = vrot.slane %v76_v9, %v46_v16 }
   0x7   :  { %v51_v27 = vrot.slane %v38_v8, %v50_v17  ;;  %v55_v28 = vrot.slane %v38_v8, %v54_v18  ;;  %v251_v29 = vrot.slane %v76_v9, %v50_v17  ;;  %v253_v30 = vrot.slane %v76_v9, %v54_v18 }
   0x8   :  { %v60_v31 = vmul.f32 %v43_v23, %v22_v2  ;;  %v61_v32 = vmul.f32 %v47_v24, %v23_v3  ;;  %v64_v33 = vmul.f32 %v43_v23, %v26_v12  ;;  %v65_v34 = vmul.f32 %v47_v24, %v27_v13 }
   0x9   :  { %v62_v35 = vmul.f32 %v51_v27, %v24_v10  ;;  %v63_v36 = vmul.f32 %v55_v28, %v25_v11  ;;  %v66_v37 = vmul.f32 %v51_v27, %v28_v19  ;;  %v67_v38 = vmul.f32 %v55_v28, %v29_v20 }
   0xa   :  { %v98_v39 = vadd.f32 %v247_v25, %v60_v31  ;;  %v99_v40 = vadd.f32 %v249_v26, %v61_v32  ;;  %v102_v41 = vadd.f32 %v247_v25, %v64_v33  ;;  %v103_v42 = vadd.f32 %v249_v26, %v65_v34 }
   0xb   :  { %v100_v43 = vadd.f32 %v251_v29, %v62_v35  ;;  %v101_v44 = vadd.f32 %v253_v30, %v63_v36  ;;  %v104_v45 = vadd.f32 %v251_v29, %v66_v37  ;;  %v105_v46 = vadd.f32 %v253_v30, %v67_v38 }
   0xc   :  { %v114_v47 = vmax.f32 %v98_v39, 0.0  ;;  %v115_v48 = vmax.f32 %v99_v40, 0.0  ;;  %v118_v49 = vmax.f32 %v102_v41, 0.0  ;;  %v119_v50 = vmax.f32 %v103_v42, 0.0 }
   0xd   :  { %v116_v52 = vmax.f32 %v100_v43, 0.0  ;;  %v117_v53 = vmax.f32 %v101_v44, 0.0  ;;  %v120_v54 = vmax.f32 %v104_v45, 0.0  ;;  %v121_v55 = vmax.f32 %v105_v46, 0.0 }
   0xe   :  { %v198_v57 = vpack.c.bf16 %v115_v48, %v114_v47  ;;  %v200_v58 = vpack.c.bf16 %v119_v50, %v118_v49  ;;  %v68_v59 = vmul.f32 %v43_v23, %v30_v21  ;;  %v69_v60 = vmul.f32 %v47_v24, %v31_v22 }
   0xf   :  { %v199_v62 = vpack.c.bf16 %v117_v53, %v116_v52  ;;  %v201_v63 = vpack.c.bf16 %v121_v55, %v120_v54  ;;  %v33_v1 = vunpack.c.h.bf16 %v19_v51  ;;  %v34_v4 = vunpack.c.l.bf16 %v20_v56 }
  0x10   :  { %178 = vst [vmem:[%s307_s3] sm:$0xff] %v198_v57  ;;  %180 = vst [vmem:[%s307_s3 + $0x10] sm:$0xff] %v200_v58  ;;  %v106_v2 = vadd.f32 %v247_v25, %v68_v59  ;;  %v107_v3 = vadd.f32 %v249_v26, %v69_v60  ;;  %v35_v5 = vunpack.c.h.bf16 %v20_v56  ;;  %v70_v6 = vmul.f32 %v51_v27, %v32_v0 }
  0x11   :  { %179 = vst [vmem:[%s307_s3 + $0x8] sm:$0xff] %v199_v62  ;;  %181 = vst [vmem:[%s307_s3 + $0x18] sm:$0xff] %v201_v63  ;;  %v71_v7 = vmul.f32 %v55_v28, %v33_v1  ;;  %v36_v8 = vunpack.c.l.bf16 %v21_v61  ;;  %v37_v9 = vunpack.c.h.bf16 %v21_v61  ;;  %v72_v12 = vmul.f32 %v43_v23, %v34_v4 }
  0x12   :  { %v122_v10 = vmax.f32 %v106_v2, 0.0  ;;  %v123_v11 = vmax.f32 %v107_v3, 0.0  ;;  %v73_v13 = vmul.f32 %v47_v24, %v35_v5  ;;  %v108_v14 = vadd.f32 %v251_v29, %v70_v6 }
  0x13   :  { %v109_v15 = vadd.f32 %v253_v30, %v71_v7  ;;  %v74_v16 = vmul.f32 %v51_v27, %v36_v8  ;;  %v75_v17 = vmul.f32 %v55_v28, %v37_v9  ;;  %v110_v19 = vadd.f32 %v247_v25, %v72_v12 }
  0x14   :  { %v202_v18 = vpack.c.bf16 %v123_v11, %v122_v10  ;;  %v111_v20 = vadd.f32 %v249_v26, %v73_v13  ;;  %v124_v21 = vmax.f32 %v108_v14, 0.0 }
  0x15   :  { %v125_v22 = vmax.f32 %v109_v15, 0.0  ;;  %v112_v31 = vadd.f32 %v251_v29, %v74_v16  ;;  %v113_v32 = vadd.f32 %v253_v30, %v75_v17  ;;  %v126_v23 = vmax.f32 %v110_v19, 0.0 }
  0x16   :  { %182 = vst [vmem:[%s307_s3 + $0x20] sm:$0xff] %v202_v18  ;;  %v127_v24 = vmax.f32 %v111_v20, 0.0 }
  0x17   :  { %v203_v33 = vpack.c.bf16 %v125_v22, %v124_v21  ;;  %v128_v27 = vmax.f32 %v112_v31, 0.0  ;;  %v129_v28 = vmax.f32 %v113_v32, 0.0 }
  0x18   :  { %v204_v34 = vpack.c.bf16 %v127_v24, %v126_v23 }
  0x19   :  { %183 = vst [vmem:[%s307_s3 + $0x28] sm:$0xff] %v203_v33  ;;  %v205_v25 = vpack.c.bf16 %v129_v28, %v128_v27 }
  0x1a   :  { %184 = vst [vmem:[%s307_s3 + $0x30] sm:$0xff] %v204_v34 }
  0x1b   :  { %185 = vst [vmem:[%s307_s3 + $0x38] sm:$0xff] %v205_v25 }

// kernel: generator_forward.11
= control target key start
LH: loop header
LB: loop body
LE: loop exit
PB: predicated region body
PF: predicated region fallthrough
CT: control target
= control target key end

     0   :  { %s3594_s15 = smov 0   ;;  %s3596_s16 = smov 0   ;;  %s4018_s0 = inlined_call_operand.vmem [shape: bf16[4,32,2048], index: 0, kind: input, shape index: {}]   ;;  %s4019_s1 = inlined_call_operand.vmem [shape: bf16[4,2048,256], index: 1, kind: input, shape index: {}]   ;;  %s4020_s2 = inlined_call_operand.vmem [shape: bf16[4,32,256], index: 2, kind: output, shape index: {0}]   ;;  %s4021_s3 = inlined_call_operand.vmem [shape: f32[8,256], index: 3, kind: output, shape index: {1}]   ;;  %s4022_s4 = inlined_call_operand.vmem [shape: f32[8,256], index: 4, kind: output, shape index: {2}]  }
   0x1   :  { %s3598_s17 = smov 0  }
   0x2 LB: > { %s30_s18 = sadd.s32 1, %s3562_s16  ;;  %p2765_p0 = scmp.ge.s32.totalorder %s3566_s17, 1  ;;  %s3566_s17 = sphi %s3598_s17, %s15_s17   ;;  %s3562_s16 = sphi %s3596_s16, %s4024_s16   ;;  %s3558_s15 = sphi %s3594_s15, %s4023_s15  }
   0x3   : > { %p32_p1 = scmp.ge.s32.totalorder %s30_s18, 4  ;;  %p215_p2 = scmp.lt.s32.totalorder %s3566_s17, 5 }
   0x5   : > { %s4026_s18 = smov (%p32_p1, %s30_s18), 0  ;;  %p216_p3 = pnand %p2765_p0, %p215_p2 }
   0x6   : > { %p275_p4 = scmp.lt.s32.totalorder (!%p216_p3), %s3558_s15, 3  ;;  %p2503_p5 = scmp.eq.s32.totalorder (!%p216_p3), %s3558_s15, 0 }
   0x7   : > { %219 = sbr.rel (%p216_p3) target bundleno = 528 (0x210), region = 28 }
   0xe   : > { %s3616_s19 = scalar_select %p275_p4, %s3558_s15, 3 }
  0x10   : > { %s3072_s20 = sshll.u32 %s3616_s19, 11  ;;  %s3071_s24 = sshll.u32 %s3616_s19, 8 }
  0x11   : > { %s3622_s23 = scalar_lea.vmem %s4019_s1, %s3072_s20  ;;  %s3672_s27 = scalar_lea.vmem %s4018_s0, %s3071_s24 }
  0x12   : > { %v3160_v0 = vld [vmem:[%s3622_s23 + $0x4] ss:$8 sps:$4 sm:$0xff]   ;;  %v3164_v2 = vld [vmem:[%s3622_s23] ss:$8 sps:$4 sm:$0xff]   ;;  %v3166_v4 = vld [vmem:[%s3622_s23 + $0x14] ss:$8 sps:$4 sm:$0xff]  }
  0x13   : > { %v3162_v1 = vld [vmem:[%s3622_s23 + $0x404] ss:$8 sps:$4 sm:$0xff]   ;;  %2051 = vmatprep.subr.bf16.mxu1 %v3160_v0  ;;  %v3165_v3 = vld [vmem:[%s3622_s23 + $0x400] ss:$8 sps:$4 sm:$0xff]   ;;  %v3168_v5 = vld [vmem:[%s3622_s23 + $0x414] ss:$8 sps:$4 sm:$0xff]  }
  0x14   : > { %2263 = vmatprep.subr.bf16.mxu0 %v3162_v1  ;;  %2052 = vmatpush1.bf16.msra.mxu1 %v3164_v2  ;;  %v3170_v6 = vld [vmem:[%s3622_s23 + $0x10] ss:$8 sps:$4 sm:$0xff]   ;;  %v3172_v8 = vld [vmem:[%s3622_s23 + $0x24] ss:$8 sps:$4 sm:$0xff]   ;;  %v3176_v10 = vld [vmem:[%s3622_s23 + $0x20] ss:$8 sps:$4 sm:$0xff]  }
  0x15   : > { %2264 = vmatpush1.bf16.msra.mxu0 %v3165_v3  ;;  %2053 = vmatprep.subr.bf16.mxu1 %v3166_v4  ;;  %v3171_v7 = vld [vmem:[%s3622_s23 + $0x410] ss:$8 sps:$4 sm:$0xff]   ;;  %v3174_v9 = vld [vmem:[%s3622_s23 + $0x424] ss:$8 sps:$4 sm:$0xff]   ;;  %v3177_v11 = vld [vmem:[%s3622_s23 + $0x420] ss:$8 sps:$4 sm:$0xff]  }
  0x16   : > { %2265 = vmatprep.subr.bf16.mxu0 %v3168_v5  ;;  %v3178_v12 = vld [vmem:[%s3622_s23 + $0x34] ss:$8 sps:$4 sm:$0xff]   ;;  %v3182_v14 = vld [vmem:[%s3622_s23 + $0x30] ss:$8 sps:$4 sm:$0xff]   ;;  %v3184_v16 = vld [vmem:[%s3622_s23 + $0x44] ss:$8 sps:$4 sm:$0xff]  }
  0x17   : > { %v3180_v13 = vld [vmem:[%s3622_s23 + $0x434] ss:$8 sps:$4 sm:$0xff]   ;;  %v3183_v15 = vld [vmem:[%s3622_s23 + $0x430] ss:$8 sps:$4 sm:$0xff]   ;;  %v3186_v17 = vld [vmem:[%s3622_s23 + $0x444] ss:$8 sps:$4 sm:$0xff]  }
  0x18   : > { %2054 = vmatpush1.bf16.msra.mxu1 %v3170_v6  ;;  %v3188_v18 = vld [vmem:[%s3622_s23 + $0x40] ss:$8 sps:$4 sm:$0xff]   ;;  %v3190_v20 = vld [vmem:[%s3622_s23 + $0x54] ss:$8 sps:$4 sm:$0xff]   ;;  %v3194_v22 = vld [vmem:[%s3622_s23 + $0x50] ss:$8 sps:$4 sm:$0xff]  }
  0x19   : > { %2266 = vmatpush1.bf16.msra.mxu0 %v3171_v7  ;;  %2055 = vmatprep.subr.bf16.mxu1 %v3172_v8  ;;  %v3189_v19 = vld [vmem:[%s3622_s23 + $0x440] ss:$8 sps:$4 sm:$0xff]   ;;  %v3192_v21 = vld [vmem:[%s3622_s23 + $0x454] ss:$8 sps:$4 sm:$0xff]   ;;  %v3195_v23 = vld [vmem:[%s3622_s23 + $0x450] ss:$8 sps:$4 sm:$0xff]  }
  0x1a   : > { %2267 = vmatprep.subr.bf16.mxu0 %v3174_v9  ;;  %v3196_v24 = vld [vmem:[%s3622_s23 + $0x64] ss:$8 sps:$4 sm:$0xff]   ;;  %v3200_v26 = vld [vmem:[%s3622_s23 + $0x60] ss:$8 sps:$4 sm:$0xff]   ;;  %v3202_v28 = vld [vmem:[%s3622_s23 + $0x74] ss:$8 sps:$4 sm:$0xff]  }
  0x1b   : > { %v3198_v25 = vld [vmem:[%s3622_s23 + $0x464] ss:$8 sps:$4 sm:$0xff]   ;;  %v3201_v27 = vld [vmem:[%s3622_s23 + $0x460] ss:$8 sps:$4 sm:$0xff]   ;;  %v3204_v29 = vld [vmem:[%s3622_s23 + $0x474] ss:$8 sps:$4 sm:$0xff]  }
  0x1c   : > { %2056 = vmatpush1.bf16.msra.mxu1 %v3176_v10  ;;  %v3206_v30 = vld [vmem:[%s3622_s23 + $0x70] ss:$8 sps:$4 sm:$0xff]   ;;  %v3208_v32 = vld [vmem:[%s3622_s23 + $0x84] ss:$8 sps:$4 sm:$0xff]   ;;  %v3212_v34 = vld [vmem:[%s3622_s23 + $0x80] ss:$8 sps:$4 sm:$0xff]  }
  0x1d   : > { %2268 = vmatpush1.bf16.msra.mxu0 %v3177_v11  ;;  %2057 = vmatprep.subr.bf16.mxu1 %v3178_v12  ;;  %v3207_v31 = vld [vmem:[%s3622_s23 + $0x470] ss:$8 sps:$4 sm:$0xff]   ;;  %v3210_v33 = vld [vmem:[%s3622_s23 + $0x484] ss:$8 sps:$4 sm:$0xff]   ;;  %v3213_v35 = vld [vmem:[%s3622_s23 + $0x480] ss:$8 sps:$4 sm:$0xff]  }
  0x1e   : > { %2269 = vmatprep.subr.bf16.mxu0 %v3180_v13  ;;  %v3214_v36 = vld [vmem:[%s3622_s23 + $0x94] ss:$8 sps:$4 sm:$0xff]   ;;  %v3218_v38 = vld [vmem:[%s3622_s23 + $0x90] ss:$8 sps:$4 sm:$0xff]   ;;  %v3220_v40 = vld [vmem:[%s3622_s23 + $0xa4] ss:$8 sps:$4 sm:$0xff]  }
  0x1f   : > { %v3216_v37 = vld [vmem:[%s3622_s23 + $0x494] ss:$8 sps:$4 sm:$0xff]   ;;  %v3219_v39 = vld [vmem:[%s3622_s23 + $0x490] ss:$8 sps:$4 sm:$0xff]   ;;  %v3222_v41 = vld [vmem:[%s3622_s23 + $0x4a4] ss:$8 sps:$4 sm:$0xff]  }
  0x20   : > { %2058 = vmatpush1.bf16.msra.mxu1 %v3182_v14  ;;  %v3224_v42 = vld [vmem:[%s3622_s23 + $0xa0] ss:$8 sps:$4 sm:$0xff]   ;;  %v3226_v44 = vld [vmem:[%s3622_s23 + $0xb4] ss:$8 sps:$4 sm:$0xff]   ;;  %v3230_v46 = vld [vmem:[%s3622_s23 + $0xb0] ss:$8 sps:$4 sm:$0xff]  }
  0x21   : > { %2270 = vmatpush1.bf16.msra.mxu0 %v3183_v15  ;;  %2059 = vmatprep.subr.bf16.mxu1 %v3184_v16  ;;  %v3225_v43 = vld [vmem:[%s3622_s23 + $0x4a0] ss:$8 sps:$4 sm:$0xff]   ;;  %v3228_v45 = vld [vmem:[%s3622_s23 + $0x4b4] ss:$8 sps:$4 sm:$0xff]   ;;  %v3231_v47 = vld [vmem:[%s3622_s23 + $0x4b0] ss:$8 sps:$4 sm:$0xff]  }
  0x22   : > { %2271 = vmatprep.subr.bf16.mxu0 %v3186_v17  ;;  %v323_v48 = vld [vmem:[%s3672_s27] sm:$0xff]  ;;  %v3238_v58 = vld [vmem:[%s3622_s23 + $0xd4] ss:$8 sps:$4 sm:$0xff]   ;;  %v3242_v60 = vld [vmem:[%s3622_s23 + $0xd0] ss:$8 sps:$4 sm:$0xff]   ;;  %s3073_s28 = sshll.u32 %s3616_s19, 5 }
  0x23   : > { %v331_v49 = vld [vmem:[%s3672_s27 + $0x40] sm:$0xff]  ;;  %v3240_v59 = vld [vmem:[%s3622_s23 + $0x4d4] ss:$8 sps:$4 sm:$0xff]   ;;  %v3243_v61 = vld [vmem:[%s3622_s23 + $0x4d0] ss:$8 sps:$4 sm:$0xff]   ;;  %s308_s5 = scalar_lea.vmem %s4020_s2, %s3073_s28 }
  0x24   : > { %2060 = vmatpush1.bf16.msra.mxu1 %v3188_v18  ;;  %v3232_v50 = vld [vmem:[%s3622_s23 + $0xc4] ss:$8 sps:$4 sm:$0xff]   ;;  %v2773_v52 = vcombine.high %v323_v48, %v331_v49  ;;  %v3236_v56 = vld [vmem:[%s3622_s23 + $0xc0] ss:$8 sps:$4 sm:$0xff]   ;;  %v3250_v2 = vld [vmem:[%s3622_s23 + $0xf4] ss:$8 sps:$4 sm:$0xff]   ;;  %v2772_v8 = vcombine.low %v323_v48, %v331_v49 }
  0x25   : > { %2272 = vmatpush1.bf16.msra.mxu0 %v3189_v19  ;;  %2061 = vmatprep.subr.bf16.mxu1 %v3190_v20  ;;  %v3234_v51 = vld [vmem:[%s3622_s23 + $0x4c4] ss:$8 sps:$4 sm:$0xff]   ;;  %v3237_v57 = vld [vmem:[%s3622_s23 + $0x4c0] ss:$8 sps:$4 sm:$0xff]   ;;  %v3252_v3 = vld [vmem:[%s3622_s23 + $0x4f4] ss:$8 sps:$4 sm:$0xff]  }
  0x26   : > { %2273 = vmatprep.subr.bf16.mxu0 %v3192_v21  ;;  %v327_v53 = vld [vmem:[%s3672_s27 + $0x20] sm:$0xff]  ;;  %2083 = vmatprep.mubr.bf16.mxu1 %v2773_v52  ;;  %v3254_v4 = vld [vmem:[%s3622_s23 + $0xf0] ss:$8 sps:$4 sm:$0xff]   ;;  %v3264_v12 = vld [vmem:[%s3622_s23 + $0x114] ss:$8 sps:$4 sm:$0xff]  }
  0x27   : > { %v335_v54 = vld [vmem:[%s3672_s27 + $0x60] sm:$0xff]  ;;  %v3255_v5 = vld [vmem:[%s3622_s23 + $0x4f0] ss:$8 sps:$4 sm:$0xff]   ;;  %v3267_v13 = vld [vmem:[%s3622_s23 + $0x514] ss:$8 sps:$4 sm:$0xff]  }
  0x28   : > { %2062 = vmatpush1.bf16.msra.mxu1 %v3194_v22  ;;  %v2781_v55 = vcombine.high %v327_v53, %v335_v54  ;;  %v3244_v62 = vld [vmem:[%s3622_s23 + $0xe4] ss:$8 sps:$4 sm:$0xff]   ;;  %v3248_v0 = vld [vmem:[%s3622_s23 + $0xe0] ss:$8 sps:$4 sm:$0xff]   ;;  %v2780_v10 = vcombine.low %v327_v53, %v335_v54  ;;  %v3262_v14 = vld [vmem:[%s3622_s23 + $0x110] ss:$8 sps:$4 sm:$0xff]  }
  0x29   : > { %2274 = vmatpush1.bf16.msra.mxu0 %v3195_v23  ;;  %2063 = vmatprep.subr.bf16.mxu1 %v3196_v24  ;;  %v3246_v63 = vld [vmem:[%s3622_s23 + $0x4e4] ss:$8 sps:$4 sm:$0xff]   ;;  %v3249_v1 = vld [vmem:[%s3622_s23 + $0x4e0] ss:$8 sps:$4 sm:$0xff]   ;;  %v3265_v15 = vld [vmem:[%s3622_s23 + $0x510] ss:$8 sps:$4 sm:$0xff]  }
  0x2a   : > { %2275 = vmatprep.subr.bf16.mxu0 %v3198_v25  ;;  %2295 = vmatprep.mubr.bf16.mxu0 %v2781_v55  ;;  %v3258_v6 = vld [vmem:[%s3622_s23 + $0x104] ss:$8 sps:$4 sm:$0xff]   ;;  %v3256_v9 = vld [vmem:[%s3622_s23 + $0x100] ss:$8 sps:$4 sm:$0xff]   ;;  %v3276_v20 = vld [vmem:[%s3622_s23 + $0x134] ss:$8 sps:$4 sm:$0xff]  }
  0x2b   : > { %v3261_v7 = vld [vmem:[%s3622_s23 + $0x504] ss:$8 sps:$4 sm:$0xff]   ;;  %v3259_v11 = vld [vmem:[%s3622_s23 + $0x500] ss:$8 sps:$4 sm:$0xff]   ;;  %v3279_v21 = vld [vmem:[%s3622_s23 + $0x534] ss:$8 sps:$4 sm:$0xff]  }
  0x2c   : > { %2064 = vmatpush1.bf16.msra.mxu1 %v3200_v26  ;;  %v3270_v16 = vld [vmem:[%s3622_s23 + $0x124] ss:$8 sps:$4 sm:$0xff]   ;;  %v3268_v18 = vld [vmem:[%s3622_s23 + $0x120] ss:$8 sps:$4 sm:$0xff]   ;;  %v3274_v22 = vld [vmem:[%s3622_s23 + $0x130] ss:$8 sps:$4 sm:$0xff]  }
  0x2d   : > { %2276 = vmatpush1.bf16.msra.mxu0 %v3201_v27  ;;  %2065 = vmatprep.subr.bf16.mxu1 %v3202_v28  ;;  %v3273_v17 = vld [vmem:[%s3622_s23 + $0x524] ss:$8 sps:$4 sm:$0xff]   ;;  %v3271_v19 = vld [vmem:[%s3622_s23 + $0x520] ss:$8 sps:$4 sm:$0xff]   ;;  %v3277_v23 = vld [vmem:[%s3622_s23 + $0x530] ss:$8 sps:$4 sm:$0xff]  }
  0x2e   : > { %2277 = vmatprep.subr.bf16.mxu0 %v3204_v29  ;;  %v3282_v24 = vld [vmem:[%s3622_s23 + $0x144] ss:$8 sps:$4 sm:$0xff]   ;;  %v3280_v26 = vld [vmem:[%s3622_s23 + $0x140] ss:$8 sps:$4 sm:$0xff]   ;;  %v3288_v28 = vld [vmem:[%s3622_s23 + $0x154] ss:$8 sps:$4 sm:$0xff]  }
  0x2f   : > { %v3285_v25 = vld [vmem:[%s3622_s23 + $0x544] ss:$8 sps:$4 sm:$0xff]   ;;  %v3283_v27 = vld [vmem:[%s3622_s23 + $0x540] ss:$8 sps:$4 sm:$0xff]   ;;  %v3291_v29 = vld [vmem:[%s3622_s23 + $0x554] ss:$8 sps:$4 sm:$0xff]  }
  0x30   : > { %2066 = vmatpush1.bf16.msra.mxu1 %v3206_v30  ;;  %v339_v30 = vld [vmem:[%s3672_s27 + $0x80] sm:$0xff]  ;;  %v3741_v49 = vld [vmem:[%s3672_s27 + $0x28] sm:$0xff]  ;;  %v3301_v52 = vld [vmem:[%s3622_s23 + $0x570] ss:$8 sps:$4 sm:$0xff]  }
  0x31   : > { %2278 = vmatpush1.bf16.msra.mxu0 %v3207_v31  ;;  %2067 = vmatprep.subr.bf16.mxu1 %v3208_v32  ;;  %v347_v31 = vld [vmem:[%s3672_s27 + $0xc0] sm:$0xff]  ;;  %v3286_v32 = vld [vmem:[%s3622_s23 + $0x150] ss:$8 sps:$4 sm:$0xff]  }
  0x32   : > { %2279 = vmatprep.subr.bf16.mxu0 %v3210_v33  ;;  %v2789_v33 = vcombine.high %v339_v30, %v347_v31  ;;  %v3306_v54 = vld [vmem:[%s3622_s23 + $0x184] ss:$8 sps:$4 sm:$0xff]  }
  0x33   : > { %v3309_v55 = vld [vmem:[%s3622_s23 + $0x584] ss:$8 sps:$4 sm:$0xff]  }
  0x34   : > { %2068 = vmatpush1.bf16.msra.mxu1 %v3212_v34  ;;  %v3289_v34 = vld [vmem:[%s3622_s23 + $0x550] ss:$8 sps:$4 sm:$0xff]  }
  0x35   : > { %2280 = vmatpush1.bf16.msra.mxu0 %v3213_v35  ;;  %2069 = vmatprep.subr.bf16.mxu1 %v3214_v36  ;;  %v343_v35 = vld [vmem:[%s3672_s27 + $0xa0] sm:$0xff] }
  0x36   : > { %2281 = vmatprep.subr.bf16.mxu0 %v3216_v37  ;;  %v351_v36 = vld [vmem:[%s3672_s27 + $0xe0] sm:$0xff]  ;;  %v2788_v37 = vcombine.low %v339_v30, %v347_v31  ;;  %v3360_v30 = vld [vmem:[%s3622_s23 + $0x214] ss:$8 sps:$4 sm:$0xff]  }
  0x37   : > { %v3363_v31 = vld [vmem:[%s3622_s23 + $0x614] ss:$8 sps:$4 sm:$0xff]  }
  0x38   : > { %2070 = vmatpush1.bf16.msra.mxu1 %v3218_v38  ;;  %v3294_v38 = vld [vmem:[%s3622_s23 + $0x164] ss:$8 sps:$4 sm:$0xff]  }
  0x39   : > { %2282 = vmatpush1.bf16.msra.mxu0 %v3219_v39  ;;  %2071 = vmatprep.subr.bf16.mxu1 %v3220_v40  ;;  %v2797_v39 = vcombine.high %v343_v35, %v351_v36  ;;  %v2796_v40 = vcombine.low %v343_v35, %v351_v36  ;;  %v3358_v36 = vld [vmem:[%s3622_s23 + $0x210] ss:$8 sps:$4 sm:$0xff]  }
  0x3a   : > { %2283 = vmatprep.subr.bf16.mxu0 %v3222_v41  ;;  %v3297_v41 = vld [vmem:[%s3622_s23 + $0x564] ss:$8 sps:$4 sm:$0xff]  }
  0x3c   : > { %2072 = vmatpush1.bf16.msra.mxu1 %v3224_v42  ;;  %v3292_v42 = vld [vmem:[%s3622_s23 + $0x160] ss:$8 sps:$4 sm:$0xff]  }
  0x3d   : > { %2284 = vmatpush1.bf16.msra.mxu0 %v3225_v43  ;;  %2073 = vmatprep.subr.bf16.mxu1 %v3226_v44  ;;  %v3295_v43 = vld [vmem:[%s3622_s23 + $0x560] ss:$8 sps:$4 sm:$0xff]  }
  0x3e   : > { %2285 = vmatprep.subr.bf16.mxu0 %v3228_v45  ;;  %v3731_v44 = vld [vmem:[%s3672_s27 + $0x8] sm:$0xff] }
  0x3f   : > { %v3734_v45 = vld [vmem:[%s3672_s27 + $0x48] sm:$0xff] }
  0x40   : > { %2074 = vmatpush1.bf16.msra.mxu1 %v3230_v46  ;;  %v3300_v46 = vld [vmem:[%s3622_s23 + $0x174] ss:$8 sps:$4 sm:$0xff]   ;;  %v2775_v48 = vcombine.high %v3731_v44, %v3734_v45 }
  0x41   : > { %2286 = vmatpush1.bf16.msra.mxu0 %v3231_v47  ;;  %2075 = vmatprep.subr.bf16.mxu1 %v3232_v50  ;;  %v3303_v47 = vld [vmem:[%s3622_s23 + $0x574] ss:$8 sps:$4 sm:$0xff]   ;;  %v3744_v50 = vld [vmem:[%s3672_s27 + $0x68] sm:$0xff] }
  0x42   : > { %2287 = vmatprep.subr.bf16.mxu0 %v3234_v51  ;;  %v3298_v51 = vld [vmem:[%s3622_s23 + $0x170] ss:$8 sps:$4 sm:$0xff]   ;;  %v2783_v53 = vcombine.high %v3741_v49, %v3744_v50 }
  0x44   : > { %2076 = vmatpush1.bf16.msra.mxu1 %v3236_v56  ;;  %v3304_v56 = vld [vmem:[%s3622_s23 + $0x180] ss:$8 sps:$4 sm:$0xff]  }
  0x45   : > { %2288 = vmatpush1.bf16.msra.mxu0 %v3237_v57  ;;  %2077 = vmatprep.subr.bf16.mxu1 %v3238_v58  ;;  %v3307_v57 = vld [vmem:[%s3622_s23 + $0x580] ss:$8 sps:$4 sm:$0xff]   ;;  %v3312_v58 = vld [vmem:[%s3622_s23 + $0x194] ss:$8 sps:$4 sm:$0xff]  }
  0x46   : > { %2289 = vmatprep.subr.bf16.mxu0 %v3240_v59  ;;  %v3315_v59 = vld [vmem:[%s3622_s23 + $0x594] ss:$8 sps:$4 sm:$0xff]  }
  0x48   : > { %2078 = vmatpush1.bf16.msra.mxu1 %v3242_v60  ;;  %v3310_v60 = vld [vmem:[%s3622_s23 + $0x190] ss:$8 sps:$4 sm:$0xff]  }
  0x49   : > { %2290 = vmatpush1.bf16.msra.mxu0 %v3243_v61  ;;  %2079 = vmatprep.subr.bf16.mxu1 %v3244_v62  ;;  %v3313_v61 = vld [vmem:[%s3622_s23 + $0x590] ss:$8 sps:$4 sm:$0xff]   ;;  %v3318_v62 = vld [vmem:[%s3622_s23 + $0x1a4] ss:$8 sps:$4 sm:$0xff]  }
  0x4a   : > { %2291 = vmatprep.subr.bf16.mxu0 %v3246_v63  ;;  %v3321_v63 = vld [vmem:[%s3622_s23 + $0x5a4] ss:$8 sps:$4 sm:$0xff]  }
  0x4c   : > { %2080 = vmatpush1.bf16.msra.mxu1 %v3248_v0  ;;  %v3316_v0 = vld [vmem:[%s3622_s23 + $0x1a0] ss:$8 sps:$4 sm:$0xff]  }
  0x4d   : > { %2292 = vmatpush1.bf16.msra.mxu0 %v3249_v1  ;;  %2081 = vmatprep.subr.bf16.mxu1 %v3250_v2  ;;  %v3319_v1 = vld [vmem:[%s3622_s23 + $0x5a0] ss:$8 sps:$4 sm:$0xff]   ;;  %v3324_v2 = vld [vmem:[%s3622_s23 + $0x1b4] ss:$8 sps:$4 sm:$0xff]  }
  0x4e   : > { %2293 = vmatprep.subr.bf16.mxu0 %v3252_v3  ;;  %v3327_v3 = vld [vmem:[%s3622_s23 + $0x5b4] ss:$8 sps:$4 sm:$0xff]  }
  0x50   : > { %2082 = vmatpush1.bf16.msra.mxu1 %v3254_v4  ;;  %v3322_v4 = vld [vmem:[%s3622_s23 + $0x1b0] ss:$8 sps:$4 sm:$0xff]  }
  0x51   : > { %2294 = vmatpush1.bf16.msra.mxu0 %v3255_v5  ;;  %2104 = vmatprep.subr.bf16.mxu1 %v3258_v6  ;;  %v3325_v5 = vld [vmem:[%s3622_s23 + $0x5b0] ss:$8 sps:$4 sm:$0xff]   ;;  %v3330_v6 = vld [vmem:[%s3622_s23 + $0x1c4] ss:$8 sps:$4 sm:$0xff]  }
  0x52   : > { %2316 = vmatprep.subr.bf16.mxu0 %v3261_v7  ;;  %v3333_v7 = vld [vmem:[%s3622_s23 + $0x5c4] ss:$8 sps:$4 sm:$0xff]  }
  0x53   : > { %2084 = vmatmul.mubr.bf16.vlgmr.msra.gmra.mrb[0].mxu1 %v2772_v8  ;;  %v3328_v8 = vld [vmem:[%s3622_s23 + $0x1c0] ss:$8 sps:$4 sm:$0xff]  }
  0x54   : > { %2296 = vmatmul.mubr.bf16.vlgmr.msra.gmra.mrb[0].mxu0 %v2780_v10  ;;  %2105 = vmatpush1.bf16.msra.mxu1 %v3256_v9  ;;  %v3331_v9 = vld [vmem:[%s3622_s23 + $0x5c0] ss:$8 sps:$4 sm:$0xff]   ;;  %v3336_v10 = vld [vmem:[%s3622_s23 + $0x1d4] ss:$8 sps:$4 sm:$0xff]  }
  0x55   : > { %2317 = vmatpush1.bf16.msra.mxu0 %v3259_v11  ;;  %2106 = vmatprep.subr.bf16.mxu1 %v3264_v12  ;;  %v3339_v11 = vld [vmem:[%s3622_s23 + $0x5d4] ss:$8 sps:$4 sm:$0xff]   ;;  %v3334_v12 = vld [vmem:[%s3622_s23 + $0x1d0] ss:$8 sps:$4 sm:$0xff]  }
  0x56   : > { %2318 = vmatprep.subr.bf16.mxu0 %v3267_v13  ;;  %2093 = vmatprep.mubr.bf16.mxu1 %v2789_v33  ;;  %v3337_v13 = vld [vmem:[%s3622_s23 + $0x5d0] ss:$8 sps:$4 sm:$0xff]   ;;  %v352_v33 = vld [vmem:[%s3672_s27 + $0xe8] sm:$0xff] }
  0x57   : > { %2305 = vmatprep.mubr.bf16.mxu0 %v2797_v39  ;;  %v3369_v39 = vld [vmem:[%s3622_s23 + $0x624] ss:$8 sps:$4 sm:$0xff]  }
  0x58   : > { %2107 = vmatpush1.bf16.msra.mxu1 %v3262_v14  ;;  %v3342_v14 = vld [vmem:[%s3622_s23 + $0x1e4] ss:$8 sps:$4 sm:$0xff]  }
  0x59   : > { %2319 = vmatpush1.bf16.msra.mxu0 %v3265_v15  ;;  %2108 = vmatprep.subr.bf16.mxu1 %v3270_v16  ;;  %v3345_v15 = vld [vmem:[%s3622_s23 + $0x5e4] ss:$8 sps:$4 sm:$0xff]   ;;  %v3340_v16 = vld [vmem:[%s3622_s23 + $0x1e0] ss:$8 sps:$4 sm:$0xff]  }
  0x5a   : > { %2320 = vmatprep.subr.bf16.mxu0 %v3273_v17  ;;  %v3343_v17 = vld [vmem:[%s3622_s23 + $0x5e0] ss:$8 sps:$4 sm:$0xff]  }
  0x5b   : > { %2094 = vmatmul.mubr.bf16.gmra.mrb[4].mxu1 %v2788_v37  ;;  %v3361_v37 = vld [vmem:[%s3622_s23 + $0x610] ss:$8 sps:$4 sm:$0xff]  }
  0x5c   : > { %2109 = vmatpush1.bf16.msra.mxu1 %v3268_v18  ;;  %2306 = vmatmul.mubr.bf16.gmra.mrb[4].mxu0 %v2796_v40  ;;  %v3348_v18 = vld [vmem:[%s3622_s23 + $0x1f4] ss:$8 sps:$4 sm:$0xff]   ;;  %v3364_v40 = vld [vmem:[%s3622_s23 + $0x220] ss:$8 sps:$4 sm:$0xff]  }
  0x5d   : > { %2321 = vmatpush1.bf16.msra.mxu0 %v3271_v19  ;;  %2110 = vmatprep.subr.bf16.mxu1 %v3276_v20  ;;  %v3351_v19 = vld [vmem:[%s3622_s23 + $0x5f4] ss:$8 sps:$4 sm:$0xff]   ;;  %v3346_v20 = vld [vmem:[%s3622_s23 + $0x1f0] ss:$8 sps:$4 sm:$0xff]  }
  0x5e   : > { %2322 = vmatprep.subr.bf16.mxu0 %v3279_v21  ;;  %2136 = vmatprep.mubr.bf16.mxu1 %v2775_v48  ;;  %v3349_v21 = vld [vmem:[%s3622_s23 + $0x5f0] ss:$8 sps:$4 sm:$0xff]   ;;  %v3372_v48 = vld [vmem:[%s3622_s23 + $0x234] ss:$8 sps:$4 sm:$0xff]  }
  0x5f   : > { %2348 = vmatprep.mubr.bf16.mxu0 %v2783_v53  ;;  %v3373_v53 = vld [vmem:[%s3622_s23 + $0x630] ss:$8 sps:$4 sm:$0xff]  }
  0x60   : > { %2111 = vmatpush1.bf16.msra.mxu1 %v3274_v22  ;;  %v3354_v22 = vld [vmem:[%s3622_s23 + $0x204] ss:$8 sps:$4 sm:$0xff]  }
  0x61   : > { %2323 = vmatpush1.bf16.msra.mxu0 %v3277_v23  ;;  %2112 = vmatprep.subr.bf16.mxu1 %v3282_v24  ;;  %v3357_v23 = vld [vmem:[%s3622_s23 + $0x604] ss:$8 sps:$4 sm:$0xff]   ;;  %v3352_v24 = vld [vmem:[%s3622_s23 + $0x200] ss:$8 sps:$4 sm:$0xff]  }
  0x62   : > { %2324 = vmatprep.subr.bf16.mxu0 %v3285_v25  ;;  %v3355_v25 = vld [vmem:[%s3622_s23 + $0x600] ss:$8 sps:$4 sm:$0xff]  }
  0x64   : > { %2113 = vmatpush1.bf16.msra.mxu1 %v3280_v26  ;;  %v340_v26 = vld [vmem:[%s3672_s27 + $0x88] sm:$0xff] }
  0x65   : > { %2325 = vmatpush1.bf16.msra.mxu0 %v3283_v27  ;;  %2114 = vmatprep.subr.bf16.mxu1 %v3288_v28  ;;  %v2774_v27 = vcombine.low %v3731_v44, %v3734_v45  ;;  %v2782_v28 = vcombine.low %v3741_v49, %v3744_v50  ;;  %v3806_v45 = vld [vmem:[%s3672_s27 + $0x50] sm:$0xff] }
  0x66   : > { %2326 = vmatprep.subr.bf16.mxu0 %v3291_v29  ;;  %v348_v29 = vld [vmem:[%s3672_s27 + $0xc8] sm:$0xff]  ;;  %v3375_v49 = vld [vmem:[%s3622_s23 + $0x634] ss:$8 sps:$4 sm:$0xff]  }
  0x68   : > { %2115 = vmatpush1.bf16.msra.mxu1 %v3286_v32  ;;  %v344_v32 = vld [vmem:[%s3672_s27 + $0xa8] sm:$0xff] }
  0x69   : > { %2327 = vmatpush1.bf16.msra.mxu0 %v3289_v34  ;;  %2116 = vmatprep.subr.bf16.mxu1 %v3294_v38  ;;  %v2791_v34 = vcombine.high %v340_v26, %v348_v29  ;;  %v2799_v35 = vcombine.high %v344_v32, %v352_v33  ;;  %v3366_v38 = vld [vmem:[%s3622_s23 + $0x224] ss:$8 sps:$4 sm:$0xff]   ;;  %v2798_v44 = vcombine.low %v344_v32, %v352_v33  ;;  %v3436_v32 = vld [vmem:[%s3622_s23 + $0x2e0] ss:$8 sps:$4 sm:$0xff]  }
  0x6a   : > { %2328 = vmatprep.subr.bf16.mxu0 %v3297_v41  ;;  %v3367_v41 = vld [vmem:[%s3622_s23 + $0x620] ss:$8 sps:$4 sm:$0xff]  }
  0x6b   : > { %v3439_v33 = vld [vmem:[%s3622_s23 + $0x6e0] ss:$8 sps:$4 sm:$0xff]  }
  0x6c   : > { %2117 = vmatpush1.bf16.msra.mxu1 %v3292_v42  ;;  %v3803_v42 = vld [vmem:[%s3672_s27 + $0x10] sm:$0xff] }
  0x6d   : > { %2329 = vmatpush1.bf16.msra.mxu0 %v3295_v43  ;;  %2118 = vmatprep.subr.bf16.mxu1 %v3300_v46  ;;  %v2790_v43 = vcombine.low %v340_v26, %v348_v29  ;;  %v3809_v46 = vld [vmem:[%s3672_s27 + $0x30] sm:$0xff]  ;;  %v2777_v50 = vcombine.high %v3803_v42, %v3806_v45 }
  0x6e   : > { %2330 = vmatprep.subr.bf16.mxu0 %v3303_v47  ;;  %v3812_v47 = vld [vmem:[%s3672_s27 + $0x70] sm:$0xff] }
  0x6f   : > { %v3432_v26 = vld [vmem:[%s3622_s23 + $0x2d4] ss:$8 sps:$4 sm:$0xff]   ;;  %v3433_v29 = vld [vmem:[%s3622_s23 + $0x6d0] ss:$8 sps:$4 sm:$0xff]  }
  0x70   : > { %2119 = vmatpush1.bf16.msra.mxu1 %v3298_v51  ;;  %v2785_v51 = vcombine.high %v3809_v46, %v3812_v47 }
  0x71   : > { %2331 = vmatpush1.bf16.msra.mxu0 %v3301_v52  ;;  %2120 = vmatprep.subr.bf16.mxu1 %v3306_v54  ;;  %v3370_v52 = vld [vmem:[%s3622_s23 + $0x230] ss:$8 sps:$4 sm:$0xff]   ;;  %v3378_v54 = vld [vmem:[%s3622_s23 + $0x244] ss:$8 sps:$4 sm:$0xff]  }
  0x72   : > { %2332 = vmatprep.subr.bf16.mxu0 %v3309_v55  ;;  %v3381_v55 = vld [vmem:[%s3622_s23 + $0x644] ss:$8 sps:$4 sm:$0xff]  }
  0x74   : > { %2121 = vmatpush1.bf16.msra.mxu1 %v3304_v56  ;;  %v3376_v56 = vld [vmem:[%s3622_s23 + $0x240] ss:$8 sps:$4 sm:$0xff]  }
  0x75   : > { %2333 = vmatpush1.bf16.msra.mxu0 %v3307_v57  ;;  %2122 = vmatprep.subr.bf16.mxu1 %v3312_v58  ;;  %v3379_v57 = vld [vmem:[%s3622_s23 + $0x640] ss:$8 sps:$4 sm:$0xff]   ;;  %v3384_v58 = vld [vmem:[%s3622_s23 + $0x254] ss:$8 sps:$4 sm:$0xff]  }
  0x76   : > { %2334 = vmatprep.subr.bf16.mxu0 %v3315_v59  ;;  %v3387_v59 = vld [vmem:[%s3622_s23 + $0x654] ss:$8 sps:$4 sm:$0xff]  }
  0x78   : > { %2123 = vmatpush1.bf16.msra.mxu1 %v3310_v60  ;;  %v3382_v60 = vld [vmem:[%s3622_s23 + $0x250] ss:$8 sps:$4 sm:$0xff]  }
  0x79   : > { %2335 = vmatpush1.bf16.msra.mxu0 %v3313_v61  ;;  %2124 = vmatprep.subr.bf16.mxu1 %v3318_v62  ;;  %v3385_v61 = vld [vmem:[%s3622_s23 + $0x650] ss:$8 sps:$4 sm:$0xff]   ;;  %v3390_v62 = vld [vmem:[%s3622_s23 + $0x264] ss:$8 sps:$4 sm:$0xff]  }
  0x7a   : > { %2336 = vmatprep.subr.bf16.mxu0 %v3321_v63  ;;  %v3393_v63 = vld [vmem:[%s3622_s23 + $0x664] ss:$8 sps:$4 sm:$0xff]  }
  0x7c   : > { %2125 = vmatpush1.bf16.msra.mxu1 %v3316_v0  ;;  %v3388_v0 = vld [vmem:[%s3622_s23 + $0x260] ss:$8 sps:$4 sm:$0xff]  }
  0x7d   : > { %2337 = vmatpush1.bf16.msra.mxu0 %v3319_v1  ;;  %2126 = vmatprep.subr.bf16.mxu1 %v3324_v2  ;;  %v3391_v1 = vld [vmem:[%s3622_s23 + $0x660] ss:$8 sps:$4 sm:$0xff]   ;;  %v3396_v2 = vld [vmem:[%s3622_s23 + $0x274] ss:$8 sps:$4 sm:$0xff]  }
  0x7e   : > { %2338 = vmatprep.subr.bf16.mxu0 %v3327_v3  ;;  %v3399_v3 = vld [vmem:[%s3622_s23 + $0x674] ss:$8 sps:$4 sm:$0xff]  }
  0x80   : > { %2127 = vmatpush1.bf16.msra.mxu1 %v3322_v4  ;;  %v3394_v4 = vld [vmem:[%s3622_s23 + $0x270] ss:$8 sps:$4 sm:$0xff]  }
  0x81   : > { %2339 = vmatpush1.bf16.msra.mxu0 %v3325_v5  ;;  %2128 = vmatprep.subr.bf16.mxu1 %v3330_v6  ;;  %v3397_v5 = vld [vmem:[%s3622_s23 + $0x670] ss:$8 sps:$4 sm:$0xff]   ;;  %v3402_v6 = vld [vmem:[%s3622_s23 + $0x284] ss:$8 sps:$4 sm:$0xff]  }
  0x82   : > { %2340 = vmatprep.subr.bf16.mxu0 %v3333_v7  ;;  %v3405_v7 = vld [vmem:[%s3622_s23 + $0x684] ss:$8 sps:$4 sm:$0xff]  }
  0x84   : > { %2129 = vmatpush1.bf16.msra.mxu1 %v3328_v8  ;;  %v3400_v8 = vld [vmem:[%s3622_s23 + $0x280] ss:$8 sps:$4 sm:$0xff]  }
  0x85   : > { %2341 = vmatpush1.bf16.msra.mxu0 %v3331_v9  ;;  %2130 = vmatprep.subr.bf16.mxu1 %v3336_v10  ;;  %v3403_v9 = vld [vmem:[%s3622_s23 + $0x680] ss:$8 sps:$4 sm:$0xff]   ;;  %v3408_v10 = vld [vmem:[%s3622_s23 + $0x294] ss:$8 sps:$4 sm:$0xff]  }
  0x86   : > { %2342 = vmatprep.subr.bf16.mxu0 %v3339_v11  ;;  %v3411_v11 = vld [vmem:[%s3622_s23 + $0x694] ss:$8 sps:$4 sm:$0xff]  }
  0x88   : > { %2131 = vmatpush1.bf16.msra.mxu1 %v3334_v12  ;;  %v3406_v12 = vld [vmem:[%s3622_s23 + $0x290] ss:$8 sps:$4 sm:$0xff]  }
  0x89   : > { %2343 = vmatpush1.bf16.msra.mxu0 %v3337_v13  ;;  %2132 = vmatprep.subr.bf16.mxu1 %v3342_v14  ;;  %v3409_v13 = vld [vmem:[%s3622_s23 + $0x690] ss:$8 sps:$4 sm:$0xff]   ;;  %v3414_v14 = vld [vmem:[%s3622_s23 + $0x2a4] ss:$8 sps:$4 sm:$0xff]  }
  0x8a   : > { %2344 = vmatprep.subr.bf16.mxu0 %v3345_v15  ;;  %v3417_v15 = vld [vmem:[%s3622_s23 + $0x6a4] ss:$8 sps:$4 sm:$0xff]  }
  0x8c   : > { %2133 = vmatpush1.bf16.msra.mxu1 %v3340_v16  ;;  %v3412_v16 = vld [vmem:[%s3622_s23 + $0x2a0] ss:$8 sps:$4 sm:$0xff]  }
  0x8d   : > { %2345 = vmatpush1.bf16.msra.mxu0 %v3343_v17  ;;  %2134 = vmatprep.subr.bf16.mxu1 %v3348_v18  ;;  %v3415_v17 = vld [vmem:[%s3622_s23 + $0x6a0] ss:$8 sps:$4 sm:$0xff]   ;;  %v3420_v18 = vld [vmem:[%s3622_s23 + $0x2b4] ss:$8 sps:$4 sm:$0xff]  }
  0x8e   : > { %2346 = vmatprep.subr.bf16.mxu0 %v3351_v19  ;;  %v3423_v19 = vld [vmem:[%s3622_s23 + $0x6b4] ss:$8 sps:$4 sm:$0xff]  }
  0x90   : > { %2135 = vmatpush1.bf16.msra.mxu1 %v3346_v20  ;;  %v3418_v20 = vld [vmem:[%s3622_s23 + $0x2b0] ss:$8 sps:$4 sm:$0xff]  }
  0x91   : > { %2347 = vmatpush1.bf16.msra.mxu0 %v3349_v21  ;;  %2157 = vmatprep.subr.bf16.mxu1 %v3354_v22  ;;  %v3421_v21 = vld [vmem:[%s3622_s23 + $0x6b0] ss:$8 sps:$4 sm:$0xff]   ;;  %v3426_v22 = vld [vmem:[%s3622_s23 + $0x2c4] ss:$8 sps:$4 sm:$0xff]  }
  0x92   : > { %2369 = vmatprep.subr.bf16.mxu0 %v3357_v23  ;;  %v3429_v23 = vld [vmem:[%s3622_s23 + $0x6c4] ss:$8 sps:$4 sm:$0xff]  }
  0x93   : > { %2137 = vmatmul.mubr.bf16.vlgmr.msra.gmra.mrb[0].mxu1 %v2774_v27  ;;  %v3435_v27 = vld [vmem:[%s3622_s23 + $0x6d4] ss:$8 sps:$4 sm:$0xff]  }
  0x94   : > { %2349 = vmatmul.mubr.bf16.vlgmr.msra.gmra.mrb[0].mxu0 %v2782_v28  ;;  %2158 = vmatpush1.bf16.msra.mxu1 %v3352_v24  ;;  %v3424_v24 = vld [vmem:[%s3622_s23 + $0x2c0] ss:$8 sps:$4 sm:$0xff]   ;;  %v3430_v28 = vld [vmem:[%s3622_s23 + $0x2d0] ss:$8 sps:$4 sm:$0xff]  }
  0x95   : > { %2370 = vmatpush1.bf16.msra.mxu0 %v3355_v25  ;;  %2159 = vmatprep.subr.bf16.mxu1 %v3360_v30  ;;  %v3427_v25 = vld [vmem:[%s3622_s23 + $0x6c0] ss:$8 sps:$4 sm:$0xff]   ;;  %v3438_v30 = vld [vmem:[%s3622_s23 + $0x2e4] ss:$8 sps:$4 sm:$0xff]  }
  0x96   : > { %2371 = vmatprep.subr.bf16.mxu0 %v3363_v31  ;;  %2146 = vmatprep.mubr.bf16.mxu1 %v2791_v34  ;;  %v3441_v31 = vld [vmem:[%s3622_s23 + $0x6e4] ss:$8 sps:$4 sm:$0xff]   ;;  %v3444_v34 = vld [vmem:[%s3622_s23 + $0x2f4] ss:$8 sps:$4 sm:$0xff]  }
  0x97   : > { %2358 = vmatprep.mubr.bf16.mxu0 %v2799_v35  ;;  %v3447_v35 = vld [vmem:[%s3622_s23 + $0x6f4] ss:$8 sps:$4 sm:$0xff]  }
  0x98   : > { %2160 = vmatpush1.bf16.msra.mxu1 %v3358_v36  ;;  %v3442_v36 = vld [vmem:[%s3622_s23 + $0x2f0] ss:$8 sps:$4 sm:$0xff]  }
  0x99   : > { %2372 = vmatpush1.bf16.msra.mxu0 %v3361_v37  ;;  %2161 = vmatprep.subr.bf16.mxu1 %v3366_v38  ;;  %v3445_v37 = vld [vmem:[%s3622_s23 + $0x6f0] ss:$8 sps:$4 sm:$0xff]   ;;  %v3450_v38 = vld [vmem:[%s3622_s23 + $0x304] ss:$8 sps:$4 sm:$0xff]  }
  0x9a   : > { %2373 = vmatprep.subr.bf16.mxu0 %v3369_v39  ;;  %v3453_v39 = vld [vmem:[%s3622_s23 + $0x704] ss:$8 sps:$4 sm:$0xff]  }
  0x9b   : > { %2147 = vmatmul.mubr.bf16.gmra.mrb[4].mxu1 %v2790_v43  ;;  %v2784_v43 = vcombine.low %v3809_v46, %v3812_v47  ;;  %v3454_v46 = vld [vmem:[%s3622_s23 + $0x310] ss:$8 sps:$4 sm:$0xff]  }
  0x9c   : > { %2359 = vmatmul.mubr.bf16.gmra.mrb[4].mxu0 %v2798_v44  ;;  %2162 = vmatpush1.bf16.msra.mxu1 %v3364_v40  ;;  %v341_v40 = vld [vmem:[%s3672_s27 + $0x90] sm:$0xff] }
  0x9d   : > { %2374 = vmatpush1.bf16.msra.mxu0 %v3367_v41  ;;  %2163 = vmatprep.subr.bf16.mxu1 %v3372_v48  ;;  %v2776_v41 = vcombine.low %v3803_v42, %v3806_v45  ;;  %v349_v44 = vld [vmem:[%s3672_s27 + $0xd0] sm:$0xff] }
  0x9e   : > { %2375 = vmatprep.subr.bf16.mxu0 %v3375_v49  ;;  %2189 = vmatprep.mubr.bf16.mxu1 %v2777_v50  ;;  %v345_v48 = vld [vmem:[%s3672_s27 + $0xb0] sm:$0xff]  ;;  %v3448_v50 = vld [vmem:[%s3622_s23 + $0x300] ss:$8 sps:$4 sm:$0xff]   ;;  %v2793_v42 = vcombine.high %v341_v40, %v349_v44 }
  0x9f   : > { %2401 = vmatprep.mubr.bf16.mxu0 %v2785_v51  ;;  %v353_v49 = vld [vmem:[%s3672_s27 + $0xf0] sm:$0xff]  ;;  %v3451_v51 = vld [vmem:[%s3622_s23 + $0x700] ss:$8 sps:$4 sm:$0xff]  }
  0xa0   : > { %2164 = vmatpush1.bf16.msra.mxu1 %v3370_v52  ;;  %v3456_v52 = vld [vmem:[%s3622_s23 + $0x314] ss:$8 sps:$4 sm:$0xff]   ;;  %v2801_v45 = vcombine.high %v345_v48, %v353_v49  ;;  %v3457_v47 = vld [vmem:[%s3622_s23 + $0x710] ss:$8 sps:$4 sm:$0xff]  }
  0xa1   : > { %2376 = vmatpush1.bf16.msra.mxu0 %v3373_v53  ;;  %2165 = vmatprep.subr.bf16.mxu1 %v3378_v54  ;;  %v3459_v53 = vld [vmem:[%s3622_s23 + $0x714] ss:$8 sps:$4 sm:$0xff]   ;;  %v3462_v54 = vld [vmem:[%s3622_s23 + $0x324] ss:$8 sps:$4 sm:$0xff]  }
  0xa2   : > { %2377 = vmatprep.subr.bf16.mxu0 %v3381_v55  ;;  %v3465_v55 = vld [vmem:[%s3622_s23 + $0x724] ss:$8 sps:$4 sm:$0xff]  }
  0xa4   : > { %2166 = vmatpush1.bf16.msra.mxu1 %v3376_v56  ;;  %v3889_v56 = vld [vmem:[%s3672_s27 + $0x18] sm:$0xff] }
  0xa5   : > { %2378 = vmatpush1.bf16.msra.mxu0 %v3379_v57  ;;  %2167 = vmatprep.subr.bf16.mxu1 %v3384_v58  ;;  %v2792_v57 = vcombine.low %v341_v40, %v349_v44  ;;  %v2800_v58 = vcombine.low %v345_v48, %v353_v49  ;;  %v3520_v40 = vld [vmem:[%s3622_s23 + $0x3c0] ss:$8 sps:$4 sm:$0xff]   ;;  %v3531_v44 = vld [vmem:[%s3622_s23 + $0x7d4] ss:$8 sps:$4 sm:$0xff]   ;;  %v3526_v48 = vld [vmem:[%s3622_s23 + $0x3d0] ss:$8 sps:$4 sm:$0xff]  }
  0xa6   : > { %2379 = vmatprep.subr.bf16.mxu0 %v3387_v59  ;;  %v3892_v59 = vld [vmem:[%s3672_s27 + $0x58] sm:$0xff] }
  0xa7   : > { %v3529_v49 = vld [vmem:[%s3622_s23 + $0x7d0] ss:$8 sps:$4 sm:$0xff]  }
  0xa8   : > { %2168 = vmatpush1.bf16.msra.mxu1 %v3382_v60  ;;  %v3895_v60 = vld [vmem:[%s3672_s27 + $0x38] sm:$0xff] }
  0xa9   : > { %2380 = vmatpush1.bf16.msra.mxu0 %v3385_v61  ;;  %2169 = vmatprep.subr.bf16.mxu1 %v3390_v62  ;;  %v3898_v61 = vld [vmem:[%s3672_s27 + $0x78] sm:$0xff]  ;;  %v3460_v62 = vld [vmem:[%s3622_s23 + $0x320] ss:$8 sps:$4 sm:$0xff]  }
  0xaa   : > { %2381 = vmatprep.subr.bf16.mxu0 %v3393_v63  ;;  %v3463_v63 = vld [vmem:[%s3622_s23 + $0x720] ss:$8 sps:$4 sm:$0xff]  }
  0xac   : > { %2170 = vmatpush1.bf16.msra.mxu1 %v3388_v0  ;;  %v3468_v0 = vld [vmem:[%s3622_s23 + $0x334] ss:$8 sps:$4 sm:$0xff]  }
  0xad   : > { %2382 = vmatpush1.bf16.msra.mxu0 %v3391_v1  ;;  %2171 = vmatprep.subr.bf16.mxu1 %v3396_v2  ;;  %v3471_v1 = vld [vmem:[%s3622_s23 + $0x734] ss:$8 sps:$4 sm:$0xff]   ;;  %v2779_v2 = vcombine.high %v3889_v56, %v3892_v59 }
  0xae   : > { %2383 = vmatprep.subr.bf16.mxu0 %v3399_v3  ;;  %v2787_v3 = vcombine.high %v3895_v60, %v3898_v61 }
  0xb0   : > { %2172 = vmatpush1.bf16.msra.mxu1 %v3394_v4  ;;  %v3466_v4 = vld [vmem:[%s3622_s23 + $0x330] ss:$8 sps:$4 sm:$0xff]  }
  0xb1   : > { %2384 = vmatpush1.bf16.msra.mxu0 %v3397_v5  ;;  %2173 = vmatprep.subr.bf16.mxu1 %v3402_v6  ;;  %v3469_v5 = vld [vmem:[%s3622_s23 + $0x730] ss:$8 sps:$4 sm:$0xff]   ;;  %v3474_v6 = vld [vmem:[%s3622_s23 + $0x344] ss:$8 sps:$4 sm:$0xff]  }
  0xb2   : > { %2385 = vmatprep.subr.bf16.mxu0 %v3405_v7  ;;  %v3477_v7 = vld [vmem:[%s3622_s23 + $0x744] ss:$8 sps:$4 sm:$0xff]  }
  0xb4   : > { %2174 = vmatpush1.bf16.msra.mxu1 %v3400_v8  ;;  %v3472_v8 = vld [vmem:[%s3622_s23 + $0x340] ss:$8 sps:$4 sm:$0xff]  }
  0xb5   : > { %2386 = vmatpush1.bf16.msra.mxu0 %v3403_v9  ;;  %2175 = vmatprep.subr.bf16.mxu1 %v3408_v10  ;;  %v3475_v9 = vld [vmem:[%s3622_s23 + $0x740] ss:$8 sps:$4 sm:$0xff]   ;;  %v3480_v10 = vld [vmem:[%s3622_s23 + $0x354] ss:$8 sps:$4 sm:$0xff]  }
  0xb6   : > { %2387 = vmatprep.subr.bf16.mxu0 %v3411_v11  ;;  %v3483_v11 = vld [vmem:[%s3622_s23 + $0x754] ss:$8 sps:$4 sm:$0xff]  }
  0xb8   : > { %2176 = vmatpush1.bf16.msra.mxu1 %v3406_v12  ;;  %v3478_v12 = vld [vmem:[%s3622_s23 + $0x350] ss:$8 sps:$4 sm:$0xff]  }
  0xb9   : > { %2388 = vmatpush1.bf16.msra.mxu0 %v3409_v13  ;;  %2177 = vmatprep.subr.bf16.mxu1 %v3414_v14  ;;  %v3481_v13 = vld [vmem:[%s3622_s23 + $0x750] ss:$8 sps:$4 sm:$0xff]   ;;  %v3486_v14 = vld [vmem:[%s3622_s23 + $0x364] ss:$8 sps:$4 sm:$0xff]  }
  0xba   : > { %2389 = vmatprep.subr.bf16.mxu0 %v3417_v15  ;;  %v3489_v15 = vld [vmem:[%s3622_s23 + $0x764] ss:$8 sps:$4 sm:$0xff]  }
  0xbc   : > { %2178 = vmatpush1.bf16.msra.mxu1 %v3412_v16  ;;  %v3484_v16 = vld [vmem:[%s3622_s23 + $0x360] ss:$8 sps:$4 sm:$0xff]  }
  0xbd   : > { %2390 = vmatpush1.bf16.msra.mxu0 %v3415_v17  ;;  %2179 = vmatprep.subr.bf16.mxu1 %v3420_v18  ;;  %v3487_v17 = vld [vmem:[%s3622_s23 + $0x760] ss:$8 sps:$4 sm:$0xff]   ;;  %v3492_v18 = vld [vmem:[%s3622_s23 + $0x374] ss:$8 sps:$4 sm:$0xff]  }
  0xbe   : > { %2391 = vmatprep.subr.bf16.mxu0 %v3423_v19  ;;  %v3495_v19 = vld [vmem:[%s3622_s23 + $0x774] ss:$8 sps:$4 sm:$0xff]  }
  0xc0   : > { %2180 = vmatpush1.bf16.msra.mxu1 %v3418_v20  ;;  %v3490_v20 = vld [vmem:[%s3622_s23 + $0x370] ss:$8 sps:$4 sm:$0xff]  }
  0xc1   : > { %2392 = vmatpush1.bf16.msra.mxu0 %v3421_v21  ;;  %2181 = vmatprep.subr.bf16.mxu1 %v3426_v22  ;;  %v3493_v21 = vld [vmem:[%s3622_s23 + $0x770] ss:$8 sps:$4 sm:$0xff]   ;;  %v3498_v22 = vld [vmem:[%s3622_s23 + $0x384] ss:$8 sps:$4 sm:$0xff]  }
  0xc2   : > { %2393 = vmatprep.subr.bf16.mxu0 %v3429_v23  ;;  %v3501_v23 = vld [vmem:[%s3622_s23 + $0x784] ss:$8 sps:$4 sm:$0xff]  }
  0xc4   : > { %2182 = vmatpush1.bf16.msra.mxu1 %v3424_v24  ;;  %v3496_v24 = vld [vmem:[%s3622_s23 + $0x380] ss:$8 sps:$4 sm:$0xff]  }
  0xc5   : > { %2394 = vmatpush1.bf16.msra.mxu0 %v3427_v25  ;;  %2183 = vmatprep.subr.bf16.mxu1 %v3432_v26  ;;  %v3499_v25 = vld [vmem:[%s3622_s23 + $0x780] ss:$8 sps:$4 sm:$0xff]   ;;  %v3504_v26 = vld [vmem:[%s3622_s23 + $0x394] ss:$8 sps:$4 sm:$0xff]  }
  0xc6   : > { %2395 = vmatprep.subr.bf16.mxu0 %v3435_v27  ;;  %v3507_v27 = vld [vmem:[%s3622_s23 + $0x794] ss:$8 sps:$4 sm:$0xff]  }
  0xc8   : > { %2184 = vmatpush1.bf16.msra.mxu1 %v3430_v28  ;;  %v3502_v28 = vld [vmem:[%s3622_s23 + $0x390] ss:$8 sps:$4 sm:$0xff]  }
  0xc9   : > { %2396 = vmatpush1.bf16.msra.mxu0 %v3433_v29  ;;  %2185 = vmatprep.subr.bf16.mxu1 %v3438_v30  ;;  %v3505_v29 = vld [vmem:[%s3622_s23 + $0x790] ss:$8 sps:$4 sm:$0xff]   ;;  %v3510_v30 = vld [vmem:[%s3622_s23 + $0x3a4] ss:$8 sps:$4 sm:$0xff]  }
  0xca   : > { %2397 = vmatprep.subr.bf16.mxu0 %v3441_v31  ;;  %v3513_v31 = vld [vmem:[%s3622_s23 + $0x7a4] ss:$8 sps:$4 sm:$0xff]  }
  0xcc   : > { %2186 = vmatpush1.bf16.msra.mxu1 %v3436_v32  ;;  %v3508_v32 = vld [vmem:[%s3622_s23 + $0x3a0] ss:$8 sps:$4 sm:$0xff]  }
  0xcd   : > { %2398 = vmatpush1.bf16.msra.mxu0 %v3439_v33  ;;  %2187 = vmatprep.subr.bf16.mxu1 %v3444_v34  ;;  %v3511_v33 = vld [vmem:[%s3622_s23 + $0x7a0] ss:$8 sps:$4 sm:$0xff]   ;;  %v3516_v34 = vld [vmem:[%s3622_s23 + $0x3b4] ss:$8 sps:$4 sm:$0xff]  }
  0xce   : > { %2399 = vmatprep.subr.bf16.mxu0 %v3447_v35  ;;  %v3519_v35 = vld [vmem:[%s3622_s23 + $0x7b4] ss:$8 sps:$4 sm:$0xff]  }
  0xd0   : > { %2188 = vmatpush1.bf16.msra.mxu1 %v3442_v36  ;;  %v3514_v36 = vld [vmem:[%s3622_s23 + $0x3b0] ss:$8 sps:$4 sm:$0xff]  }
  0xd1   : > { %2400 = vmatpush1.bf16.msra.mxu0 %v3445_v37  ;;  %2210 = vmatprep.subr.bf16.mxu1 %v3450_v38  ;;  %v3517_v37 = vld [vmem:[%s3622_s23 + $0x7b0] ss:$8 sps:$4 sm:$0xff]   ;;  %v3522_v38 = vld [vmem:[%s3622_s23 + $0x3c4] ss:$8 sps:$4 sm:$0xff]  }
  0xd2   : > { %2422 = vmatprep.subr.bf16.mxu0 %v3453_v39  ;;  %v3525_v39 = vld [vmem:[%s3622_s23 + $0x7c4] ss:$8 sps:$4 sm:$0xff]  }
  0xd3   : > { %2190 = vmatmul.mubr.bf16.vlgmr.msra.gmra.mrb[0].mxu1 %v2776_v41  ;;  %v3523_v41 = vld [vmem:[%s3622_s23 + $0x7c0] ss:$8 sps:$4 sm:$0xff]  }
  0xd4   : > { %2402 = vmatmul.mubr.bf16.vlgmr.msra.gmra.mrb[0].mxu0 %v2784_v43  ;;  %2211 = vmatpush1.bf16.msra.mxu1 %v3448_v50  ;;  %v3528_v43 = vld [vmem:[%s3622_s23 + $0x3d4] ss:$8 sps:$4 sm:$0xff]   ;;  %v3534_v50 = vld [vmem:[%s3622_s23 + $0x3e4] ss:$8 sps:$4 sm:$0xff]  }
  0xd5   : > { %2423 = vmatpush1.bf16.msra.mxu0 %v3451_v51  ;;  %2212 = vmatprep.subr.bf16.mxu1 %v3456_v52  ;;  %v3537_v51 = vld [vmem:[%s3622_s23 + $0x7e4] ss:$8 sps:$4 sm:$0xff]   ;;  %v3532_v52 = vld [vmem:[%s3622_s23 + $0x3e0] ss:$8 sps:$4 sm:$0xff]  }
  0xd6   : > { %2424 = vmatprep.subr.bf16.mxu0 %v3459_v53  ;;  %2199 = vmatprep.mubr.bf16.mxu1 %v2793_v42  ;;  %v3535_v53 = vld [vmem:[%s3622_s23 + $0x7e0] ss:$8 sps:$4 sm:$0xff]   ;;  %v3540_v42 = vld [vmem:[%s3622_s23 + $0x3f4] ss:$8 sps:$4 sm:$0xff]  }
  0xd7   : > { %2411 = vmatprep.mubr.bf16.mxu0 %v2801_v45  ;;  %v3543_v45 = vld [vmem:[%s3622_s23 + $0x7f4] ss:$8 sps:$4 sm:$0xff]  }
  0xd8   : > { %2213 = vmatpush1.bf16.msra.mxu1 %v3454_v46  ;;  %v3538_v46 = vld [vmem:[%s3622_s23 + $0x3f0] ss:$8 sps:$4 sm:$0xff]  }
  0xd9   : > { %2425 = vmatpush1.bf16.msra.mxu0 %v3457_v47  ;;  %2214 = vmatprep.subr.bf16.mxu1 %v3462_v54  ;;  %v3541_v47 = vld [vmem:[%s3622_s23 + $0x7f0] ss:$8 sps:$4 sm:$0xff]  }
  0xda   : > { %2426 = vmatprep.subr.bf16.mxu0 %v3465_v55  ;;  %v342_v54 = vld [vmem:[%s3672_s27 + $0x98] sm:$0xff] }
  0xdb   : > { %2200 = vmatmul.mubr.bf16.gmra.mrb[4].mxu1 %v2792_v57  ;;  %v350_v55 = vld [vmem:[%s3672_s27 + $0xd8] sm:$0xff] }
  0xdc   : > { %2412 = vmatmul.mubr.bf16.gmra.mrb[4].mxu0 %v2800_v58  ;;  %2215 = vmatpush1.bf16.msra.mxu1 %v3460_v62  ;;  %v346_v57 = vld [vmem:[%s3672_s27 + $0xb8] sm:$0xff]  ;;  %v2778_v62 = vcombine.low %v3889_v56, %v3892_v59 }
  0xdd   : > { %2427 = vmatpush1.bf16.msra.mxu0 %v3463_v63  ;;  %2216 = vmatprep.subr.bf16.mxu1 %v3468_v0  ;;  %v354_v58 = vld [vmem:[%s3672_s27 + $0xf8] sm:$0xff]  ;;  %v2786_v63 = vcombine.low %v3895_v60, %v3898_v61  ;;  %v2795_v0 = vcombine.high %v342_v54, %v350_v55 }
  0xde   : > { %2428 = vmatprep.subr.bf16.mxu0 %v3471_v1  ;;  %2242 = vmatprep.mubr.bf16.mxu1 %v2779_v2  ;;  %v2803_v1 = vcombine.high %v346_v57, %v354_v58  ;;  %v2794_v2 = vcombine.low %v342_v54, %v350_v55 }
  0xdf   : > { %2454 = vmatprep.mubr.bf16.mxu0 %v2787_v3  ;;  %v2802_v3 = vcombine.low %v346_v57, %v354_v58 }
  0xe0   : > { %2217 = vmatpush1.bf16.msra.mxu1 %v3466_v4 }
  0xe1   : > { %2429 = vmatpush1.bf16.msra.mxu0 %v3469_v5  ;;  %2218 = vmatprep.subr.bf16.mxu1 %v3474_v6 }
  0xe2   : > { %2430 = vmatprep.subr.bf16.mxu0 %v3477_v7 }
  0xe4   : > { %2219 = vmatpush1.bf16.msra.mxu1 %v3472_v8 }
  0xe5   : > { %2431 = vmatpush1.bf16.msra.mxu0 %v3475_v9  ;;  %2220 = vmatprep.subr.bf16.mxu1 %v3480_v10 }
  0xe6   : > { %2432 = vmatprep.subr.bf16.mxu0 %v3483_v11 }
  0xe8   : > { %2221 = vmatpush1.bf16.msra.mxu1 %v3478_v12 }
  0xe9   : > { %2433 = vmatpush1.bf16.msra.mxu0 %v3481_v13  ;;  %2222 = vmatprep.subr.bf16.mxu1 %v3486_v14 }
  0xea   : > { %2434 = vmatprep.subr.bf16.mxu0 %v3489_v15 }
  0xec   : > { %2223 = vmatpush1.bf16.msra.mxu1 %v3484_v16 }
  0xed   : > { %2435 = vmatpush1.bf16.msra.mxu0 %v3487_v17  ;;  %2224 = vmatprep.subr.bf16.mxu1 %v3492_v18 }
  0xee   : > { %2436 = vmatprep.subr.bf16.mxu0 %v3495_v19 }
  0xf0   : > { %2225 = vmatpush1.bf16.msra.mxu1 %v3490_v20 }
  0xf1   : > { %2437 = vmatpush1.bf16.msra.mxu0 %v3493_v21  ;;  %2226 = vmatprep.subr.bf16.mxu1 %v3498_v22 }
  0xf2   : > { %2438 = vmatprep.subr.bf16.mxu0 %v3501_v23 }
  0xf4   : > { %2227 = vmatpush1.bf16.msra.mxu1 %v3496_v24 }
  0xf5   : > { %2439 = vmatpush1.bf16.msra.mxu0 %v3499_v25  ;;  %2228 = vmatprep.subr.bf16.mxu1 %v3504_v26 }
  0xf6   : > { %2440 = vmatprep.subr.bf16.mxu0 %v3507_v27 }
  0xf8   : > { %2229 = vmatpush1.bf16.msra.mxu1 %v3502_v28  ;;  %v3568_v28 = vmov (%p2503_p5), 0.0  }
  0xf9   : > { %2441 = vmatpush1.bf16.msra.mxu0 %v3505_v29  ;;  %2230 = vmatprep.subr.bf16.mxu1 %v3510_v30  ;;  %2509 = vst [vmem:[%s4021_s3] sm:$0xff] (%p2503_p5), %v3568_v28  ;;  %2510 = vst [vmem:[%s4021_s3 + $0x8] sm:$0xff] (%p2503_p5), %v3568_v28 }
  0xfa   : > { %2442 = vmatprep.subr.bf16.mxu0 %v3513_v31  ;;  %2511 = vst [vmem:[%s4022_s4] sm:$0xff] (%p2503_p5), %v3568_v28  ;;  %2512 = vst [vmem:[%s4022_s4 + $0x8] sm:$0xff] (%p2503_p5), %v3568_v28 }
  0xfc   : > { %2231 = vmatpush1.bf16.msra.mxu1 %v3508_v32 }
  0xfd   : > { %2443 = vmatpush1.bf16.msra.mxu0 %v3511_v33  ;;  %2232 = vmatprep.subr.bf16.mxu1 %v3516_v34 }
  0xfe   : > { %2444 = vmatprep.subr.bf16.mxu0 %v3519_v35 }
 0x100   : > { %2233 = vmatpush1.bf16.msra.mxu1 %v3514_v36 }
 0x101   : > { %2445 = vmatpush1.bf16.msra.mxu0 %v3517_v37  ;;  %2234 = vmatprep.subr.bf16.mxu1 %v3522_v38 }
 0x102   : > { %2446 = vmatprep.subr.bf16.mxu0 %v3525_v39 }
 0x104   : > { %2235 = vmatpush1.bf16.msra.mxu1 %v3520_v40 }
 0x105   : > { %2447 = vmatpush1.bf16.msra.mxu0 %v3523_v41  ;;  %2236 = vmatprep.subr.bf16.mxu1 %v3528_v43 }
 0x106   : > { %2448 = vmatprep.subr.bf16.mxu0 %v3531_v44 }
 0x108   : > { %2237 = vmatpush1.bf16.msra.mxu1 %v3526_v48 }
 0x109   : > { %2449 = vmatpush1.bf16.msra.mxu0 %v3529_v49  ;;  %2238 = vmatprep.subr.bf16.mxu1 %v3534_v50 }
 0x10a   : > { %2450 = vmatprep.subr.bf16.mxu0 %v3537_v51 }
 0x10c   : > { %2239 = vmatpush1.bf16.msra.mxu1 %v3532_v52 }
 0x10d   : > { %2451 = vmatpush1.bf16.msra.mxu0 %v3535_v53  ;;  %2240 = vmatprep.subr.bf16.mxu1 %v3540_v42 }
 0x10e   : > { %2452 = vmatprep.subr.bf16.mxu0 %v3543_v45 }
 0x110   : > { %2241 = vmatpush1.bf16.msra.mxu1 %v3538_v46 }
 0x111   : > { %2453 = vmatpush1.bf16.msra.mxu0 %v3541_v47 }
 0x113   : > { %2243 = vmatmul.mubr.bf16.vlgmr.msra.gmra.mrb[0].mxu1 %v2778_v62 }
 0x114   : > { %2455 = vmatmul.mubr.bf16.vlgmr.msra.gmra.mrb[0].mxu0 %v2786_v63  ;;  %2252 = vmatprep.mubr.bf16.mxu1 %v2795_v0 }
 0x115   : > { %2464 = vmatprep.mubr.bf16.mxu0 %v2803_v1 }
 0x11b   : > { %2253 = vmatmul.mubr.bf16.gmra.mrb[4].mxu1 %v2794_v2 }
 0x11c   : > { %2465 = vmatmul.mubr.bf16.gmra.mrb[4].mxu0 %v2802_v3 }
 0x1e6   : > { %v2244_v4 = vpop.f32.mrb[0].mxu1 }
 0x1e7   : > { %v2456_v5 = vpop.f32.mrb[0].mxu0  ;;  %v2246_v59 = vpop.f32.mrb[1].mxu1 }
 0x1e8   : > { %v3079_v56 = vadd.f32 %v2456_v5, %v2244_v4  ;;  %v2458_v60 = vpop.f32.mrb[1].mxu0  ;;  %v2248_v6 = vpop.f32.mrb[2].mxu1 }
 0x1e9   : > { %v3080_v61 = vadd.f32 %v2458_v60, %v2246_v59  ;;  %v2460_v7 = vpop.f32.mrb[2].mxu0  ;;  %v2250_v9 = vpop.f32.mrb[3].mxu1 }
 0x1ea   : > { %v3081_v8 = vadd.f32 %v2460_v7, %v2248_v6  ;;  %v2462_v10 = vpop.f32.mrb[3].mxu0 }
 0x1eb   : > { %v3074_v11 = vpack.c.bf16 %v3080_v61, %v3079_v56  ;;  %v3082_v12 = vadd.f32 %v2462_v10, %v2250_v9 }
 0x1ed   : > { %2499 = vst [vmem:[%s308_s5] sm:$0xff] %v3074_v11  ;;  %v3075_v13 = vpack.c.bf16 %v3082_v12, %v3081_v8 }
 0x1ee   : > { %v2254_v14 = vpop.f32.mrb[4].mxu1 }
 0x1ef   : > { %2500 = vst [vmem:[%s308_s5 + $0x8] sm:$0xff] %v3075_v13  ;;  %v2466_v15 = vpop.f32.mrb[4].mxu0  ;;  %v2256_v17 = vpop.f32.mrb[5].mxu1 }
 0x1f0   : > { %v3083_v16 = vadd.f32 %v2466_v15, %v2254_v14  ;;  %v2468_v18 = vpop.f32.mrb[5].mxu0  ;;  %v2258_v20 = vpop.f32.mrb[6].mxu1 }
 0x1f1   : > { %v3084_v19 = vadd.f32 %v2468_v18, %v2256_v17  ;;  %v2470_v21 = vpop.f32.mrb[6].mxu0  ;;  %v2260_v23 = vpop.f32.mrb[7].mxu1  ;;  %2508 = sbr.rel (!%p2503_p5) target bundleno = 504 (0x1f8), region = 32 }
 0x1f2   : > { %v3085_v22 = vadd.f32 %v2470_v21, %v2258_v20  ;;  %v2472_v24 = vpop.f32.mrb[7].mxu0 }
 0x1f3   : > { %v3076_v25 = vpack.c.bf16 %v3084_v19, %v3083_v16  ;;  %v3086_v26 = vadd.f32 %v2472_v24, %v2260_v23 }
 0x1f5   : > { %2501 = vst [vmem:[%s308_s5 + $0x10] sm:$0xff] %v3076_v25  ;;  %v3077_v27 = vpack.c.bf16 %v3086_v26, %v3085_v22 }
 0x1f7   : > { %2502 = vst [vmem:[%s308_s5 + $0x18] sm:$0xff] %v3077_v27 }
 0x1f8 PF: > { %v2513_v29 = vadd.f32 %v3081_v8, %v3079_v56  ;;  %v2522_v30 = vadd.f32 %v3082_v12, %v3080_v61  ;;  %v2531_v31 = vmul.f32 %v3079_v56, %v3079_v56  ;;  %v2533_v32 = vmul.f32 %v3081_v8, %v3081_v8  ;;  %v2557_v56 = vld [vmem:[%s4021_s3] sm:$0xff]  ;;  %v2558_v59 = vld [vmem:[%s4021_s3 + $0x8] sm:$0xff] }
 0x1f9   : > { %v2535_v33 = vmul.f32 %v3083_v16, %v3083_v16  ;;  %v2537_v34 = vmul.f32 %v3085_v22, %v3085_v22  ;;  %v2532_v35 = vmul.f32 %v3080_v61, %v3080_v61  ;;  %v2534_v36 = vmul.f32 %v3082_v12, %v3082_v12  ;;  %v2563_v8 = vld [vmem:[%s4022_s4] sm:$0xff]  ;;  %v2564_v13 = vld [vmem:[%s4022_s4 + $0x8] sm:$0xff] }
 0x1fa   : > { %v2514_v37 = vadd.f32 %v3083_v16, %v2513_v29  ;;  %v2523_v38 = vadd.f32 %v3084_v19, %v2522_v30  ;;  %v2539_v39 = vadd.f32 %v2533_v32, %v2531_v31  ;;  %v2536_v40 = vmul.f32 %v3084_v19, %v3084_v19 }
 0x1fb   : > { %v2538_v41 = vmul.f32 %v3086_v26, %v3086_v26  ;;  %v2548_v43 = vadd.f32 %v2534_v36, %v2532_v35 }
 0x1fc   : > { %v2515_v44 = vadd.f32 %v3085_v22, %v2514_v37  ;;  %v2524_v48 = vadd.f32 %v3086_v26, %v2523_v38  ;;  %v2540_v49 = vadd.f32 %v2539_v39, %v2535_v33 }
 0x1fd   : > { %v2549_v50 = vadd.f32 %v2548_v43, %v2536_v40 }
 0x1fe   : > { %v2516_v51 = vrot.slane %v2515_v44, 4  ;;  %v2525_v52 = vrot.slane %v2524_v48, 4  ;;  %v2541_v53 = vadd.f32 %v2540_v49, %v2537_v34 }
 0x1ff   : > { %v2550_v42 = vadd.f32 %v2549_v50, %v2538_v41 }
 0x200   : > { %v2517_v45 = vadd.f32 %v2516_v51, %v2515_v44  ;;  %v2526_v46 = vadd.f32 %v2525_v52, %v2524_v48  ;;  %v2542_v47 = vrot.slane %v2541_v53, 4 }
 0x201   : > { %v2551_v54 = vrot.slane %v2550_v42, 4 }
 0x202   : > { %v2518_v55 = vrot.slane %v2517_v45, 2  ;;  %v2527_v57 = vrot.slane %v2526_v46, 2  ;;  %v2543_v58 = vadd.f32 %v2542_v47, %v2541_v53 }
 0x203   : > { %v2552_v62 = vadd.f32 %v2551_v54, %v2550_v42 }
 0x204   : > { %v2519_v63 = vadd.f32 %v2518_v55, %v2517_v45  ;;  %v2528_v0 = vadd.f32 %v2527_v57, %v2526_v46  ;;  %v2544_v1 = vrot.slane %v2543_v58, 2 }
 0x205   : > { %v2553_v2 = vrot.slane %v2552_v62, 2 }
 0x206   : > { %v2520_v3 = vrot.slane %v2519_v63, 1  ;;  %v2529_v4 = vrot.slane %v2528_v0, 1  ;;  %v2545_v5 = vadd.f32 %v2544_v1, %v2543_v58 }
 0x207   : > { %v2554_v60 = vadd.f32 %v2553_v2, %v2552_v62 }
 0x208   : > { %v2521_v61 = vadd.f32 %v2520_v3, %v2519_v63  ;;  %v2530_v6 = vadd.f32 %v2529_v4, %v2528_v0  ;;  %v2546_v7 = vrot.slane %v2545_v5, 1 }
 0x209   : > { %v2555_v9 = vrot.slane %v2554_v60, 1 }
 0x20a   : > { %v2559_v10 = vadd.f32 %v2557_v56, %v2521_v61  ;;  %v2560_v11 = vadd.f32 %v2558_v59, %v2530_v6  ;;  %v2547_v12 = vadd.f32 %v2546_v7, %v2545_v5 }
 0x20b   : > { %v2556_v14 = vadd.f32 %v2555_v9, %v2554_v60 }
 0x20c   : > { %2561 = vst [vmem:[%s4021_s3] sm:$0xff] %v2559_v10  ;;  %2562 = vst [vmem:[%s4021_s3 + $0x8] sm:$0xff] %v2560_v11  ;;  %v2565_v15 = vadd.f32 %v2563_v8, %v2547_v12 }
 0x20d   : > { %v2566_v16 = vadd.f32 %v2564_v13, %v2556_v14 }
 0x20e   : > { %2567 = vst [vmem:[%s4022_s4] sm:$0xff] %v2565_v15 }
 0x20f   : > { %2568 = vst [vmem:[%s4022_s4 + $0x8] sm:$0xff] %v2566_v16 }
 0x210 PF: > { %s15_s17 = sadd.s32 1, %s3566_s17   ;;  %s4023_s15 = smov %s3562_s16 }
 0x211   : > { %p12_p6 = scmp.ge.s32.totalorder %s15_s17, 6   ;;  %s4024_s16 = smov %s4026_s18 }
 0x213   :  { %14 = sbr.rel (!%p12_p6) target bundleno = 2 (0x2), region = 89 }

// kernel: generator_forward.12
= control target key start
LH: loop header
LB: loop body
LE: loop exit
PB: predicated region body
PF: predicated region fallthrough
CT: control target
= control target key end

     0   :  { %s605_s12 = smov 0   ;;  %s607_s13 = smov 0   ;;  %s651_s0 = inlined_call_operand.vmem [shape: bf16[4,32,256], index: 0, kind: input, shape index: {}]   ;;  %s652_s1 = inlined_call_operand.vmem [shape: f32[1,256], index: 1, kind: input, shape index: {}]   ;;  %s653_s2 = inlined_call_operand.vmem [shape: f32[1,256], index: 2, kind: input, shape index: {}]   ;;  %s654_s3 = inlined_call_operand.vmem [shape: bf16[4,32,256], index: 3, kind: output, shape index: {}]  }
   0x1   :  { %s609_s14 = smov 0  }
   0x2 LB: > { %s32_s15 = sadd.s32 1, %s579_s13  ;;  %p520_p0 = scmp.ge.s32.totalorder %s583_s14, 1  ;;  %s583_s14 = sphi %s609_s14, %s13_s14   ;;  %s579_s13 = sphi %s607_s13, %s656_s13   ;;  %s575_s12 = sphi %s605_s12, %s655_s12  }
   0x3   : > { %p34_p1 = scmp.ge.s32.totalorder %s32_s15, 4  ;;  %p195_p2 = scmp.lt.s32.totalorder %s583_s14, 5 }
   0x5   : > { %s658_s15 = smov (%p34_p1, %s32_s15), 0  ;;  %p196_p3 = pnand %p520_p0, %p195_p2 }
   0x6   : > { %p247_p4 = scmp.lt.s32.totalorder (!%p196_p3), %s575_s12, 3  ;;  %v301_v0 = vlaneseq (!%p196_p3)  ;;  %v299_v2 = vld [vmem:[%s652_s1] sm:$0x3] (!%p196_p3) }
   0x7   : > { %199 = sbr.rel (%p196_p3) target bundleno = 30 (0x1e), region = 32  ;;  %v319_v3 = vld [vmem:[%s653_s2] sm:$0x3] (!%p196_p3) }
   0x8   : > { %v302_v1 = vshrl.u32 (!%p196_p3), %v301_v0, 7 }
   0xa   : > { %v303_v4 = vsub.s32 (!%p196_p3), 0, %v302_v1  ;;  %v307_v5 = vsub.s32 (!%p196_p3), 1, %v302_v1 }
   0xc   : > { %v304_v7 = vrot.slane (!%p196_p3), %v299_v2, %v303_v4  ;;  %v308_v8 = vrot.slane (!%p196_p3), %v299_v2, %v307_v5  ;;  %v324_v9 = vrot.slane (!%p196_p3), %v319_v3, %v303_v4  ;;  %v328_v10 = vrot.slane (!%p196_p3), %v319_v3, %v307_v5 }
   0xe   : > { %s660_s12 = smov (!%p247_p4, %s575_s12), 3 }
   0xf   : > { %s531_s20 = sshll.u32 %s660_s12, 5 }
  0x10   : > { %s258_s23 = scalar_lea.vmem %s651_s0, %s531_s20  ;;  %s284_s26 = scalar_lea.vmem %s654_s3, %s531_s20 }
  0x11   : > { %v287_v6 = vld [vmem:[%s258_s23] sm:$0xff]  ;;  %v288_v11 = vld [vmem:[%s258_s23 + $0x8] sm:$0xff]  ;;  %v289_v12 = vld [vmem:[%s258_s23 + $0x10] sm:$0xff] }
  0x12   : > { %v291_v13 = vunpack.c.l.bf16 %v287_v6  ;;  %v292_v14 = vunpack.c.h.bf16 %v287_v6  ;;  %v293_v15 = vunpack.c.l.bf16 %v288_v11  ;;  %v294_v16 = vunpack.c.h.bf16 %v288_v11  ;;  %v290_v17 = vld [vmem:[%s258_s23 + $0x18] sm:$0xff] }
  0x13   : > { %v295_v18 = vunpack.c.l.bf16 %v289_v12  ;;  %v296_v19 = vunpack.c.h.bf16 %v289_v12  ;;  %v297_v20 = vunpack.c.l.bf16 %v290_v17  ;;  %v298_v21 = vunpack.c.h.bf16 %v290_v17 }
  0x14   : > { %v311_v22 = vmul.f32 %v304_v7, %v291_v13  ;;  %v312_v23 = vmul.f32 %v308_v8, %v292_v14  ;;  %v313_v24 = vmul.f32 %v304_v7, %v293_v15  ;;  %v314_v25 = vmul.f32 %v308_v8, %v294_v16 }
  0x15   : > { %v315_v26 = vmul.f32 %v304_v7, %v295_v18  ;;  %v316_v27 = vmul.f32 %v308_v8, %v296_v19  ;;  %v317_v28 = vmul.f32 %v304_v7, %v297_v20  ;;  %v318_v29 = vmul.f32 %v308_v8, %v298_v21 }
  0x16   : > { %v331_v30 = vadd.f32 %v324_v9, %v311_v22  ;;  %v332_v31 = vadd.f32 %v328_v10, %v312_v23  ;;  %v333_v32 = vadd.f32 %v324_v9, %v313_v24  ;;  %v334_v33 = vadd.f32 %v328_v10, %v314_v25 }
  0x17   : > { %v335_v34 = vadd.f32 %v324_v9, %v315_v26  ;;  %v336_v35 = vadd.f32 %v328_v10, %v316_v27  ;;  %v337_v36 = vadd.f32 %v324_v9, %v317_v28  ;;  %v338_v37 = vadd.f32 %v328_v10, %v318_v29 }
  0x18   : > { %v339_v38 = vmax.f32 %v331_v30, 0.0  ;;  %v340_v39 = vmax.f32 %v332_v31, 0.0  ;;  %v341_v40 = vmax.f32 %v333_v32, 0.0  ;;  %v342_v41 = vmax.f32 %v334_v33, 0.0 }
  0x19   : > { %v343_v42 = vmax.f32 %v335_v34, 0.0  ;;  %v344_v43 = vmax.f32 %v336_v35, 0.0  ;;  %v345_v44 = vmax.f32 %v337_v36, 0.0  ;;  %v346_v45 = vmax.f32 %v338_v37, 0.0 }
  0x1a   : > { %v533_v46 = vpack.c.bf16 %v340_v39, %v339_v38  ;;  %v534_v47 = vpack.c.bf16 %v342_v41, %v341_v40 }
  0x1b   : > { %v535_v48 = vpack.c.bf16 %v344_v43, %v343_v42  ;;  %v536_v49 = vpack.c.bf16 %v346_v45, %v345_v44 }
  0x1c   : > { %371 = vst [vmem:[%s284_s26] sm:$0xff] %v533_v46  ;;  %372 = vst [vmem:[%s284_s26 + $0x8] sm:$0xff] %v534_v47 }
  0x1d   : > { %373 = vst [vmem:[%s284_s26 + $0x10] sm:$0xff] %v535_v48  ;;  %374 = vst [vmem:[%s284_s26 + $0x18] sm:$0xff] %v536_v49 }
  0x1e PF: > { %s13_s14 = sadd.s32 1, %s583_s14   ;;  %s655_s12 = smov %s579_s13 }
  0x1f   : > { %p10_p5 = scmp.ge.s32.totalorder %s13_s14, 6   ;;  %s656_s13 = smov %s658_s15 }
  0x21   :  { %12 = sbr.rel (!%p10_p5) target bundleno = 2 (0x2), region = 68 }

// kernel: generator_forward.14
= control target key start
LH: loop header
LB: loop body
LE: loop exit
PB: predicated region body
PF: predicated region fallthrough
CT: control target
= control target key end

     0   :  { %s768_s12 = smov 0   ;;  %s770_s13 = smov 0   ;;  %s870_s0 = inlined_call_operand.vmem [shape: bf16[4,128,128], index: 0, kind: input, shape index: {}]   ;;  %s871_s1 = inlined_call_operand.vmem [shape: f32[1,128], index: 1, kind: input, shape index: {}]   ;;  %s872_s2 = inlined_call_operand.vmem [shape: f32[1,128], index: 2, kind: input, shape index: {}]   ;;  %s873_s3 = inlined_call_operand.vmem [shape: bf16[4,128,128], index: 3, kind: output, shape index: {}]  }
   0x1   :  { %s772_s14 = smov 0  }
   0x2 LB: > { %s32_s15 = sadd.s32 1, %s742_s13  ;;  %p571_p0 = scmp.ge.s32.totalorder %s746_s14, 1  ;;  %s746_s14 = sphi %s772_s14, %s13_s14   ;;  %s742_s13 = sphi %s770_s13, %s875_s13   ;;  %s738_s12 = sphi %s768_s12, %s874_s12  }
   0x3   : > { %p34_p1 = scmp.ge.s32.totalorder %s32_s15, 4  ;;  %p188_p2 = scmp.lt.s32.totalorder %s746_s14, 5 }
   0x5   : > { %s877_s15 = smov (%p34_p1, %s32_s15), 0  ;;  %p189_p3 = pnand %p571_p0, %p188_p2 }
   0x6   : > { %p233_p4 = scmp.lt.s32.totalorder (!%p189_p3), %s738_s12, 3  ;;  %v799_v0 = vld [vmem:[%s871_s1] ss:$0 sm:$0xff] (!%p189_p3) }
   0x7   : > { %192 = sbr.rel (%p189_p3) target bundleno = 40 (0x28), region = 32  ;;  %v808_v9 = vld [vmem:[%s872_s2] ss:$0 sm:$0xff] (!%p189_p3) }
   0xe   : > { %s879_s12 = smov (!%p233_p4, %s738_s12), 3 }
   0xf   : > { %s596_s16 = sshll.u32 %s879_s12, 6 }
  0x10   : > { %s794_s19 = scalar_lea.vmem %s870_s0, %s596_s16  ;;  %s833_s26 = scalar_lea.vmem %s873_s3, %s596_s16 }
  0x11   : > { %v615_v1 = vld [vmem:[%s794_s19] sm:$0xff]   ;;  %v686_v2 = vld [vmem:[%s794_s19 + $0x8] sm:$0xff]   ;;  %v687_v3 = vld [vmem:[%s794_s19 + $0x10] sm:$0xff]  }
  0x12   : > { %v616_v4 = vunpack.c.l.bf16 %v615_v1  ;;  %v617_v5 = vunpack.c.h.bf16 %v615_v1  ;;  %v620_v6 = vunpack.c.l.bf16 %v686_v2  ;;  %v621_v7 = vunpack.c.h.bf16 %v686_v2  ;;  %v688_v8 = vld [vmem:[%s794_s19 + $0x18] sm:$0xff]   ;;  %v689_v30 = vld [vmem:[%s794_s19 + $0x20] sm:$0xff]   ;;  %v690_v35 = vld [vmem:[%s794_s19 + $0x28] sm:$0xff]  }
  0x13   : > { %v624_v10 = vunpack.c.l.bf16 %v687_v3  ;;  %v625_v11 = vunpack.c.h.bf16 %v687_v3  ;;  %v628_v12 = vunpack.c.l.bf16 %v688_v8  ;;  %v629_v13 = vunpack.c.h.bf16 %v688_v8  ;;  %v691_v40 = vld [vmem:[%s794_s19 + $0x30] sm:$0xff]   ;;  %v692_v45 = vld [vmem:[%s794_s19 + $0x38] sm:$0xff]  }
  0x14   : > { %v303_v14 = vmul.f32 %v616_v4, %v799_v0  ;;  %v304_v15 = vmul.f32 %v617_v5, %v799_v0  ;;  %v305_v16 = vmul.f32 %v620_v6, %v799_v0  ;;  %v306_v17 = vmul.f32 %v621_v7, %v799_v0 }
  0x15   : > { %v307_v18 = vmul.f32 %v624_v10, %v799_v0  ;;  %v308_v19 = vmul.f32 %v625_v11, %v799_v0  ;;  %v309_v20 = vmul.f32 %v628_v12, %v799_v0  ;;  %v310_v21 = vmul.f32 %v629_v13, %v799_v0 }
  0x16   : > { %v326_v22 = vadd.f32 %v808_v9, %v303_v14  ;;  %v327_v23 = vadd.f32 %v808_v9, %v304_v15  ;;  %v328_v24 = vadd.f32 %v808_v9, %v305_v16  ;;  %v329_v25 = vadd.f32 %v808_v9, %v306_v17 }
  0x17   : > { %v330_v26 = vadd.f32 %v808_v9, %v307_v18  ;;  %v331_v27 = vadd.f32 %v808_v9, %v308_v19  ;;  %v332_v28 = vadd.f32 %v808_v9, %v309_v20  ;;  %v333_v29 = vadd.f32 %v808_v9, %v310_v21 }
  0x18   : > { %v342_v31 = vmax.f32 %v326_v22, 0.0  ;;  %v343_v32 = vmax.f32 %v327_v23, 0.0  ;;  %v344_v33 = vmax.f32 %v328_v24, 0.0  ;;  %v345_v34 = vmax.f32 %v329_v25, 0.0 }
  0x19   : > { %v346_v36 = vmax.f32 %v330_v26, 0.0  ;;  %v347_v37 = vmax.f32 %v331_v27, 0.0  ;;  %v348_v38 = vmax.f32 %v332_v28, 0.0  ;;  %v349_v39 = vmax.f32 %v333_v29, 0.0 }
  0x1a   : > { %v649_v41 = vpack.c.bf16 %v343_v32, %v342_v31  ;;  %v654_v42 = vpack.c.bf16 %v345_v34, %v344_v33  ;;  %v632_v43 = vunpack.c.l.bf16 %v689_v30  ;;  %v633_v44 = vunpack.c.h.bf16 %v689_v30 }
  0x1b   : > { %v659_v46 = vpack.c.bf16 %v347_v37, %v346_v36  ;;  %v664_v47 = vpack.c.bf16 %v349_v39, %v348_v38  ;;  %v636_v48 = vunpack.c.l.bf16 %v690_v35  ;;  %v637_v49 = vunpack.c.h.bf16 %v690_v35 }
  0x1c   : > { %650 = vst [vmem:[%s833_s26] sm:$0xff] %v649_v41   ;;  %693 = vst [vmem:[%s833_s26 + $0x8] sm:$0xff] %v654_v42   ;;  %v311_v50 = vmul.f32 %v632_v43, %v799_v0  ;;  %v312_v51 = vmul.f32 %v633_v44, %v799_v0  ;;  %v640_v52 = vunpack.c.l.bf16 %v691_v40  ;;  %v641_v53 = vunpack.c.h.bf16 %v691_v40 }
  0x1d   : > { %694 = vst [vmem:[%s833_s26 + $0x10] sm:$0xff] %v659_v46   ;;  %695 = vst [vmem:[%s833_s26 + $0x18] sm:$0xff] %v664_v47   ;;  %v313_v54 = vmul.f32 %v636_v48, %v799_v0  ;;  %v314_v55 = vmul.f32 %v637_v49, %v799_v0  ;;  %v644_v56 = vunpack.c.l.bf16 %v692_v45  ;;  %v645_v57 = vunpack.c.h.bf16 %v692_v45 }
  0x1e   : > { %v334_v58 = vadd.f32 %v808_v9, %v311_v50  ;;  %v335_v59 = vadd.f32 %v808_v9, %v312_v51  ;;  %v315_v60 = vmul.f32 %v640_v52, %v799_v0  ;;  %v316_v61 = vmul.f32 %v641_v53, %v799_v0 }
  0x1f   : > { %v336_v62 = vadd.f32 %v808_v9, %v313_v54  ;;  %v337_v63 = vadd.f32 %v808_v9, %v314_v55  ;;  %v317_v1 = vmul.f32 %v644_v56, %v799_v0  ;;  %v318_v2 = vmul.f32 %v645_v57, %v799_v0 }
  0x20   : > { %v350_v3 = vmax.f32 %v334_v58, 0.0  ;;  %v351_v4 = vmax.f32 %v335_v59, 0.0  ;;  %v338_v5 = vadd.f32 %v808_v9, %v315_v60  ;;  %v339_v6 = vadd.f32 %v808_v9, %v316_v61 }
  0x21   : > { %v352_v7 = vmax.f32 %v336_v62, 0.0  ;;  %v353_v8 = vmax.f32 %v337_v63, 0.0  ;;  %v340_v10 = vadd.f32 %v808_v9, %v317_v1  ;;  %v341_v11 = vadd.f32 %v808_v9, %v318_v2 }
  0x22   : > { %v669_v12 = vpack.c.bf16 %v351_v4, %v350_v3  ;;  %v354_v13 = vmax.f32 %v338_v5, 0.0  ;;  %v355_v14 = vmax.f32 %v339_v6, 0.0 }
  0x23   : > { %v674_v15 = vpack.c.bf16 %v353_v8, %v352_v7  ;;  %v356_v0 = vmax.f32 %v340_v10, 0.0  ;;  %v357_v16 = vmax.f32 %v341_v11, 0.0 }
  0x24   : > { %696 = vst [vmem:[%s833_s26 + $0x20] sm:$0xff] %v669_v12   ;;  %v679_v17 = vpack.c.bf16 %v355_v14, %v354_v13 }
  0x25   : > { %697 = vst [vmem:[%s833_s26 + $0x28] sm:$0xff] %v674_v15   ;;  %v684_v18 = vpack.c.bf16 %v357_v16, %v356_v0 }
  0x26   : > { %698 = vst [vmem:[%s833_s26 + $0x30] sm:$0xff] %v679_v17  }
  0x27   : > { %699 = vst [vmem:[%s833_s26 + $0x38] sm:$0xff] %v684_v18  }
  0x28 PF: > { %s13_s14 = sadd.s32 1, %s746_s14   ;;  %s874_s12 = smov %s742_s13 }
  0x29   : > { %p10_p5 = scmp.ge.s32.totalorder %s13_s14, 6   ;;  %s875_s13 = smov %s877_s15 }
  0x2b   :  { %12 = sbr.rel (!%p10_p5) target bundleno = 2 (0x2), region = 68 }

// kernel: generator_forward.13
= control target key start
LH: loop header
LB: loop body
LE: loop exit
PB: predicated region body
PF: predicated region fallthrough
CT: control target
= control target key end

     0   :  { %s2543_s15 = smov 0   ;;  %s2545_s16 = smov 0   ;;  %s2874_s0 = inlined_call_operand.vmem [shape: bf16[4,128,1024], index: 0, kind: input, shape index: {}]   ;;  %s2875_s1 = inlined_call_operand.vmem [shape: bf16[4,1024,128], index: 1, kind: input, shape index: {}]   ;;  %s2876_s2 = inlined_call_operand.vmem [shape: bf16[4,128,128], index: 2, kind: output, shape index: {0}]   ;;  %s2877_s3 = inlined_call_operand.vmem [shape: f32[8,128], index: 3, kind: output, shape index: {1}]   ;;  %s2878_s4 = inlined_call_operand.vmem [shape: f32[8,128], index: 4, kind: output, shape index: {2}]  }
   0x1   :  { %s2547_s17 = smov 0  }
   0x2 LB: > { %s30_s18 = sadd.s32 1, %s2511_s16  ;;  %p1925_p0 = scmp.ge.s32.totalorder %s2515_s17, 1  ;;  %s2515_s17 = sphi %s2547_s17, %s15_s17   ;;  %s2511_s16 = sphi %s2545_s16, %s2880_s16   ;;  %s2507_s15 = sphi %s2543_s15, %s2879_s15  }
   0x3   : > { %p32_p1 = scmp.ge.s32.totalorder %s30_s18, 4  ;;  %p213_p2 = scmp.lt.s32.totalorder %s2515_s17, 5 }
   0x5   : > { %s2882_s18 = smov (%p32_p1, %s30_s18), 0  ;;  %p214_p3 = pnand %p1925_p0, %p213_p2 }
   0x6   : > { %p268_p4 = scmp.lt.s32.totalorder (!%p214_p3), %s2507_s15, 3  ;;  %p1672_p5 = scmp.eq.s32.totalorder (!%p214_p3), %s2507_s15, 0 }
   0x7   : > { %217 = sbr.rel (%p214_p3) target bundleno = 443 (0x1bb), region = 28 }
   0xe   : > { %s2565_s19 = scalar_select %p268_p4, %s2507_s15, 3 }
  0x10   : > { %s2081_s20 = sshll.u32 %s2565_s19, 9  ;;  %s2083_s27 = sshll.u32 %s2565_s19, 6 }
  0x11   : > { %s2573_s23 = scalar_lea.vmem %s2875_s1, %s2081_s20  ;;  %s2610_s26 = scalar_lea.vmem %s2874_s0, %s2081_s20 }
  0x12   : > { %v2429_v0 = vld [vmem:[%s2573_s23 + $0x40] sm:$0xff]   ;;  %v2433_v4 = vld [vmem:[%s2573_s23 + $0x48] sm:$0xff]   ;;  %v2437_v8 = vld [vmem:[%s2573_s23 + $0x50] sm:$0xff]   ;;  %s2753_s30 = scalar_lea.vmem %s2876_s2, %s2083_s27 }
  0x13   : > { %v2430_v1 = vld [vmem:[%s2573_s23 + $0xc0] sm:$0xff]   ;;  %2148 = vmatprep.subr.bf16.mxu0 %v2429_v0  ;;  %v2434_v5 = vld [vmem:[%s2573_s23 + $0xc8] sm:$0xff]   ;;  %v2438_v9 = vld [vmem:[%s2573_s23 + $0xd0] sm:$0xff]  }
  0x14   : > { %v2431_v2 = vld [vmem:[%s2573_s23] sm:$0xff]   ;;  %2212 = vmatprep.subr.bf16.mxu1 %v2430_v1  ;;  %v2435_v6 = vld [vmem:[%s2573_s23 + $0x8] sm:$0xff]   ;;  %v2439_v10 = vld [vmem:[%s2573_s23 + $0x10] sm:$0xff]  }
  0x15   : > { %v2432_v3 = vld [vmem:[%s2573_s23 + $0x80] sm:$0xff]   ;;  %2149 = vmatpush3.bf16.msra.mxu0 %v2431_v2  ;;  %v2436_v7 = vld [vmem:[%s2573_s23 + $0x88] sm:$0xff]   ;;  %v2440_v11 = vld [vmem:[%s2573_s23 + $0x90] sm:$0xff]  }
  0x16   : > { %2213 = vmatpush3.bf16.msra.mxu1 %v2432_v3  ;;  %2150 = vmatprep.subr.bf16.mxu0 %v2433_v4  ;;  %v2441_v12 = vld [vmem:[%s2573_s23 + $0x58] sm:$0xff]   ;;  %v2445_v16 = vld [vmem:[%s2573_s23 + $0x60] sm:$0xff]   ;;  %v2449_v20 = vld [vmem:[%s2573_s23 + $0x68] sm:$0xff]  }
  0x17   : > { %2214 = vmatprep.subr.bf16.mxu1 %v2434_v5  ;;  %v2442_v13 = vld [vmem:[%s2573_s23 + $0xd8] sm:$0xff]   ;;  %v2446_v17 = vld [vmem:[%s2573_s23 + $0xe0] sm:$0xff]   ;;  %v2450_v21 = vld [vmem:[%s2573_s23 + $0xe8] sm:$0xff]  }
  0x18   : > { %v2443_v14 = vld [vmem:[%s2573_s23 + $0x18] sm:$0xff]   ;;  %v2447_v18 = vld [vmem:[%s2573_s23 + $0x20] sm:$0xff]   ;;  %v2451_v22 = vld [vmem:[%s2573_s23 + $0x28] sm:$0xff]  }
  0x19   : > { %2151 = vmatpush3.bf16.msra.mxu0 %v2435_v6  ;;  %v2444_v15 = vld [vmem:[%s2573_s23 + $0x98] sm:$0xff]   ;;  %v2448_v19 = vld [vmem:[%s2573_s23 + $0xa0] sm:$0xff]   ;;  %v2452_v23 = vld [vmem:[%s2573_s23 + $0xa8] sm:$0xff]  }
  0x1a   : > { %2215 = vmatpush3.bf16.msra.mxu1 %v2436_v7  ;;  %2152 = vmatprep.subr.bf16.mxu0 %v2437_v8  ;;  %v2453_v24 = vld [vmem:[%s2573_s23 + $0x70] sm:$0xff]   ;;  %v2457_v28 = vld [vmem:[%s2573_s23 + $0x78] sm:$0xff]   ;;  %v308_v32 = vld [vmem:[%s2610_s26] sm:$0xff] }
  0x1b   : > { %2216 = vmatprep.subr.bf16.mxu1 %v2438_v9  ;;  %v2454_v25 = vld [vmem:[%s2573_s23 + $0xf0] sm:$0xff]   ;;  %v2458_v29 = vld [vmem:[%s2573_s23 + $0xf8] sm:$0xff]   ;;  %v312_v33 = vld [vmem:[%s2610_s26 + $0x20] sm:$0xff] }
  0x1c   : > { %v2455_v26 = vld [vmem:[%s2573_s23 + $0x30] sm:$0xff]   ;;  %v2459_v30 = vld [vmem:[%s2573_s23 + $0x38] sm:$0xff]   ;;  %v309_v34 = vld [vmem:[%s2610_s26 + $0x8] sm:$0xff]  ;;  %v1932_v35 = vcombine.low %v308_v32, %v312_v33  ;;  %v1933_v36 = vcombine.high %v308_v32, %v312_v33 }
  0x1d   : > { %2153 = vmatpush3.bf16.msra.mxu0 %v2439_v10  ;;  %v2456_v27 = vld [vmem:[%s2573_s23 + $0xb0] sm:$0xff]   ;;  %v2460_v31 = vld [vmem:[%s2573_s23 + $0xb8] sm:$0xff]   ;;  %v313_v37 = vld [vmem:[%s2610_s26 + $0x28] sm:$0xff] }
  0x1e   : > { %2217 = vmatpush3.bf16.msra.mxu1 %v2440_v11  ;;  %2154 = vmatprep.subr.bf16.mxu0 %v2441_v12  ;;  %v1934_v38 = vcombine.low %v309_v34, %v313_v37  ;;  %v1935_v39 = vcombine.high %v309_v34, %v313_v37  ;;  %v2461_v40 = vld [vmem:[%s2573_s23 + $0x140] sm:$0xff]   ;;  %v317_v47 = vld [vmem:[%s2610_s26 + $0x48] sm:$0xff]  ;;  %v2469_v62 = vld [vmem:[%s2573_s23 + $0x150] sm:$0xff]  }
  0x1f   : > { %2218 = vmatprep.subr.bf16.mxu1 %v2442_v13  ;;  %1236 = vmatprep.mubr.bf16.mxu0 %v1933_v36  ;;  %v2462_v41 = vld [vmem:[%s2573_s23 + $0x100] sm:$0xff]   ;;  %v321_v48 = vld [vmem:[%s2610_s26 + $0x68] sm:$0xff]  ;;  %v2470_v63 = vld [vmem:[%s2573_s23 + $0x110] sm:$0xff]  }
  0x20   : > { %1333 = vmatprep.mubr.bf16.mxu1 %v1935_v39  ;;  %v2463_v42 = vld [vmem:[%s2573_s23 + $0x1c0] sm:$0xff]   ;;  %v1943_v49 = vcombine.high %v317_v47, %v321_v48  ;;  %v2465_v50 = vld [vmem:[%s2573_s23 + $0x148] sm:$0xff]   ;;  %v1942_v53 = vcombine.low %v317_v47, %v321_v48  ;;  %v2471_v0 = vld [vmem:[%s2573_s23 + $0x1d0] sm:$0xff]  }
  0x21   : > { %2155 = vmatpush3.bf16.msra.mxu0 %v2443_v14  ;;  %v2464_v43 = vld [vmem:[%s2573_s23 + $0x180] sm:$0xff]   ;;  %v2466_v52 = vld [vmem:[%s2573_s23 + $0x108] sm:$0xff]   ;;  %v2472_v1 = vld [vmem:[%s2573_s23 + $0x190] sm:$0xff]  }
  0x22   : > { %2219 = vmatpush3.bf16.msra.mxu1 %v2444_v15  ;;  %2156 = vmatprep.subr.bf16.mxu0 %v2445_v16  ;;  %v316_v44 = vld [vmem:[%s2610_s26 + $0x40] sm:$0xff]  ;;  %v2467_v54 = vld [vmem:[%s2573_s23 + $0x1c8] sm:$0xff]   ;;  %v2473_v10 = vld [vmem:[%s2573_s23 + $0x158] sm:$0xff]  }
  0x23   : > { %2220 = vmatprep.subr.bf16.mxu1 %v2446_v17  ;;  %v320_v45 = vld [vmem:[%s2610_s26 + $0x60] sm:$0xff]  ;;  %v2468_v55 = vld [vmem:[%s2573_s23 + $0x188] sm:$0xff]   ;;  %v2474_v11 = vld [vmem:[%s2573_s23 + $0x118] sm:$0xff]  }
  0x24   : > { %v1941_v46 = vcombine.high %v316_v44, %v320_v45  ;;  %v1940_v51 = vcombine.low %v316_v44, %v320_v45  ;;  %v324_v56 = vld [vmem:[%s2610_s26 + $0x80] sm:$0xff]  ;;  %v325_v58 = vld [vmem:[%s2610_s26 + $0x88] sm:$0xff]  ;;  %v2475_v12 = vld [vmem:[%s2573_s23 + $0x1d8] sm:$0xff]  }
  0x25   : > { %2157 = vmatpush3.bf16.msra.mxu0 %v2447_v18  ;;  %v328_v57 = vld [vmem:[%s2610_s26 + $0xa0] sm:$0xff]  ;;  %v329_v59 = vld [vmem:[%s2610_s26 + $0xa8] sm:$0xff]  ;;  %v2476_v13 = vld [vmem:[%s2573_s23 + $0x198] sm:$0xff]  }
  0x26   : > { %2221 = vmatpush3.bf16.msra.mxu1 %v2448_v19  ;;  %2158 = vmatprep.subr.bf16.mxu0 %v2449_v20  ;;  %v1949_v60 = vcombine.high %v324_v56, %v328_v57  ;;  %v1951_v61 = vcombine.high %v325_v58, %v329_v59  ;;  %v1948_v2 = vcombine.low %v324_v56, %v328_v57  ;;  %v332_v3 = vld [vmem:[%s2610_s26 + $0xc0] sm:$0xff]  ;;  %v333_v5 = vld [vmem:[%s2610_s26 + $0xc8] sm:$0xff]  ;;  %v2486_v39 = vld [vmem:[%s2573_s23 + $0x130] sm:$0xff]  }
  0x27   : > { %2222 = vmatprep.subr.bf16.mxu1 %v2450_v21  ;;  %v336_v4 = vld [vmem:[%s2610_s26 + $0xe0] sm:$0xff]  ;;  %v1950_v6 = vcombine.low %v325_v58, %v329_v59  ;;  %v337_v8 = vld [vmem:[%s2610_s26 + $0xe8] sm:$0xff]  ;;  %v2490_v48 = vld [vmem:[%s2573_s23 + $0x138] sm:$0xff]  }
  0x28   : > { %v1957_v7 = vcombine.high %v332_v3, %v336_v4  ;;  %v1959_v9 = vcombine.high %v333_v5, %v337_v8  ;;  %v340_v14 = vld [vmem:[%s2610_s26 + $0x100] sm:$0xff]  ;;  %v341_v16 = vld [vmem:[%s2610_s26 + $0x108] sm:$0xff]  ;;  %v1956_v19 = vcombine.low %v332_v3, %v336_v4  ;;  %v1958_v21 = vcombine.low %v333_v5, %v337_v8  ;;  %v319_v8 = vld [vmem:[%s2610_s26 + $0x58] sm:$0xff] }
  0x29   : > { %2159 = vmatpush3.bf16.msra.mxu0 %v2451_v22  ;;  %v344_v15 = vld [vmem:[%s2610_s26 + $0x120] sm:$0xff]  ;;  %v345_v17 = vld [vmem:[%s2610_s26 + $0x128] sm:$0xff] }
  0x2a   : > { %2223 = vmatpush3.bf16.msra.mxu1 %v2452_v23  ;;  %2160 = vmatprep.subr.bf16.mxu0 %v2453_v24  ;;  %v2477_v18 = vld [vmem:[%s2573_s23 + $0x160] sm:$0xff]   ;;  %v1965_v22 = vcombine.high %v340_v14, %v344_v15  ;;  %v1967_v24 = vcombine.high %v341_v16, %v345_v17  ;;  %v2483_v32 = vld [vmem:[%s2573_s23 + $0x1e8] sm:$0xff]   ;;  %v1964_v34 = vcombine.low %v340_v14, %v344_v15  ;;  %v326_v14 = vld [vmem:[%s2610_s26 + $0x90] sm:$0xff] }
  0x2b   : > { %2224 = vmatprep.subr.bf16.mxu1 %v2454_v25  ;;  %v2478_v20 = vld [vmem:[%s2573_s23 + $0x120] sm:$0xff]   ;;  %v2484_v33 = vld [vmem:[%s2573_s23 + $0x1a8] sm:$0xff]   ;;  %v330_v15 = vld [vmem:[%s2610_s26 + $0xb0] sm:$0xff] }
  0x2c   : > { %v2479_v23 = vld [vmem:[%s2573_s23 + $0x1e0] sm:$0xff]   ;;  %v357_v44 = vld [vmem:[%s2610_s26 + $0x188] sm:$0xff] }
  0x2d   : > { %2161 = vmatpush3.bf16.msra.mxu0 %v2455_v26  ;;  %v2480_v25 = vld [vmem:[%s2573_s23 + $0x1a0] sm:$0xff]   ;;  %v361_v45 = vld [vmem:[%s2610_s26 + $0x1a8] sm:$0xff] }
  0x2e   : > { %2225 = vmatpush3.bf16.msra.mxu1 %v2456_v27  ;;  %2162 = vmatprep.subr.bf16.mxu0 %v2457_v28  ;;  %v348_v26 = vld [vmem:[%s2610_s26 + $0x140] sm:$0xff]  ;;  %v2481_v28 = vld [vmem:[%s2573_s23 + $0x168] sm:$0xff]   ;;  %v1982_v59 = vcombine.low %v357_v44, %v361_v45 }
  0x2f   : > { %2226 = vmatprep.subr.bf16.mxu1 %v2458_v29  ;;  %v352_v27 = vld [vmem:[%s2610_s26 + $0x160] sm:$0xff]  ;;  %v349_v29 = vld [vmem:[%s2610_s26 + $0x148] sm:$0xff] }
  0x30   : > { %v1973_v36 = vcombine.high %v348_v26, %v352_v27  ;;  %v1972_v47 = vcombine.low %v348_v26, %v352_v27  ;;  %v365_v56 = vld [vmem:[%s2610_s26 + $0x1c8] sm:$0xff]  ;;  %v1952_v26 = vcombine.low %v326_v14, %v330_v15 }
  0x31   : > { %2163 = vmatpush3.bf16.msra.mxu0 %v2459_v30  ;;  %v353_v30 = vld [vmem:[%s2610_s26 + $0x168] sm:$0xff] }
  0x32   : > { %2227 = vmatpush3.bf16.msra.mxu1 %v2460_v31  ;;  %2276 = vmatprep.subr.bf16.mxu0 %v2461_v40  ;;  %v2482_v31 = vld [vmem:[%s2573_s23 + $0x128] sm:$0xff]   ;;  %v1975_v37 = vcombine.high %v349_v29, %v353_v30  ;;  %v2487_v40 = vld [vmem:[%s2573_s23 + $0x1f0] sm:$0xff]  }
  0x33   : > { %2340 = vmatprep.subr.bf16.mxu1 %v2463_v42  ;;  %v360_v42 = vld [vmem:[%s2610_s26 + $0x1a0] sm:$0xff]  ;;  %v369_v57 = vld [vmem:[%s2610_s26 + $0x1e8] sm:$0xff] }
  0x34   : > { %1237 = vmatmul.mubr.bf16.vlgmr.msra.gmra.mrb[0].mxu0 %v1932_v35  ;;  %v1966_v35 = vcombine.low %v341_v16, %v345_v17  ;;  %v1990_v3 = vcombine.low %v365_v56, %v369_v57  ;;  %v327_v16 = vld [vmem:[%s2610_s26 + $0x98] sm:$0xff] }
  0x35   : > { %1334 = vmatmul.mubr.bf16.vlgmr.msra.gmra.mrb[0].mxu1 %v1934_v38  ;;  %2277 = vmatpush3.bf16.msra.mxu0 %v2462_v41  ;;  %v2485_v38 = vld [vmem:[%s2573_s23 + $0x170] sm:$0xff]   ;;  %v356_v41 = vld [vmem:[%s2610_s26 + $0x180] sm:$0xff]  ;;  %v331_v17 = vld [vmem:[%s2610_s26 + $0xb8] sm:$0xff] }
  0x36   : > { %2341 = vmatpush3.bf16.msra.mxu1 %v2464_v43  ;;  %1244 = vmatprep.mubr.bf16.mxu0 %v1941_v46  ;;  %v2488_v43 = vld [vmem:[%s2573_s23 + $0x1b0] sm:$0xff]   ;;  %v2489_v46 = vld [vmem:[%s2573_s23 + $0x178] sm:$0xff]   ;;  %v1980_v58 = vcombine.low %v356_v41, %v360_v42  ;;  %v1954_v27 = vcombine.low %v327_v16, %v331_v17 }
  0x37   : > { %1341 = vmatprep.mubr.bf16.mxu1 %v1943_v49  ;;  %2278 = vmatprep.subr.bf16.mxu0 %v2465_v50  ;;  %v1974_v49 = vcombine.low %v349_v29, %v353_v30  ;;  %v1981_v50 = vcombine.high %v356_v41, %v360_v42  ;;  %v342_v30 = vld [vmem:[%s2610_s26 + $0x110] sm:$0xff]  ;;  %v355_v41 = vld [vmem:[%s2610_s26 + $0x178] sm:$0xff] }
  0x38   : > { %2342 = vmatprep.subr.bf16.mxu1 %v2467_v54  ;;  %v364_v54 = vld [vmem:[%s2610_s26 + $0x1c0] sm:$0xff] }
  0x39   : > { %2279 = vmatpush3.bf16.msra.mxu0 %v2466_v52  ;;  %v1983_v52 = vcombine.high %v357_v44, %v361_v45 }
  0x3a   : > { %2343 = vmatpush3.bf16.msra.mxu1 %v2468_v55  ;;  %2280 = vmatprep.subr.bf16.mxu0 %v2469_v62  ;;  %v368_v55 = vld [vmem:[%s2610_s26 + $0x1e0] sm:$0xff]  ;;  %v310_v62 = vld [vmem:[%s2610_s26 + $0x10] sm:$0xff] }
  0x3b   : > { %2344 = vmatprep.subr.bf16.mxu1 %v2471_v0  ;;  %v311_v0 = vld [vmem:[%s2610_s26 + $0x18] sm:$0xff] }
  0x3c   : > { %1245 = vmatmul.mubr.bf16.gmra.mrb[4].mxu0 %v1940_v51  ;;  %v2491_v51 = vld [vmem:[%s2573_s23 + $0x1f8] sm:$0xff]  }
  0x3d   : > { %1342 = vmatmul.mubr.bf16.gmra.mrb[4].mxu1 %v1942_v53  ;;  %1252 = vmatprep.mubr.bf16.mxu0 %v1949_v60  ;;  %v2492_v53 = vld [vmem:[%s2573_s23 + $0x1b8] sm:$0xff]   ;;  %v1989_v60 = vcombine.high %v364_v54, %v368_v55 }
  0x3e   : > { %1349 = vmatprep.mubr.bf16.mxu1 %v1951_v61  ;;  %2281 = vmatpush3.bf16.msra.mxu0 %v2470_v63  ;;  %v1991_v61 = vcombine.high %v365_v56, %v369_v57  ;;  %v314_v63 = vld [vmem:[%s2610_s26 + $0x30] sm:$0xff]  ;;  %v367_v56 = vld [vmem:[%s2610_s26 + $0x1d8] sm:$0xff] }
  0x3f   : > { %2345 = vmatpush3.bf16.msra.mxu1 %v2472_v1  ;;  %2282 = vmatprep.subr.bf16.mxu0 %v2473_v10  ;;  %v315_v1 = vld [vmem:[%s2610_s26 + $0x38] sm:$0xff]  ;;  %v1937_v4 = vcombine.high %v310_v62, %v314_v63  ;;  %v1936_v10 = vcombine.low %v310_v62, %v314_v63 }
  0x40   : > { %2346 = vmatprep.subr.bf16.mxu1 %v2475_v12  ;;  %v1939_v5 = vcombine.high %v311_v0, %v315_v1  ;;  %v371_v57 = vld [vmem:[%s2610_s26 + $0x1f8] sm:$0xff] }
  0x41   : > { %v1994_v63 = vcombine.low %v367_v56, %v371_v57 }
  0x42   : > { %2283 = vmatpush3.bf16.msra.mxu0 %v2474_v11  ;;  %v1938_v11 = vcombine.low %v311_v0, %v315_v1 }
  0x43   : > { %2347 = vmatpush3.bf16.msra.mxu1 %v2476_v13  ;;  %2284 = vmatprep.subr.bf16.mxu0 %v2477_v18 }
  0x44   : > { %1253 = vmatmul.mubr.bf16.gmra.mrb[8].mxu0 %v1948_v2  ;;  %2348 = vmatprep.subr.bf16.mxu1 %v2479_v23  ;;  %v1988_v2 = vcombine.low %v364_v54, %v368_v55  ;;  %v338_v23 = vld [vmem:[%s2610_s26 + $0xf0] sm:$0xff] }
  0x45   : > { %1350 = vmatmul.mubr.bf16.gmra.mrb[8].mxu1 %v1950_v6  ;;  %1260 = vmatprep.mubr.bf16.mxu0 %v1957_v7  ;;  %v318_v6 = vld [vmem:[%s2610_s26 + $0x50] sm:$0xff] }
  0x46   : > { %1357 = vmatprep.mubr.bf16.mxu1 %v1959_v9  ;;  %2285 = vmatpush3.bf16.msra.mxu0 %v2478_v20  ;;  %v322_v7 = vld [vmem:[%s2610_s26 + $0x70] sm:$0xff]  ;;  %v323_v9 = vld [vmem:[%s2610_s26 + $0x78] sm:$0xff]  ;;  %v1953_v20 = vcombine.high %v326_v14, %v330_v15 }
  0x47   : > { %2349 = vmatpush3.bf16.msra.mxu1 %v2480_v25  ;;  %2286 = vmatprep.subr.bf16.mxu0 %v2481_v28  ;;  %v1945_v12 = vcombine.high %v318_v6, %v322_v7  ;;  %v1947_v13 = vcombine.high %v319_v8, %v323_v9  ;;  %v1944_v18 = vcombine.low %v318_v6, %v322_v7  ;;  %v339_v25 = vld [vmem:[%s2610_s26 + $0xf8] sm:$0xff]  ;;  %v366_v54 = vld [vmem:[%s2610_s26 + $0x1d0] sm:$0xff] }
  0x48   : > { %2350 = vmatprep.subr.bf16.mxu1 %v2483_v32  ;;  %v343_v32 = vld [vmem:[%s2610_s26 + $0x118] sm:$0xff]  ;;  %v370_v55 = vld [vmem:[%s2610_s26 + $0x1f0] sm:$0xff] }
  0x49   : > { %v1992_v62 = vcombine.low %v366_v54, %v370_v55 }
  0x4a   : > { %2287 = vmatpush3.bf16.msra.mxu0 %v2482_v31  ;;  %v346_v31 = vld [vmem:[%s2610_s26 + $0x130] sm:$0xff] }
  0x4b   : > { %2351 = vmatpush3.bf16.msra.mxu1 %v2484_v33  ;;  %2288 = vmatprep.subr.bf16.mxu0 %v2485_v38  ;;  %v347_v33 = vld [vmem:[%s2610_s26 + $0x138] sm:$0xff]  ;;  %v350_v38 = vld [vmem:[%s2610_s26 + $0x150] sm:$0xff]  ;;  %v1968_v42 = vcombine.low %v342_v30, %v346_v31 }
  0x4c   : > { %1261 = vmatmul.mubr.bf16.gmra.mrb[12].mxu0 %v1956_v19  ;;  %2352 = vmatprep.subr.bf16.mxu1 %v2487_v40  ;;  %v1946_v19 = vcombine.low %v319_v8, %v323_v9  ;;  %v351_v40 = vld [vmem:[%s2610_s26 + $0x158] sm:$0xff] }
  0x4d   : > { %1358 = vmatmul.mubr.bf16.gmra.mrb[12].mxu1 %v1958_v21  ;;  %1268 = vmatprep.mubr.bf16.mxu0 %v1965_v22  ;;  %v1955_v21 = vcombine.high %v327_v16, %v331_v17  ;;  %v334_v22 = vld [vmem:[%s2610_s26 + $0xd0] sm:$0xff]  ;;  %v1979_v45 = vcombine.high %v351_v40, %v355_v41 }
  0x4e   : > { %1365 = vmatprep.mubr.bf16.mxu1 %v1967_v24  ;;  %2289 = vmatpush3.bf16.msra.mxu0 %v2486_v39  ;;  %v335_v24 = vld [vmem:[%s2610_s26 + $0xd8] sm:$0xff]  ;;  %v1961_v28 = vcombine.high %v334_v22, %v338_v23  ;;  %v354_v39 = vld [vmem:[%s2610_s26 + $0x170] sm:$0xff] }
  0x4f   : > { %2353 = vmatpush3.bf16.msra.mxu1 %v2488_v43  ;;  %2290 = vmatprep.subr.bf16.mxu0 %v2489_v46  ;;  %v1963_v29 = vcombine.high %v335_v24, %v339_v25  ;;  %v1970_v43 = vcombine.low %v343_v32, %v347_v33  ;;  %v1977_v44 = vcombine.high %v350_v38, %v354_v39  ;;  %v358_v46 = vld [vmem:[%s2610_s26 + $0x190] sm:$0xff] }
  0x50   : > { %2354 = vmatprep.subr.bf16.mxu1 %v2491_v51  ;;  %v1978_v51 = vcombine.low %v351_v40, %v355_v41 }
  0x52   : > { %2291 = vmatpush3.bf16.msra.mxu0 %v2490_v48  ;;  %v359_v48 = vld [vmem:[%s2610_s26 + $0x198] sm:$0xff] }
  0x53   : > { %2355 = vmatpush3.bf16.msra.mxu1 %v2492_v53 }
  0x54   : > { %1269 = vmatmul.mubr.bf16.gmra.mrb[16].mxu0 %v1964_v34  ;;  %v1960_v34 = vcombine.low %v334_v22, %v338_v23 }
  0x55   : > { %1366 = vmatmul.mubr.bf16.gmra.mrb[16].mxu1 %v1966_v35  ;;  %1276 = vmatprep.mubr.bf16.mxu0 %v1973_v36  ;;  %v1962_v35 = vcombine.low %v335_v24, %v339_v25  ;;  %v1969_v36 = vcombine.high %v342_v30, %v346_v31 }
  0x56   : > { %1373 = vmatprep.mubr.bf16.mxu1 %v1975_v37  ;;  %v1971_v37 = vcombine.high %v343_v32, %v347_v33 }
  0x5c   : > { %1277 = vmatmul.mubr.bf16.gmra.mrb[20].mxu0 %v1972_v47  ;;  %v362_v47 = vld [vmem:[%s2610_s26 + $0x1b0] sm:$0xff] }
  0x5d   : > { %1374 = vmatmul.mubr.bf16.gmra.mrb[20].mxu1 %v1974_v49  ;;  %1284 = vmatprep.mubr.bf16.mxu0 %v1981_v50  ;;  %v363_v49 = vld [vmem:[%s2610_s26 + $0x1b8] sm:$0xff]  ;;  %v1976_v50 = vcombine.low %v350_v38, %v354_v39 }
  0x5e   : > { %1381 = vmatprep.mubr.bf16.mxu1 %v1983_v52  ;;  %v1985_v52 = vcombine.high %v358_v46, %v362_v47  ;;  %v1987_v53 = vcombine.high %v359_v48, %v363_v49 }
  0x64   : > { %1285 = vmatmul.mubr.bf16.gmra.mrb[24].mxu0 %v1980_v58  ;;  %v1984_v58 = vcombine.low %v358_v46, %v362_v47 }
  0x65   : > { %1382 = vmatmul.mubr.bf16.gmra.mrb[24].mxu1 %v1982_v59  ;;  %1292 = vmatprep.mubr.bf16.mxu0 %v1989_v60  ;;  %v1986_v59 = vcombine.low %v359_v48, %v363_v49  ;;  %v1993_v60 = vcombine.high %v366_v54, %v370_v55 }
  0x66   : > { %1389 = vmatprep.mubr.bf16.mxu1 %v1991_v61  ;;  %v1995_v61 = vcombine.high %v367_v56, %v371_v57 }
  0x6c   : > { %1293 = vmatmul.mubr.bf16.gmra.mrb[28].mxu0 %v1988_v2 }
  0x6d   : > { %1390 = vmatmul.mubr.bf16.gmra.mrb[28].mxu1 %v1990_v3  ;;  %1430 = vmatprep.mubr.bf16.mxu0 %v1937_v4 }
  0x6e   : > { %1527 = vmatprep.mubr.bf16.mxu1 %v1939_v5 }
  0x74   : > { %1431 = vmatmul.mubr.bf16.vlgmr.msra.gmra.mrb[32].mxu0 %v1936_v10 }
  0x75   : > { %1528 = vmatmul.mubr.bf16.vlgmr.msra.gmra.mrb[32].mxu1 %v1938_v11  ;;  %1438 = vmatprep.mubr.bf16.mxu0 %v1945_v12 }
  0x76   : > { %1535 = vmatprep.mubr.bf16.mxu1 %v1947_v13 }
  0x7c   : > { %1439 = vmatmul.mubr.bf16.gmra.mrb[36].mxu0 %v1944_v18 }
  0x7d   : > { %1536 = vmatmul.mubr.bf16.gmra.mrb[36].mxu1 %v1946_v19  ;;  %1446 = vmatprep.mubr.bf16.mxu0 %v1953_v20 }
  0x7e   : > { %1543 = vmatprep.mubr.bf16.mxu1 %v1955_v21 }
  0x84   : > { %1447 = vmatmul.mubr.bf16.gmra.mrb[40].mxu0 %v1952_v26 }
  0x85   : > { %1544 = vmatmul.mubr.bf16.gmra.mrb[40].mxu1 %v1954_v27  ;;  %1454 = vmatprep.mubr.bf16.mxu0 %v1961_v28 }
  0x86   : > { %1551 = vmatprep.mubr.bf16.mxu1 %v1963_v29 }
  0x8c   : > { %1455 = vmatmul.mubr.bf16.gmra.mrb[44].mxu0 %v1960_v34 }
  0x8d   : > { %1552 = vmatmul.mubr.bf16.gmra.mrb[44].mxu1 %v1962_v35  ;;  %1462 = vmatprep.mubr.bf16.mxu0 %v1969_v36 }
  0x8e   : > { %1559 = vmatprep.mubr.bf16.mxu1 %v1971_v37 }
  0x94   : > { %1463 = vmatmul.mubr.bf16.gmra.mrb[48].mxu0 %v1968_v42 }
  0x95   : > { %1560 = vmatmul.mubr.bf16.gmra.mrb[48].mxu1 %v1970_v43  ;;  %1470 = vmatprep.mubr.bf16.mxu0 %v1977_v44 }
  0x96   : > { %1567 = vmatprep.mubr.bf16.mxu1 %v1979_v45 }
  0x9c   : > { %1471 = vmatmul.mubr.bf16.gmra.mrb[52].mxu0 %v1976_v50 }
  0x9d   : > { %1568 = vmatmul.mubr.bf16.gmra.mrb[52].mxu1 %v1978_v51  ;;  %1478 = vmatprep.mubr.bf16.mxu0 %v1985_v52 }
  0x9e   : > { %1575 = vmatprep.mubr.bf16.mxu1 %v1987_v53 }
  0xa4   : > { %1479 = vmatmul.mubr.bf16.gmra.mrb[56].mxu0 %v1984_v58 }
  0xa5   : > { %1576 = vmatmul.mubr.bf16.gmra.mrb[56].mxu1 %v1986_v59  ;;  %1486 = vmatprep.mubr.bf16.mxu0 %v1993_v60 }
  0xa6   : > { %1583 = vmatprep.mubr.bf16.mxu1 %v1995_v61 }
  0xac   : > { %1487 = vmatmul.mubr.bf16.gmra.mrb[60].mxu0 %v1992_v62 }
  0xad   : > { %1584 = vmatmul.mubr.bf16.gmra.mrb[60].mxu1 %v1994_v63 }
 0x107   : > { %v2164_v0 = vpop.f32.mrb[0].mxu0 }
 0x108   : > { %v2228_v1 = vpop.f32.mrb[0].mxu1  ;;  %v2165_v2 = vpop.f32.mrb[1].mxu0 }
 0x109   : > { %v2166_v3 = vadd.f32 %v2165_v2, %v2164_v0  ;;  %v2229_v4 = vpop.f32.mrb[1].mxu1  ;;  %v2167_v5 = vpop.f32.mrb[2].mxu0 }
 0x10a   : > { %v2230_v6 = vadd.f32 %v2229_v4, %v2228_v1  ;;  %v2231_v7 = vpop.f32.mrb[2].mxu1  ;;  %v2168_v8 = vpop.f32.mrb[3].mxu0 }
 0x10b   : > { %v2169_v9 = vadd.f32 %v2168_v8, %v2167_v5  ;;  %v2232_v10 = vpop.f32.mrb[3].mxu1 }
 0x10c   : > { %v2711_v11 = vadd.f32 %v2230_v6, %v2166_v3  ;;  %v2233_v12 = vadd.f32 %v2232_v10, %v2231_v7 }
 0x10e   : > { %v2713_v13 = vadd.f32 %v2233_v12, %v2169_v9 }
 0x10f   : > { %v2170_v14 = vpop.f32.mrb[4].mxu0 }
 0x110   : > { %v2234_v15 = vpop.f32.mrb[4].mxu1  ;;  %v2171_v16 = vpop.f32.mrb[5].mxu0 }
 0x111   : > { %v2172_v17 = vadd.f32 %v2171_v16, %v2170_v14  ;;  %v2235_v18 = vpop.f32.mrb[5].mxu1  ;;  %v2173_v19 = vpop.f32.mrb[6].mxu0 }
 0x112   : > { %v2236_v20 = vadd.f32 %v2235_v18, %v2234_v15  ;;  %v2237_v21 = vpop.f32.mrb[6].mxu1  ;;  %v2174_v22 = vpop.f32.mrb[7].mxu0 }
 0x113   : > { %v2175_v23 = vadd.f32 %v2174_v22, %v2173_v19  ;;  %v2238_v24 = vpop.f32.mrb[7].mxu1 }
 0x114   : > { %v2715_v25 = vadd.f32 %v2236_v20, %v2172_v17  ;;  %v2239_v26 = vadd.f32 %v2238_v24, %v2237_v21 }
 0x116   : > { %v2717_v27 = vadd.f32 %v2239_v26, %v2175_v23 }
 0x117   : > { %v2176_v28 = vpop.f32.mrb[8].mxu0 }
 0x118   : > { %v2240_v29 = vpop.f32.mrb[8].mxu1  ;;  %v2177_v30 = vpop.f32.mrb[9].mxu0 }
 0x119   : > { %v2178_v31 = vadd.f32 %v2177_v30, %v2176_v28  ;;  %v2241_v32 = vpop.f32.mrb[9].mxu1  ;;  %v2179_v33 = vpop.f32.mrb[10].mxu0 }
 0x11a   : > { %v2242_v34 = vadd.f32 %v2241_v32, %v2240_v29  ;;  %v2243_v35 = vpop.f32.mrb[10].mxu1  ;;  %v2180_v36 = vpop.f32.mrb[11].mxu0 }
 0x11b   : > { %v2181_v37 = vadd.f32 %v2180_v36, %v2179_v33  ;;  %v2244_v38 = vpop.f32.mrb[11].mxu1 }
 0x11c   : > { %v2719_v39 = vadd.f32 %v2242_v34, %v2178_v31  ;;  %v2245_v40 = vadd.f32 %v2244_v38, %v2243_v35 }
 0x11e   : > { %v2721_v41 = vadd.f32 %v2245_v40, %v2181_v37 }
 0x11f   : > { %v2182_v42 = vpop.f32.mrb[12].mxu0 }
 0x120   : > { %v2246_v43 = vpop.f32.mrb[12].mxu1  ;;  %v2183_v44 = vpop.f32.mrb[13].mxu0 }
 0x121   : > { %v2184_v45 = vadd.f32 %v2183_v44, %v2182_v42  ;;  %v2247_v46 = vpop.f32.mrb[13].mxu1  ;;  %v2185_v47 = vpop.f32.mrb[14].mxu0 }
 0x122   : > { %v2248_v48 = vadd.f32 %v2247_v46, %v2246_v43  ;;  %v2249_v49 = vpop.f32.mrb[14].mxu1  ;;  %v2186_v50 = vpop.f32.mrb[15].mxu0 }
 0x123   : > { %v2187_v51 = vadd.f32 %v2186_v50, %v2185_v47  ;;  %v2250_v52 = vpop.f32.mrb[15].mxu1 }
 0x124   : > { %v2723_v53 = vadd.f32 %v2248_v48, %v2184_v45  ;;  %v2251_v54 = vadd.f32 %v2250_v52, %v2249_v49 }
 0x126   : > { %v2725_v55 = vadd.f32 %v2251_v54, %v2187_v51 }
 0x127   : > { %v2188_v56 = vpop.f32.mrb[16].mxu0 }
 0x128   : > { %v2252_v57 = vpop.f32.mrb[16].mxu1  ;;  %v2189_v58 = vpop.f32.mrb[17].mxu0 }
 0x129   : > { %v2190_v59 = vadd.f32 %v2189_v58, %v2188_v56  ;;  %v2253_v60 = vpop.f32.mrb[17].mxu1  ;;  %v2191_v61 = vpop.f32.mrb[18].mxu0 }
 0x12a   : > { %v2254_v62 = vadd.f32 %v2253_v60, %v2252_v57  ;;  %v2255_v63 = vpop.f32.mrb[18].mxu1  ;;  %v2192_v0 = vpop.f32.mrb[19].mxu0 }
 0x12b   : > { %v2193_v1 = vadd.f32 %v2192_v0, %v2191_v61  ;;  %v2256_v2 = vpop.f32.mrb[19].mxu1 }
 0x12c   : > { %v2727_v3 = vadd.f32 %v2254_v62, %v2190_v59  ;;  %v2257_v4 = vadd.f32 %v2256_v2, %v2255_v63 }
 0x12e   : > { %v2729_v5 = vadd.f32 %v2257_v4, %v2193_v1 }
 0x12f   : > { %v2194_v6 = vpop.f32.mrb[20].mxu0 }
 0x130   : > { %v2258_v7 = vpop.f32.mrb[20].mxu1  ;;  %v2195_v8 = vpop.f32.mrb[21].mxu0 }
 0x131   : > { %v2196_v9 = vadd.f32 %v2195_v8, %v2194_v6  ;;  %v2259_v10 = vpop.f32.mrb[21].mxu1  ;;  %v2197_v12 = vpop.f32.mrb[22].mxu0 }
 0x132   : > { %v2260_v14 = vadd.f32 %v2259_v10, %v2258_v7  ;;  %v2261_v15 = vpop.f32.mrb[22].mxu1  ;;  %v2198_v16 = vpop.f32.mrb[23].mxu0 }
 0x133   : > { %v2199_v17 = vadd.f32 %v2198_v16, %v2197_v12  ;;  %v2262_v18 = vpop.f32.mrb[23].mxu1 }
 0x134   : > { %v2731_v19 = vadd.f32 %v2260_v14, %v2196_v9  ;;  %v2263_v20 = vadd.f32 %v2262_v18, %v2261_v15 }
 0x136   : > { %v2733_v21 = vadd.f32 %v2263_v20, %v2199_v17 }
 0x137   : > { %v2200_v22 = vpop.f32.mrb[24].mxu0 }
 0x138   : > { %v2264_v23 = vpop.f32.mrb[24].mxu1  ;;  %v2201_v24 = vpop.f32.mrb[25].mxu0 }
 0x139   : > { %v2202_v26 = vadd.f32 %v2201_v24, %v2200_v22  ;;  %v2265_v28 = vpop.f32.mrb[25].mxu1  ;;  %v2203_v29 = vpop.f32.mrb[26].mxu0 }
 0x13a   : > { %v2266_v30 = vadd.f32 %v2265_v28, %v2264_v23  ;;  %v2267_v31 = vpop.f32.mrb[26].mxu1  ;;  %v2204_v32 = vpop.f32.mrb[27].mxu0 }
 0x13b   : > { %v2205_v33 = vadd.f32 %v2204_v32, %v2203_v29  ;;  %v2268_v34 = vpop.f32.mrb[27].mxu1 }
 0x13c   : > { %v2735_v35 = vadd.f32 %v2266_v30, %v2202_v26  ;;  %v2269_v36 = vadd.f32 %v2268_v34, %v2267_v31 }
 0x13e   : > { %v2737_v37 = vadd.f32 %v2269_v36, %v2205_v33 }
 0x13f   : > { %v2206_v38 = vpop.f32.mrb[28].mxu0 }
 0x140   : > { %v2270_v40 = vpop.f32.mrb[28].mxu1  ;;  %v2207_v42 = vpop.f32.mrb[29].mxu0 }
 0x141   : > { %v2208_v43 = vadd.f32 %v2207_v42, %v2206_v38  ;;  %v2271_v44 = vpop.f32.mrb[29].mxu1  ;;  %v2209_v45 = vpop.f32.mrb[30].mxu0 }
 0x142   : > { %v2272_v46 = vadd.f32 %v2271_v44, %v2270_v40  ;;  %v2273_v47 = vpop.f32.mrb[30].mxu1  ;;  %v2210_v48 = vpop.f32.mrb[31].mxu0 }
 0x143   : > { %v2211_v49 = vadd.f32 %v2210_v48, %v2209_v45  ;;  %v2274_v50 = vpop.f32.mrb[31].mxu1 }
 0x144   : > { %v2739_v51 = vadd.f32 %v2272_v46, %v2208_v43  ;;  %v2275_v52 = vadd.f32 %v2274_v50, %v2273_v47 }
 0x146   : > { %v2741_v54 = vadd.f32 %v2275_v52, %v2211_v49 }
 0x147   : > { %v2292_v56 = vpop.f32.mrb[32].mxu0 }
 0x148   : > { %v2356_v57 = vpop.f32.mrb[32].mxu1  ;;  %v2293_v58 = vpop.f32.mrb[33].mxu0 }
 0x149   : > { %v2294_v59 = vadd.f32 %v2293_v58, %v2292_v56  ;;  %v2357_v60 = vpop.f32.mrb[33].mxu1  ;;  %v2295_v61 = vpop.f32.mrb[34].mxu0 }
 0x14a   : > { %v2358_v62 = vadd.f32 %v2357_v60, %v2356_v57  ;;  %v2359_v63 = vpop.f32.mrb[34].mxu1  ;;  %v2296_v0 = vpop.f32.mrb[35].mxu0 }
 0x14b   : > { %v1433_v1 = vadd.f32 %v2294_v59, %v2711_v11  ;;  %v2297_v2 = vadd.f32 %v2296_v0, %v2295_v61  ;;  %v2360_v4 = vpop.f32.mrb[35].mxu1 }
 0x14c   : > { %v2361_v6 = vadd.f32 %v2360_v4, %v2359_v63 }
 0x14d   : > { %v2744_v7 = vadd.f32 %v2358_v62, %v1433_v1  ;;  %v1436_v8 = vadd.f32 %v2297_v2, %v2713_v13 }
 0x14f   : > { %v2748_v9 = vadd.f32 %v2361_v6, %v1436_v8  ;;  %v2298_v10 = vpop.f32.mrb[36].mxu0 }
 0x150   : > { %v2362_v12 = vpop.f32.mrb[36].mxu1  ;;  %v2299_v14 = vpop.f32.mrb[37].mxu0 }
 0x151   : > { %v2104_v11 = vpack.c.bf16 %v2748_v9, %v2744_v7  ;;  %v2300_v15 = vadd.f32 %v2299_v14, %v2298_v10  ;;  %v2363_v16 = vpop.f32.mrb[37].mxu1  ;;  %v2301_v17 = vpop.f32.mrb[38].mxu0 }
 0x152   : > { %v2364_v18 = vadd.f32 %v2363_v16, %v2362_v12  ;;  %v2365_v13 = vpop.f32.mrb[38].mxu1  ;;  %v2302_v20 = vpop.f32.mrb[39].mxu0 }
 0x153   : > { %2105 = vst [vmem:[%s2753_s30] sm:$0xff] %v2104_v11   ;;  %v1441_v22 = vadd.f32 %v2300_v15, %v2715_v25  ;;  %v2303_v23 = vadd.f32 %v2302_v20, %v2301_v17  ;;  %v2366_v24 = vpop.f32.mrb[39].mxu1 }
 0x154   : > { %v2367_v26 = vadd.f32 %v2366_v24, %v2365_v13 }
 0x155   : > { %v2759_v28 = vadd.f32 %v2364_v18, %v1441_v22  ;;  %v1444_v29 = vadd.f32 %v2303_v23, %v2717_v27 }
 0x157   : > { %v2762_v30 = vadd.f32 %v2367_v26, %v1444_v29  ;;  %v2304_v31 = vpop.f32.mrb[40].mxu0 }
 0x158   : > { %v2368_v32 = vpop.f32.mrb[40].mxu1  ;;  %v2305_v33 = vpop.f32.mrb[41].mxu0 }
 0x159   : > { %v2109_v34 = vpack.c.bf16 %v2762_v30, %v2759_v28  ;;  %v2306_v36 = vadd.f32 %v2305_v33, %v2304_v31  ;;  %v2369_v38 = vpop.f32.mrb[41].mxu1  ;;  %v2307_v40 = vpop.f32.mrb[42].mxu0 }
 0x15a   : > { %v2370_v25 = vadd.f32 %v2369_v38, %v2368_v32  ;;  %v2371_v42 = vpop.f32.mrb[42].mxu1  ;;  %v2308_v43 = vpop.f32.mrb[43].mxu0 }
 0x15b   : > { %2141 = vst [vmem:[%s2753_s30 + $0x8] sm:$0xff] %v2109_v34   ;;  %v1449_v44 = vadd.f32 %v2306_v36, %v2719_v39  ;;  %v2309_v45 = vadd.f32 %v2308_v43, %v2307_v40  ;;  %v2372_v27 = vpop.f32.mrb[43].mxu1 }
 0x15c   : > { %v2373_v46 = vadd.f32 %v2372_v27, %v2371_v42 }
 0x15d   : > { %v2768_v47 = vadd.f32 %v2370_v25, %v1449_v44  ;;  %v1452_v48 = vadd.f32 %v2309_v45, %v2721_v41 }
 0x15f   : > { %v2771_v49 = vadd.f32 %v2373_v46, %v1452_v48  ;;  %v2310_v50 = vpop.f32.mrb[44].mxu0 }
 0x160   : > { %v2374_v52 = vpop.f32.mrb[44].mxu1  ;;  %v2311_v56 = vpop.f32.mrb[45].mxu0 }
 0x161   : > { %v2114_v57 = vpack.c.bf16 %v2771_v49, %v2768_v47  ;;  %v2312_v58 = vadd.f32 %v2311_v56, %v2310_v50  ;;  %v2375_v59 = vpop.f32.mrb[45].mxu1  ;;  %v2313_v60 = vpop.f32.mrb[46].mxu0 }
 0x162   : > { %v2376_v39 = vadd.f32 %v2375_v59, %v2374_v52  ;;  %v2377_v61 = vpop.f32.mrb[46].mxu1  ;;  %v2314_v62 = vpop.f32.mrb[47].mxu0 }
 0x163   : > { %2142 = vst [vmem:[%s2753_s30 + $0x10] sm:$0xff] %v2114_v57   ;;  %v1457_v63 = vadd.f32 %v2312_v58, %v2723_v53  ;;  %v2315_v0 = vadd.f32 %v2314_v62, %v2313_v60  ;;  %v2378_v41 = vpop.f32.mrb[47].mxu1 }
 0x164   : > { %v2379_v1 = vadd.f32 %v2378_v41, %v2377_v61 }
 0x165   : > { %v2777_v2 = vadd.f32 %v2376_v39, %v1457_v63  ;;  %v1460_v4 = vadd.f32 %v2315_v0, %v2725_v55 }
 0x167   : > { %v2780_v6 = vadd.f32 %v2379_v1, %v1460_v4  ;;  %v2316_v8 = vpop.f32.mrb[48].mxu0 }
 0x168   : > { %v2380_v10 = vpop.f32.mrb[48].mxu1  ;;  %v2317_v12 = vpop.f32.mrb[49].mxu0 }
 0x169   : > { %v2119_v14 = vpack.c.bf16 %v2780_v6, %v2777_v2  ;;  %v2318_v11 = vadd.f32 %v2317_v12, %v2316_v8  ;;  %v2381_v15 = vpop.f32.mrb[49].mxu1  ;;  %v2319_v16 = vpop.f32.mrb[50].mxu0 }
 0x16a   : > { %v2382_v53 = vadd.f32 %v2381_v15, %v2380_v10  ;;  %v2383_v17 = vpop.f32.mrb[50].mxu1  ;;  %v2320_v18 = vpop.f32.mrb[51].mxu0 }
 0x16b   : > { %2143 = vst [vmem:[%s2753_s30 + $0x18] sm:$0xff] %v2119_v14   ;;  %v1465_v13 = vadd.f32 %v2318_v11, %v2727_v3  ;;  %v2321_v20 = vadd.f32 %v2320_v18, %v2319_v16  ;;  %v2384_v55 = vpop.f32.mrb[51].mxu1 }
 0x16c   : > { %v2385_v22 = vadd.f32 %v2384_v55, %v2383_v17 }
 0x16d   : > { %v2786_v23 = vadd.f32 %v2382_v53, %v1465_v13  ;;  %v1468_v24 = vadd.f32 %v2321_v20, %v2729_v5 }
 0x16f   : > { %v2789_v26 = vadd.f32 %v2385_v22, %v1468_v24  ;;  %v2322_v29 = vpop.f32.mrb[52].mxu0 }
 0x170   : > { %v2386_v31 = vpop.f32.mrb[52].mxu1  ;;  %v2323_v32 = vpop.f32.mrb[53].mxu0 }
 0x171   : > { %v2124_v33 = vpack.c.bf16 %v2789_v26, %v2786_v23  ;;  %v2324_v34 = vadd.f32 %v2323_v32, %v2322_v29  ;;  %v2387_v36 = vpop.f32.mrb[53].mxu1  ;;  %v2325_v38 = vpop.f32.mrb[54].mxu0  ;;  %v2517_v29 = vmov (%p1672_p5), 0.0  }
 0x172   : > { %v2388_v3 = vadd.f32 %v2387_v36, %v2386_v31  ;;  %v2389_v40 = vpop.f32.mrb[54].mxu1  ;;  %v2326_v25 = vpop.f32.mrb[55].mxu0  ;;  %1678 = vst [vmem:[%s2877_s3] sm:$0xff] (%p1672_p5), %v2517_v29  ;;  %1679 = vst [vmem:[%s2878_s4] sm:$0xff] (%p1672_p5), %v2517_v29 }
 0x173   : > { %2144 = vst [vmem:[%s2753_s30 + $0x20] sm:$0xff] %v2124_v33   ;;  %v1473_v42 = vadd.f32 %v2324_v34, %v2731_v19  ;;  %v2327_v43 = vadd.f32 %v2326_v25, %v2325_v38  ;;  %v2390_v5 = vpop.f32.mrb[55].mxu1 }
 0x174   : > { %v2391_v44 = vadd.f32 %v2390_v5, %v2389_v40 }
 0x175   : > { %v2795_v45 = vadd.f32 %v2388_v3, %v1473_v42  ;;  %v1476_v27 = vadd.f32 %v2327_v43, %v2733_v21 }
 0x177   : > { %v2798_v46 = vadd.f32 %v2391_v44, %v1476_v27  ;;  %v2328_v48 = vpop.f32.mrb[56].mxu0 }
 0x178   : > { %v2392_v50 = vpop.f32.mrb[56].mxu1  ;;  %v2329_v52 = vpop.f32.mrb[57].mxu0 }
 0x179   : > { %v2129_v56 = vpack.c.bf16 %v2798_v46, %v2795_v45  ;;  %v2330_v57 = vadd.f32 %v2329_v52, %v2328_v48  ;;  %v2393_v58 = vpop.f32.mrb[57].mxu1  ;;  %v2331_v59 = vpop.f32.mrb[58].mxu0 }
 0x17a   : > { %v2394_v19 = vadd.f32 %v2393_v58, %v2392_v50  ;;  %v2395_v60 = vpop.f32.mrb[58].mxu1  ;;  %v2332_v39 = vpop.f32.mrb[59].mxu0 }
 0x17b   : > { %2145 = vst [vmem:[%s2753_s30 + $0x28] sm:$0xff] %v2129_v56   ;;  %v1481_v61 = vadd.f32 %v2330_v57, %v2735_v35  ;;  %v2333_v62 = vadd.f32 %v2332_v39, %v2331_v59  ;;  %v2396_v21 = vpop.f32.mrb[59].mxu1 }
 0x17c   : > { %v2397_v63 = vadd.f32 %v2396_v21, %v2395_v60 }
 0x17d   : > { %v1578_v0 = vadd.f32 %v2394_v19, %v1481_v61  ;;  %v1484_v41 = vadd.f32 %v2333_v62, %v2737_v37 }
 0x17f   : > { %v1581_v1 = vadd.f32 %v2397_v63, %v1484_v41  ;;  %v2334_v4 = vpop.f32.mrb[60].mxu0 }
 0x180   : > { %v2398_v8 = vpop.f32.mrb[60].mxu1  ;;  %v2335_v10 = vpop.f32.mrb[61].mxu0 }
 0x181   : > { %v2134_v12 = vpack.c.bf16 %v1581_v1, %v1578_v0  ;;  %v2336_v14 = vadd.f32 %v2335_v10, %v2334_v4  ;;  %v2399_v11 = vpop.f32.mrb[61].mxu1  ;;  %v2337_v15 = vpop.f32.mrb[62].mxu0 }
 0x182   : > { %v2400_v16 = vadd.f32 %v2399_v11, %v2398_v8  ;;  %v2401_v53 = vpop.f32.mrb[62].mxu1  ;;  %v2338_v17 = vpop.f32.mrb[63].mxu0 }
 0x183   : > { %2146 = vst [vmem:[%s2753_s30 + $0x30] sm:$0xff] %v2134_v12   ;;  %v1489_v35 = vadd.f32 %v2336_v14, %v2739_v51  ;;  %v2339_v18 = vadd.f32 %v2338_v17, %v2337_v15  ;;  %v2402_v13 = vpop.f32.mrb[63].mxu1 }
 0x184   : > { %v2403_v20 = vadd.f32 %v2402_v13, %v2401_v53 }
 0x185   : > { %v1586_v55 = vadd.f32 %v2400_v16, %v1489_v35  ;;  %v1492_v37 = vadd.f32 %v2339_v18, %v2741_v54  ;;  %1677 = sbr.rel (!%p1672_p5) target bundleno = 396 (0x18c), region = 32 }
 0x187   : > { %v1589_v22 = vadd.f32 %v2403_v20, %v1492_v37 }
 0x189   : > { %v2139_v24 = vpack.c.bf16 %v1589_v22, %v1586_v55 }
 0x18b   : > { %2147 = vst [vmem:[%s2753_s30 + $0x38] sm:$0xff] %v2139_v24  }
 0x18c PF: > { %v1680_v51 = vadd.f32 %v2748_v9, %v2744_v7  ;;  %v1701_v54 = vmul.f32 %v2744_v7, %v2744_v7  ;;  %v1702_v31 = vmul.f32 %v2748_v9, %v2748_v9  ;;  %v1703_v33 = vmul.f32 %v2759_v28, %v2759_v28 }
 0x18d   : > { %v1704_v36 = vmul.f32 %v2762_v30, %v2762_v30  ;;  %v1705_v40 = vmul.f32 %v2768_v47, %v2768_v47  ;;  %v1706_v9 = vmul.f32 %v2771_v49, %v2771_v49  ;;  %v1707_v43 = vmul.f32 %v2777_v2, %v2777_v2 }
 0x18e   : > { %v1681_v32 = vadd.f32 %v1680_v51, %v2759_v28  ;;  %v1717_v38 = vadd.f32 %v1702_v31, %v1701_v54  ;;  %v1708_v44 = vmul.f32 %v2780_v6, %v2780_v6  ;;  %v1709_v48 = vmul.f32 %v2786_v23, %v2786_v23 }
 0x18f   : > { %v1710_v52 = vmul.f32 %v2789_v26, %v2789_v26  ;;  %v1711_v57 = vmul.f32 %v2795_v45, %v2795_v45  ;;  %v1712_v59 = vmul.f32 %v2798_v46, %v2798_v46  ;;  %v1713_v60 = vmul.f32 %v1578_v0, %v1578_v0 }
 0x190   : > { %v1682_v34 = vadd.f32 %v1681_v32, %v2762_v30  ;;  %v1718_v7 = vadd.f32 %v1717_v38, %v1703_v33  ;;  %v1714_v62 = vmul.f32 %v1581_v1, %v1581_v1  ;;  %v1715_v63 = vmul.f32 %v1586_v55, %v1586_v55 }
 0x191   : > { %v1716_v8 = vmul.f32 %v1589_v22, %v1589_v22 }
 0x192   : > { %v1683_v3 = vadd.f32 %v1682_v34, %v2768_v47  ;;  %v1719_v42 = vadd.f32 %v1718_v7, %v1704_v36 }
 0x194   : > { %v1684_v25 = vadd.f32 %v1683_v3, %v2771_v49  ;;  %v1720_v5 = vadd.f32 %v1719_v42, %v1705_v40 }
 0x196   : > { %v1685_v28 = vadd.f32 %v1684_v25, %v2777_v2  ;;  %v1721_v27 = vadd.f32 %v1720_v5, %v1706_v9 }
 0x198   : > { %v1686_v30 = vadd.f32 %v1685_v28, %v2780_v6  ;;  %v1722_v50 = vadd.f32 %v1721_v27, %v1707_v43 }
 0x19a   : > { %v1687_v47 = vadd.f32 %v1686_v30, %v2786_v23  ;;  %v1723_v56 = vadd.f32 %v1722_v50, %v1708_v44 }
 0x19c   : > { %v1688_v49 = vadd.f32 %v1687_v47, %v2789_v26  ;;  %v1724_v58 = vadd.f32 %v1723_v56, %v1709_v48 }
 0x19e   : > { %v1689_v2 = vadd.f32 %v1688_v49, %v2795_v45  ;;  %v1725_v19 = vadd.f32 %v1724_v58, %v1710_v52 }
 0x1a0   : > { %v1690_v6 = vadd.f32 %v1689_v2, %v2798_v46  ;;  %v1726_v39 = vadd.f32 %v1725_v19, %v1711_v57 }
 0x1a2   : > { %v1691_v23 = vadd.f32 %v1690_v6, %v1578_v0  ;;  %v1727_v21 = vadd.f32 %v1726_v39, %v1712_v59 }
 0x1a4   : > { %v1692_v61 = vadd.f32 %v1691_v23, %v1581_v1  ;;  %v1728_v41 = vadd.f32 %v1727_v21, %v1713_v60  ;;  %v1738_v1 = vld [vmem:[%s2877_s3] sm:$0xff] }
 0x1a6   : > { %v1693_v26 = vadd.f32 %v1692_v61, %v1586_v55  ;;  %v1729_v10 = vadd.f32 %v1728_v41, %v1714_v62  ;;  %v1741_v55 = vld [vmem:[%s2878_s4] sm:$0xff] }
 0x1a8   : > { %v1694_v4 = vadd.f32 %v1693_v26, %v1589_v22  ;;  %v1730_v12 = vadd.f32 %v1729_v10, %v1715_v63 }
 0x1aa   : > { %v1695_v45 = vrot.slane %v1694_v4, 4  ;;  %v1731_v11 = vadd.f32 %v1730_v12, %v1716_v8 }
 0x1ac   : > { %v1696_v14 = vadd.f32 %v1695_v45, %v1694_v4  ;;  %v1732_v16 = vrot.slane %v1731_v11, 4 }
 0x1ae   : > { %v1697_v15 = vrot.slane %v1696_v14, 2  ;;  %v1733_v53 = vadd.f32 %v1732_v16, %v1731_v11 }
 0x1b0   : > { %v1698_v46 = vadd.f32 %v1697_v15, %v1696_v14  ;;  %v1734_v0 = vrot.slane %v1733_v53, 2 }
 0x1b2   : > { %v1699_v17 = vrot.slane %v1698_v46, 1  ;;  %v1735_v18 = vadd.f32 %v1734_v0, %v1733_v53 }
 0x1b4   : > { %v1700_v35 = vadd.f32 %v1699_v17, %v1698_v46  ;;  %v1736_v20 = vrot.slane %v1735_v18, 1 }
 0x1b6   : > { %v1739_v13 = vadd.f32 %v1738_v1, %v1700_v35  ;;  %v1737_v37 = vadd.f32 %v1736_v20, %v1735_v18 }
 0x1b8   : > { %1740 = vst [vmem:[%s2877_s3] sm:$0xff] %v1739_v13  ;;  %v1742_v22 = vadd.f32 %v1741_v55, %v1737_v37 }
 0x1ba   : > { %1743 = vst [vmem:[%s2878_s4] sm:$0xff] %v1742_v22 }
 0x1bb PF: > { %s15_s17 = sadd.s32 1, %s2515_s17   ;;  %s2879_s15 = smov %s2511_s16 }
 0x1bc   : > { %p12_p6 = scmp.ge.s32.totalorder %s15_s17, 6   ;;  %s2880_s16 = smov %s2882_s18 }
 0x1be   :  { %14 = sbr.rel (!%p12_p6) target bundleno = 2 (0x2), region = 89 }

// kernel: generator_forward.15
= control target key start
LH: loop header
LB: loop body
LE: loop exit
PB: predicated region body
PF: predicated region fallthrough
CT: control target
= control target key end

     0   :  { %s2463_s15 = smov 0   ;;  %s2465_s16 = smov 0   ;;  %s2872_s0 = inlined_call_operand.vmem [shape: bf16[4,512,512], index: 0, kind: input, shape index: {}]   ;;  %s2873_s1 = inlined_call_operand.vmem [shape: bf16[4,512,128], index: 1, kind: input, shape index: {}]   ;;  %s2874_s2 = inlined_call_operand.vmem [shape: bf16[4,512,128], index: 2, kind: output, shape index: {0}]   ;;  %s2875_s3 = inlined_call_operand.vmem [shape: f32[8,128], index: 3, kind: output, shape index: {1}]   ;;  %s2876_s4 = inlined_call_operand.vmem [shape: f32[8,128], index: 4, kind: output, shape index: {2}]  }
   0x1   :  { %s2467_s17 = smov 0   ;;  %s2469_s18 = smov 0  }
   0x2   :  { %s2471_s19 = smov 0  }
   0x3 LB: > { %s27_s20 = sadd.s32 1, %s2427_s17  ;;  %s30_s21 = sadd.s32 1, %s2431_s18  ;;  %s2435_s19 = sphi %s2471_s19, %s15_s19   ;;  %s2431_s18 = sphi %s2469_s18, %s2881_s18   ;;  %s2427_s17 = sphi %s2467_s17, %s2880_s17   ;;  %s2423_s16 = sphi %s2465_s16, %s2879_s16   ;;  %s2419_s15 = sphi %s2463_s15, %s2878_s15  }
   0x4   : > { %p28_p0 = scmp.ge.s32.totalorder %s27_s20, 2  ;;  %p1734_p1 = scmp.ge.s32.totalorder %s2435_s19, 1 }
   0x5   : > { %p213_p2 = scmp.lt.s32.totalorder %s2435_s19, 9 }
   0x6   : > { %s2883_s20 = smov (%p28_p0, %s27_s20), 0  ;;  %s2885_s21 = smov (!%p28_p0, %s30_s21), %s2431_s18 }
   0x7   : > { %p214_p3 = pnand %p1734_p1, %p213_p2  ;;  %p32_p4 = scmp.ge.s32.totalorder %s2885_s21, 4 }
   0x8   : > { %p268_p5 = scmp.lt.s32.totalorder (!%p214_p3), %s2423_s16, 3  ;;  %s1735_s27 = sshll.u32 (!%p214_p3), %s2419_s15, 5 }
   0x9   : > { %s2887_s21 = smov (%p32_p4, %s2885_s21), 0  ;;  %217 = sbr.rel (%p214_p3) target bundleno = 476 (0x1dc), region = 28 }
   0xa   : > { %p270_p6 = scmp.lt.s32.totalorder (!%p214_p3), %s1735_s27, 63  ;;  %p1430_p7 = scmp.eq.s32.totalorder (!%p214_p3), %s2423_s16, 0 }
   0xb   : > { %p1431_p8 = scmp.eq.s32.totalorder (!%p214_p3), %s2419_s15, 0 }
   0xd   : > { %p2620_p9 = pnand (!%p214_p3), %p1431_p8, %p1430_p7 }
  0x10   : > { %s2499_s22 = scalar_select %p268_p5, %s2423_s16, 3 }
  0x11   : > { %s2889_s27 = smov (!%p270_p6, %s1735_s27), 63 }
  0x12   : > { %s1737_s23 = sshll.u32 %s2499_s22, 8  ;;  %s1736_s28 = sshll.u32 %s2889_s27, 2 }
  0x13   : > { %s2507_s26 = scalar_lea.vmem %s2873_s1, %s1737_s23  ;;  %s274_s29 = sadd.s32 %s1737_s23, %s1736_s28 }
  0x14   : > { %v2269_v0 = vld [vmem:[%s2507_s26 + $0x40] sm:$0xff]   ;;  %v2273_v4 = vld [vmem:[%s2507_s26 + $0x48] sm:$0xff]   ;;  %v2277_v8 = vld [vmem:[%s2507_s26 + $0x50] sm:$0xff]   ;;  %s1738_s30 = sshll.u32 %s274_s29, 2  ;;  %s1742_s8 = sshll.u32 %s2499_s22, 6 }
  0x15   : > { %v2270_v1 = vld [vmem:[%s2507_s26 + $0xc0] sm:$0xff]   ;;  %2004 = vmatprep.subr.bf16.mxu0 %v2269_v0  ;;  %v2274_v5 = vld [vmem:[%s2507_s26 + $0xc8] sm:$0xff]   ;;  %v2278_v9 = vld [vmem:[%s2507_s26 + $0xd0] sm:$0xff]   ;;  %s2548_s7 = scalar_lea.vmem %s2872_s0, %s1738_s30  ;;  %s295_s9 = sadd.s32 %s1742_s8, %s2889_s27 }
  0x16   : > { %v2271_v2 = vld [vmem:[%s2507_s26] sm:$0xff]   ;;  %2116 = vmatprep.subr.bf16.mxu1 %v2270_v1  ;;  %v2275_v6 = vld [vmem:[%s2507_s26 + $0x8] sm:$0xff]   ;;  %v2279_v10 = vld [vmem:[%s2507_s26 + $0x10] sm:$0xff]   ;;  %s1743_s11 = sshll.u32 %s295_s9, 2 }
  0x17   : > { %v2272_v3 = vld [vmem:[%s2507_s26 + $0x80] sm:$0xff]   ;;  %2005 = vmatpush3.bf16.msra.mxu0 %v2271_v2  ;;  %v2276_v7 = vld [vmem:[%s2507_s26 + $0x88] sm:$0xff]   ;;  %v2280_v11 = vld [vmem:[%s2507_s26 + $0x90] sm:$0xff]   ;;  %s2631_s14 = scalar_lea.vmem %s2874_s2, %s1743_s11 }
  0x18   : > { %2117 = vmatpush3.bf16.msra.mxu1 %v2272_v3  ;;  %2006 = vmatprep.subr.bf16.mxu0 %v2273_v4  ;;  %v2281_v12 = vld [vmem:[%s2507_s26 + $0x58] sm:$0xff]   ;;  %v2285_v16 = vld [vmem:[%s2507_s26 + $0x60] sm:$0xff]   ;;  %v2289_v20 = vld [vmem:[%s2507_s26 + $0x68] sm:$0xff]  }
  0x19   : > { %2118 = vmatprep.subr.bf16.mxu1 %v2274_v5  ;;  %v2282_v13 = vld [vmem:[%s2507_s26 + $0xd8] sm:$0xff]   ;;  %v2286_v17 = vld [vmem:[%s2507_s26 + $0xe0] sm:$0xff]   ;;  %v2290_v21 = vld [vmem:[%s2507_s26 + $0xe8] sm:$0xff]  }
  0x1a   : > { %v2283_v14 = vld [vmem:[%s2507_s26 + $0x18] sm:$0xff]   ;;  %v2287_v18 = vld [vmem:[%s2507_s26 + $0x20] sm:$0xff]   ;;  %v2291_v22 = vld [vmem:[%s2507_s26 + $0x28] sm:$0xff]  }
  0x1b   : > { %2007 = vmatpush3.bf16.msra.mxu0 %v2275_v6  ;;  %v2284_v15 = vld [vmem:[%s2507_s26 + $0x98] sm:$0xff]   ;;  %v2288_v19 = vld [vmem:[%s2507_s26 + $0xa0] sm:$0xff]   ;;  %v2292_v23 = vld [vmem:[%s2507_s26 + $0xa8] sm:$0xff]  }
  0x1c   : > { %2119 = vmatpush3.bf16.msra.mxu1 %v2276_v7  ;;  %2008 = vmatprep.subr.bf16.mxu0 %v2277_v8  ;;  %v2293_v24 = vld [vmem:[%s2507_s26 + $0x70] sm:$0xff]   ;;  %v2297_v28 = vld [vmem:[%s2507_s26 + $0x78] sm:$0xff]  }
  0x1d   : > { %2120 = vmatprep.subr.bf16.mxu1 %v2278_v9  ;;  %v2294_v25 = vld [vmem:[%s2507_s26 + $0xf0] sm:$0xff]   ;;  %v2298_v29 = vld [vmem:[%s2507_s26 + $0xf8] sm:$0xff]  }
  0x1e   : > { %v2295_v26 = vld [vmem:[%s2507_s26 + $0x30] sm:$0xff]   ;;  %v2299_v30 = vld [vmem:[%s2507_s26 + $0x38] sm:$0xff]  }
  0x1f   : > { %2009 = vmatpush3.bf16.msra.mxu0 %v2279_v10  ;;  %v2296_v27 = vld [vmem:[%s2507_s26 + $0xb0] sm:$0xff]   ;;  %v2300_v31 = vld [vmem:[%s2507_s26 + $0xb8] sm:$0xff]  }
  0x20   : > { %2121 = vmatpush3.bf16.msra.mxu1 %v2280_v11  ;;  %2010 = vmatprep.subr.bf16.mxu0 %v2281_v12  ;;  %v2301_v32 = vld [vmem:[%s2548_s7] ss:$16 sps:$4 sm:$0xff]   ;;  %v2303_v33 = vld [vmem:[%s2548_s7 + $0x4] ss:$16 sps:$4 sm:$0xff]   ;;  %v2304_v34 = vld [vmem:[%s2548_s7 + $0x8] ss:$16 sps:$4 sm:$0xff]  }
  0x21   : > { %2122 = vmatprep.subr.bf16.mxu1 %v2282_v13  ;;  %v2306_v35 = vld [vmem:[%s2548_s7 + $0xc] ss:$16 sps:$4 sm:$0xff]   ;;  %980 = vmatprep.mubr.bf16.mxu0 %v2303_v33  ;;  %v2307_v36 = vld [vmem:[%s2548_s7 + $0x24] ss:$16 sps:$4 sm:$0xff]   ;;  %v2311_v38 = vld [vmem:[%s2548_s7 + $0x20] ss:$16 sps:$4 sm:$0xff]  }
  0x22   : > { %1141 = vmatprep.mubr.bf16.mxu1 %v2306_v35  ;;  %v2309_v37 = vld [vmem:[%s2548_s7 + $0x2c] ss:$16 sps:$4 sm:$0xff]   ;;  %v2312_v39 = vld [vmem:[%s2548_s7 + $0x28] ss:$16 sps:$4 sm:$0xff]   ;;  %v2313_v40 = vld [vmem:[%s2548_s7 + $0x44] ss:$16 sps:$4 sm:$0xff]  }
  0x23   : > { %2011 = vmatpush3.bf16.msra.mxu0 %v2283_v14  ;;  %v2315_v41 = vld [vmem:[%s2548_s7 + $0x4c] ss:$16 sps:$4 sm:$0xff]   ;;  %v2317_v42 = vld [vmem:[%s2548_s7 + $0x40] ss:$16 sps:$4 sm:$0xff]   ;;  %v2318_v43 = vld [vmem:[%s2548_s7 + $0x48] ss:$16 sps:$4 sm:$0xff]  }
  0x24   : > { %2123 = vmatpush3.bf16.msra.mxu1 %v2284_v15  ;;  %2012 = vmatprep.subr.bf16.mxu0 %v2285_v16  ;;  %v2319_v44 = vld [vmem:[%s2548_s7 + $0x64] ss:$16 sps:$4 sm:$0xff]   ;;  %v2321_v45 = vld [vmem:[%s2548_s7 + $0x6c] ss:$16 sps:$4 sm:$0xff]   ;;  %v2323_v46 = vld [vmem:[%s2548_s7 + $0x60] ss:$16 sps:$4 sm:$0xff]  }
  0x25   : > { %2124 = vmatprep.subr.bf16.mxu1 %v2286_v17  ;;  %v2324_v47 = vld [vmem:[%s2548_s7 + $0x68] ss:$16 sps:$4 sm:$0xff]   ;;  %v2325_v48 = vld [vmem:[%s2548_s7 + $0x84] ss:$16 sps:$4 sm:$0xff]   ;;  %v2327_v49 = vld [vmem:[%s2548_s7 + $0x8c] ss:$16 sps:$4 sm:$0xff]  }
  0x26   : > { %v2329_v50 = vld [vmem:[%s2548_s7 + $0x80] ss:$16 sps:$4 sm:$0xff]   ;;  %v2330_v51 = vld [vmem:[%s2548_s7 + $0x88] ss:$16 sps:$4 sm:$0xff]   ;;  %v2331_v52 = vld [vmem:[%s2548_s7 + $0xa4] ss:$16 sps:$4 sm:$0xff]  }
  0x27   : > { %2013 = vmatpush3.bf16.msra.mxu0 %v2287_v18  ;;  %v2333_v53 = vld [vmem:[%s2548_s7 + $0xac] ss:$16 sps:$4 sm:$0xff]   ;;  %v2335_v54 = vld [vmem:[%s2548_s7 + $0xa0] ss:$16 sps:$4 sm:$0xff]   ;;  %v2336_v55 = vld [vmem:[%s2548_s7 + $0xa8] ss:$16 sps:$4 sm:$0xff]  }
  0x28   : > { %2125 = vmatpush3.bf16.msra.mxu1 %v2288_v19  ;;  %2014 = vmatprep.subr.bf16.mxu0 %v2289_v20  ;;  %v2337_v56 = vld [vmem:[%s2548_s7 + $0xc4] ss:$16 sps:$4 sm:$0xff]   ;;  %v2339_v57 = vld [vmem:[%s2548_s7 + $0xcc] ss:$16 sps:$4 sm:$0xff]   ;;  %v2341_v58 = vld [vmem:[%s2548_s7 + $0xc0] ss:$16 sps:$4 sm:$0xff]  }
  0x29   : > { %2126 = vmatprep.subr.bf16.mxu1 %v2290_v21  ;;  %v2342_v59 = vld [vmem:[%s2548_s7 + $0xc8] ss:$16 sps:$4 sm:$0xff]   ;;  %v2343_v60 = vld [vmem:[%s2548_s7 + $0xe4] ss:$16 sps:$4 sm:$0xff]   ;;  %v2345_v61 = vld [vmem:[%s2548_s7 + $0xec] ss:$16 sps:$4 sm:$0xff]  }
  0x2a   : > { %v2347_v62 = vld [vmem:[%s2548_s7 + $0xe0] ss:$16 sps:$4 sm:$0xff]   ;;  %v2348_v63 = vld [vmem:[%s2548_s7 + $0xe8] ss:$16 sps:$4 sm:$0xff]   ;;  %v2349_v0 = vld [vmem:[%s2548_s7 + $0x104] ss:$16 sps:$4 sm:$0xff]  }
  0x2b   : > { %2015 = vmatpush3.bf16.msra.mxu0 %v2291_v22  ;;  %v2351_v1 = vld [vmem:[%s2548_s7 + $0x10c] ss:$16 sps:$4 sm:$0xff]   ;;  %v2353_v2 = vld [vmem:[%s2548_s7 + $0x100] ss:$16 sps:$4 sm:$0xff]   ;;  %v2354_v3 = vld [vmem:[%s2548_s7 + $0x108] ss:$16 sps:$4 sm:$0xff]  }
  0x2c   : > { %2127 = vmatpush3.bf16.msra.mxu1 %v2292_v23  ;;  %2016 = vmatprep.subr.bf16.mxu0 %v2293_v24  ;;  %v2355_v4 = vld [vmem:[%s2548_s7 + $0x124] ss:$16 sps:$4 sm:$0xff]   ;;  %v2357_v5 = vld [vmem:[%s2548_s7 + $0x12c] ss:$16 sps:$4 sm:$0xff]   ;;  %v2359_v6 = vld [vmem:[%s2548_s7 + $0x120] ss:$16 sps:$4 sm:$0xff]  }
  0x2d   : > { %2128 = vmatprep.subr.bf16.mxu1 %v2294_v25  ;;  %v2360_v7 = vld [vmem:[%s2548_s7 + $0x128] ss:$16 sps:$4 sm:$0xff]   ;;  %v2361_v8 = vld [vmem:[%s2548_s7 + $0x144] ss:$16 sps:$4 sm:$0xff]   ;;  %v2363_v9 = vld [vmem:[%s2548_s7 + $0x14c] ss:$16 sps:$4 sm:$0xff]  }
  0x2e   : > { %v2365_v10 = vld [vmem:[%s2548_s7 + $0x140] ss:$16 sps:$4 sm:$0xff]   ;;  %v2366_v11 = vld [vmem:[%s2548_s7 + $0x148] ss:$16 sps:$4 sm:$0xff]   ;;  %v2367_v12 = vld [vmem:[%s2548_s7 + $0x164] ss:$16 sps:$4 sm:$0xff]  }
  0x2f   : > { %2017 = vmatpush3.bf16.msra.mxu0 %v2295_v26  ;;  %v2369_v13 = vld [vmem:[%s2548_s7 + $0x16c] ss:$16 sps:$4 sm:$0xff]   ;;  %v2371_v14 = vld [vmem:[%s2548_s7 + $0x160] ss:$16 sps:$4 sm:$0xff]   ;;  %v2372_v15 = vld [vmem:[%s2548_s7 + $0x168] ss:$16 sps:$4 sm:$0xff]  }
  0x30   : > { %2129 = vmatpush3.bf16.msra.mxu1 %v2296_v27  ;;  %2018 = vmatprep.subr.bf16.mxu0 %v2297_v28  ;;  %v2373_v16 = vld [vmem:[%s2548_s7 + $0x184] ss:$16 sps:$4 sm:$0xff]   ;;  %v2375_v17 = vld [vmem:[%s2548_s7 + $0x18c] ss:$16 sps:$4 sm:$0xff]   ;;  %v2377_v18 = vld [vmem:[%s2548_s7 + $0x180] ss:$16 sps:$4 sm:$0xff]  }
  0x31   : > { %2130 = vmatprep.subr.bf16.mxu1 %v2298_v29  ;;  %v2378_v19 = vld [vmem:[%s2548_s7 + $0x188] ss:$16 sps:$4 sm:$0xff]   ;;  %v2379_v20 = vld [vmem:[%s2548_s7 + $0x1a4] ss:$16 sps:$4 sm:$0xff]   ;;  %v2381_v21 = vld [vmem:[%s2548_s7 + $0x1ac] ss:$16 sps:$4 sm:$0xff]  }
  0x32   : > { %v2383_v22 = vld [vmem:[%s2548_s7 + $0x1a0] ss:$16 sps:$4 sm:$0xff]   ;;  %v2384_v23 = vld [vmem:[%s2548_s7 + $0x1a8] ss:$16 sps:$4 sm:$0xff]   ;;  %v2385_v24 = vld [vmem:[%s2548_s7 + $0x1c4] ss:$16 sps:$4 sm:$0xff]  }
  0x33   : > { %2019 = vmatpush3.bf16.msra.mxu0 %v2299_v30  ;;  %v2387_v25 = vld [vmem:[%s2548_s7 + $0x1cc] ss:$16 sps:$4 sm:$0xff]   ;;  %v2389_v26 = vld [vmem:[%s2548_s7 + $0x1c0] ss:$16 sps:$4 sm:$0xff]   ;;  %v2390_v27 = vld [vmem:[%s2548_s7 + $0x1c8] ss:$16 sps:$4 sm:$0xff]  }
  0x34   : > { %2131 = vmatpush3.bf16.msra.mxu1 %v2300_v31  ;;  %v2391_v28 = vld [vmem:[%s2548_s7 + $0x1e4] ss:$16 sps:$4 sm:$0xff]   ;;  %v2393_v29 = vld [vmem:[%s2548_s7 + $0x1ec] ss:$16 sps:$4 sm:$0xff]   ;;  %v2395_v30 = vld [vmem:[%s2548_s7 + $0x1e0] ss:$16 sps:$4 sm:$0xff]  }
  0x35   : > { %v2396_v31 = vld [vmem:[%s2548_s7 + $0x1e8] ss:$16 sps:$4 sm:$0xff]  }
  0x36   : > { %981 = vmatmul.mubr.bf16.vlgmr.msra.gmra.mrb[0].mxu0 %v2301_v32 }
  0x37   : > { %1142 = vmatmul.mubr.bf16.vlgmr.msra.gmra.mrb[0].mxu1 %v2304_v34  ;;  %988 = vmatprep.mubr.bf16.mxu0 %v2307_v36 }
  0x38   : > { %1149 = vmatprep.mubr.bf16.mxu1 %v2309_v37 }
  0x3e   : > { %989 = vmatmul.mubr.bf16.gmra.mrb[4].mxu0 %v2311_v38 }
  0x3f   : > { %1150 = vmatmul.mubr.bf16.gmra.mrb[4].mxu1 %v2312_v39  ;;  %996 = vmatprep.mubr.bf16.mxu0 %v2313_v40 }
  0x40   : > { %1157 = vmatprep.mubr.bf16.mxu1 %v2315_v41 }
  0x46   : > { %997 = vmatmul.mubr.bf16.gmra.mrb[8].mxu0 %v2317_v42 }
  0x47   : > { %1158 = vmatmul.mubr.bf16.gmra.mrb[8].mxu1 %v2318_v43  ;;  %1004 = vmatprep.mubr.bf16.mxu0 %v2319_v44 }
  0x48   : > { %1165 = vmatprep.mubr.bf16.mxu1 %v2321_v45 }
  0x4e   : > { %1005 = vmatmul.mubr.bf16.gmra.mrb[12].mxu0 %v2323_v46 }
  0x4f   : > { %1166 = vmatmul.mubr.bf16.gmra.mrb[12].mxu1 %v2324_v47  ;;  %1012 = vmatprep.mubr.bf16.mxu0 %v2325_v48 }
  0x50   : > { %1173 = vmatprep.mubr.bf16.mxu1 %v2327_v49 }
  0x56   : > { %1013 = vmatmul.mubr.bf16.gmra.mrb[16].mxu0 %v2329_v50 }
  0x57   : > { %1174 = vmatmul.mubr.bf16.gmra.mrb[16].mxu1 %v2330_v51  ;;  %1020 = vmatprep.mubr.bf16.mxu0 %v2331_v52 }
  0x58   : > { %1181 = vmatprep.mubr.bf16.mxu1 %v2333_v53 }
  0x5e   : > { %1021 = vmatmul.mubr.bf16.gmra.mrb[20].mxu0 %v2335_v54 }
  0x5f   : > { %1182 = vmatmul.mubr.bf16.gmra.mrb[20].mxu1 %v2336_v55  ;;  %1028 = vmatprep.mubr.bf16.mxu0 %v2337_v56 }
  0x60   : > { %1189 = vmatprep.mubr.bf16.mxu1 %v2339_v57 }
  0x66   : > { %1029 = vmatmul.mubr.bf16.gmra.mrb[24].mxu0 %v2341_v58 }
  0x67   : > { %1190 = vmatmul.mubr.bf16.gmra.mrb[24].mxu1 %v2342_v59  ;;  %1036 = vmatprep.mubr.bf16.mxu0 %v2343_v60 }
  0x68   : > { %1197 = vmatprep.mubr.bf16.mxu1 %v2345_v61 }
  0x6e   : > { %1037 = vmatmul.mubr.bf16.gmra.mrb[28].mxu0 %v2347_v62 }
  0x6f   : > { %1198 = vmatmul.mubr.bf16.gmra.mrb[28].mxu1 %v2348_v63  ;;  %1044 = vmatprep.mubr.bf16.mxu0 %v2349_v0 }
  0x70   : > { %1205 = vmatprep.mubr.bf16.mxu1 %v2351_v1 }
  0x76   : > { %1045 = vmatmul.mubr.bf16.gmra.mrb[32].mxu0 %v2353_v2 }
  0x77   : > { %1206 = vmatmul.mubr.bf16.gmra.mrb[32].mxu1 %v2354_v3  ;;  %1052 = vmatprep.mubr.bf16.mxu0 %v2355_v4 }
  0x78   : > { %1213 = vmatprep.mubr.bf16.mxu1 %v2357_v5 }
  0x7e   : > { %1053 = vmatmul.mubr.bf16.gmra.mrb[36].mxu0 %v2359_v6 }
  0x7f   : > { %1214 = vmatmul.mubr.bf16.gmra.mrb[36].mxu1 %v2360_v7  ;;  %1060 = vmatprep.mubr.bf16.mxu0 %v2361_v8 }
  0x80   : > { %1221 = vmatprep.mubr.bf16.mxu1 %v2363_v9 }
  0x86   : > { %1061 = vmatmul.mubr.bf16.gmra.mrb[40].mxu0 %v2365_v10 }
  0x87   : > { %1222 = vmatmul.mubr.bf16.gmra.mrb[40].mxu1 %v2366_v11  ;;  %1068 = vmatprep.mubr.bf16.mxu0 %v2367_v12 }
  0x88   : > { %1229 = vmatprep.mubr.bf16.mxu1 %v2369_v13 }
  0x8e   : > { %1069 = vmatmul.mubr.bf16.gmra.mrb[44].mxu0 %v2371_v14 }
  0x8f   : > { %1230 = vmatmul.mubr.bf16.gmra.mrb[44].mxu1 %v2372_v15  ;;  %1076 = vmatprep.mubr.bf16.mxu0 %v2373_v16 }
  0x90   : > { %1237 = vmatprep.mubr.bf16.mxu1 %v2375_v17 }
  0x96   : > { %1077 = vmatmul.mubr.bf16.gmra.mrb[48].mxu0 %v2377_v18 }
  0x97   : > { %1238 = vmatmul.mubr.bf16.gmra.mrb[48].mxu1 %v2378_v19  ;;  %1084 = vmatprep.mubr.bf16.mxu0 %v2379_v20 }
  0x98   : > { %1245 = vmatprep.mubr.bf16.mxu1 %v2381_v21 }
  0x9e   : > { %1085 = vmatmul.mubr.bf16.gmra.mrb[52].mxu0 %v2383_v22 }
  0x9f   : > { %1246 = vmatmul.mubr.bf16.gmra.mrb[52].mxu1 %v2384_v23  ;;  %1092 = vmatprep.mubr.bf16.mxu0 %v2385_v24 }
  0xa0   : > { %1253 = vmatprep.mubr.bf16.mxu1 %v2387_v25 }
  0xa6   : > { %1093 = vmatmul.mubr.bf16.gmra.mrb[56].mxu0 %v2389_v26 }
  0xa7   : > { %1254 = vmatmul.mubr.bf16.gmra.mrb[56].mxu1 %v2390_v27  ;;  %1100 = vmatprep.mubr.bf16.mxu0 %v2391_v28 }
  0xa8   : > { %1261 = vmatprep.mubr.bf16.mxu1 %v2393_v29 }
  0xae   : > { %1101 = vmatmul.mubr.bf16.gmra.mrb[60].mxu0 %v2395_v30 }
  0xaf   : > { %1262 = vmatmul.mubr.bf16.gmra.mrb[60].mxu1 %v2396_v31 }
 0x109   : > { %v2020_v32 = vpop.f32.mrb[0].mxu0 }
 0x10a   : > { %v2132_v33 = vpop.f32.mrb[0].mxu1  ;;  %v2021_v34 = vpop.f32.mrb[1].mxu0 }
 0x10b   : > { %v2022_v35 = vadd.f32 %v2021_v34, %v2020_v32  ;;  %v2133_v36 = vpop.f32.mrb[1].mxu1  ;;  %v2023_v37 = vpop.f32.mrb[2].mxu0 }
 0x10c   : > { %v2134_v38 = vadd.f32 %v2133_v36, %v2132_v33  ;;  %v2135_v39 = vpop.f32.mrb[2].mxu1  ;;  %v2024_v40 = vpop.f32.mrb[3].mxu0 }
 0x10d   : > { %v2025_v41 = vadd.f32 %v2024_v40, %v2023_v37  ;;  %v2136_v42 = vpop.f32.mrb[3].mxu1 }
 0x10e   : > { %v2624_v43 = vadd.f32 %v2134_v38, %v2022_v35  ;;  %v2137_v44 = vadd.f32 %v2136_v42, %v2135_v39 }
 0x110   : > { %v2626_v45 = vadd.f32 %v2137_v44, %v2025_v41 }
 0x111   : > { %v2026_v46 = vpop.f32.mrb[4].mxu0 }
 0x112   : > { %v1912_v47 = vpack.c.bf16 %v2626_v45, %v2624_v43  ;;  %v2138_v48 = vpop.f32.mrb[4].mxu1  ;;  %v2027_v49 = vpop.f32.mrb[5].mxu0 }
 0x113   : > { %v2028_v50 = vadd.f32 %v2027_v49, %v2026_v46  ;;  %v2139_v51 = vpop.f32.mrb[5].mxu1  ;;  %v2029_v52 = vpop.f32.mrb[6].mxu0 }
 0x114   : > { %1913 = vst [vmem:[%s2631_s14] sm:$0xff] %v1912_v47   ;;  %v2140_v53 = vadd.f32 %v2139_v51, %v2138_v48  ;;  %v2141_v54 = vpop.f32.mrb[6].mxu1  ;;  %v2030_v55 = vpop.f32.mrb[7].mxu0 }
 0x115   : > { %v2031_v56 = vadd.f32 %v2030_v55, %v2029_v52  ;;  %v2142_v57 = vpop.f32.mrb[7].mxu1 }
 0x116   : > { %v2636_v58 = vadd.f32 %v2140_v53, %v2028_v50  ;;  %v2143_v59 = vadd.f32 %v2142_v57, %v2141_v54 }
 0x118   : > { %v2638_v60 = vadd.f32 %v2143_v59, %v2031_v56 }
 0x119   : > { %v2032_v61 = vpop.f32.mrb[8].mxu0 }
 0x11a   : > { %v1917_v62 = vpack.c.bf16 %v2638_v60, %v2636_v58  ;;  %v2144_v63 = vpop.f32.mrb[8].mxu1  ;;  %v2033_v0 = vpop.f32.mrb[9].mxu0 }
 0x11b   : > { %v2034_v1 = vadd.f32 %v2033_v0, %v2032_v61  ;;  %v2145_v2 = vpop.f32.mrb[9].mxu1  ;;  %v2035_v3 = vpop.f32.mrb[10].mxu0 }
 0x11c   : > { %1989 = vst [vmem:[%s2631_s14 + $0x8] sm:$0xff] %v1917_v62   ;;  %v2146_v4 = vadd.f32 %v2145_v2, %v2144_v63  ;;  %v2147_v5 = vpop.f32.mrb[10].mxu1  ;;  %v2036_v6 = vpop.f32.mrb[11].mxu0 }
 0x11d   : > { %v2037_v7 = vadd.f32 %v2036_v6, %v2035_v3  ;;  %v2148_v8 = vpop.f32.mrb[11].mxu1 }
 0x11e   : > { %v2643_v9 = vadd.f32 %v2146_v4, %v2034_v1  ;;  %v2149_v10 = vadd.f32 %v2148_v8, %v2147_v5 }
 0x120   : > { %v2645_v11 = vadd.f32 %v2149_v10, %v2037_v7 }
 0x121   : > { %v2038_v12 = vpop.f32.mrb[12].mxu0 }
 0x122   : > { %v1922_v13 = vpack.c.bf16 %v2645_v11, %v2643_v9  ;;  %v2150_v14 = vpop.f32.mrb[12].mxu1  ;;  %v2039_v15 = vpop.f32.mrb[13].mxu0 }
 0x123   : > { %v2040_v16 = vadd.f32 %v2039_v15, %v2038_v12  ;;  %v2151_v17 = vpop.f32.mrb[13].mxu1  ;;  %v2041_v18 = vpop.f32.mrb[14].mxu0 }
 0x124   : > { %1990 = vst [vmem:[%s2631_s14 + $0x10] sm:$0xff] %v1922_v13   ;;  %v2152_v19 = vadd.f32 %v2151_v17, %v2150_v14  ;;  %v2153_v20 = vpop.f32.mrb[14].mxu1  ;;  %v2042_v21 = vpop.f32.mrb[15].mxu0 }
 0x125   : > { %v2043_v22 = vadd.f32 %v2042_v21, %v2041_v18  ;;  %v2154_v23 = vpop.f32.mrb[15].mxu1 }
 0x126   : > { %v2650_v24 = vadd.f32 %v2152_v19, %v2040_v16  ;;  %v2155_v25 = vadd.f32 %v2154_v23, %v2153_v20 }
 0x128   : > { %v2652_v26 = vadd.f32 %v2155_v25, %v2043_v22 }
 0x129   : > { %v2044_v27 = vpop.f32.mrb[16].mxu0 }
 0x12a   : > { %v1927_v28 = vpack.c.bf16 %v2652_v26, %v2650_v24  ;;  %v2156_v29 = vpop.f32.mrb[16].mxu1  ;;  %v2045_v30 = vpop.f32.mrb[17].mxu0 }
 0x12b   : > { %v2046_v31 = vadd.f32 %v2045_v30, %v2044_v27  ;;  %v2157_v32 = vpop.f32.mrb[17].mxu1  ;;  %v2047_v33 = vpop.f32.mrb[18].mxu0 }
 0x12c   : > { %1991 = vst [vmem:[%s2631_s14 + $0x18] sm:$0xff] %v1927_v28   ;;  %v2158_v34 = vadd.f32 %v2157_v32, %v2156_v29  ;;  %v2159_v35 = vpop.f32.mrb[18].mxu1  ;;  %v2048_v36 = vpop.f32.mrb[19].mxu0 }
 0x12d   : > { %v2049_v37 = vadd.f32 %v2048_v36, %v2047_v33  ;;  %v2160_v38 = vpop.f32.mrb[19].mxu1 }
 0x12e   : > { %v2657_v39 = vadd.f32 %v2158_v34, %v2046_v31  ;;  %v2161_v40 = vadd.f32 %v2160_v38, %v2159_v35 }
 0x130   : > { %v2659_v41 = vadd.f32 %v2161_v40, %v2049_v37 }
 0x131   : > { %v2050_v42 = vpop.f32.mrb[20].mxu0 }
 0x132   : > { %v1932_v44 = vpack.c.bf16 %v2659_v41, %v2657_v39  ;;  %v2162_v46 = vpop.f32.mrb[20].mxu1  ;;  %v2051_v47 = vpop.f32.mrb[21].mxu0 }
 0x133   : > { %v2052_v48 = vadd.f32 %v2051_v47, %v2050_v42  ;;  %v2163_v49 = vpop.f32.mrb[21].mxu1  ;;  %v2053_v50 = vpop.f32.mrb[22].mxu0 }
 0x134   : > { %1992 = vst [vmem:[%s2631_s14 + $0x20] sm:$0xff] %v1932_v44   ;;  %v2164_v51 = vadd.f32 %v2163_v49, %v2162_v46  ;;  %v2165_v52 = vpop.f32.mrb[22].mxu1  ;;  %v2054_v53 = vpop.f32.mrb[23].mxu0 }
 0x135   : > { %v2055_v54 = vadd.f32 %v2054_v53, %v2053_v50  ;;  %v2166_v55 = vpop.f32.mrb[23].mxu1 }
 0x136   : > { %v2664_v56 = vadd.f32 %v2164_v51, %v2052_v48  ;;  %v2167_v57 = vadd.f32 %v2166_v55, %v2165_v52 }
 0x138   : > { %v2666_v59 = vadd.f32 %v2167_v57, %v2055_v54 }
 0x139   : > { %v2056_v61 = vpop.f32.mrb[24].mxu0 }
 0x13a   : > { %v1937_v62 = vpack.c.bf16 %v2666_v59, %v2664_v56  ;;  %v2168_v63 = vpop.f32.mrb[24].mxu1  ;;  %v2057_v0 = vpop.f32.mrb[25].mxu0 }
 0x13b   : > { %v2058_v1 = vadd.f32 %v2057_v0, %v2056_v61  ;;  %v2169_v2 = vpop.f32.mrb[25].mxu1  ;;  %v2059_v3 = vpop.f32.mrb[26].mxu0 }
 0x13c   : > { %1993 = vst [vmem:[%s2631_s14 + $0x28] sm:$0xff] %v1937_v62   ;;  %v2170_v4 = vadd.f32 %v2169_v2, %v2168_v63  ;;  %v2171_v5 = vpop.f32.mrb[26].mxu1  ;;  %v2060_v6 = vpop.f32.mrb[27].mxu0 }
 0x13d   : > { %v2061_v7 = vadd.f32 %v2060_v6, %v2059_v3  ;;  %v2172_v8 = vpop.f32.mrb[27].mxu1 }
 0x13e   : > { %v2671_v10 = vadd.f32 %v2170_v4, %v2058_v1  ;;  %v2173_v12 = vadd.f32 %v2172_v8, %v2171_v5 }
 0x140   : > { %v2673_v13 = vadd.f32 %v2173_v12, %v2061_v7 }
 0x141   : > { %v2062_v14 = vpop.f32.mrb[28].mxu0 }
 0x142   : > { %v1942_v15 = vpack.c.bf16 %v2673_v13, %v2671_v10  ;;  %v2174_v16 = vpop.f32.mrb[28].mxu1  ;;  %v2063_v17 = vpop.f32.mrb[29].mxu0 }
 0x143   : > { %v2064_v18 = vadd.f32 %v2063_v17, %v2062_v14  ;;  %v2175_v19 = vpop.f32.mrb[29].mxu1  ;;  %v2065_v20 = vpop.f32.mrb[30].mxu0 }
 0x144   : > { %1994 = vst [vmem:[%s2631_s14 + $0x30] sm:$0xff] %v1942_v15   ;;  %v2176_v21 = vadd.f32 %v2175_v19, %v2174_v16  ;;  %v2177_v22 = vpop.f32.mrb[30].mxu1  ;;  %v2066_v23 = vpop.f32.mrb[31].mxu0 }
 0x145   : > { %v2067_v25 = vadd.f32 %v2066_v23, %v2065_v20  ;;  %v2178_v27 = vpop.f32.mrb[31].mxu1 }
 0x146   : > { %v2678_v28 = vadd.f32 %v2176_v21, %v2064_v18  ;;  %v2179_v29 = vadd.f32 %v2178_v27, %v2177_v22 }
 0x148   : > { %v2680_v30 = vadd.f32 %v2179_v29, %v2067_v25 }
 0x149   : > { %v2068_v31 = vpop.f32.mrb[32].mxu0 }
 0x14a   : > { %v1947_v32 = vpack.c.bf16 %v2680_v30, %v2678_v28  ;;  %v2180_v33 = vpop.f32.mrb[32].mxu1  ;;  %v2069_v34 = vpop.f32.mrb[33].mxu0 }
 0x14b   : > { %v2070_v35 = vadd.f32 %v2069_v34, %v2068_v31  ;;  %v2181_v36 = vpop.f32.mrb[33].mxu1  ;;  %v2071_v37 = vpop.f32.mrb[34].mxu0 }
 0x14c   : > { %1995 = vst [vmem:[%s2631_s14 + $0x38] sm:$0xff] %v1947_v32   ;;  %v2182_v38 = vadd.f32 %v2181_v36, %v2180_v33  ;;  %v2183_v40 = vpop.f32.mrb[34].mxu1  ;;  %v2072_v42 = vpop.f32.mrb[35].mxu0 }
 0x14d   : > { %v2073_v44 = vadd.f32 %v2072_v42, %v2071_v37  ;;  %v2184_v46 = vpop.f32.mrb[35].mxu1 }
 0x14e   : > { %v2685_v47 = vadd.f32 %v2182_v38, %v2070_v35  ;;  %v2185_v48 = vadd.f32 %v2184_v46, %v2183_v40 }
 0x150   : > { %v2687_v49 = vadd.f32 %v2185_v48, %v2073_v44 }
 0x151   : > { %v2074_v50 = vpop.f32.mrb[36].mxu0 }
 0x152   : > { %v1952_v51 = vpack.c.bf16 %v2687_v49, %v2685_v47  ;;  %v2186_v52 = vpop.f32.mrb[36].mxu1  ;;  %v2075_v53 = vpop.f32.mrb[37].mxu0 }
 0x153   : > { %v2076_v54 = vadd.f32 %v2075_v53, %v2074_v50  ;;  %v2187_v55 = vpop.f32.mrb[37].mxu1  ;;  %v2077_v57 = vpop.f32.mrb[38].mxu0 }
 0x154   : > { %1996 = vst [vmem:[%s2631_s14 + $0x40] sm:$0xff] %v1952_v51   ;;  %v2188_v61 = vadd.f32 %v2187_v55, %v2186_v52  ;;  %v2189_v62 = vpop.f32.mrb[38].mxu1  ;;  %v2078_v63 = vpop.f32.mrb[39].mxu0 }
 0x155   : > { %v2079_v0 = vadd.f32 %v2078_v63, %v2077_v57  ;;  %v2190_v1 = vpop.f32.mrb[39].mxu1 }
 0x156   : > { %v2692_v2 = vadd.f32 %v2188_v61, %v2076_v54  ;;  %v2191_v3 = vadd.f32 %v2190_v1, %v2189_v62 }
 0x158   : > { %v2694_v4 = vadd.f32 %v2191_v3, %v2079_v0 }
 0x159   : > { %v2080_v5 = vpop.f32.mrb[40].mxu0 }
 0x15a   : > { %v1957_v6 = vpack.c.bf16 %v2694_v4, %v2692_v2  ;;  %v2192_v7 = vpop.f32.mrb[40].mxu1  ;;  %v2081_v8 = vpop.f32.mrb[41].mxu0 }
 0x15b   : > { %v2082_v12 = vadd.f32 %v2081_v8, %v2080_v5  ;;  %v2193_v14 = vpop.f32.mrb[41].mxu1  ;;  %v2083_v15 = vpop.f32.mrb[42].mxu0 }
 0x15c   : > { %1997 = vst [vmem:[%s2631_s14 + $0x48] sm:$0xff] %v1957_v6   ;;  %v2194_v16 = vadd.f32 %v2193_v14, %v2192_v7  ;;  %v2195_v17 = vpop.f32.mrb[42].mxu1  ;;  %v2084_v18 = vpop.f32.mrb[43].mxu0 }
 0x15d   : > { %v2085_v19 = vadd.f32 %v2084_v18, %v2083_v15  ;;  %v2196_v20 = vpop.f32.mrb[43].mxu1 }
 0x15e   : > { %v2699_v21 = vadd.f32 %v2194_v16, %v2082_v12  ;;  %v2197_v22 = vadd.f32 %v2196_v20, %v2195_v17 }
 0x160   : > { %v2701_v23 = vadd.f32 %v2197_v22, %v2085_v19 }
 0x161   : > { %v2086_v25 = vpop.f32.mrb[44].mxu0 }
 0x162   : > { %v1962_v27 = vpack.c.bf16 %v2701_v23, %v2699_v21  ;;  %v2198_v29 = vpop.f32.mrb[44].mxu1  ;;  %v2087_v31 = vpop.f32.mrb[45].mxu0 }
 0x163   : > { %v2088_v32 = vadd.f32 %v2087_v31, %v2086_v25  ;;  %v2199_v33 = vpop.f32.mrb[45].mxu1  ;;  %v2089_v34 = vpop.f32.mrb[46].mxu0 }
 0x164   : > { %1998 = vst [vmem:[%s2631_s14 + $0x50] sm:$0xff] %v1962_v27   ;;  %v2200_v35 = vadd.f32 %v2199_v33, %v2198_v29  ;;  %v2201_v36 = vpop.f32.mrb[46].mxu1  ;;  %v2090_v37 = vpop.f32.mrb[47].mxu0 }
 0x165   : > { %v2091_v38 = vadd.f32 %v2090_v37, %v2089_v34  ;;  %v2202_v40 = vpop.f32.mrb[47].mxu1 }
 0x166   : > { %v2706_v42 = vadd.f32 %v2200_v35, %v2088_v32  ;;  %v2203_v44 = vadd.f32 %v2202_v40, %v2201_v36 }
 0x168   : > { %v2708_v46 = vadd.f32 %v2203_v44, %v2091_v38 }
 0x169   : > { %v2092_v48 = vpop.f32.mrb[48].mxu0 }
 0x16a   : > { %v1967_v50 = vpack.c.bf16 %v2708_v46, %v2706_v42  ;;  %v2204_v51 = vpop.f32.mrb[48].mxu1  ;;  %v2093_v52 = vpop.f32.mrb[49].mxu0 }
 0x16b   : > { %v2094_v53 = vadd.f32 %v2093_v52, %v2092_v48  ;;  %v2205_v54 = vpop.f32.mrb[49].mxu1  ;;  %v2095_v55 = vpop.f32.mrb[50].mxu0 }
 0x16c   : > { %1999 = vst [vmem:[%s2631_s14 + $0x58] sm:$0xff] %v1967_v50   ;;  %v2206_v57 = vadd.f32 %v2205_v54, %v2204_v51  ;;  %v2207_v61 = vpop.f32.mrb[50].mxu1  ;;  %v2096_v62 = vpop.f32.mrb[51].mxu0 }
 0x16d   : > { %v2097_v63 = vadd.f32 %v2096_v62, %v2095_v55  ;;  %v2208_v0 = vpop.f32.mrb[51].mxu1 }
 0x16e   : > { %v2713_v1 = vadd.f32 %v2206_v57, %v2094_v53  ;;  %v2209_v3 = vadd.f32 %v2208_v0, %v2207_v61 }
 0x170   : > { %v2715_v5 = vadd.f32 %v2209_v3, %v2097_v63 }
 0x171   : > { %v2098_v6 = vpop.f32.mrb[52].mxu0 }
 0x172   : > { %v1972_v7 = vpack.c.bf16 %v2715_v5, %v2713_v1  ;;  %v2210_v8 = vpop.f32.mrb[52].mxu1  ;;  %v2099_v12 = vpop.f32.mrb[53].mxu0 }
 0x173   : > { %v2100_v14 = vadd.f32 %v2099_v12, %v2098_v6  ;;  %v2211_v15 = vpop.f32.mrb[53].mxu1  ;;  %v2101_v16 = vpop.f32.mrb[54].mxu0 }
 0x174   : > { %2000 = vst [vmem:[%s2631_s14 + $0x60] sm:$0xff] %v1972_v7   ;;  %v2212_v17 = vadd.f32 %v2211_v15, %v2210_v8  ;;  %v2213_v18 = vpop.f32.mrb[54].mxu1  ;;  %v2102_v19 = vpop.f32.mrb[55].mxu0 }
 0x175   : > { %v2103_v20 = vadd.f32 %v2102_v19, %v2101_v16  ;;  %v2214_v22 = vpop.f32.mrb[55].mxu1 }
 0x176   : > { %v2720_v25 = vadd.f32 %v2212_v17, %v2100_v14  ;;  %v2215_v27 = vadd.f32 %v2214_v22, %v2213_v18  ;;  %v2437_v18 = vmov (!%p2620_p9), 0.0  }
 0x177   : > { %1436 = vst [vmem:[%s2875_s3] sm:$0xff] (!%p2620_p9), %v2437_v18  ;;  %1437 = vst [vmem:[%s2876_s4] sm:$0xff] (!%p2620_p9), %v2437_v18 }
 0x178   : > { %v2722_v29 = vadd.f32 %v2215_v27, %v2103_v20 }
 0x179   : > { %v2104_v31 = vpop.f32.mrb[56].mxu0 }
 0x17a   : > { %v1977_v32 = vpack.c.bf16 %v2722_v29, %v2720_v25  ;;  %v2216_v33 = vpop.f32.mrb[56].mxu1  ;;  %v2105_v34 = vpop.f32.mrb[57].mxu0 }
 0x17b   : > { %v2106_v35 = vadd.f32 %v2105_v34, %v2104_v31  ;;  %v2217_v36 = vpop.f32.mrb[57].mxu1  ;;  %v2107_v37 = vpop.f32.mrb[58].mxu0 }
 0x17c   : > { %2001 = vst [vmem:[%s2631_s14 + $0x68] sm:$0xff] %v1977_v32   ;;  %v2218_v38 = vadd.f32 %v2217_v36, %v2216_v33  ;;  %v2219_v40 = vpop.f32.mrb[58].mxu1  ;;  %v2108_v44 = vpop.f32.mrb[59].mxu0 }
 0x17d   : > { %v2109_v48 = vadd.f32 %v2108_v44, %v2107_v37  ;;  %v2220_v50 = vpop.f32.mrb[59].mxu1 }
 0x17e   : > { %v2727_v51 = vadd.f32 %v2218_v38, %v2106_v35  ;;  %v2221_v52 = vadd.f32 %v2220_v50, %v2219_v40 }
 0x180   : > { %v2729_v53 = vadd.f32 %v2221_v52, %v2109_v48 }
 0x181   : > { %v2110_v54 = vpop.f32.mrb[60].mxu0 }
 0x182   : > { %v1982_v55 = vpack.c.bf16 %v2729_v53, %v2727_v51  ;;  %v2222_v57 = vpop.f32.mrb[60].mxu1  ;;  %v2111_v61 = vpop.f32.mrb[61].mxu0 }
 0x183   : > { %v2112_v62 = vadd.f32 %v2111_v61, %v2110_v54  ;;  %v2223_v63 = vpop.f32.mrb[61].mxu1  ;;  %v2113_v0 = vpop.f32.mrb[62].mxu0 }
 0x184   : > { %2002 = vst [vmem:[%s2631_s14 + $0x70] sm:$0xff] %v1982_v55   ;;  %v2224_v3 = vadd.f32 %v2223_v63, %v2222_v57  ;;  %v2225_v6 = vpop.f32.mrb[62].mxu1  ;;  %v2114_v7 = vpop.f32.mrb[63].mxu0 }
 0x185   : > { %v2115_v8 = vadd.f32 %v2114_v7, %v2113_v0  ;;  %v2226_v12 = vpop.f32.mrb[63].mxu1 }
 0x186   : > { %v2734_v14 = vadd.f32 %v2224_v3, %v2112_v62  ;;  %v2227_v15 = vadd.f32 %v2226_v12, %v2225_v6  ;;  %1435 = sbr.rel (%p2620_p9) target bundleno = 397 (0x18d), region = 32 }
 0x188   : > { %v2736_v16 = vadd.f32 %v2227_v15, %v2115_v8 }
 0x18a   : > { %v1987_v17 = vpack.c.bf16 %v2736_v16, %v2734_v14 }
 0x18c   : > { %2003 = vst [vmem:[%s2631_s14 + $0x78] sm:$0xff] %v1987_v17  }
 0x18d PF: > { %v1438_v19 = vadd.f32 %v2626_v45, %v2624_v43  ;;  %v1475_v27 = vmul.f32 %v2624_v43, %v2624_v43  ;;  %v1476_v31 = vmul.f32 %v2626_v45, %v2626_v45  ;;  %v1477_v33 = vmul.f32 %v2636_v58, %v2636_v58 }
 0x18e   : > { %v1478_v35 = vmul.f32 %v2638_v60, %v2638_v60  ;;  %v1479_v38 = vmul.f32 %v2643_v9, %v2643_v9  ;;  %v1480_v45 = vmul.f32 %v2645_v11, %v2645_v11  ;;  %v1481_v48 = vmul.f32 %v2650_v24, %v2650_v24 }
 0x18f   : > { %v1439_v20 = vadd.f32 %v1438_v19, %v2636_v58  ;;  %v1507_v36 = vadd.f32 %v1476_v31, %v1475_v27  ;;  %v1482_v52 = vmul.f32 %v2652_v26, %v2652_v26  ;;  %v1483_v55 = vmul.f32 %v2657_v39, %v2657_v39 }
 0x190   : > { %v1484_v61 = vmul.f32 %v2659_v41, %v2659_v41  ;;  %v1485_v63 = vmul.f32 %v2664_v56, %v2664_v56  ;;  %v1486_v3 = vmul.f32 %v2666_v59, %v2666_v59  ;;  %v1487_v7 = vmul.f32 %v2671_v10, %v2671_v10 }
 0x191   : > { %v1440_v22 = vadd.f32 %v1439_v20, %v2638_v60  ;;  %v1508_v43 = vadd.f32 %v1507_v36, %v1477_v33  ;;  %v1488_v12 = vmul.f32 %v2673_v13, %v2673_v13  ;;  %v1489_v17 = vmul.f32 %v2678_v28, %v2678_v28 }
 0x192   : > { %v1490_v19 = vmul.f32 %v2680_v30, %v2680_v30  ;;  %v1492_v31 = vmul.f32 %v2687_v49, %v2687_v49  ;;  %v1493_v33 = vmul.f32 %v2692_v2, %v2692_v2 }
 0x193   : > { %v1441_v32 = vadd.f32 %v1440_v22, %v2643_v9  ;;  %v1509_v44 = vadd.f32 %v1508_v43, %v1478_v35  ;;  %v1491_v22 = vmul.f32 %v2685_v47, %v2685_v47  ;;  %v1494_v35 = vmul.f32 %v2694_v4, %v2694_v4 }
 0x194   : > { %v1496_v43 = vmul.f32 %v2701_v23, %v2701_v23 }
 0x195   : > { %v1442_v34 = vadd.f32 %v1441_v32, %v2645_v11  ;;  %v1510_v50 = vadd.f32 %v1509_v44, %v1479_v38 }
 0x197   : > { %v1443_v37 = vadd.f32 %v1442_v34, %v2650_v24  ;;  %v1511_v54 = vadd.f32 %v1510_v50, %v1480_v45  ;;  %v1497_v45 = vmul.f32 %v2706_v42, %v2706_v42  ;;  %v1499_v50 = vmul.f32 %v2713_v1, %v2713_v1 }
 0x199   : > { %v1444_v40 = vadd.f32 %v1443_v37, %v2652_v26  ;;  %v1512_v57 = vadd.f32 %v1511_v54, %v1481_v48  ;;  %v1495_v37 = vmul.f32 %v2699_v21, %v2699_v21 }
 0x19b   : > { %v1445_v58 = vadd.f32 %v1444_v40, %v2657_v39  ;;  %v1513_v62 = vadd.f32 %v1512_v57, %v1482_v52  ;;  %v1500_v52 = vmul.f32 %v2715_v5, %v2715_v5  ;;  %v1502_v57 = vmul.f32 %v2722_v29, %v2722_v29 }
 0x19d   : > { %v1446_v60 = vadd.f32 %v1445_v58, %v2659_v41  ;;  %v1514_v0 = vadd.f32 %v1513_v62, %v1483_v55  ;;  %v1498_v58 = vmul.f32 %v2708_v46, %v2708_v46 }
 0x19f   : > { %v1447_v9 = vadd.f32 %v1446_v60, %v2664_v56  ;;  %v1515_v6 = vadd.f32 %v1514_v0, %v1484_v61  ;;  %v1503_v61 = vmul.f32 %v2727_v51, %v2727_v51  ;;  %v1505_v0 = vmul.f32 %v2734_v14, %v2734_v14 }
 0x1a1   : > { %v1448_v11 = vadd.f32 %v1447_v9, %v2666_v59  ;;  %v1516_v8 = vadd.f32 %v1515_v6, %v1485_v63  ;;  %v1501_v9 = vmul.f32 %v2720_v25, %v2720_v25 }
 0x1a3   : > { %v1449_v24 = vadd.f32 %v1448_v11, %v2671_v10  ;;  %v1517_v15 = vadd.f32 %v1516_v8, %v1486_v3 }
 0x1a5   : > { %v1450_v26 = vadd.f32 %v1449_v24, %v2673_v13  ;;  %v1518_v18 = vadd.f32 %v1517_v15, %v1487_v7  ;;  %v1504_v24 = vmul.f32 %v2729_v53, %v2729_v53 }
 0x1a7   : > { %v1451_v39 = vadd.f32 %v1450_v26, %v2678_v28  ;;  %v1519_v20 = vadd.f32 %v1518_v18, %v1488_v12 }
 0x1a9   : > { %v1452_v41 = vadd.f32 %v1451_v39, %v2680_v30  ;;  %v1520_v27 = vadd.f32 %v1519_v20, %v1489_v17 }
 0x1ab   : > { %v1453_v56 = vadd.f32 %v1452_v41, %v2685_v47  ;;  %v1521_v32 = vadd.f32 %v1520_v27, %v1490_v19 }
 0x1ad   : > { %v1454_v59 = vadd.f32 %v1453_v56, %v2687_v49  ;;  %v1522_v34 = vadd.f32 %v1521_v32, %v1491_v22 }
 0x1af   : > { %v1455_v10 = vadd.f32 %v1454_v59, %v2692_v2  ;;  %v1523_v36 = vadd.f32 %v1522_v34, %v1492_v31  ;;  %v1547_v59 = vld [vmem:[%s2876_s4] sm:$0xff] }
 0x1b1   : > { %v1456_v13 = vadd.f32 %v1455_v10, %v2694_v4  ;;  %v1524_v38 = vadd.f32 %v1523_v36, %v1493_v33 }
 0x1b3   : > { %v1457_v28 = vadd.f32 %v1456_v13, %v2699_v21  ;;  %v1525_v40 = vadd.f32 %v1524_v38, %v1494_v35 }
 0x1b5   : > { %v1458_v30 = vadd.f32 %v1457_v28, %v2701_v23  ;;  %v1526_v44 = vadd.f32 %v1525_v40, %v1495_v37 }
 0x1b7   : > { %v1459_v47 = vadd.f32 %v1458_v30, %v2706_v42  ;;  %v1527_v48 = vadd.f32 %v1526_v44, %v1496_v43 }
 0x1b9   : > { %v1460_v49 = vadd.f32 %v1459_v47, %v2708_v46  ;;  %v1528_v60 = vadd.f32 %v1527_v48, %v1497_v45 }
 0x1bb   : > { %v1461_v2 = vadd.f32 %v1460_v49, %v2713_v1  ;;  %v1529_v54 = vadd.f32 %v1528_v60, %v1498_v58 }
 0x1bd   : > { %v1462_v4 = vadd.f32 %v1461_v2, %v2715_v5  ;;  %v1530_v55 = vadd.f32 %v1529_v54, %v1499_v50 }
 0x1bf   : > { %v1463_v21 = vadd.f32 %v1462_v4, %v2720_v25  ;;  %v1531_v11 = vadd.f32 %v1530_v55, %v1500_v52 }
 0x1c1   : > { %v1464_v23 = vadd.f32 %v1463_v21, %v2722_v29  ;;  %v1532_v62 = vadd.f32 %v1531_v11, %v1501_v9  ;;  %v1506_v29 = vmul.f32 %v2736_v16, %v2736_v16 }
 0x1c3   : > { %v1465_v42 = vadd.f32 %v1464_v23, %v2727_v51  ;;  %v1533_v63 = vadd.f32 %v1532_v62, %v1502_v57 }
 0x1c5   : > { %v1466_v46 = vadd.f32 %v1465_v42, %v2729_v53  ;;  %v1534_v26 = vadd.f32 %v1533_v63, %v1503_v61  ;;  %v1544_v53 = vld [vmem:[%s2875_s3] sm:$0xff] }
 0x1c7   : > { %v1467_v1 = vadd.f32 %v1466_v46, %v2734_v14  ;;  %v1535_v6 = vadd.f32 %v1534_v26, %v1504_v24 }
 0x1c9   : > { %v1468_v5 = vadd.f32 %v1467_v1, %v2736_v16  ;;  %v1536_v7 = vadd.f32 %v1535_v6, %v1505_v0 }
 0x1cb   : > { %v1469_v25 = vrot.slane %v1468_v5, 4  ;;  %v1537_v8 = vadd.f32 %v1536_v7, %v1506_v29 }
 0x1cd   : > { %v1470_v3 = vadd.f32 %v1469_v25, %v1468_v5  ;;  %v1538_v12 = vrot.slane %v1537_v8, 4 }
 0x1cf   : > { %v1471_v39 = vrot.slane %v1470_v3, 2  ;;  %v1539_v56 = vadd.f32 %v1538_v12, %v1537_v8 }
 0x1d1   : > { %v1472_v51 = vadd.f32 %v1471_v39, %v1470_v3  ;;  %v1540_v14 = vrot.slane %v1539_v56, 2 }
 0x1d3   : > { %v1473_v41 = vrot.slane %v1472_v51, 1  ;;  %v1541_v16 = vadd.f32 %v1540_v14, %v1539_v56 }
 0x1d5   : > { %v1474_v15 = vadd.f32 %v1473_v41, %v1472_v51  ;;  %v1542_v18 = vrot.slane %v1541_v16, 1 }
 0x1d7   : > { %v1545_v17 = vadd.f32 %v1544_v53, %v1474_v15  ;;  %v1543_v19 = vadd.f32 %v1542_v18, %v1541_v16 }
 0x1d9   : > { %1546 = vst [vmem:[%s2875_s3] sm:$0xff] %v1545_v17  ;;  %v1548_v20 = vadd.f32 %v1547_v59, %v1543_v19 }
 0x1db   : > { %1549 = vst [vmem:[%s2876_s4] sm:$0xff] %v1548_v20 }
 0x1dc PF: > { %s15_s19 = sadd.s32 1, %s2435_s19   ;;  %s2878_s15 = smov %s2427_s17 }
 0x1dd   : > { %p12_p10 = scmp.ge.s32.totalorder %s15_s19, 10   ;;  %s2879_s16 = smov %s2431_s18 }
 0x1de   : > { %s2880_s17 = smov %s2883_s20  ;;  %s2881_s18 = smov %s2887_s21 }
 0x1df   :  { %14 = sbr.rel (!%p12_p10) target bundleno = 3 (0x3), region = 89 }

// kernel: generator_forward.16
= control target key start
LH: loop header
LB: loop body
LE: loop exit
PB: predicated region body
PF: predicated region fallthrough
CT: control target
= control target key end

     0   :  { %s1608_s12 = smov 0   ;;  %s1610_s13 = smov 0   ;;  %s1854_s0 = inlined_call_operand.vmem [shape: bf16[4,512,128], index: 0, kind: input, shape index: {}]   ;;  %s1855_s1 = inlined_call_operand.vmem [shape: f32[1,128], index: 1, kind: input, shape index: {}]   ;;  %s1856_s2 = inlined_call_operand.vmem [shape: f32[1,128], index: 2, kind: input, shape index: {}]   ;;  %s1857_s3 = inlined_call_operand.vmem [shape: bf16[4,512,128], index: 3, kind: output, shape index: {}]  }
   0x1   :  { %s1612_s14 = smov 0  }
   0x2 LB: > { %s32_s15 = sadd.s32 1, %s1582_s13  ;;  %p1051_p0 = scmp.ge.s32.totalorder %s1586_s14, 1  ;;  %s1586_s14 = sphi %s1612_s14, %s13_s14   ;;  %s1582_s13 = sphi %s1610_s13, %s1859_s13   ;;  %s1578_s12 = sphi %s1608_s12, %s1858_s12  }
   0x3   : > { %p34_p1 = scmp.ge.s32.totalorder %s32_s15, 4  ;;  %p188_p2 = scmp.lt.s32.totalorder %s1586_s14, 5 }
   0x5   : > { %s1861_s15 = smov (%p34_p1, %s32_s15), 0  ;;  %p189_p3 = pnand %p1051_p0, %p188_p2 }
   0x6   : > { %p233_p4 = scmp.lt.s32.totalorder (!%p189_p3), %s1578_s12, 3  ;;  %v1639_v0 = vld [vmem:[%s1855_s1] ss:$0 sm:$0xff] (!%p189_p3) }
   0x7   : > { %192 = sbr.rel (%p189_p3) target bundleno = 96 (0x60), region = 32  ;;  %v1648_v9 = vld [vmem:[%s1856_s2] ss:$0 sm:$0xff] (!%p189_p3) }
   0xe   : > { %s1863_s12 = smov (!%p233_p4, %s1578_s12), 3 }
   0xf   : > { %s1124_s16 = sshll.u32 %s1863_s12, 8 }
  0x10   : > { %s1634_s19 = scalar_lea.vmem %s1854_s0, %s1124_s16  ;;  %s1673_s26 = scalar_lea.vmem %s1857_s3, %s1124_s16 }
  0x11   : > { %v1191_v1 = vld [vmem:[%s1634_s19] sm:$0xff]   ;;  %v1478_v2 = vld [vmem:[%s1634_s19 + $0x8] sm:$0xff]   ;;  %v1479_v3 = vld [vmem:[%s1634_s19 + $0x10] sm:$0xff]  }
  0x12   : > { %v1192_v4 = vunpack.c.l.bf16 %v1191_v1  ;;  %v1193_v5 = vunpack.c.h.bf16 %v1191_v1  ;;  %v1196_v6 = vunpack.c.l.bf16 %v1478_v2  ;;  %v1197_v7 = vunpack.c.h.bf16 %v1478_v2  ;;  %v1480_v8 = vld [vmem:[%s1634_s19 + $0x18] sm:$0xff]   ;;  %v1481_v30 = vld [vmem:[%s1634_s19 + $0x20] sm:$0xff]   ;;  %v1482_v35 = vld [vmem:[%s1634_s19 + $0x28] sm:$0xff]  }
  0x13   : > { %v1200_v10 = vunpack.c.l.bf16 %v1479_v3  ;;  %v1201_v11 = vunpack.c.h.bf16 %v1479_v3  ;;  %v1204_v12 = vunpack.c.l.bf16 %v1480_v8  ;;  %v1205_v13 = vunpack.c.h.bf16 %v1480_v8  ;;  %v1483_v40 = vld [vmem:[%s1634_s19 + $0x30] sm:$0xff]   ;;  %v1484_v45 = vld [vmem:[%s1634_s19 + $0x38] sm:$0xff]   ;;  %v1485_v3 = vld [vmem:[%s1634_s19 + $0x40] sm:$0xff]  }
  0x14   : > { %v399_v14 = vmul.f32 %v1192_v4, %v1639_v0  ;;  %v400_v15 = vmul.f32 %v1193_v5, %v1639_v0  ;;  %v401_v16 = vmul.f32 %v1196_v6, %v1639_v0  ;;  %v402_v17 = vmul.f32 %v1197_v7, %v1639_v0 }
  0x15   : > { %v403_v18 = vmul.f32 %v1200_v10, %v1639_v0  ;;  %v404_v19 = vmul.f32 %v1201_v11, %v1639_v0  ;;  %v405_v20 = vmul.f32 %v1204_v12, %v1639_v0  ;;  %v406_v21 = vmul.f32 %v1205_v13, %v1639_v0  ;;  %v1486_v13 = vld [vmem:[%s1634_s19 + $0x48] sm:$0xff]  }
  0x16   : > { %v470_v22 = vadd.f32 %v1648_v9, %v399_v14  ;;  %v471_v23 = vadd.f32 %v1648_v9, %v400_v15  ;;  %v472_v24 = vadd.f32 %v1648_v9, %v401_v16  ;;  %v473_v25 = vadd.f32 %v1648_v9, %v402_v17 }
  0x17   : > { %v474_v26 = vadd.f32 %v1648_v9, %v403_v18  ;;  %v475_v27 = vadd.f32 %v1648_v9, %v404_v19  ;;  %v476_v28 = vadd.f32 %v1648_v9, %v405_v20  ;;  %v477_v29 = vadd.f32 %v1648_v9, %v406_v21  ;;  %v1487_v18 = vld [vmem:[%s1634_s19 + $0x50] sm:$0xff]  }
  0x18   : > { %v534_v31 = vmax.f32 %v470_v22, 0.0  ;;  %v535_v32 = vmax.f32 %v471_v23, 0.0  ;;  %v536_v33 = vmax.f32 %v472_v24, 0.0  ;;  %v537_v34 = vmax.f32 %v473_v25, 0.0  ;;  %v1488_v23 = vld [vmem:[%s1634_s19 + $0x58] sm:$0xff]  }
  0x19   : > { %v538_v36 = vmax.f32 %v474_v26, 0.0  ;;  %v539_v37 = vmax.f32 %v475_v27, 0.0  ;;  %v540_v38 = vmax.f32 %v476_v28, 0.0  ;;  %v541_v39 = vmax.f32 %v477_v29, 0.0 }
  0x1a   : > { %v1321_v41 = vpack.c.bf16 %v535_v32, %v534_v31  ;;  %v1326_v42 = vpack.c.bf16 %v537_v34, %v536_v33  ;;  %v1208_v43 = vunpack.c.l.bf16 %v1481_v30  ;;  %v1209_v44 = vunpack.c.h.bf16 %v1481_v30 }
  0x1b   : > { %v1331_v46 = vpack.c.bf16 %v539_v37, %v538_v36  ;;  %v1336_v47 = vpack.c.bf16 %v541_v39, %v540_v38  ;;  %v1212_v48 = vunpack.c.l.bf16 %v1482_v35  ;;  %v1213_v49 = vunpack.c.h.bf16 %v1482_v35 }
  0x1c   : > { %1322 = vst [vmem:[%s1673_s26] sm:$0xff] %v1321_v41   ;;  %1509 = vst [vmem:[%s1673_s26 + $0x8] sm:$0xff] %v1326_v42   ;;  %v407_v50 = vmul.f32 %v1208_v43, %v1639_v0  ;;  %v408_v51 = vmul.f32 %v1209_v44, %v1639_v0  ;;  %v1216_v52 = vunpack.c.l.bf16 %v1483_v40  ;;  %v1217_v53 = vunpack.c.h.bf16 %v1483_v40  ;;  %v1489_v40 = vld [vmem:[%s1634_s19 + $0x60] sm:$0xff]  }
  0x1d   : > { %1510 = vst [vmem:[%s1673_s26 + $0x10] sm:$0xff] %v1331_v46   ;;  %1511 = vst [vmem:[%s1673_s26 + $0x18] sm:$0xff] %v1336_v47   ;;  %v409_v54 = vmul.f32 %v1212_v48, %v1639_v0  ;;  %v410_v55 = vmul.f32 %v1213_v49, %v1639_v0  ;;  %v1220_v56 = vunpack.c.l.bf16 %v1484_v45  ;;  %v1221_v57 = vunpack.c.h.bf16 %v1484_v45 }
  0x1e   : > { %v478_v58 = vadd.f32 %v1648_v9, %v407_v50  ;;  %v479_v59 = vadd.f32 %v1648_v9, %v408_v51  ;;  %v411_v60 = vmul.f32 %v1216_v52, %v1639_v0  ;;  %v412_v61 = vmul.f32 %v1217_v53, %v1639_v0  ;;  %v1490_v53 = vld [vmem:[%s1634_s19 + $0x68] sm:$0xff]  }
  0x1f   : > { %v480_v62 = vadd.f32 %v1648_v9, %v409_v54  ;;  %v481_v63 = vadd.f32 %v1648_v9, %v410_v55  ;;  %v413_v1 = vmul.f32 %v1220_v56, %v1639_v0  ;;  %v414_v2 = vmul.f32 %v1221_v57, %v1639_v0 }
  0x20   : > { %v542_v4 = vmax.f32 %v478_v58, 0.0  ;;  %v543_v5 = vmax.f32 %v479_v59, 0.0  ;;  %v482_v6 = vadd.f32 %v1648_v9, %v411_v60  ;;  %v483_v7 = vadd.f32 %v1648_v9, %v412_v61  ;;  %v1491_v58 = vld [vmem:[%s1634_s19 + $0x70] sm:$0xff]  }
  0x21   : > { %v544_v8 = vmax.f32 %v480_v62, 0.0  ;;  %v545_v10 = vmax.f32 %v481_v63, 0.0  ;;  %v484_v11 = vadd.f32 %v1648_v9, %v413_v1  ;;  %v485_v12 = vadd.f32 %v1648_v9, %v414_v2  ;;  %v1492_v63 = vld [vmem:[%s1634_s19 + $0x78] sm:$0xff]  }
  0x22   : > { %v1341_v14 = vpack.c.bf16 %v543_v5, %v542_v4  ;;  %v546_v15 = vmax.f32 %v482_v6, 0.0  ;;  %v547_v16 = vmax.f32 %v483_v7, 0.0  ;;  %v1224_v17 = vunpack.c.l.bf16 %v1485_v3 }
  0x23   : > { %v1346_v19 = vpack.c.bf16 %v545_v10, %v544_v8  ;;  %v548_v20 = vmax.f32 %v484_v11, 0.0  ;;  %v549_v21 = vmax.f32 %v485_v12, 0.0  ;;  %v1225_v22 = vunpack.c.h.bf16 %v1485_v3 }
  0x24   : > { %1512 = vst [vmem:[%s1673_s26 + $0x20] sm:$0xff] %v1341_v14   ;;  %v1351_v24 = vpack.c.bf16 %v547_v16, %v546_v15  ;;  %v415_v25 = vmul.f32 %v1224_v17, %v1639_v0  ;;  %v1228_v26 = vunpack.c.l.bf16 %v1486_v13  ;;  %v1229_v27 = vunpack.c.h.bf16 %v1486_v13  ;;  %v1493_v14 = vld [vmem:[%s1634_s19 + $0x80] sm:$0xff]  }
  0x25   : > { %1513 = vst [vmem:[%s1673_s26 + $0x28] sm:$0xff] %v1346_v19   ;;  %v1356_v28 = vpack.c.bf16 %v549_v21, %v548_v20  ;;  %v416_v29 = vmul.f32 %v1225_v22, %v1639_v0  ;;  %v1232_v30 = vunpack.c.l.bf16 %v1487_v18  ;;  %v1233_v31 = vunpack.c.h.bf16 %v1487_v18 }
  0x26   : > { %1514 = vst [vmem:[%s1673_s26 + $0x30] sm:$0xff] %v1351_v24   ;;  %v486_v32 = vadd.f32 %v1648_v9, %v415_v25  ;;  %v417_v33 = vmul.f32 %v1228_v26, %v1639_v0  ;;  %v418_v34 = vmul.f32 %v1229_v27, %v1639_v0  ;;  %v1236_v35 = vunpack.c.l.bf16 %v1488_v23 }
  0x27   : > { %1515 = vst [vmem:[%s1673_s26 + $0x38] sm:$0xff] %v1356_v28   ;;  %v487_v36 = vadd.f32 %v1648_v9, %v416_v29  ;;  %v419_v37 = vmul.f32 %v1232_v30, %v1639_v0  ;;  %v420_v38 = vmul.f32 %v1233_v31, %v1639_v0  ;;  %v1237_v39 = vunpack.c.h.bf16 %v1488_v23  ;;  %v1494_v31 = vld [vmem:[%s1634_s19 + $0x88] sm:$0xff]  }
  0x28   : > { %v550_v41 = vmax.f32 %v486_v32, 0.0  ;;  %v488_v42 = vadd.f32 %v1648_v9, %v417_v33  ;;  %v489_v43 = vadd.f32 %v1648_v9, %v418_v34  ;;  %v421_v44 = vmul.f32 %v1236_v35, %v1639_v0 }
  0x29   : > { %v551_v45 = vmax.f32 %v487_v36, 0.0  ;;  %v490_v46 = vadd.f32 %v1648_v9, %v419_v37  ;;  %v491_v47 = vadd.f32 %v1648_v9, %v420_v38  ;;  %v422_v48 = vmul.f32 %v1237_v39, %v1639_v0  ;;  %v1495_v36 = vld [vmem:[%s1634_s19 + $0x90] sm:$0xff]  }
  0x2a   : > { %v552_v49 = vmax.f32 %v488_v42, 0.0  ;;  %v553_v50 = vmax.f32 %v489_v43, 0.0  ;;  %v492_v51 = vadd.f32 %v1648_v9, %v421_v44  ;;  %v1240_v52 = vunpack.c.l.bf16 %v1489_v40 }
  0x2b   : > { %v1361_v54 = vpack.c.bf16 %v551_v45, %v550_v41  ;;  %v554_v55 = vmax.f32 %v490_v46, 0.0  ;;  %v555_v56 = vmax.f32 %v491_v47, 0.0  ;;  %v493_v57 = vadd.f32 %v1648_v9, %v422_v48  ;;  %v1496_v41 = vld [vmem:[%s1634_s19 + $0x98] sm:$0xff]  }
  0x2c   : > { %v1366_v59 = vpack.c.bf16 %v553_v50, %v552_v49  ;;  %v556_v60 = vmax.f32 %v492_v51, 0.0  ;;  %v1241_v61 = vunpack.c.h.bf16 %v1489_v40  ;;  %v423_v62 = vmul.f32 %v1240_v52, %v1639_v0 }
  0x2d   : > { %1516 = vst [vmem:[%s1673_s26 + $0x40] sm:$0xff] %v1361_v54   ;;  %v1371_v1 = vpack.c.bf16 %v555_v56, %v554_v55  ;;  %v557_v2 = vmax.f32 %v493_v57, 0.0  ;;  %v1244_v3 = vunpack.c.l.bf16 %v1490_v53  ;;  %v1245_v4 = vunpack.c.h.bf16 %v1490_v53  ;;  %v1497_v54 = vld [vmem:[%s1634_s19 + $0xa0] sm:$0xff]  }
  0x2e   : > { %1517 = vst [vmem:[%s1673_s26 + $0x48] sm:$0xff] %v1366_v59   ;;  %v424_v5 = vmul.f32 %v1241_v61, %v1639_v0  ;;  %v494_v6 = vadd.f32 %v1648_v9, %v423_v62  ;;  %v1248_v7 = vunpack.c.l.bf16 %v1491_v58  ;;  %v1249_v8 = vunpack.c.h.bf16 %v1491_v58 }
  0x2f   : > { %1518 = vst [vmem:[%s1673_s26 + $0x50] sm:$0xff] %v1371_v1   ;;  %v1376_v10 = vpack.c.bf16 %v557_v2, %v556_v60  ;;  %v425_v11 = vmul.f32 %v1244_v3, %v1639_v0  ;;  %v426_v12 = vmul.f32 %v1245_v4, %v1639_v0  ;;  %v1252_v13 = vunpack.c.l.bf16 %v1492_v63  ;;  %v1498_v4 = vld [vmem:[%s1634_s19 + $0xa8] sm:$0xff]  }
  0x30   : > { %v495_v15 = vadd.f32 %v1648_v9, %v424_v5  ;;  %v558_v16 = vmax.f32 %v494_v6, 0.0  ;;  %v427_v17 = vmul.f32 %v1248_v7, %v1639_v0  ;;  %v428_v18 = vmul.f32 %v1249_v8, %v1639_v0 }
  0x31   : > { %1519 = vst [vmem:[%s1673_s26 + $0x58] sm:$0xff] %v1376_v10   ;;  %v496_v19 = vadd.f32 %v1648_v9, %v425_v11  ;;  %v497_v20 = vadd.f32 %v1648_v9, %v426_v12  ;;  %v1253_v21 = vunpack.c.h.bf16 %v1492_v63  ;;  %v429_v22 = vmul.f32 %v1252_v13, %v1639_v0 }
  0x32   : > { %v559_v23 = vmax.f32 %v495_v15, 0.0  ;;  %v498_v24 = vadd.f32 %v1648_v9, %v427_v17  ;;  %v499_v25 = vadd.f32 %v1648_v9, %v428_v18  ;;  %v1256_v26 = vunpack.c.l.bf16 %v1493_v14 }
  0x33   : > { %v560_v27 = vmax.f32 %v496_v19, 0.0  ;;  %v561_v28 = vmax.f32 %v497_v20, 0.0  ;;  %v430_v29 = vmul.f32 %v1253_v21, %v1639_v0  ;;  %v500_v30 = vadd.f32 %v1648_v9, %v429_v22  ;;  %v1500_v19 = vld [vmem:[%s1634_s19 + $0xb8] sm:$0xff]  }
  0x34   : > { %v1381_v32 = vpack.c.bf16 %v559_v23, %v558_v16  ;;  %v562_v33 = vmax.f32 %v498_v24, 0.0  ;;  %v563_v34 = vmax.f32 %v499_v25, 0.0  ;;  %v1257_v35 = vunpack.c.h.bf16 %v1493_v14  ;;  %v1499_v14 = vld [vmem:[%s1634_s19 + $0xb0] sm:$0xff]  }
  0x35   : > { %v1386_v37 = vpack.c.bf16 %v561_v28, %v560_v27  ;;  %v501_v38 = vadd.f32 %v1648_v9, %v430_v29  ;;  %v564_v39 = vmax.f32 %v500_v30, 0.0  ;;  %v431_v40 = vmul.f32 %v1256_v26, %v1639_v0 }
  0x36   : > { %1520 = vst [vmem:[%s1673_s26 + $0x60] sm:$0xff] %v1381_v32   ;;  %v1391_v42 = vpack.c.bf16 %v563_v34, %v562_v33  ;;  %v432_v43 = vmul.f32 %v1257_v35, %v1639_v0  ;;  %v1260_v44 = vunpack.c.l.bf16 %v1494_v31  ;;  %v1261_v45 = vunpack.c.h.bf16 %v1494_v31  ;;  %v1501_v32 = vld [vmem:[%s1634_s19 + $0xc0] sm:$0xff]  }
  0x37   : > { %1521 = vst [vmem:[%s1673_s26 + $0x68] sm:$0xff] %v1386_v37   ;;  %v565_v46 = vmax.f32 %v501_v38, 0.0  ;;  %v502_v47 = vadd.f32 %v1648_v9, %v431_v40  ;;  %v1264_v48 = vunpack.c.l.bf16 %v1495_v36  ;;  %v1265_v49 = vunpack.c.h.bf16 %v1495_v36 }
  0x38   : > { %1522 = vst [vmem:[%s1673_s26 + $0x70] sm:$0xff] %v1391_v42   ;;  %v503_v50 = vadd.f32 %v1648_v9, %v432_v43  ;;  %v433_v51 = vmul.f32 %v1260_v44, %v1639_v0  ;;  %v434_v52 = vmul.f32 %v1261_v45, %v1639_v0  ;;  %v1268_v53 = vunpack.c.l.bf16 %v1496_v41  ;;  %v1502_v45 = vld [vmem:[%s1634_s19 + $0xc8] sm:$0xff]  }
  0x39   : > { %v1396_v55 = vpack.c.bf16 %v565_v46, %v564_v39  ;;  %v566_v56 = vmax.f32 %v502_v47, 0.0  ;;  %v435_v57 = vmul.f32 %v1264_v48, %v1639_v0  ;;  %v436_v58 = vmul.f32 %v1265_v49, %v1639_v0 }
  0x3a   : > { %v567_v59 = vmax.f32 %v503_v50, 0.0  ;;  %v504_v60 = vadd.f32 %v1648_v9, %v433_v51  ;;  %v505_v61 = vadd.f32 %v1648_v9, %v434_v52  ;;  %v1269_v62 = vunpack.c.h.bf16 %v1496_v41 }
  0x3b   : > { %1523 = vst [vmem:[%s1673_s26 + $0x78] sm:$0xff] %v1396_v55   ;;  %v506_v63 = vadd.f32 %v1648_v9, %v435_v57  ;;  %v507_v1 = vadd.f32 %v1648_v9, %v436_v58  ;;  %v437_v2 = vmul.f32 %v1268_v53, %v1639_v0  ;;  %v1272_v3 = vunpack.c.l.bf16 %v1497_v54 }
  0x3c   : > { %v1401_v5 = vpack.c.bf16 %v567_v59, %v566_v56  ;;  %v568_v6 = vmax.f32 %v504_v60, 0.0  ;;  %v569_v7 = vmax.f32 %v505_v61, 0.0  ;;  %v438_v8 = vmul.f32 %v1269_v62, %v1639_v0 }
  0x3d   : > { %v570_v10 = vmax.f32 %v506_v63, 0.0  ;;  %v571_v11 = vmax.f32 %v507_v1, 0.0  ;;  %v508_v12 = vadd.f32 %v1648_v9, %v437_v2  ;;  %v1273_v13 = vunpack.c.h.bf16 %v1497_v54  ;;  %v1503_v54 = vld [vmem:[%s1634_s19 + $0xd0] sm:$0xff]   ;;  %v1504_v63 = vld [vmem:[%s1634_s19 + $0xd8] sm:$0xff]  }
  0x3e   : > { %1524 = vst [vmem:[%s1673_s26 + $0x80] sm:$0xff] %v1401_v5   ;;  %v1406_v15 = vpack.c.bf16 %v569_v7, %v568_v6  ;;  %v509_v16 = vadd.f32 %v1648_v9, %v438_v8  ;;  %v439_v17 = vmul.f32 %v1272_v3, %v1639_v0  ;;  %v1276_v18 = vunpack.c.l.bf16 %v1498_v4 }
  0x3f   : > { %v1411_v20 = vpack.c.bf16 %v571_v11, %v570_v10  ;;  %v572_v21 = vmax.f32 %v508_v12, 0.0  ;;  %v440_v22 = vmul.f32 %v1273_v13, %v1639_v0  ;;  %v1277_v23 = vunpack.c.h.bf16 %v1498_v4  ;;  %v1505_v10 = vld [vmem:[%s1634_s19 + $0xe0] sm:$0xff]  }
  0x40   : > { %1525 = vst [vmem:[%s1673_s26 + $0x88] sm:$0xff] %v1406_v15   ;;  %v573_v24 = vmax.f32 %v509_v16, 0.0  ;;  %v510_v25 = vadd.f32 %v1648_v9, %v439_v17  ;;  %v441_v26 = vmul.f32 %v1276_v18, %v1639_v0  ;;  %v1280_v27 = vunpack.c.l.bf16 %v1499_v14 }
  0x41   : > { %1526 = vst [vmem:[%s1673_s26 + $0x90] sm:$0xff] %v1411_v20   ;;  %v511_v28 = vadd.f32 %v1648_v9, %v440_v22  ;;  %v442_v29 = vmul.f32 %v1277_v23, %v1639_v0  ;;  %v1281_v30 = vunpack.c.h.bf16 %v1499_v14  ;;  %v1284_v31 = vunpack.c.l.bf16 %v1500_v19  ;;  %v1506_v23 = vld [vmem:[%s1634_s19 + $0xe8] sm:$0xff]  }
  0x42   : > { %v1416_v33 = vpack.c.bf16 %v573_v24, %v572_v21  ;;  %v574_v34 = vmax.f32 %v510_v25, 0.0  ;;  %v512_v35 = vadd.f32 %v1648_v9, %v441_v26  ;;  %v443_v36 = vmul.f32 %v1280_v27, %v1639_v0 }
  0x43   : > { %v575_v37 = vmax.f32 %v511_v28, 0.0  ;;  %v513_v38 = vadd.f32 %v1648_v9, %v442_v29  ;;  %v444_v39 = vmul.f32 %v1281_v30, %v1639_v0  ;;  %v1285_v40 = vunpack.c.h.bf16 %v1500_v19 }
  0x44   : > { %1527 = vst [vmem:[%s1673_s26 + $0x98] sm:$0xff] %v1416_v33   ;;  %v576_v41 = vmax.f32 %v512_v35, 0.0  ;;  %v514_v42 = vadd.f32 %v1648_v9, %v443_v36  ;;  %v445_v43 = vmul.f32 %v1284_v31, %v1639_v0  ;;  %v1288_v44 = vunpack.c.l.bf16 %v1501_v32 }
  0x45   : > { %v1421_v46 = vpack.c.bf16 %v575_v37, %v574_v34  ;;  %v577_v47 = vmax.f32 %v513_v38, 0.0  ;;  %v515_v48 = vadd.f32 %v1648_v9, %v444_v39  ;;  %v446_v49 = vmul.f32 %v1285_v40, %v1639_v0 }
  0x46   : > { %v578_v50 = vmax.f32 %v514_v42, 0.0  ;;  %v516_v51 = vadd.f32 %v1648_v9, %v445_v43  ;;  %v1289_v52 = vunpack.c.h.bf16 %v1501_v32  ;;  %v447_v53 = vmul.f32 %v1288_v44, %v1639_v0  ;;  %v1507_v32 = vld [vmem:[%s1634_s19 + $0xf0] sm:$0xff]  }
  0x47   : > { %1528 = vst [vmem:[%s1673_s26 + $0xa0] sm:$0xff] %v1421_v46   ;;  %v1426_v55 = vpack.c.bf16 %v577_v47, %v576_v41  ;;  %v579_v56 = vmax.f32 %v515_v48, 0.0  ;;  %v517_v57 = vadd.f32 %v1648_v9, %v446_v49  ;;  %v1292_v58 = vunpack.c.l.bf16 %v1502_v45  ;;  %v1508_v41 = vld [vmem:[%s1634_s19 + $0xf8] sm:$0xff]  }
  0x48   : > { %v580_v59 = vmax.f32 %v516_v51, 0.0  ;;  %v448_v60 = vmul.f32 %v1289_v52, %v1639_v0  ;;  %v518_v61 = vadd.f32 %v1648_v9, %v447_v53  ;;  %v1293_v62 = vunpack.c.h.bf16 %v1502_v45 }
  0x49   : > { %1529 = vst [vmem:[%s1673_s26 + $0xa8] sm:$0xff] %v1426_v55   ;;  %v1431_v1 = vpack.c.bf16 %v579_v56, %v578_v50  ;;  %v581_v2 = vmax.f32 %v517_v57, 0.0  ;;  %v449_v3 = vmul.f32 %v1292_v58, %v1639_v0  ;;  %v1296_v4 = vunpack.c.l.bf16 %v1503_v54 }
  0x4a   : > { %v519_v5 = vadd.f32 %v1648_v9, %v448_v60  ;;  %v582_v6 = vmax.f32 %v518_v61, 0.0  ;;  %v450_v7 = vmul.f32 %v1293_v62, %v1639_v0  ;;  %v1297_v8 = vunpack.c.h.bf16 %v1503_v54 }
  0x4b   : > { %1530 = vst [vmem:[%s1673_s26 + $0xb0] sm:$0xff] %v1431_v1   ;;  %v1436_v11 = vpack.c.bf16 %v581_v2, %v580_v59  ;;  %v520_v12 = vadd.f32 %v1648_v9, %v449_v3  ;;  %v451_v13 = vmul.f32 %v1296_v4, %v1639_v0  ;;  %v1300_v14 = vunpack.c.l.bf16 %v1504_v63 }
  0x4c   : > { %v583_v15 = vmax.f32 %v519_v5, 0.0  ;;  %v521_v16 = vadd.f32 %v1648_v9, %v450_v7  ;;  %v452_v17 = vmul.f32 %v1297_v8, %v1639_v0  ;;  %v1301_v18 = vunpack.c.h.bf16 %v1504_v63 }
  0x4d   : > { %1531 = vst [vmem:[%s1673_s26 + $0xb8] sm:$0xff] %v1436_v11   ;;  %v584_v19 = vmax.f32 %v520_v12, 0.0  ;;  %v522_v20 = vadd.f32 %v1648_v9, %v451_v13  ;;  %v453_v21 = vmul.f32 %v1300_v14, %v1639_v0  ;;  %v1304_v22 = vunpack.c.l.bf16 %v1505_v10 }
  0x4e   : > { %v1441_v24 = vpack.c.bf16 %v583_v15, %v582_v6  ;;  %v585_v25 = vmax.f32 %v521_v16, 0.0  ;;  %v523_v26 = vadd.f32 %v1648_v9, %v452_v17  ;;  %v454_v27 = vmul.f32 %v1301_v18, %v1639_v0 }
  0x4f   : > { %v586_v28 = vmax.f32 %v522_v20, 0.0  ;;  %v524_v29 = vadd.f32 %v1648_v9, %v453_v21  ;;  %v1305_v30 = vunpack.c.h.bf16 %v1505_v10  ;;  %v455_v31 = vmul.f32 %v1304_v22, %v1639_v0 }
  0x50   : > { %1532 = vst [vmem:[%s1673_s26 + $0xc0] sm:$0xff] %v1441_v24   ;;  %v1446_v33 = vpack.c.bf16 %v585_v25, %v584_v19  ;;  %v587_v34 = vmax.f32 %v523_v26, 0.0  ;;  %v525_v35 = vadd.f32 %v1648_v9, %v454_v27  ;;  %v1308_v36 = vunpack.c.l.bf16 %v1506_v23 }
  0x51   : > { %v588_v37 = vmax.f32 %v524_v29, 0.0  ;;  %v456_v38 = vmul.f32 %v1305_v30, %v1639_v0  ;;  %v526_v39 = vadd.f32 %v1648_v9, %v455_v31  ;;  %v1309_v40 = vunpack.c.h.bf16 %v1506_v23 }
  0x52   : > { %1533 = vst [vmem:[%s1673_s26 + $0xc8] sm:$0xff] %v1446_v33   ;;  %v1451_v42 = vpack.c.bf16 %v587_v34, %v586_v28  ;;  %v589_v43 = vmax.f32 %v525_v35, 0.0  ;;  %v457_v44 = vmul.f32 %v1308_v36, %v1639_v0  ;;  %v1312_v45 = vunpack.c.l.bf16 %v1507_v32 }
  0x53   : > { %v527_v46 = vadd.f32 %v1648_v9, %v456_v38  ;;  %v590_v47 = vmax.f32 %v526_v39, 0.0  ;;  %v458_v48 = vmul.f32 %v1309_v40, %v1639_v0  ;;  %v1313_v49 = vunpack.c.h.bf16 %v1507_v32 }
  0x54   : > { %1534 = vst [vmem:[%s1673_s26 + $0xd0] sm:$0xff] %v1451_v42   ;;  %v1456_v50 = vpack.c.bf16 %v589_v43, %v588_v37  ;;  %v528_v51 = vadd.f32 %v1648_v9, %v457_v44  ;;  %v459_v52 = vmul.f32 %v1312_v45, %v1639_v0  ;;  %v1316_v53 = vunpack.c.l.bf16 %v1508_v41 }
  0x55   : > { %v591_v54 = vmax.f32 %v527_v46, 0.0  ;;  %v529_v55 = vadd.f32 %v1648_v9, %v458_v48  ;;  %v460_v56 = vmul.f32 %v1313_v49, %v1639_v0  ;;  %v1317_v57 = vunpack.c.h.bf16 %v1508_v41 }
  0x56   : > { %1535 = vst [vmem:[%s1673_s26 + $0xd8] sm:$0xff] %v1456_v50   ;;  %v592_v58 = vmax.f32 %v528_v51, 0.0  ;;  %v530_v59 = vadd.f32 %v1648_v9, %v459_v52  ;;  %v461_v60 = vmul.f32 %v1316_v53, %v1639_v0 }
  0x57   : > { %v1461_v61 = vpack.c.bf16 %v591_v54, %v590_v47  ;;  %v593_v62 = vmax.f32 %v529_v55, 0.0  ;;  %v531_v63 = vadd.f32 %v1648_v9, %v460_v56  ;;  %v462_v1 = vmul.f32 %v1317_v57, %v1639_v0 }
  0x58   : > { %v594_v2 = vmax.f32 %v530_v59, 0.0  ;;  %v532_v3 = vadd.f32 %v1648_v9, %v461_v60 }
  0x59   : > { %1536 = vst [vmem:[%s1673_s26 + $0xe0] sm:$0xff] %v1461_v61   ;;  %v1466_v4 = vpack.c.bf16 %v593_v62, %v592_v58  ;;  %v595_v5 = vmax.f32 %v531_v63, 0.0  ;;  %v533_v6 = vadd.f32 %v1648_v9, %v462_v1 }
  0x5a   : > { %v596_v7 = vmax.f32 %v532_v3, 0.0 }
  0x5b   : > { %1537 = vst [vmem:[%s1673_s26 + $0xe8] sm:$0xff] %v1466_v4   ;;  %v1471_v8 = vpack.c.bf16 %v595_v5, %v594_v2  ;;  %v597_v10 = vmax.f32 %v533_v6, 0.0 }
  0x5d   : > { %1538 = vst [vmem:[%s1673_s26 + $0xf0] sm:$0xff] %v1471_v8   ;;  %v1476_v11 = vpack.c.bf16 %v597_v10, %v596_v7 }
  0x5f   : > { %1539 = vst [vmem:[%s1673_s26 + $0xf8] sm:$0xff] %v1476_v11  }
  0x60 PF: > { %s13_s14 = sadd.s32 1, %s1586_s14   ;;  %s1858_s12 = smov %s1582_s13 }
  0x61   : > { %p10_p5 = scmp.ge.s32.totalorder %s13_s14, 6   ;;  %s1859_s13 = smov %s1861_s15 }
  0x63   :  { %12 = sbr.rel (!%p10_p5) target bundleno = 2 (0x2), region = 68 }

// kernel: generator_forward.17
= control target key start
LH: loop header
LB: loop body
LE: loop exit
PB: predicated region body
PF: predicated region fallthrough
CT: control target
= control target key end

     0   :  { %s1318_s9 = smov 0   ;;  %s1320_s10 = smov 0   ;;  %s1461_s0 = inlined_call_operand.vmem [shape: bf16[4,2048,256], index: 0, kind: input, shape index: {}]   ;;  %s1462_s1 = inlined_call_operand.vmem [shape: bf16[4,256,128], index: 1, kind: input, shape index: {}]   ;;  %s1463_s2 = inlined_call_operand.vmem [shape: f32[4,2048,128], index: 2, kind: output, shape index: {}]  }
   0x1   :  { %s1322_s11 = smov 0   ;;  %s1324_s12 = smov 0  }
   0x2   :  { %s1326_s13 = smov 0  }
   0x3 LB: > { %s27_s14 = sadd.s32 1, %s1293_s11  ;;  %s31_s15 = sadd.s32 1, %s1297_s12  ;;  %s1301_s13 = sphi %s1326_s13, %s12_s13   ;;  %s1297_s12 = sphi %s1324_s12, %s1467_s12   ;;  %s1293_s11 = sphi %s1322_s11, %s1466_s11   ;;  %s1289_s10 = sphi %s1320_s10, %s1465_s10   ;;  %s1285_s9 = sphi %s1318_s9, %s1464_s9  }
   0x4   : > { %p29_p0 = scmp.ge.s32.totalorder %s27_s14, 8  ;;  %p906_p1 = scmp.ge.s32.totalorder %s1301_s13, 1 }
   0x5   : > { %p158_p2 = scmp.lt.s32.totalorder %s1301_s13, 33 }
   0x6   : > { %s1469_s14 = smov (%p29_p0, %s27_s14), 0  ;;  %s1471_s15 = smov (!%p29_p0, %s31_s15), %s1297_s12 }
   0x7   : > { %p159_p3 = pnand %p906_p1, %p158_p2  ;;  %p33_p4 = scmp.ge.s32.totalorder %s1471_s15, 4 }
   0x8   : > { %p201_p5 = scmp.lt.s32.totalorder (!%p159_p3), %s1289_s10, 3  ;;  %s907_s16 = sshll.u32 (!%p159_p3), %s1285_s9, 5 }
   0x9   : > { %s1473_s15 = smov (%p33_p4, %s1471_s15), 0  ;;  %162 = sbr.rel (%p159_p3) target bundleno = 339 (0x153), region = 28 }
   0xa   : > { %p203_p6 = scmp.lt.s32.totalorder (!%p159_p3), %s907_s16, 255 }
  0x10   : > { %s1475_s10 = smov (!%p201_p5, %s1289_s10), 3  ;;  %s1477_s16 = smov (!%p203_p6, %s907_s16), 255 }
  0x11   : > { %s966_s17 = sshll.u32 %s1475_s10, 7  ;;  %s914_s21 = sshll.u32 %s1475_s10, 8 }
  0x12   : > { %s1351_s20 = scalar_lea.vmem %s1462_s1, %s966_s17  ;;  %s1355_s22 = sadd.s32 %s914_s21, %s1477_s16 }
  0x13   : > { %v1135_v0 = vld [vmem:[%s1351_s20 + $0x40] sm:$0xff]   ;;  %v1137_v2 = vld [vmem:[%s1351_s20 + $0x48] sm:$0xff]   ;;  %v1139_v4 = vld [vmem:[%s1351_s20 + $0x50] sm:$0xff]   ;;  %s908_s23 = sshll.u32 %s1477_s16, 1  ;;  %s909_s24 = sshll.u32 %s1475_s10, 9 }
  0x14   : > { %v1136_v1 = vld [vmem:[%s1351_s20] sm:$0xff]   ;;  %967 = vmatprep.subr.bf16.mxu0 %v1135_v0  ;;  %1079 = vmatprep.subr.bf16.mxu1 %v1135_v0  ;;  %v1138_v3 = vld [vmem:[%s1351_s20 + $0x8] sm:$0xff]   ;;  %v1140_v5 = vld [vmem:[%s1351_s20 + $0x10] sm:$0xff]   ;;  %s207_s25 = sadd.s32 %s909_s24, %s908_s23  ;;  %s915_s30 = sshll.u32 %s1355_s22, 3 }
  0x15   : > { %968 = vmatpush3.bf16.msra.mxu0 %v1136_v1  ;;  %1087 = vmatpush3.bf16.msra.mxu1 %v1136_v1  ;;  %v1141_v6 = vld [vmem:[%s1351_s20 + $0x58] sm:$0xff]   ;;  %s910_s26 = sshll.u32 %s207_s25, 2  ;;  %v1143_v8 = vld [vmem:[%s1351_s20 + $0x60] sm:$0xff]   ;;  %v1145_v10 = vld [vmem:[%s1351_s20 + $0x68] sm:$0xff]   ;;  %s1412_s5 = scalar_lea.vmem %s1463_s2, %s915_s30 }
  0x16   : > { %969 = vmatprep.subr.bf16.mxu0 %v1137_v2  ;;  %1080 = vmatprep.subr.bf16.mxu1 %v1137_v2  ;;  %v1142_v7 = vld [vmem:[%s1351_s20 + $0x18] sm:$0xff]   ;;  %s1367_s29 = scalar_lea.vmem %s1461_s0, %s910_s26  ;;  %v1144_v9 = vld [vmem:[%s1351_s20 + $0x20] sm:$0xff]   ;;  %v1146_v13 = vld [vmem:[%s1351_s20 + $0x28] sm:$0xff]  }
  0x17   : > { %v1153_v11 = vld [vmem:[%s1367_s29 + $0x4] ss:$8 sps:$4 sm:$0xff]   ;;  %v1147_v14 = vld [vmem:[%s1351_s20 + $0x70] sm:$0xff]   ;;  %v1149_v16 = vld [vmem:[%s1351_s20 + $0x78] sm:$0xff]  }
  0x18   : > { %v1156_v12 = vld [vmem:[%s1367_s29 + $0x84] ss:$8 sps:$4 sm:$0xff]   ;;  %585 = vmatprep.mubr.bf16.mxu0 %v1153_v11  ;;  %v1148_v15 = vld [vmem:[%s1351_s20 + $0x30] sm:$0xff]   ;;  %v1150_v17 = vld [vmem:[%s1351_s20 + $0x38] sm:$0xff]  }
  0x19   : > { %970 = vmatpush3.bf16.msra.mxu0 %v1138_v3  ;;  %1088 = vmatpush3.bf16.msra.mxu1 %v1138_v3  ;;  %v1151_v18 = vld [vmem:[%s1367_s29] ss:$8 sps:$4 sm:$0xff]   ;;  %v1157_v20 = vld [vmem:[%s1367_s29 + $0x14] ss:$8 sps:$4 sm:$0xff]   ;;  %v1161_v22 = vld [vmem:[%s1367_s29 + $0x10] ss:$8 sps:$4 sm:$0xff]  }
  0x1a   : > { %971 = vmatprep.subr.bf16.mxu0 %v1139_v4  ;;  %1081 = vmatprep.subr.bf16.mxu1 %v1139_v4  ;;  %v1154_v19 = vld [vmem:[%s1367_s29 + $0x80] ss:$8 sps:$4 sm:$0xff]   ;;  %v1159_v21 = vld [vmem:[%s1367_s29 + $0x94] ss:$8 sps:$4 sm:$0xff]   ;;  %v1162_v23 = vld [vmem:[%s1367_s29 + $0x90] ss:$8 sps:$4 sm:$0xff]  }
  0x1b   : > { %649 = vmatprep.mubr.bf16.mxu1 %v1156_v12  ;;  %v1163_v24 = vld [vmem:[%s1367_s29 + $0x24] ss:$8 sps:$4 sm:$0xff]   ;;  %v1167_v26 = vld [vmem:[%s1367_s29 + $0x20] ss:$8 sps:$4 sm:$0xff]   ;;  %v1169_v28 = vld [vmem:[%s1367_s29 + $0x34] ss:$8 sps:$4 sm:$0xff]  }
  0x1c   : > { %v1165_v25 = vld [vmem:[%s1367_s29 + $0xa4] ss:$8 sps:$4 sm:$0xff]   ;;  %v1168_v27 = vld [vmem:[%s1367_s29 + $0xa0] ss:$8 sps:$4 sm:$0xff]   ;;  %v1171_v29 = vld [vmem:[%s1367_s29 + $0xb4] ss:$8 sps:$4 sm:$0xff]  }
  0x1d   : > { %972 = vmatpush3.bf16.msra.mxu0 %v1140_v5  ;;  %1089 = vmatpush3.bf16.msra.mxu1 %v1140_v5  ;;  %v1173_v30 = vld [vmem:[%s1367_s29 + $0x30] ss:$8 sps:$4 sm:$0xff]   ;;  %v1175_v32 = vld [vmem:[%s1367_s29 + $0x44] ss:$8 sps:$4 sm:$0xff]   ;;  %v1179_v34 = vld [vmem:[%s1367_s29 + $0x40] ss:$8 sps:$4 sm:$0xff]  }
  0x1e   : > { %973 = vmatprep.subr.bf16.mxu0 %v1141_v6  ;;  %1082 = vmatprep.subr.bf16.mxu1 %v1141_v6  ;;  %v1174_v31 = vld [vmem:[%s1367_s29 + $0xb0] ss:$8 sps:$4 sm:$0xff]   ;;  %v1177_v33 = vld [vmem:[%s1367_s29 + $0xc4] ss:$8 sps:$4 sm:$0xff]   ;;  %v1180_v35 = vld [vmem:[%s1367_s29 + $0xc0] ss:$8 sps:$4 sm:$0xff]  }
  0x1f   : > { %v1181_v36 = vld [vmem:[%s1367_s29 + $0x54] ss:$8 sps:$4 sm:$0xff]   ;;  %v1185_v38 = vld [vmem:[%s1367_s29 + $0x50] ss:$8 sps:$4 sm:$0xff]   ;;  %v1187_v40 = vld [vmem:[%s1367_s29 + $0x64] ss:$8 sps:$4 sm:$0xff]  }
  0x20   : > { %v1183_v37 = vld [vmem:[%s1367_s29 + $0xd4] ss:$8 sps:$4 sm:$0xff]   ;;  %v1186_v39 = vld [vmem:[%s1367_s29 + $0xd0] ss:$8 sps:$4 sm:$0xff]   ;;  %v1189_v41 = vld [vmem:[%s1367_s29 + $0xe4] ss:$8 sps:$4 sm:$0xff]  }
  0x21   : > { %974 = vmatpush3.bf16.msra.mxu0 %v1142_v7  ;;  %1090 = vmatpush3.bf16.msra.mxu1 %v1142_v7  ;;  %v1191_v42 = vld [vmem:[%s1367_s29 + $0x60] ss:$8 sps:$4 sm:$0xff]   ;;  %v1193_v44 = vld [vmem:[%s1367_s29 + $0x74] ss:$8 sps:$4 sm:$0xff]   ;;  %v1197_v46 = vld [vmem:[%s1367_s29 + $0x70] ss:$8 sps:$4 sm:$0xff]  }
  0x22   : > { %975 = vmatprep.subr.bf16.mxu0 %v1143_v8  ;;  %1083 = vmatprep.subr.bf16.mxu1 %v1143_v8  ;;  %v1192_v43 = vld [vmem:[%s1367_s29 + $0xe0] ss:$8 sps:$4 sm:$0xff]   ;;  %v1195_v45 = vld [vmem:[%s1367_s29 + $0xf4] ss:$8 sps:$4 sm:$0xff]   ;;  %v1198_v47 = vld [vmem:[%s1367_s29 + $0xf0] ss:$8 sps:$4 sm:$0xff]  }
  0x25   : > { %976 = vmatpush3.bf16.msra.mxu0 %v1144_v9  ;;  %1091 = vmatpush3.bf16.msra.mxu1 %v1144_v9 }
  0x26   : > { %977 = vmatprep.subr.bf16.mxu0 %v1145_v10  ;;  %1084 = vmatprep.subr.bf16.mxu1 %v1145_v10 }
  0x29   : > { %978 = vmatpush3.bf16.msra.mxu0 %v1146_v13  ;;  %1092 = vmatpush3.bf16.msra.mxu1 %v1146_v13 }
  0x2a   : > { %979 = vmatprep.subr.bf16.mxu0 %v1147_v14  ;;  %1085 = vmatprep.subr.bf16.mxu1 %v1147_v14 }
  0x2d   : > { %980 = vmatpush3.bf16.msra.mxu0 %v1148_v15  ;;  %1093 = vmatpush3.bf16.msra.mxu1 %v1148_v15 }
  0x2e   : > { %981 = vmatprep.subr.bf16.mxu0 %v1149_v16  ;;  %1086 = vmatprep.subr.bf16.mxu1 %v1149_v16 }
  0x31   : > { %982 = vmatpush3.bf16.msra.mxu0 %v1150_v17  ;;  %1094 = vmatpush3.bf16.msra.mxu1 %v1150_v17 }
  0x34   : > { %586 = vmatmul.mubr.bf16.vlgmr.msra.gmra.mrb[0].mxu0 %v1151_v18  ;;  %650 = vmatmul.mubr.bf16.vlgmr.msra.gmra.mrb[0].mxu1 %v1154_v19 }
  0x35   : > { %593 = vmatprep.mubr.bf16.mxu0 %v1157_v20  ;;  %657 = vmatprep.mubr.bf16.mxu1 %v1159_v21 }
  0x3c   : > { %594 = vmatmul.mubr.bf16.gmra.mrb[4].mxu0 %v1161_v22  ;;  %658 = vmatmul.mubr.bf16.gmra.mrb[4].mxu1 %v1162_v23 }
  0x3d   : > { %601 = vmatprep.mubr.bf16.mxu0 %v1163_v24  ;;  %665 = vmatprep.mubr.bf16.mxu1 %v1165_v25 }
  0x44   : > { %602 = vmatmul.mubr.bf16.gmra.mrb[8].mxu0 %v1167_v26  ;;  %666 = vmatmul.mubr.bf16.gmra.mrb[8].mxu1 %v1168_v27 }
  0x45   : > { %609 = vmatprep.mubr.bf16.mxu0 %v1169_v28  ;;  %673 = vmatprep.mubr.bf16.mxu1 %v1171_v29 }
  0x4c   : > { %610 = vmatmul.mubr.bf16.gmra.mrb[12].mxu0 %v1173_v30  ;;  %674 = vmatmul.mubr.bf16.gmra.mrb[12].mxu1 %v1174_v31 }
  0x4d   : > { %617 = vmatprep.mubr.bf16.mxu0 %v1175_v32  ;;  %681 = vmatprep.mubr.bf16.mxu1 %v1177_v33 }
  0x54   : > { %618 = vmatmul.mubr.bf16.gmra.mrb[16].mxu0 %v1179_v34  ;;  %682 = vmatmul.mubr.bf16.gmra.mrb[16].mxu1 %v1180_v35 }
  0x55   : > { %625 = vmatprep.mubr.bf16.mxu0 %v1181_v36  ;;  %689 = vmatprep.mubr.bf16.mxu1 %v1183_v37 }
  0x5c   : > { %626 = vmatmul.mubr.bf16.gmra.mrb[20].mxu0 %v1185_v38  ;;  %690 = vmatmul.mubr.bf16.gmra.mrb[20].mxu1 %v1186_v39 }
  0x5d   : > { %633 = vmatprep.mubr.bf16.mxu0 %v1187_v40  ;;  %697 = vmatprep.mubr.bf16.mxu1 %v1189_v41 }
  0x64   : > { %634 = vmatmul.mubr.bf16.gmra.mrb[24].mxu0 %v1191_v42  ;;  %698 = vmatmul.mubr.bf16.gmra.mrb[24].mxu1 %v1192_v43 }
  0x65   : > { %641 = vmatprep.mubr.bf16.mxu0 %v1193_v44  ;;  %705 = vmatprep.mubr.bf16.mxu1 %v1195_v45 }
  0x6c   : > { %642 = vmatmul.mubr.bf16.gmra.mrb[28].mxu0 %v1197_v46  ;;  %706 = vmatmul.mubr.bf16.gmra.mrb[28].mxu1 %v1198_v47 }
 0x107   : > { %v983_v48 = vpop.f32.mrb[0].mxu0  ;;  %v1031_v49 = vpop.f32.mrb[0].mxu1 }
 0x108   : > { %v984_v50 = vpop.f32.mrb[1].mxu0  ;;  %v1032_v51 = vpop.f32.mrb[1].mxu1 }
 0x109   : > { %v985_v52 = vadd.f32 %v984_v50, %v983_v48  ;;  %v1033_v53 = vadd.f32 %v1032_v51, %v1031_v49  ;;  %v986_v54 = vpop.f32.mrb[2].mxu0  ;;  %v1034_v55 = vpop.f32.mrb[2].mxu1 }
 0x10a   : > { %v987_v56 = vpop.f32.mrb[3].mxu0  ;;  %v1035_v57 = vpop.f32.mrb[3].mxu1 }
 0x10b   : > { %1199 = vtanh.f32 %v985_v52  ;;  %v988_v58 = vadd.f32 %v987_v56, %v986_v54  ;;  %v1036_v59 = vadd.f32 %v1035_v57, %v1034_v55 }
 0x10c   : > { %1201 = vtanh.f32 %v1033_v53 }
 0x10d   : > { %1203 = vtanh.f32 %v988_v58 }
 0x10e   : > { %1205 = vtanh.f32 %v1036_v59 }
 0x10f   : > { %v989_v60 = vpop.f32.mrb[4].mxu0  ;;  %v1037_v61 = vpop.f32.mrb[4].mxu1 }
 0x110   : > { %v990_v62 = vpop.f32.mrb[5].mxu0  ;;  %v1038_v63 = vpop.f32.mrb[5].mxu1 }
 0x111   : > { %v991_v0 = vadd.f32 %v990_v62, %v989_v60  ;;  %v1039_v1 = vadd.f32 %v1038_v63, %v1037_v61  ;;  %v992_v2 = vpop.f32.mrb[6].mxu0  ;;  %v1040_v3 = vpop.f32.mrb[6].mxu1 }
 0x112   : > { %v993_v4 = vpop.f32.mrb[7].mxu0  ;;  %v1041_v5 = vpop.f32.mrb[7].mxu1 }
 0x113   : > { %1207 = vtanh.f32 %v991_v0  ;;  %v994_v6 = vadd.f32 %v993_v4, %v992_v2  ;;  %v1042_v7 = vadd.f32 %v1041_v5, %v1040_v3 }
 0x114   : > { %1209 = vtanh.f32 %v1039_v1 }
 0x115   : > { %v1200_v8 = vpop.eup %1199  ;;  %1211 = vtanh.f32 %v994_v6 }
 0x116   : > { %v1202_v9 = vpop.eup %1201  ;;  %746 = vst [vmem:[%s1412_s5] sm:$0xff] %v1200_v8  ;;  %1213 = vtanh.f32 %v1042_v7 }
 0x117   : > { %v1204_v10 = vpop.eup %1203  ;;  %762 = vst [vmem:[%s1412_s5 + $0x80] sm:$0xff] %v1202_v9  ;;  %v995_v11 = vpop.f32.mrb[8].mxu0 }
 0x118   : > { %v1043_v12 = vpop.f32.mrb[8].mxu1  ;;  %v1206_v13 = vpop.eup %1205  ;;  %747 = vst [vmem:[%s1412_s5 + $0x8] sm:$0xff] %v1204_v10 }
 0x119   : > { %v996_v14 = vpop.f32.mrb[9].mxu0  ;;  %v1044_v15 = vpop.f32.mrb[9].mxu1  ;;  %763 = vst [vmem:[%s1412_s5 + $0x88] sm:$0xff] %v1206_v13 }
 0x11a   : > { %v997_v16 = vadd.f32 %v996_v14, %v995_v11  ;;  %v1045_v17 = vadd.f32 %v1044_v15, %v1043_v12  ;;  %v998_v18 = vpop.f32.mrb[10].mxu0  ;;  %v1046_v19 = vpop.f32.mrb[10].mxu1 }
 0x11b   : > { %v999_v20 = vpop.f32.mrb[11].mxu0  ;;  %v1047_v21 = vpop.f32.mrb[11].mxu1 }
 0x11c   : > { %1215 = vtanh.f32 %v997_v16  ;;  %v1000_v22 = vadd.f32 %v999_v20, %v998_v18  ;;  %v1048_v23 = vadd.f32 %v1047_v21, %v1046_v19 }
 0x11d   : > { %1217 = vtanh.f32 %v1045_v17  ;;  %v1208_v24 = vpop.eup %1207 }
 0x11e   : > { %1219 = vtanh.f32 %v1000_v22  ;;  %v1210_v25 = vpop.eup %1209  ;;  %748 = vst [vmem:[%s1412_s5 + $0x10] sm:$0xff] %v1208_v24 }
 0x11f   : > { %1221 = vtanh.f32 %v1048_v23  ;;  %v1212_v26 = vpop.eup %1211  ;;  %764 = vst [vmem:[%s1412_s5 + $0x90] sm:$0xff] %v1210_v25  ;;  %v1001_v27 = vpop.f32.mrb[12].mxu0 }
 0x120   : > { %v1049_v28 = vpop.f32.mrb[12].mxu1  ;;  %v1214_v29 = vpop.eup %1213  ;;  %749 = vst [vmem:[%s1412_s5 + $0x18] sm:$0xff] %v1212_v26 }
 0x121   : > { %v1002_v30 = vpop.f32.mrb[13].mxu0  ;;  %v1050_v31 = vpop.f32.mrb[13].mxu1  ;;  %765 = vst [vmem:[%s1412_s5 + $0x98] sm:$0xff] %v1214_v29 }
 0x122   : > { %v1003_v32 = vadd.f32 %v1002_v30, %v1001_v27  ;;  %v1051_v33 = vadd.f32 %v1050_v31, %v1049_v28  ;;  %v1004_v34 = vpop.f32.mrb[14].mxu0  ;;  %v1052_v35 = vpop.f32.mrb[14].mxu1 }
 0x123   : > { %v1005_v36 = vpop.f32.mrb[15].mxu0  ;;  %v1053_v37 = vpop.f32.mrb[15].mxu1 }
 0x124   : > { %1223 = vtanh.f32 %v1003_v32  ;;  %v1006_v38 = vadd.f32 %v1005_v36, %v1004_v34  ;;  %v1054_v39 = vadd.f32 %v1053_v37, %v1052_v35 }
 0x125   : > { %1225 = vtanh.f32 %v1051_v33 }
 0x126   : > { %v1216_v40 = vpop.eup %1215  ;;  %1227 = vtanh.f32 %v1006_v38 }
 0x127   : > { %v1218_v41 = vpop.eup %1217  ;;  %750 = vst [vmem:[%s1412_s5 + $0x20] sm:$0xff] %v1216_v40  ;;  %1229 = vtanh.f32 %v1054_v39  ;;  %v1007_v43 = vpop.f32.mrb[16].mxu0 }
 0x128   : > { %v1220_v42 = vpop.eup %1219  ;;  %766 = vst [vmem:[%s1412_s5 + $0xa0] sm:$0xff] %v1218_v41  ;;  %v1055_v44 = vpop.f32.mrb[16].mxu1 }
 0x129   : > { %v1222_v45 = vpop.eup %1221  ;;  %751 = vst [vmem:[%s1412_s5 + $0x28] sm:$0xff] %v1220_v42  ;;  %v1008_v46 = vpop.f32.mrb[17].mxu0 }
 0x12a   : > { %v1056_v47 = vpop.f32.mrb[17].mxu1  ;;  %767 = vst [vmem:[%s1412_s5 + $0xa8] sm:$0xff] %v1222_v45  ;;  %v1009_v48 = vadd.f32 %v1008_v46, %v1007_v43  ;;  %v1010_v50 = vpop.f32.mrb[18].mxu0 }
 0x12b   : > { %v1057_v49 = vadd.f32 %v1056_v47, %v1055_v44  ;;  %v1058_v51 = vpop.f32.mrb[18].mxu1  ;;  %v1011_v52 = vpop.f32.mrb[19].mxu0 }
 0x12c   : > { %v1059_v53 = vpop.f32.mrb[19].mxu1  ;;  %1231 = vtanh.f32 %v1009_v48  ;;  %v1012_v54 = vadd.f32 %v1011_v52, %v1010_v50 }
 0x12d   : > { %v1060_v55 = vadd.f32 %v1059_v53, %v1058_v51  ;;  %1233 = vtanh.f32 %v1057_v49 }
 0x12e   : > { %v1224_v56 = vpop.eup %1223  ;;  %1235 = vtanh.f32 %v1012_v54 }
 0x12f   : > { %v1226_v57 = vpop.eup %1225  ;;  %752 = vst [vmem:[%s1412_s5 + $0x30] sm:$0xff] %v1224_v56  ;;  %1237 = vtanh.f32 %v1060_v55  ;;  %v1013_v59 = vpop.f32.mrb[20].mxu0 }
 0x130   : > { %v1228_v58 = vpop.eup %1227  ;;  %768 = vst [vmem:[%s1412_s5 + $0xb0] sm:$0xff] %v1226_v57  ;;  %v1061_v60 = vpop.f32.mrb[20].mxu1 }
 0x131   : > { %v1230_v61 = vpop.eup %1229  ;;  %753 = vst [vmem:[%s1412_s5 + $0x38] sm:$0xff] %v1228_v58  ;;  %v1014_v62 = vpop.f32.mrb[21].mxu0 }
 0x132   : > { %v1062_v63 = vpop.f32.mrb[21].mxu1  ;;  %769 = vst [vmem:[%s1412_s5 + $0xb8] sm:$0xff] %v1230_v61  ;;  %v1015_v0 = vadd.f32 %v1014_v62, %v1013_v59  ;;  %v1016_v2 = vpop.f32.mrb[22].mxu0 }
 0x133   : > { %v1063_v1 = vadd.f32 %v1062_v63, %v1061_v60  ;;  %v1064_v3 = vpop.f32.mrb[22].mxu1  ;;  %v1017_v4 = vpop.f32.mrb[23].mxu0 }
 0x134   : > { %v1065_v5 = vpop.f32.mrb[23].mxu1  ;;  %1239 = vtanh.f32 %v1015_v0  ;;  %v1018_v6 = vadd.f32 %v1017_v4, %v1016_v2 }
 0x135   : > { %v1066_v7 = vadd.f32 %v1065_v5, %v1064_v3  ;;  %1241 = vtanh.f32 %v1063_v1 }
 0x136   : > { %v1232_v8 = vpop.eup %1231  ;;  %1243 = vtanh.f32 %v1018_v6 }
 0x137   : > { %v1234_v9 = vpop.eup %1233  ;;  %754 = vst [vmem:[%s1412_s5 + $0x40] sm:$0xff] %v1232_v8  ;;  %1245 = vtanh.f32 %v1066_v7  ;;  %v1019_v11 = vpop.f32.mrb[24].mxu0 }
 0x138   : > { %v1236_v10 = vpop.eup %1235  ;;  %770 = vst [vmem:[%s1412_s5 + $0xc0] sm:$0xff] %v1234_v9  ;;  %v1067_v12 = vpop.f32.mrb[24].mxu1 }
 0x139   : > { %v1238_v13 = vpop.eup %1237  ;;  %755 = vst [vmem:[%s1412_s5 + $0x48] sm:$0xff] %v1236_v10  ;;  %v1020_v14 = vpop.f32.mrb[25].mxu0 }
 0x13a   : > { %v1068_v15 = vpop.f32.mrb[25].mxu1  ;;  %771 = vst [vmem:[%s1412_s5 + $0xc8] sm:$0xff] %v1238_v13  ;;  %v1021_v16 = vadd.f32 %v1020_v14, %v1019_v11  ;;  %v1022_v18 = vpop.f32.mrb[26].mxu0 }
 0x13b   : > { %v1069_v17 = vadd.f32 %v1068_v15, %v1067_v12  ;;  %v1070_v19 = vpop.f32.mrb[26].mxu1  ;;  %v1023_v20 = vpop.f32.mrb[27].mxu0 }
 0x13c   : > { %v1071_v21 = vpop.f32.mrb[27].mxu1  ;;  %1247 = vtanh.f32 %v1021_v16  ;;  %v1024_v22 = vadd.f32 %v1023_v20, %v1022_v18 }
 0x13d   : > { %v1072_v23 = vadd.f32 %v1071_v21, %v1070_v19  ;;  %1249 = vtanh.f32 %v1069_v17 }
 0x13e   : > { %v1240_v24 = vpop.eup %1239  ;;  %1251 = vtanh.f32 %v1024_v22 }
 0x13f   : > { %v1242_v25 = vpop.eup %1241  ;;  %756 = vst [vmem:[%s1412_s5 + $0x50] sm:$0xff] %v1240_v24  ;;  %1253 = vtanh.f32 %v1072_v23  ;;  %v1025_v27 = vpop.f32.mrb[28].mxu0 }
 0x140   : > { %v1244_v26 = vpop.eup %1243  ;;  %772 = vst [vmem:[%s1412_s5 + $0xd0] sm:$0xff] %v1242_v25  ;;  %v1073_v28 = vpop.f32.mrb[28].mxu1 }
 0x141   : > { %v1246_v29 = vpop.eup %1245  ;;  %757 = vst [vmem:[%s1412_s5 + $0x58] sm:$0xff] %v1244_v26  ;;  %v1026_v30 = vpop.f32.mrb[29].mxu0 }
 0x142   : > { %v1074_v31 = vpop.f32.mrb[29].mxu1  ;;  %773 = vst [vmem:[%s1412_s5 + $0xd8] sm:$0xff] %v1246_v29  ;;  %v1027_v32 = vadd.f32 %v1026_v30, %v1025_v27  ;;  %v1028_v34 = vpop.f32.mrb[30].mxu0 }
 0x143   : > { %v1075_v33 = vadd.f32 %v1074_v31, %v1073_v28  ;;  %v1076_v35 = vpop.f32.mrb[30].mxu1  ;;  %v1029_v36 = vpop.f32.mrb[31].mxu0 }
 0x144   : > { %v1077_v37 = vpop.f32.mrb[31].mxu1  ;;  %1255 = vtanh.f32 %v1027_v32  ;;  %v1030_v38 = vadd.f32 %v1029_v36, %v1028_v34 }
 0x145   : > { %v1078_v39 = vadd.f32 %v1077_v37, %v1076_v35  ;;  %1257 = vtanh.f32 %v1075_v33 }
 0x146   : > { %v1248_v40 = vpop.eup %1247  ;;  %1259 = vtanh.f32 %v1030_v38 }
 0x147   : > { %v1250_v41 = vpop.eup %1249  ;;  %758 = vst [vmem:[%s1412_s5 + $0x60] sm:$0xff] %v1248_v40  ;;  %1261 = vtanh.f32 %v1078_v39 }
 0x148   : > { %v1252_v42 = vpop.eup %1251  ;;  %774 = vst [vmem:[%s1412_s5 + $0xe0] sm:$0xff] %v1250_v41 }
 0x149   : > { %v1254_v43 = vpop.eup %1253  ;;  %759 = vst [vmem:[%s1412_s5 + $0x68] sm:$0xff] %v1252_v42 }
 0x14a   : > { %775 = vst [vmem:[%s1412_s5 + $0xe8] sm:$0xff] %v1254_v43 }
 0x14e   : > { %v1256_v44 = vpop.eup %1255 }
 0x14f   : > { %v1258_v45 = vpop.eup %1257  ;;  %760 = vst [vmem:[%s1412_s5 + $0x70] sm:$0xff] %v1256_v44 }
 0x150   : > { %v1260_v46 = vpop.eup %1259  ;;  %776 = vst [vmem:[%s1412_s5 + $0xf0] sm:$0xff] %v1258_v45 }
 0x151   : > { %v1262_v47 = vpop.eup %1261  ;;  %761 = vst [vmem:[%s1412_s5 + $0x78] sm:$0xff] %v1260_v46 }
 0x152   : > { %777 = vst [vmem:[%s1412_s5 + $0xf8] sm:$0xff] %v1262_v47 }
 0x153 PF: > { %s12_s13 = sadd.s32 1, %s1301_s13   ;;  %s1464_s9 = smov %s1293_s11 }
 0x154   : > { %p9_p7 = scmp.ge.s32.totalorder %s12_s13, 34   ;;  %s1465_s10 = smov %s1297_s12 }
 0x155   : > { %s1466_s11 = smov %s1469_s14  ;;  %s1467_s12 = smov %s1473_s15 }
 0x156   :  { %11 = sbr.rel (!%p9_p7) target bundleno = 3 (0x3), region = 61 }

</bundles_post_ra>
